<compile_context>
chip_gen: v7x
topology: tpu7x:2x2x1
jax: 0.10.0
libtpu: 0.0.40
codegen_flags: <defaults>
</compile_context>

<pallas_src>
import math
import jax
import jax.numpy as jnp
from jax.experimental import pallas as pl
from jax.experimental.pallas import tpu as pltpu


def _round_up(n, m):
    return ((n + m - 1) // m) * m


def _pad_axis(a, axis, new_size):
    pad = new_size - a.shape[axis]
    if pad == 0:
        return a
    widths = [(0, 0)] * a.ndim
    widths[axis] = (0, pad)
    return jnp.pad(a, widths)


def _make_kernel(*, TB, B_p, H_p, D, T, NT, compute_dtype, out_dtype):
    """Builds the kernel body with all shape parameters baked in as Python constants."""
    G = 4 * H_p
    tail = (NT * TB != T)          # static: do padded timesteps exist at all?

    def kernel(x_ref, wih_ref, whh_ref, b_ref, h0_ref, c0_ref,
               out_ref, hn_ref, cn_ref, gin_sc, h_sc, c_sc):
        d = pl.program_id(0)       # direction: 0 = forward, 1 = reverse
        tb = pl.program_id(1)      # time-block index in PROCESSING order

        # (Re)initialize the recurrent carry at the start of each direction.
        @pl.when(tb == 0)
        def _():
            h_sc[...] = h0_ref[...].astype(jnp.float32)
            c_sc[...] = c0_ref[...].astype(jnp.float32)

        # ---- fused input projection for the whole time block ----
        # One large-M MXU matmul off the per-timestep serial path, f32 accumulation.
        x2d = x_ref[...].reshape(TB * B_p, D)
        gin = jnp.dot(x2d, wih_ref[...], preferred_element_type=jnp.float32)
        gin = gin + b_ref[...]                       # (1, G) f32 broadcast
        gin_sc[...] = gin.reshape(TB, B_p, G)

        def run_steps(idx_order, t_blk):
            # t_blk: original-time block index of this grid step (traced scalar).
            h = h_sc[...]
            c = c_sc[...]
            for idx in idx_order:                    # static in-block time indices
                hm = h.astype(compute_dtype)
                g_row = gin_sc[idx]                  # (B_p, G) f32, static slab load

                # Per-gate column-block dots: lane-aligned (H_p multiple of 128) weight
                # slices, gate nonlinearity applied as soon as each gate is available.
                def gate(k, act):
                    z = g_row[:, k * H_p:(k + 1) * H_p] + jnp.dot(
                        hm, whh_ref[:, k * H_p:(k + 1) * H_p],
                        preferred_element_type=jnp.float32)
                    return act(z)

                i_t = gate(0, jax.nn.sigmoid)
                f_t = gate(1, jax.nn.sigmoid)
                g_t = gate(2, jnp.tanh)
                o_t = gate(3, jax.nn.sigmoid)

                c_new = f_t * c + i_t * g_t
                h_new = o_t * jnp.tanh(c_new)

                # Store at the original time index (padded-time rows are stripped later).
                out_ref[idx] = h_new.astype(out_dtype)

                if tail:
                    # Freeze the carry on padded timesteps (t >= T). NOTE: padded batch
                    # rows still evolve (bias-only dynamics) but are sliced off outside.
                    valid = (t_blk * TB + idx) < T
                    h = jnp.where(valid, h_new, h)
                    c = jnp.where(valid, c_new, c)
                else:
                    h, c = h_new, c_new
            h_sc[...] = h
            c_sc[...] = c

        # Static per-direction loops: forward walks the block 0..TB-1, reverse walks
        # TB-1..0 so its output lands directly at its original time index (no flips).
        @pl.when(d == 0)
        def _():
            run_steps(list(range(TB)), tb)

        @pl.when(d == 1)
        def _():
            run_steps(list(range(TB - 1, -1, -1)), NT - 1 - tb)

        # Final-state outputs only need the very last processed block of each direction.
        @pl.when(tb == NT - 1)
        def _():
            hn_ref[...] = h_sc[...].astype(out_dtype)
            cn_ref[...] = c_sc[...].astype(out_dtype)

    return kernel


def bidirectional_dplstm_layer(x, params, h0, c0, *,
                               compute_dtype=jnp.bfloat16, time_block=16):
    """BidirectionalDPLSTMLayer.forward (batch_sizes=None path).

    x:  [T, B, D];  h0, c0: [2, B, H]
    returns: out [T, B, 2H], (h_n [2, B, H], c_n [2, B, H])
    """
    (wih_f, whh_f, b_f), (wih_r, whh_r, b_r) = params
    T, B, D = x.shape
    H = h0.shape[-1]
    out_dtype = x.dtype

    # ---- padding: batch -> sublane multiple, hidden -> lane multiple, time -> TB multiple ----
    B_p = _round_up(B, 8)
    H_p = _round_up(H, 128)
    G = 4 * H_p
    TB = max(1, min(int(time_block), T))
    T_p = _round_up(T, TB)
    NT = T_p // TB

    def pad_gate_cols(w):                 # [..., 4H] -> [..., 4*H_p], per-gate zero pad
        w4 = w.reshape(*w.shape[:-1], 4, H)
        w4 = _pad_axis(w4, w4.ndim - 1, H_p)
        return w4.reshape(*w.shape[:-1], G)

    def pack_dir(wih, whh, b):
        return (pad_gate_cols(wih),                      # [D, G]
                pad_gate_cols(_pad_axis(whh, 0, H_p)),   # [H_p, G]
                pad_gate_cols(b).reshape(1, G))          # [1, G]

    wih_fp, whh_fp, b_fp = pack_dir(wih_f, whh_f, b_f)
    wih_rp, whh_rp, b_rp = pack_dir(wih_r, whh_r, b_r)
    wih_all = jnp.stack([wih_fp, wih_rp]).astype(compute_dtype)   # [2, D, G]
    whh_all = jnp.stack([whh_fp, whh_rp]).astype(compute_dtype)   # [2, H_p, G]
    b_all = jnp.stack([b_fp, b_rp]).astype(jnp.float32)           # [2, 1, G]

    x_p = _pad_axis(_pad_axis(x, 0, T_p), 1, B_p).astype(compute_dtype)   # [T_p, B_p, D]
    h0_p = _pad_axis(_pad_axis(h0, 1, B_p), 2, H_p).astype(jnp.float32)   # [2, B_p, H_p]
    c0_p = _pad_axis(_pad_axis(c0, 1, B_p), 2, H_p).astype(jnp.float32)

    # ---- VMEM budget: request what the pipeline actually needs (+headroom), not a blanket
    # 64 MiB (v7x only has 64 MiB physical / 32 MiB scoped default per TensorCore). ----
    cbytes = jnp.dtype(compute_dtype).itemsize
    obytes = jnp.dtype(out_dtype).itemsize
    est = (2 * TB * B_p * D * cbytes           # x block (double buffered)
           + D * G * cbytes                    # W_ih (single buffered, resident)
           + H_p * G * cbytes                  # W_hh (single buffered, resident)
           + G * 4 + 2 * B_p * H_p * 4         # bias, h0, c0 (single buffered)
           + 2 * TB * B_p * H_p * obytes       # out block (double buffered)
           + 4 * B_p * H_p * obytes            # h_n, c_n
           + TB * B_p * G * 4                  # gin scratch
           + 2 * B_p * H_p * 4)                # h/c carry scratch
    vmem_limit = int(min(max(2 * est + (4 << 20), 16 << 20), 100 << 20))

    def t_block(d, t):
        # Forward processes original blocks 0..NT-1; reverse processes NT-1..0.
        return (1 - d) * t + d * (NT - 1 - t)

    kernel = _make_kernel(TB=TB, B_p=B_p, H_p=H_p, D=D, T=T, NT=NT,
                          compute_dtype=compute_dtype, out_dtype=out_dtype)

    resident = pl.Buffered(1)   # block index changes only with direction -> single buffer

    grid_spec = pltpu.PrefetchScalarGridSpec(
        num_scalar_prefetch=0,
        grid=(2, NT),
        in_specs=[
            pl.BlockSpec((TB, B_p, D), lambda d, t: (t_block(d, t), 0, 0)),                 # x
            pl.BlockSpec((None, D, G), lambda d, t: (d, 0, 0), pipeline_mode=resident),     # W_ih
            pl.BlockSpec((None, H_p, G), lambda d, t: (d, 0, 0), pipeline_mode=resident),   # W_hh
            pl.BlockSpec((None, 1, G), lambda d, t: (d, 0, 0), pipeline_mode=resident),     # bias
            pl.BlockSpec((None, B_p, H_p), lambda d, t: (d, 0, 0), pipeline_mode=resident), # h0
            pl.BlockSpec((None, B_p, H_p), lambda d, t: (d, 0, 0), pipeline_mode=resident), # c0
        ],
        out_specs=[
            # Direction-fused output: each direction writes its own lane-aligned column block
            # of a single (T_p, B_p, 2*H_p) array -> no post-kernel concatenate pass.
            pl.BlockSpec((TB, B_p, H_p), lambda d, t: (t_block(d, t), 0, d)),
            pl.BlockSpec((None, B_p, H_p), lambda d, t: (d, 0, 0)),   # h_n (resident block)
            pl.BlockSpec((None, B_p, H_p), lambda d, t: (d, 0, 0)),   # c_n (resident block)
        ],
        scratch_shapes=[
            pltpu.VMEM((TB, B_p, G), jnp.float32),   # per-block input-projection gates
            pltpu.VMEM((B_p, H_p), jnp.float32),     # h carry
            pltpu.VMEM((B_p, H_p), jnp.float32),     # c carry
        ],
    )

    out_shapes = (
        jax.ShapeDtypeStruct((T_p, B_p, 2 * H_p), out_dtype),
        jax.ShapeDtypeStruct((2, B_p, H_p), out_dtype),
        jax.ShapeDtypeStruct((2, B_p, H_p), out_dtype),
    )

    out_p, hn_p, cn_p = pl.pallas_call(
        kernel,
        out_shape=out_shapes,
        grid_spec=grid_spec,
        compiler_params=pltpu.CompilerParams(
            dimension_semantics=("parallel", "arbitrary"),  # directions parallel, time serial
            vmem_limit_bytes=vmem_limit),
    )(x_p, wih_all, whh_all, b_all, h0_p, c0_p)

    # Pad-strip only (no concatenate): the kernel already laid out [fwd | rev] features.
    if (T_p, B_p, H_p) == (T, B, H):
        out = out_p
    else:
        out = out_p[:T, :B].reshape(T, B, 2, H_p)[..., :H].reshape(T, B, 2 * H)
    h_n = hn_p[:, :B, :H]
    c_n = cn_p[:, :B, :H]
    return out, (h_n, c_n)


def init_params(key, input_size, hidden_size):
    """Deterministic init matching DPLSTMCell.reset_parameters: U(-1/sqrt(H), 1/sqrt(H)).

    PyTorch stores ih.weight [4H, D], hh.weight [4H, H]; we keep the transposed form for the
    kernel and fold the two biases (b_ih + b_hh) into one [4H] vector.
    """
    stdv = 1.0 / math.sqrt(hidden_size)
    G = 4 * hidden_size

    def one_direction(k):
        k1, k2, k3, k4 = jax.random.split(k, 4)
        w_ih = jax.random.uniform(k1, (G, input_size), jnp.float32, -stdv, stdv)
        w_hh = jax.random.uniform(k2, (G, hidden_size), jnp.float32, -stdv, stdv)
        b_ih = jax.random.uniform(k3, (G,), jnp.float32, -stdv, stdv)
        b_hh = jax.random.uniform(k4, (G,), jnp.float32, -stdv, stdv)
        return (w_ih.T, w_hh.T, b_ih + b_hh), (w_ih, w_hh, b_ih, b_hh)

    kf, kr = jax.random.split(key, 2)
    p_f, raw_f = one_direction(kf)
    p_r, raw_r = one_direction(kr)
    return (p_f, p_r), (raw_f, raw_r)


def _reference_direction(x, raw, h0, c0, reverse):
    """Pure-JAX reference of DPLSTMLayer.forward for correctness checking."""
    w_ih, w_hh, b_ih, b_hh = raw
    H = h0.shape[-1]
    xs = jnp.flip(x, 0) if reverse else x

    def step(carry, x_t):
        h, c = carry
        gates = x_t @ w_ih.T + b_ih + h @ w_hh.T + b_hh
        i = jax.nn.sigmoid(gates[:, 0:H])
        f = jax.nn.sigmoid(gates[:, H:2 * H])
        g = jnp.tanh(gates[:, 2 * H:3 * H])
        o = jax.nn.sigmoid(gates[:, 3 * H:4 * H])
        c_new = f * c + i * g
        h_new = o * jnp.tanh(c_new)
        return (h_new, c_new), h_new

    (h_last, c_last), hs = jax.lax.scan(step, (h0, c0), xs)
    out = jnp.flip(hs, 0) if reverse else hs
    return out, h_last, c_last


def _reference_bidir(x, raw_params, h0, c0):
    out_f, hf, cf = _reference_direction(x, raw_params[0], h0[0], c0[0], reverse=False)
    out_r, hr, cr = _reference_direction(x, raw_params[1], h0[1], c0[1], reverse=True)
    return (jnp.concatenate([out_f, out_r], axis=-1),
            jnp.stack([hf, hr], 0), jnp.stack([cf, cr], 0))


if __name__ == "__main__":
    keys = jax.random.split(jax.random.PRNGKey(0), 8)

    run = jax.jit(bidirectional_dplstm_layer,
                  static_argnames=("compute_dtype", "time_block"))

    # ---- main shapes: T=16, B=4, D=32, H=32 ----
    T, B, D, H = 16, 4, 32, 32
    params, raw_params = init_params(keys[0], D, H)
    x = jax.random.normal(keys[1], (T, B, D), jnp.float32)
    h0 = jax.random.normal(keys[2], (2, B, H), jnp.float32)
    c0 = jax.random.normal(keys[3], (2, B, H), jnp.float32)
    out_ref, h_ref, c_ref = _reference_bidir(x, raw_params, h0, c0)

    # float32 path, multi-block chaining (TB=8 -> NT=2): strict correctness check.
    out, (h_n, c_n) = run(x, params, h0, c0, compute_dtype=jnp.float32, time_block=8)
    jax.block_until_ready((out, h_n, c_n))
    assert out.shape == (T, B, 2 * H)
    assert h_n.shape == (2, B, H) and c_n.shape == (2, B, H)
    assert jnp.allclose(out, out_ref, atol=1e-3, rtol=1e-3)
    assert jnp.allclose(h_n, h_ref, atol=1e-3, rtol=1e-3)
    assert jnp.allclose(c_n, c_ref, atol=1e-3, rtol=1e-3)

    # default bf16 MXU path (f32 accumulation + f32 gate math/carries): loose tolerance
    # only reflects bf16 rounding of the matmul operands.
    out16, (h16, c16) = run(x, params, h0, c0)
    jax.block_until_ready((out16, h16, c16))
    assert out16.shape == (T, B, 2 * H)
    assert jnp.allclose(out16, out_ref, atol=1e-1, rtol=1e-1)
    assert jnp.allclose(h16, h_ref, atol=1e-1, rtol=1e-1)
    assert jnp.allclose(c16, c_ref, atol=1e-1, rtol=1e-1)

    # ---- awkward shapes: exercises time / batch / hidden padding and the tail-mask path ----
    T2, B2, D2, H2 = 11, 3, 24, 40
    params2, raw2 = init_params(keys[4], D2, H2)
    x2 = jax.random.normal(keys[5], (T2, B2, D2), jnp.float32)
    h02 = jax.random.normal(keys[6], (2, B2, H2), jnp.float32)
    c02 = jax.random.normal(keys[7], (2, B2, H2), jnp.float32)
    out_ref2, h_ref2, c_ref2 = _reference_bidir(x2, raw2, h02, c02)

    out2, (h2, c2) = run(x2, params2, h02, c02, compute_dtype=jnp.float32, time_block=8)
    jax.block_until_ready((out2, h2, c2))
    assert out2.shape == (T2, B2, 2 * H2)
    assert jnp.allclose(out2, out_ref2, atol=1e-3, rtol=1e-3)
    assert jnp.allclose(h2, h_ref2, atol=1e-3, rtol=1e-3)
    assert jnp.allclose(c2, c_ref2, atol=1e-3, rtol=1e-3)

    print("KERNEL_OK")
</pallas_src>

<mosaic_0001>
module attributes {stable_mosaic.version = 11 : i64} {
  func.func @kernel(%arg0: i32, %arg1: i32, %arg2: memref<8x8x32xf32, #tpu.memory_space<vmem>>, %arg3: memref<1x32x512xf32, #tpu.memory_space<vmem>>, %arg4: memref<1x128x512xf32, #tpu.memory_space<vmem>>, %arg5: memref<1x1x512xf32, #tpu.memory_space<vmem>>, %arg6: memref<1x8x128xf32, #tpu.memory_space<vmem>>, %arg7: memref<1x8x128xf32, #tpu.memory_space<vmem>>, %arg8: memref<8x8x128xf32, #tpu.memory_space<vmem>>, %arg9: memref<1x8x128xf32, #tpu.memory_space<vmem>>, %arg10: memref<1x8x128xf32, #tpu.memory_space<vmem>>, %arg11: memref<8x8x512xf32, #tpu.memory_space<vmem>>, %arg12: memref<8x128xf32, #tpu.memory_space<vmem>>, %arg13: memref<8x128xf32, #tpu.memory_space<vmem>>) attributes {dimension_semantics = [#tpu.dimension_semantics<parallel>, #tpu.dimension_semantics<arbitrary>], iteration_bounds = array<i64: 2, 2>, scalar_prefetch = 0 : i64, scratch_operands = 3 : i64, tpu.core_type = #tpu.core_type<tc>, window_params = [{transform_indices = @transform_0, window_bounds = array<i64: 8, 8, 32>}, {pipeline_mode = #tpu.pipeline_mode<synchronous>, transform_indices = @transform_1, window_bounds = array<i64: 1, 32, 512>}, {pipeline_mode = #tpu.pipeline_mode<synchronous>, transform_indices = @transform_2, window_bounds = array<i64: 1, 128, 512>}, {pipeline_mode = #tpu.pipeline_mode<synchronous>, transform_indices = @transform_3, window_bounds = array<i64: 1, 1, 512>}, {pipeline_mode = #tpu.pipeline_mode<synchronous>, transform_indices = @transform_4, window_bounds = array<i64: 1, 8, 128>}, {pipeline_mode = #tpu.pipeline_mode<synchronous>, transform_indices = @transform_5, window_bounds = array<i64: 1, 8, 128>}, {transform_indices = @transform_6, window_bounds = array<i64: 8, 8, 128>}, {transform_indices = @transform_7, window_bounds = array<i64: 1, 8, 128>}, {transform_indices = @transform_8, window_bounds = array<i64: 1, 8, 128>}]} {
    %c0_i32 = arith.constant 0 : i32
    %0 = arith.cmpi eq, %arg1, %c0_i32 : i32
    %1 = arith.extui %0 : i1 to i32
    %c0_i32_0 = arith.constant 0 : i32
    %2 = arith.cmpi ne, %1, %c0_i32_0 : i32
    scf.if %2 {
      %c0_17 = arith.constant 0 : index
      %c0_18 = arith.constant 0 : index
      %c0_19 = arith.constant 0 : index
      %23 = vector.load %arg6[%c0_17, %c0_18, %c0_19] : memref<1x8x128xf32, #tpu.memory_space<vmem>>, vector<1x8x128xf32>
      %24 = vector.shape_cast %23 : vector<1x8x128xf32> to vector<8x128xf32>
      %c0_20 = arith.constant 0 : index
      %c0_21 = arith.constant 0 : index
      %25 = vector.load %arg12[%c0_20, %c0_21] : memref<8x128xf32, #tpu.memory_space<vmem>>, vector<8x128xf32>
      tpu.vector_store %arg12[%c0_20, %c0_21], %24 {strides = array<i32>} : memref<8x128xf32, #tpu.memory_space<vmem>>, vector<8x128xf32>,
      %c0_22 = arith.constant 0 : index
      %c0_23 = arith.constant 0 : index
      %c0_24 = arith.constant 0 : index
      %26 = vector.load %arg7[%c0_22, %c0_23, %c0_24] : memref<1x8x128xf32, #tpu.memory_space<vmem>>, vector<1x8x128xf32>
      %27 = vector.shape_cast %26 : vector<1x8x128xf32> to vector<8x128xf32>
      %c0_25 = arith.constant 0 : index
      %c0_26 = arith.constant 0 : index
      %28 = vector.load %arg13[%c0_25, %c0_26] : memref<8x128xf32, #tpu.memory_space<vmem>>, vector<8x128xf32>
      tpu.vector_store %arg13[%c0_25, %c0_26], %27 {strides = array<i32>} : memref<8x128xf32, #tpu.memory_space<vmem>>, vector<8x128xf32>,
    } else {
    }
    %c0 = arith.constant 0 : index
    %c0_1 = arith.constant 0 : index
    %c0_2 = arith.constant 0 : index
    %3 = vector.load %arg2[%c0, %c0_1, %c0_2] : memref<8x8x32xf32, #tpu.memory_space<vmem>>, vector<8x8x32xf32>
    %4 = vector.shape_cast %3 : vector<8x8x32xf32> to vector<64x32xf32>
    %c0_3 = arith.constant 0 : index
    %c0_4 = arith.constant 0 : index
    %c0_5 = arith.constant 0 : index
    %5 = vector.load %arg3[%c0_3, %c0_4, %c0_5] : memref<1x32x512xf32, #tpu.memory_space<vmem>>, vector<1x32x512xf32>
    %6 = vector.shape_cast %5 : vector<1x32x512xf32> to vector<32x512xf32>
    %cst = arith.constant dense<0.000000e+00> : vector<64x512xf32>
    %7 = tpu.matmul %4, %6, %cst {dimension_numbers = #tpu.dot_dimension_numbers<[1], [0], [0], [1], [0, 0, 1, 1], [], []>} : vector<64x32xf32>, vector<32x512xf32>, vector<64x512xf32> -> vector<64x512xf32>
    %c0_6 = arith.constant 0 : index
    %c0_7 = arith.constant 0 : index
    %c0_8 = arith.constant 0 : index
    %8 = vector.load %arg5[%c0_6, %c0_7, %c0_8] : memref<1x1x512xf32, #tpu.memory_space<vmem>>, vector<1x1x512xf32>
    %9 = vector.shape_cast %8 : vector<1x1x512xf32> to vector<1x512xf32>
    %10 = vector.broadcast %9 : vector<1x512xf32> to vector<64x512xf32>
    %11 = arith.addf %7, %10 : vector<64x512xf32>
    %12 = vector.shape_cast %11 : vector<64x512xf32> to vector<8x8x512xf32>
    %c0_9 = arith.constant 0 : index
    %c0_10 = arith.constant 0 : index
    %c0_11 = arith.constant 0 : index
    %13 = vector.load %arg11[%c0_9, %c0_10, %c0_11] : memref<8x8x512xf32, #tpu.memory_space<vmem>>, vector<8x8x512xf32>
    tpu.vector_store %arg11[%c0_9, %c0_10, %c0_11], %12 {strides = array<i32>} : memref<8x8x512xf32, #tpu.memory_space<vmem>>, vector<8x8x512xf32>,
    %c0_i32_12 = arith.constant 0 : i32
    %14 = arith.cmpi eq, %arg0, %c0_i32_12 : i32
    %15 = arith.extui %14 : i1 to i32
    %c0_i32_13 = arith.constant 0 : i32
    %16 = arith.cmpi ne, %15, %c0_i32_13 : i32
    scf.if %16 {
      %c0_17 = arith.constant 0 : index
      %c0_18 = arith.constant 0 : index
      %23 = vector.load %arg12[%c0_17, %c0_18] : memref<8x128xf32, #tpu.memory_space<vmem>>, vector<8x128xf32>
      %c0_19 = arith.constant 0 : index
      %c0_20 = arith.constant 0 : index
      %24 = vector.load %arg13[%c0_19, %c0_20] : memref<8x128xf32, #tpu.memory_space<vmem>>, vector<8x128xf32>
      %c0_21 = arith.constant 0 : index
      %c0_22 = arith.constant 0 : index
      %c0_23 = arith.constant 0 : index
      %25 = vector.load %arg11[%c0_21, %c0_22, %c0_23] : memref<8x8x512xf32, #tpu.memory_space<vmem>>, vector<1x8x512xf32>
      %26 = vector.shape_cast %25 : vector<1x8x512xf32> to vector<8x512xf32>
      %27 = vector.extract_strided_slice %26 {offsets = [0, 0], sizes = [8, 128], strides = [1, 1]} : vector<8x512xf32> to vector<8x128xf32>
      %c0_24 = arith.constant 0 : index
      %c0_25 = arith.constant 0 : index
      %c0_26 = arith.constant 0 : index
      %28 = vector.load %arg4[%c0_24, %c0_25, %c0_26] : memref<1x128x512xf32, #tpu.memory_space<vmem>>, vector<1x128x128xf32>
      %29 = vector.shape_cast %28 : vector<1x128x128xf32> to vector<128x128xf32>
      %cst_27 = arith.constant dense<0.000000e+00> : vector<8x128xf32>
      %30 = tpu.matmul %23, %29, %cst_27 {dimension_numbers = #tpu.dot_dimension_numbers<[1], [0], [0], [1], [0, 0, 1, 1], [], []>} : vector<8x128xf32>, vector<128x128xf32>, vector<8x128xf32> -> vector<8x128xf32>
      %31 = arith.addf %27, %30 : vector<8x128xf32>
      %32 = arith.negf %31 : vector<8x128xf32>
      %33 = math.exp %32 : vector<8x128xf32>
      %cst_28 = arith.constant 1.000000e+00 : f32
      %34 = vector.broadcast %cst_28 : f32 to vector<8x128xf32>
      %35 = arith.addf %34, %33 : vector<8x128xf32>
      %36 = arith.divf %34, %35 : vector<8x128xf32>
      %37 = vector.extract_strided_slice %26 {offsets = [0, 128], sizes = [8, 128], strides = [1, 1]} : vector<8x512xf32> to vector<8x128xf32>
      %c0_29 = arith.constant 0 : index
      %c0_30 = arith.constant 0 : index
      %c128 = arith.constant 128 : index
      %38 = vector.load %arg4[%c0_29, %c0_30, %c128] : memref<1x128x512xf32, #tpu.memory_space<vmem>>, vector<1x128x128xf32>
      %39 = vector.shape_cast %38 : vector<1x128x128xf32> to vector<128x128xf32>
      %cst_31 = arith.constant dense<0.000000e+00> : vector<8x128xf32>
      %40 = tpu.matmul %23, %39, %cst_31 {dimension_numbers = #tpu.dot_dimension_numbers<[1], [0], [0], [1], [0, 0, 1, 1], [], []>} : vector<8x128xf32>, vector<128x128xf32>, vector<8x128xf32> -> vector<8x128xf32>
      %41 = arith.addf %37, %40 : vector<8x128xf32>
      %42 = arith.negf %41 : vector<8x128xf32>
      %43 = math.exp %42 : vector<8x128xf32>
      %cst_32 = arith.constant 1.000000e+00 : f32
      %44 = vector.broadcast %cst_32 : f32 to vector<8x128xf32>
      %45 = arith.addf %44, %43 : vector<8x128xf32>
      %46 = arith.divf %44, %45 : vector<8x128xf32>
      %47 = vector.extract_strided_slice %26 {offsets = [0, 256], sizes = [8, 128], strides = [1, 1]} : vector<8x512xf32> to vector<8x128xf32>
      %c0_33 = arith.constant 0 : index
      %c0_34 = arith.constant 0 : index
      %c256 = arith.constant 256 : index
      %48 = vector.load %arg4[%c0_33, %c0_34, %c256] : memref<1x128x512xf32, #tpu.memory_space<vmem>>, vector<1x128x128xf32>
      %49 = vector.shape_cast %48 : vector<1x128x128xf32> to vector<128x128xf32>
      %cst_35 = arith.constant dense<0.000000e+00> : vector<8x128xf32>
      %50 = tpu.matmul %23, %49, %cst_35 {dimension_numbers = #tpu.dot_dimension_numbers<[1], [0], [0], [1], [0, 0, 1, 1], [], []>} : vector<8x128xf32>, vector<128x128xf32>, vector<8x128xf32> -> vector<8x128xf32>
      %51 = arith.addf %47, %50 : vector<8x128xf32>
      %52 = math.tanh %51 : vector<8x128xf32>
      %53 = vector.extract_strided_slice %26 {offsets = [0, 384], sizes = [8, 128], strides = [1, 1]} : vector<8x512xf32> to vector<8x128xf32>
      %c0_36 = arith.constant 0 : index
      %c0_37 = arith.constant 0 : index
      %c384 = arith.constant 384 : index
      %54 = vector.load %arg4[%c0_36, %c0_37, %c384] : memref<1x128x512xf32, #tpu.memory_space<vmem>>, vector<1x128x128xf32>
      %55 = vector.shape_cast %54 : vector<1x128x128xf32> to vector<128x128xf32>
      %cst_38 = arith.constant dense<0.000000e+00> : vector<8x128xf32>
      %56 = tpu.matmul %23, %55, %cst_38 {dimension_numbers = #tpu.dot_dimension_numbers<[1], [0], [0], [1], [0, 0, 1, 1], [], []>} : vector<8x128xf32>, vector<128x128xf32>, vector<8x128xf32> -> vector<8x128xf32>
      %57 = arith.addf %53, %56 : vector<8x128xf32>
      %58 = arith.negf %57 : vector<8x128xf32>
      %59 = math.exp %58 : vector<8x128xf32>
      %cst_39 = arith.constant 1.000000e+00 : f32
      %60 = vector.broadcast %cst_39 : f32 to vector<8x128xf32>
      %61 = arith.addf %60, %59 : vector<8x128xf32>
      %62 = arith.divf %60, %61 : vector<8x128xf32>
      %63 = arith.mulf %46, %24 : vector<8x128xf32>
      %64 = arith.mulf %36, %52 : vector<8x128xf32>
      %65 = arith.addf %63, %64 : vector<8x128xf32>
      %66 = math.tanh %65 : vector<8x128xf32>
      %67 = arith.mulf %62, %66 : vector<8x128xf32>
      %c0_40 = arith.constant 0 : index
      %c0_41 = arith.constant 0 : index
      %c0_42 = arith.constant 0 : index
      %68 = vector.load %arg8[%c0_40, %c0_41, %c0_42] : memref<8x8x128xf32, #tpu.memory_space<vmem>>, vector<1x8x128xf32>
      %69 = vector.shape_cast %68 : vector<1x8x128xf32> to vector<8x128xf32>
      %70 = vector.shape_cast %67 : vector<8x128xf32> to vector<1x8x128xf32>
      tpu.vector_store %arg8[%c0_40, %c0_41, %c0_42], %70 {strides = array<i32>} : memref<8x8x128xf32, #tpu.memory_space<vmem>>, vector<1x8x128xf32>,
      %c1 = arith.constant 1 : index
      %c0_43 = arith.constant 0 : index
      %c0_44 = arith.constant 0 : index
      %71 = vector.load %arg11[%c1, %c0_43, %c0_44] : memref<8x8x512xf32, #tpu.memory_space<vmem>>, vector<1x8x512xf32>
      %72 = vector.shape_cast %71 : vector<1x8x512xf32> to vector<8x512xf32>
      %73 = vector.extract_strided_slice %72 {offsets = [0, 0], sizes = [8, 128], strides = [1, 1]} : vector<8x512xf32> to vector<8x128xf32>
      %c0_45 = arith.constant 0 : index
      %c0_46 = arith.constant 0 : index
      %c0_47 = arith.constant 0 : index
      %74 = vector.load %arg4[%c0_45, %c0_46, %c0_47] : memref<1x128x512xf32, #tpu.memory_space<vmem>>, vector<1x128x128xf32>
      %75 = vector.shape_cast %74 : vector<1x128x128xf32> to vector<128x128xf32>
      %cst_48 = arith.constant dense<0.000000e+00> : vector<8x128xf32>
      %76 = tpu.matmul %67, %75, %cst_48 {dimension_numbers = #tpu.dot_dimension_numbers<[1], [0], [0], [1], [0, 0, 1, 1], [], []>} : vector<8x128xf32>, vector<128x128xf32>, vector<8x128xf32> -> vector<8x128xf32>
      %77 = arith.addf %73, %76 : vector<8x128xf32>
      %78 = arith.negf %77 : vector<8x128xf32>
      %79 = math.exp %78 : vector<8x128xf32>
      %cst_49 = arith.constant 1.000000e+00 : f32
      %80 = vector.broadcast %cst_49 : f32 to vector<8x128xf32>
      %81 = arith.addf %80, %79 : vector<8x128xf32>
      %82 = arith.divf %80, %81 : vector<8x128xf32>
      %83 = vector.extract_strided_slice %72 {offsets = [0, 128], sizes = [8, 128], strides = [1, 1]} : vector<8x512xf32> to vector<8x128xf32>
      %c0_50 = arith.constant 0 : index
      %c0_51 = arith.constant 0 : index
      %c128_52 = arith.constant 128 : index
      %84 = vector.load %arg4[%c0_50, %c0_51, %c128_52] : memref<1x128x512xf32, #tpu.memory_space<vmem>>, vector<1x128x128xf32>
      %85 = vector.shape_cast %84 : vector<1x128x128xf32> to vector<128x128xf32>
      %cst_53 = arith.constant dense<0.000000e+00> : vector<8x128xf32>
      %86 = tpu.matmul %67, %85, %cst_53 {dimension_numbers = #tpu.dot_dimension_numbers<[1], [0], [0], [1], [0, 0, 1, 1], [], []>} : vector<8x128xf32>, vector<128x128xf32>, vector<8x128xf32> -> vector<8x128xf32>
      %87 = arith.addf %83, %86 : vector<8x128xf32>
      %88 = arith.negf %87 : vector<8x128xf32>
      %89 = math.exp %88 : vector<8x128xf32>
      %cst_54 = arith.constant 1.000000e+00 : f32
      %90 = vector.broadcast %cst_54 : f32 to vector<8x128xf32>
      %91 = arith.addf %90, %89 : vector<8x128xf32>
      %92 = arith.divf %90, %91 : vector<8x128xf32>
      %93 = vector.extract_strided_slice %72 {offsets = [0, 256], sizes = [8, 128], strides = [1, 1]} : vector<8x512xf32> to vector<8x128xf32>
      %c0_55 = arith.constant 0 : index
      %c0_56 = arith.constant 0 : index
      %c256_57 = arith.constant 256 : index
      %94 = vector.load %arg4[%c0_55, %c0_56, %c256_57] : memref<1x128x512xf32, #tpu.memory_space<vmem>>, vector<1x128x128xf32>
      %95 = vector.shape_cast %94 : vector<1x128x128xf32> to vector<128x128xf32>
      %cst_58 = arith.constant dense<0.000000e+00> : vector<8x128xf32>
      %96 = tpu.matmul %67, %95, %cst_58 {dimension_numbers = #tpu.dot_dimension_numbers<[1], [0], [0], [1], [0, 0, 1, 1], [], []>} : vector<8x128xf32>, vector<128x128xf32>, vector<8x128xf32> -> vector<8x128xf32>
      %97 = arith.addf %93, %96 : vector<8x128xf32>
      %98 = math.tanh %97 : vector<8x128xf32>
      %99 = vector.extract_strided_slice %72 {offsets = [0, 384], sizes = [8, 128], strides = [1, 1]} : vector<8x512xf32> to vector<8x128xf32>
      %c0_59 = arith.constant 0 : index
      %c0_60 = arith.constant 0 : index
      %c384_61 = arith.constant 384 : index
      %100 = vector.load %arg4[%c0_59, %c0_60, %c384_61] : memref<1x128x512xf32, #tpu.memory_space<vmem>>, vector<1x128x128xf32>
      %101 = vector.shape_cast %100 : vector<1x128x128xf32> to vector<128x128xf32>
      %cst_62 = arith.constant dense<0.000000e+00> : vector<8x128xf32>
      %102 = tpu.matmul %67, %101, %cst_62 {dimension_numbers = #tpu.dot_dimension_numbers<[1], [0], [0], [1], [0, 0, 1, 1], [], []>} : vector<8x128xf32>, vector<128x128xf32>, vector<8x128xf32> -> vector<8x128xf32>
      %103 = arith.addf %99, %102 : vector<8x128xf32>
      %104 = arith.negf %103 : vector<8x128xf32>
      %105 = math.exp %104 : vector<8x128xf32>
      %cst_63 = arith.constant 1.000000e+00 : f32
      %106 = vector.broadcast %cst_63 : f32 to vector<8x128xf32>
      %107 = arith.addf %106, %105 : vector<8x128xf32>
      %108 = arith.divf %106, %107 : vector<8x128xf32>
      %109 = arith.mulf %92, %65 : vector<8x128xf32>
      %110 = arith.mulf %82, %98 : vector<8x128xf32>
      %111 = arith.addf %109, %110 : vector<8x128xf32>
      %112 = math.tanh %111 : vector<8x128xf32>
      %113 = arith.mulf %108, %112 : vector<8x128xf32>
      %c1_64 = arith.constant 1 : index
      %c0_65 = arith.constant 0 : index
      %c0_66 = arith.constant 0 : index
      %114 = vector.load %arg8[%c1_64, %c0_65, %c0_66] : memref<8x8x128xf32, #tpu.memory_space<vmem>>, vector<1x8x128xf32>
      %115 = vector.shape_cast %114 : vector<1x8x128xf32> to vector<8x128xf32>
      %116 = vector.shape_cast %113 : vector<8x128xf32> to vector<1x8x128xf32>
      tpu.vector_store %arg8[%c1_64, %c0_65, %c0_66], %116 {strides = array<i32>} : memref<8x8x128xf32, #tpu.memory_space<vmem>>, vector<1x8x128xf32>,
      %c2 = arith.constant 2 : index
      %c0_67 = arith.constant 0 : index
      %c0_68 = arith.constant 0 : index
      %117 = vector.load %arg11[%c2, %c0_67, %c0_68] : memref<8x8x512xf32, #tpu.memory_space<vmem>>, vector<1x8x512xf32>
      %118 = vector.shape_cast %117 : vector<1x8x512xf32> to vector<8x512xf32>
      %119 = vector.extract_strided_slice %118 {offsets = [0, 0], sizes = [8, 128], strides = [1, 1]} : vector<8x512xf32> to vector<8x128xf32>
      %c0_69 = arith.constant 0 : index
      %c0_70 = arith.constant 0 : index
      %c0_71 = arith.constant 0 : index
      %120 = vector.load %arg4[%c0_69, %c0_70, %c0_71] : memref<1x128x512xf32, #tpu.memory_space<vmem>>, vector<1x128x128xf32>
      %121 = vector.shape_cast %120 : vector<1x128x128xf32> to vector<128x128xf32>
      %cst_72 = arith.constant dense<0.000000e+00> : vector<8x128xf32>
      %122 = tpu.matmul %113, %121, %cst_72 {dimension_numbers = #tpu.dot_dimension_numbers<[1], [0], [0], [1], [0, 0, 1, 1], [], []>} : vector<8x128xf32>, vector<128x128xf32>, vector<8x128xf32> -> vector<8x128xf32>
      %123 = arith.addf %119, %122 : vector<8x128xf32>
      %124 = arith.negf %123 : vector<8x128xf32>
      %125 = math.exp %124 : vector<8x128xf32>
      %cst_73 = arith.constant 1.000000e+00 : f32
      %126 = vector.broadcast %cst_73 : f32 to vector<8x128xf32>
      %127 = arith.addf %126, %125 : vector<8x128xf32>
      %128 = arith.divf %126, %127 : vector<8x128xf32>
      %129 = vector.extract_strided_slice %118 {offsets = [0, 128], sizes = [8, 128], strides = [1, 1]} : vector<8x512xf32> to vector<8x128xf32>
      %c0_74 = arith.constant 0 : index
      %c0_75 = arith.constant 0 : index
      %c128_76 = arith.constant 128 : index
      %130 = vector.load %arg4[%c0_74, %c0_75, %c128_76] : memref<1x128x512xf32, #tpu.memory_space<vmem>>, vector<1x128x128xf32>
      %131 = vector.shape_cast %130 : vector<1x128x128xf32> to vector<128x128xf32>
      %cst_77 = arith.constant dense<0.000000e+00> : vector<8x128xf32>
      %132 = tpu.matmul %113, %131, %cst_77 {dimension_numbers = #tpu.dot_dimension_numbers<[1], [0], [0], [1], [0, 0, 1, 1], [], []>} : vector<8x128xf32>, vector<128x128xf32>, vector<8x128xf32> -> vector<8x128xf32>
      %133 = arith.addf %129, %132 : vector<8x128xf32>
      %134 = arith.negf %133 : vector<8x128xf32>
      %135 = math.exp %134 : vector<8x128xf32>
      %cst_78 = arith.constant 1.000000e+00 : f32
      %136 = vector.broadcast %cst_78 : f32 to vector<8x128xf32>
      %137 = arith.addf %136, %135 : vector<8x128xf32>
      %138 = arith.divf %136, %137 : vector<8x128xf32>
      %139 = vector.extract_strided_slice %118 {offsets = [0, 256], sizes = [8, 128], strides = [1, 1]} : vector<8x512xf32> to vector<8x128xf32>
      %c0_79 = arith.constant 0 : index
      %c0_80 = arith.constant 0 : index
      %c256_81 = arith.constant 256 : index
      %140 = vector.load %arg4[%c0_79, %c0_80, %c256_81] : memref<1x128x512xf32, #tpu.memory_space<vmem>>, vector<1x128x128xf32>
      %141 = vector.shape_cast %140 : vector<1x128x128xf32> to vector<128x128xf32>
      %cst_82 = arith.constant dense<0.000000e+00> : vector<8x128xf32>
      %142 = tpu.matmul %113, %141, %cst_82 {dimension_numbers = #tpu.dot_dimension_numbers<[1], [0], [0], [1], [0, 0, 1, 1], [], []>} : vector<8x128xf32>, vector<128x128xf32>, vector<8x128xf32> -> vector<8x128xf32>
      %143 = arith.addf %139, %142 : vector<8x128xf32>
      %144 = math.tanh %143 : vector<8x128xf32>
      %145 = vector.extract_strided_slice %118 {offsets = [0, 384], sizes = [8, 128], strides = [1, 1]} : vector<8x512xf32> to vector<8x128xf32>
      %c0_83 = arith.constant 0 : index
      %c0_84 = arith.constant 0 : index
      %c384_85 = arith.constant 384 : index
      %146 = vector.load %arg4[%c0_83, %c0_84, %c384_85] : memref<1x128x512xf32, #tpu.memory_space<vmem>>, vector<1x128x128xf32>
      %147 = vector.shape_cast %146 : vector<1x128x128xf32> to vector<128x128xf32>
      %cst_86 = arith.constant dense<0.000000e+00> : vector<8x128xf32>
      %148 = tpu.matmul %113, %147, %cst_86 {dimension_numbers = #tpu.dot_dimension_numbers<[1], [0], [0], [1], [0, 0, 1, 1], [], []>} : vector<8x128xf32>, vector<128x128xf32>, vector<8x128xf32> -> vector<8x128xf32>
      %149 = arith.addf %145, %148 : vector<8x128xf32>
      %150 = arith.negf %149 : vector<8x128xf32>
      %151 = math.exp %150 : vector<8x128xf32>
      %cst_87 = arith.constant 1.000000e+00 : f32
      %152 = vector.broadcast %cst_87 : f32 to vector<8x128xf32>
      %153 = arith.addf %152, %151 : vector<8x128xf32>
      %154 = arith.divf %152, %153 : vector<8x128xf32>
      %155 = arith.mulf %138, %111 : vector<8x128xf32>
      %156 = arith.mulf %128, %144 : vector<8x128xf32>
      %157 = arith.addf %155, %156 : vector<8x128xf32>
      %158 = math.tanh %157 : vector<8x128xf32>
      %159 = arith.mulf %154, %158 : vector<8x128xf32>
      %c2_88 = arith.constant 2 : index
      %c0_89 = arith.constant 0 : index
      %c0_90 = arith.constant 0 : index
      %160 = vector.load %arg8[%c2_88, %c0_89, %c0_90] : memref<8x8x128xf32, #tpu.memory_space<vmem>>, vector<1x8x128xf32>
      %161 = vector.shape_cast %160 : vector<1x8x128xf32> to vector<8x128xf32>
      %162 = vector.shape_cast %159 : vector<8x128xf32> to vector<1x8x128xf32>
      tpu.vector_store %arg8[%c2_88, %c0_89, %c0_90], %162 {strides = array<i32>} : memref<8x8x128xf32, #tpu.memory_space<vmem>>, vector<1x8x128xf32>,
      %c3 = arith.constant 3 : index
      %c0_91 = arith.constant 0 : index
      %c0_92 = arith.constant 0 : index
      %163 = vector.load %arg11[%c3, %c0_91, %c0_92] : memref<8x8x512xf32, #tpu.memory_space<vmem>>, vector<1x8x512xf32>
      %164 = vector.shape_cast %163 : vector<1x8x512xf32> to vector<8x512xf32>
      %165 = vector.extract_strided_slice %164 {offsets = [0, 0], sizes = [8, 128], strides = [1, 1]} : vector<8x512xf32> to vector<8x128xf32>
      %c0_93 = arith.constant 0 : index
      %c0_94 = arith.constant 0 : index
      %c0_95 = arith.constant 0 : index
      %166 = vector.load %arg4[%c0_93, %c0_94, %c0_95] : memref<1x128x512xf32, #tpu.memory_space<vmem>>, vector<1x128x128xf32>
      %167 = vector.shape_cast %166 : vector<1x128x128xf32> to vector<128x128xf32>
      %cst_96 = arith.constant dense<0.000000e+00> : vector<8x128xf32>
      %168 = tpu.matmul %159, %167, %cst_96 {dimension_numbers = #tpu.dot_dimension_numbers<[1], [0], [0], [1], [0, 0, 1, 1], [], []>} : vector<8x128xf32>, vector<128x128xf32>, vector<8x128xf32> -> vector<8x128xf32>
      %169 = arith.addf %165, %168 : vector<8x128xf32>
      %170 = arith.negf %169 : vector<8x128xf32>
      %171 = math.exp %170 : vector<8x128xf32>
      %cst_97 = arith.constant 1.000000e+00 : f32
      %172 = vector.broadcast %cst_97 : f32 to vector<8x128xf32>
      %173 = arith.addf %172, %171 : vector<8x128xf32>
      %174 = arith.divf %172, %173 : vector<8x128xf32>
      %175 = vector.extract_strided_slice %164 {offsets = [0, 128], sizes = [8, 128], strides = [1, 1]} : vector<8x512xf32> to vector<8x128xf32>
      %c0_98 = arith.constant 0 : index
      %c0_99 = arith.constant 0 : index
      %c128_100 = arith.constant 128 : index
      %176 = vector.load %arg4[%c0_98, %c0_99, %c128_100] : memref<1x128x512xf32, #tpu.memory_space<vmem>>, vector<1x128x128xf32>
      %177 = vector.shape_cast %176 : vector<1x128x128xf32> to vector<128x128xf32>
      %cst_101 = arith.constant dense<0.000000e+00> : vector<8x128xf32>
      %178 = tpu.matmul %159, %177, %cst_101 {dimension_numbers = #tpu.dot_dimension_numbers<[1], [0], [0], [1], [0, 0, 1, 1], [], []>} : vector<8x128xf32>, vector<128x128xf32>, vector<8x128xf32> -> vector<8x128xf32>
      %179 = arith.addf %175, %178 : vector<8x128xf32>
      %180 = arith.negf %179 : vector<8x128xf32>
      %181 = math.exp %180 : vector<8x128xf32>
      %cst_102 = arith.constant 1.000000e+00 : f32
      %182 = vector.broadcast %cst_102 : f32 to vector<8x128xf32>
      %183 = arith.addf %182, %181 : vector<8x128xf32>
      %184 = arith.divf %182, %183 : vector<8x128xf32>
      %185 = vector.extract_strided_slice %164 {offsets = [0, 256], sizes = [8, 128], strides = [1, 1]} : vector<8x512xf32> to vector<8x128xf32>
      %c0_103 = arith.constant 0 : index
      %c0_104 = arith.constant 0 : index
      %c256_105 = arith.constant 256 : index
      %186 = vector.load %arg4[%c0_103, %c0_104, %c256_105] : memref<1x128x512xf32, #tpu.memory_space<vmem>>, vector<1x128x128xf32>
      %187 = vector.shape_cast %186 : vector<1x128x128xf32> to vector<128x128xf32>
      %cst_106 = arith.constant dense<0.000000e+00> : vector<8x128xf32>
      %188 = tpu.matmul %159, %187, %cst_106 {dimension_numbers = #tpu.dot_dimension_numbers<[1], [0], [0], [1], [0, 0, 1, 1], [], []>} : vector<8x128xf32>, vector<128x128xf32>, vector<8x128xf32> -> vector<8x128xf32>
      %189 = arith.addf %185, %188 : vector<8x128xf32>
      %190 = math.tanh %189 : vector<8x128xf32>
      %191 = vector.extract_strided_slice %164 {offsets = [0, 384], sizes = [8, 128], strides = [1, 1]} : vector<8x512xf32> to vector<8x128xf32>
      %c0_107 = arith.constant 0 : index
      %c0_108 = arith.constant 0 : index
      %c384_109 = arith.constant 384 : index
      %192 = vector.load %arg4[%c0_107, %c0_108, %c384_109] : memref<1x128x512xf32, #tpu.memory_space<vmem>>, vector<1x128x128xf32>
      %193 = vector.shape_cast %192 : vector<1x128x128xf32> to vector<128x128xf32>
      %cst_110 = arith.constant dense<0.000000e+00> : vector<8x128xf32>
      %194 = tpu.matmul %159, %193, %cst_110 {dimension_numbers = #tpu.dot_dimension_numbers<[1], [0], [0], [1], [0, 0, 1, 1], [], []>} : vector<8x128xf32>, vector<128x128xf32>, vector<8x128xf32> -> vector<8x128xf32>
      %195 = arith.addf %191, %194 : vector<8x128xf32>
      %196 = arith.negf %195 : vector<8x128xf32>
      %197 = math.exp %196 : vector<8x128xf32>
      %cst_111 = arith.constant 1.000000e+00 : f32
      %198 = vector.broadcast %cst_111 : f32 to vector<8x128xf32>
      %199 = arith.addf %198, %197 : vector<8x128xf32>
      %200 = arith.divf %198, %199 : vector<8x128xf32>
      %201 = arith.mulf %184, %157 : vector<8x128xf32>
      %202 = arith.mulf %174, %190 : vector<8x128xf32>
      %203 = arith.addf %201, %202 : vector<8x128xf32>
      %204 = math.tanh %203 : vector<8x128xf32>
      %205 = arith.mulf %200, %204 : vector<8x128xf32>
      %c3_112 = arith.constant 3 : index
      %c0_113 = arith.constant 0 : index
      %c0_114 = arith.constant 0 : index
      %206 = vector.load %arg8[%c3_112, %c0_113, %c0_114] : memref<8x8x128xf32, #tpu.memory_space<vmem>>, vector<1x8x128xf32>
      %207 = vector.shape_cast %206 : vector<1x8x128xf32> to vector<8x128xf32>
      %208 = vector.shape_cast %205 : vector<8x128xf32> to vector<1x8x128xf32>
      tpu.vector_store %arg8[%c3_112, %c0_113, %c0_114], %208 {strides = array<i32>} : memref<8x8x128xf32, #tpu.memory_space<vmem>>, vector<1x8x128xf32>,
      %c4 = arith.constant 4 : index
      %c0_115 = arith.constant 0 : index
      %c0_116 = arith.constant 0 : index
      %209 = vector.load %arg11[%c4, %c0_115, %c0_116] : memref<8x8x512xf32, #tpu.memory_space<vmem>>, vector<1x8x512xf32>
      %210 = vector.shape_cast %209 : vector<1x8x512xf32> to vector<8x512xf32>
      %211 = vector.extract_strided_slice %210 {offsets = [0, 0], sizes = [8, 128], strides = [1, 1]} : vector<8x512xf32> to vector<8x128xf32>
      %c0_117 = arith.constant 0 : index
      %c0_118 = arith.constant 0 : index
      %c0_119 = arith.constant 0 : index
      %212 = vector.load %arg4[%c0_117, %c0_118, %c0_119] : memref<1x128x512xf32, #tpu.memory_space<vmem>>, vector<1x128x128xf32>
      %213 = vector.shape_cast %212 : vector<1x128x128xf32> to vector<128x128xf32>
      %cst_120 = arith.constant dense<0.000000e+00> : vector<8x128xf32>
      %214 = tpu.matmul %205, %213, %cst_120 {dimension_numbers = #tpu.dot_dimension_numbers<[1], [0], [0], [1], [0, 0, 1, 1], [], []>} : vector<8x128xf32>, vector<128x128xf32>, vector<8x128xf32> -> vector<8x128xf32>
      %215 = arith.addf %211, %214 : vector<8x128xf32>
      %216 = arith.negf %215 : vector<8x128xf32>
      %217 = math.exp %216 : vector<8x128xf32>
      %cst_121 = arith.constant 1.000000e+00 : f32
      %218 = vector.broadcast %cst_121 : f32 to vector<8x128xf32>
      %219 = arith.addf %218, %217 : vector<8x128xf32>
      %220 = arith.divf %218, %219 : vector<8x128xf32>
      %221 = vector.extract_strided_slice %210 {offsets = [0, 128], sizes = [8, 128], strides = [1, 1]} : vector<8x512xf32> to vector<8x128xf32>
      %c0_122 = arith.constant 0 : index
      %c0_123 = arith.constant 0 : index
      %c128_124 = arith.constant 128 : index
      %222 = vector.load %arg4[%c0_122, %c0_123, %c128_124] : memref<1x128x512xf32, #tpu.memory_space<vmem>>, vector<1x128x128xf32>
      %223 = vector.shape_cast %222 : vector<1x128x128xf32> to vector<128x128xf32>
      %cst_125 = arith.constant dense<0.000000e+00> : vector<8x128xf32>
      %224 = tpu.matmul %205, %223, %cst_125 {dimension_numbers = #tpu.dot_dimension_numbers<[1], [0], [0], [1], [0, 0, 1, 1], [], []>} : vector<8x128xf32>, vector<128x128xf32>, vector<8x128xf32> -> vector<8x128xf32>
      %225 = arith.addf %221, %224 : vector<8x128xf32>
      %226 = arith.negf %225 : vector<8x128xf32>
      %227 = math.exp %226 : vector<8x128xf32>
      %cst_126 = arith.constant 1.000000e+00 : f32
      %228 = vector.broadcast %cst_126 : f32 to vector<8x128xf32>
      %229 = arith.addf %228, %227 : vector<8x128xf32>
      %230 = arith.divf %228, %229 : vector<8x128xf32>
      %231 = vector.extract_strided_slice %210 {offsets = [0, 256], sizes = [8, 128], strides = [1, 1]} : vector<8x512xf32> to vector<8x128xf32>
      %c0_127 = arith.constant 0 : index
      %c0_128 = arith.constant 0 : index
      %c256_129 = arith.constant 256 : index
      %232 = vector.load %arg4[%c0_127, %c0_128, %c256_129] : memref<1x128x512xf32, #tpu.memory_space<vmem>>, vector<1x128x128xf32>
      %233 = vector.shape_cast %232 : vector<1x128x128xf32> to vector<128x128xf32>
      %cst_130 = arith.constant dense<0.000000e+00> : vector<8x128xf32>
      %234 = tpu.matmul %205, %233, %cst_130 {dimension_numbers = #tpu.dot_dimension_numbers<[1], [0], [0], [1], [0, 0, 1, 1], [], []>} : vector<8x128xf32>, vector<128x128xf32>, vector<8x128xf32> -> vector<8x128xf32>
      %235 = arith.addf %231, %234 : vector<8x128xf32>
      %236 = math.tanh %235 : vector<8x128xf32>
      %237 = vector.extract_strided_slice %210 {offsets = [0, 384], sizes = [8, 128], strides = [1, 1]} : vector<8x512xf32> to vector<8x128xf32>
      %c0_131 = arith.constant 0 : index
      %c0_132 = arith.constant 0 : index
      %c384_133 = arith.constant 384 : index
      %238 = vector.load %arg4[%c0_131, %c0_132, %c384_133] : memref<1x128x512xf32, #tpu.memory_space<vmem>>, vector<1x128x128xf32>
      %239 = vector.shape_cast %238 : vector<1x128x128xf32> to vector<128x128xf32>
      %cst_134 = arith.constant dense<0.000000e+00> : vector<8x128xf32>
      %240 = tpu.matmul %205, %239, %cst_134 {dimension_numbers = #tpu.dot_dimension_numbers<[1], [0], [0], [1], [0, 0, 1, 1], [], []>} : vector<8x128xf32>, vector<128x128xf32>, vector<8x128xf32> -> vector<8x128xf32>
      %241 = arith.addf %237, %240 : vector<8x128xf32>
      %242 = arith.negf %241 : vector<8x128xf32>
      %243 = math.exp %242 : vector<8x128xf32>
      %cst_135 = arith.constant 1.000000e+00 : f32
      %244 = vector.broadcast %cst_135 : f32 to vector<8x128xf32>
      %245 = arith.addf %244, %243 : vector<8x128xf32>
      %246 = arith.divf %244, %245 : vector<8x128xf32>
      %247 = arith.mulf %230, %203 : vector<8x128xf32>
      %248 = arith.mulf %220, %236 : vector<8x128xf32>
      %249 = arith.addf %247, %248 : vector<8x128xf32>
      %250 = math.tanh %249 : vector<8x128xf32>
      %251 = arith.mulf %246, %250 : vector<8x128xf32>
      %c4_136 = arith.constant 4 : index
      %c0_137 = arith.constant 0 : index
      %c0_138 = arith.constant 0 : index
      %252 = vector.load %arg8[%c4_136, %c0_137, %c0_138] : memref<8x8x128xf32, #tpu.memory_space<vmem>>, vector<1x8x128xf32>
      %253 = vector.shape_cast %252 : vector<1x8x128xf32> to vector<8x128xf32>
      %254 = vector.shape_cast %251 : vector<8x128xf32> to vector<1x8x128xf32>
      tpu.vector_store %arg8[%c4_136, %c0_137, %c0_138], %254 {strides = array<i32>} : memref<8x8x128xf32, #tpu.memory_space<vmem>>, vector<1x8x128xf32>,
      %c5 = arith.constant 5 : index
      %c0_139 = arith.constant 0 : index
      %c0_140 = arith.constant 0 : index
      %255 = vector.load %arg11[%c5, %c0_139, %c0_140] : memref<8x8x512xf32, #tpu.memory_space<vmem>>, vector<1x8x512xf32>
      %256 = vector.shape_cast %255 : vector<1x8x512xf32> to vector<8x512xf32>
      %257 = vector.extract_strided_slice %256 {offsets = [0, 0], sizes = [8, 128], strides = [1, 1]} : vector<8x512xf32> to vector<8x128xf32>
      %c0_141 = arith.constant 0 : index
      %c0_142 = arith.constant 0 : index
      %c0_143 = arith.constant 0 : index
      %258 = vector.load %arg4[%c0_141, %c0_142, %c0_143] : memref<1x128x512xf32, #tpu.memory_space<vmem>>, vector<1x128x128xf32>
      %259 = vector.shape_cast %258 : vector<1x128x128xf32> to vector<128x128xf32>
      %cst_144 = arith.constant dense<0.000000e+00> : vector<8x128xf32>
      %260 = tpu.matmul %251, %259, %cst_144 {dimension_numbers = #tpu.dot_dimension_numbers<[1], [0], [0], [1], [0, 0, 1, 1], [], []>} : vector<8x128xf32>, vector<128x128xf32>, vector<8x128xf32> -> vector<8x128xf32>
      %261 = arith.addf %257, %260 : vector<8x128xf32>
      %262 = arith.negf %261 : vector<8x128xf32>
      %263 = math.exp %262 : vector<8x128xf32>
      %cst_145 = arith.constant 1.000000e+00 : f32
      %264 = vector.broadcast %cst_145 : f32 to vector<8x128xf32>
      %265 = arith.addf %264, %263 : vector<8x128xf32>
      %266 = arith.divf %264, %265 : vector<8x128xf32>
      %267 = vector.extract_strided_slice %256 {offsets = [0, 128], sizes = [8, 128], strides = [1, 1]} : vector<8x512xf32> to vector<8x128xf32>
      %c0_146 = arith.constant 0 : index
      %c0_147 = arith.constant 0 : index
      %c128_148 = arith.constant 128 : index
      %268 = vector.load %arg4[%c0_146, %c0_147, %c128_148] : memref<1x128x512xf32, #tpu.memory_space<vmem>>, vector<1x128x128xf32>
      %269 = vector.shape_cast %268 : vector<1x128x128xf32> to vector<128x128xf32>
      %cst_149 = arith.constant dense<0.000000e+00> : vector<8x128xf32>
      %270 = tpu.matmul %251, %269, %cst_149 {dimension_numbers = #tpu.dot_dimension_numbers<[1], [0], [0], [1], [0, 0, 1, 1], [], []>} : vector<8x128xf32>, vector<128x128xf32>, vector<8x128xf32> -> vector<8x128xf32>
      %271 = arith.addf %267, %270 : vector<8x128xf32>
      %272 = arith.negf %271 : vector<8x128xf32>
      %273 = math.exp %272 : vector<8x128xf32>
      %cst_150 = arith.constant 1.000000e+00 : f32
      %274 = vector.broadcast %cst_150 : f32 to vector<8x128xf32>
      %275 = arith.addf %274, %273 : vector<8x128xf32>
      %276 = arith.divf %274, %275 : vector<8x128xf32>
      %277 = vector.extract_strided_slice %256 {offsets = [0, 256], sizes = [8, 128], strides = [1, 1]} : vector<8x512xf32> to vector<8x128xf32>
      %c0_151 = arith.constant 0 : index
      %c0_152 = arith.constant 0 : index
      %c256_153 = arith.constant 256 : index
      %278 = vector.load %arg4[%c0_151, %c0_152, %c256_153] : memref<1x128x512xf32, #tpu.memory_space<vmem>>, vector<1x128x128xf32>
      %279 = vector.shape_cast %278 : vector<1x128x128xf32> to vector<128x128xf32>
      %cst_154 = arith.constant dense<0.000000e+00> : vector<8x128xf32>
      %280 = tpu.matmul %251, %279, %cst_154 {dimension_numbers = #tpu.dot_dimension_numbers<[1], [0], [0], [1], [0, 0, 1, 1], [], []>} : vector<8x128xf32>, vector<128x128xf32>, vector<8x128xf32> -> vector<8x128xf32>
      %281 = arith.addf %277, %280 : vector<8x128xf32>
      %282 = math.tanh %281 : vector<8x128xf32>
      %283 = vector.extract_strided_slice %256 {offsets = [0, 384], sizes = [8, 128], strides = [1, 1]} : vector<8x512xf32> to vector<8x128xf32>
      %c0_155 = arith.constant 0 : index
      %c0_156 = arith.constant 0 : index
      %c384_157 = arith.constant 384 : index
      %284 = vector.load %arg4[%c0_155, %c0_156, %c384_157] : memref<1x128x512xf32, #tpu.memory_space<vmem>>, vector<1x128x128xf32>
      %285 = vector.shape_cast %284 : vector<1x128x128xf32> to vector<128x128xf32>
      %cst_158 = arith.constant dense<0.000000e+00> : vector<8x128xf32>
      %286 = tpu.matmul %251, %285, %cst_158 {dimension_numbers = #tpu.dot_dimension_numbers<[1], [0], [0], [1], [0, 0, 1, 1], [], []>} : vector<8x128xf32>, vector<128x128xf32>, vector<8x128xf32> -> vector<8x128xf32>
      %287 = arith.addf %283, %286 : vector<8x128xf32>
      %288 = arith.negf %287 : vector<8x128xf32>
      %289 = math.exp %288 : vector<8x128xf32>
      %cst_159 = arith.constant 1.000000e+00 : f32
      %290 = vector.broadcast %cst_159 : f32 to vector<8x128xf32>
      %291 = arith.addf %290, %289 : vector<8x128xf32>
      %292 = arith.divf %290, %291 : vector<8x128xf32>
      %293 = arith.mulf %276, %249 : vector<8x128xf32>
      %294 = arith.mulf %266, %282 : vector<8x128xf32>
      %295 = arith.addf %293, %294 : vector<8x128xf32>
      %296 = math.tanh %295 : vector<8x128xf32>
      %297 = arith.mulf %292, %296 : vector<8x128xf32>
      %c5_160 = arith.constant 5 : index
      %c0_161 = arith.constant 0 : index
      %c0_162 = arith.constant 0 : index
      %298 = vector.load %arg8[%c5_160, %c0_161, %c0_162] : memref<8x8x128xf32, #tpu.memory_space<vmem>>, vector<1x8x128xf32>
      %299 = vector.shape_cast %298 : vector<1x8x128xf32> to vector<8x128xf32>
      %300 = vector.shape_cast %297 : vector<8x128xf32> to vector<1x8x128xf32>
      tpu.vector_store %arg8[%c5_160, %c0_161, %c0_162], %300 {strides = array<i32>} : memref<8x8x128xf32, #tpu.memory_space<vmem>>, vector<1x8x128xf32>,
      %c6 = arith.constant 6 : index
      %c0_163 = arith.constant 0 : index
      %c0_164 = arith.constant 0 : index
      %301 = vector.load %arg11[%c6, %c0_163, %c0_164] : memref<8x8x512xf32, #tpu.memory_space<vmem>>, vector<1x8x512xf32>
      %302 = vector.shape_cast %301 : vector<1x8x512xf32> to vector<8x512xf32>
      %303 = vector.extract_strided_slice %302 {offsets = [0, 0], sizes = [8, 128], strides = [1, 1]} : vector<8x512xf32> to vector<8x128xf32>
      %c0_165 = arith.constant 0 : index
      %c0_166 = arith.constant 0 : index
      %c0_167 = arith.constant 0 : index
      %304 = vector.load %arg4[%c0_165, %c0_166, %c0_167] : memref<1x128x512xf32, #tpu.memory_space<vmem>>, vector<1x128x128xf32>
      %305 = vector.shape_cast %304 : vector<1x128x128xf32> to vector<128x128xf32>
      %cst_168 = arith.constant dense<0.000000e+00> : vector<8x128xf32>
      %306 = tpu.matmul %297, %305, %cst_168 {dimension_numbers = #tpu.dot_dimension_numbers<[1], [0], [0], [1], [0, 0, 1, 1], [], []>} : vector<8x128xf32>, vector<128x128xf32>, vector<8x128xf32> -> vector<8x128xf32>
      %307 = arith.addf %303, %306 : vector<8x128xf32>
      %308 = arith.negf %307 : vector<8x128xf32>
      %309 = math.exp %308 : vector<8x128xf32>
      %cst_169 = arith.constant 1.000000e+00 : f32
      %310 = vector.broadcast %cst_169 : f32 to vector<8x128xf32>
      %311 = arith.addf %310, %309 : vector<8x128xf32>
      %312 = arith.divf %310, %311 : vector<8x128xf32>
      %313 = vector.extract_strided_slice %302 {offsets = [0, 128], sizes = [8, 128], strides = [1, 1]} : vector<8x512xf32> to vector<8x128xf32>
      %c0_170 = arith.constant 0 : index
      %c0_171 = arith.constant 0 : index
      %c128_172 = arith.constant 128 : index
      %314 = vector.load %arg4[%c0_170, %c0_171, %c128_172] : memref<1x128x512xf32, #tpu.memory_space<vmem>>, vector<1x128x128xf32>
      %315 = vector.shape_cast %314 : vector<1x128x128xf32> to vector<128x128xf32>
      %cst_173 = arith.constant dense<0.000000e+00> : vector<8x128xf32>
      %316 = tpu.matmul %297, %315, %cst_173 {dimension_numbers = #tpu.dot_dimension_numbers<[1], [0], [0], [1], [0, 0, 1, 1], [], []>} : vector<8x128xf32>, vector<128x128xf32>, vector<8x128xf32> -> vector<8x128xf32>
      %317 = arith.addf %313, %316 : vector<8x128xf32>
      %318 = arith.negf %317 : vector<8x128xf32>
      %319 = math.exp %318 : vector<8x128xf32>
      %cst_174 = arith.constant 1.000000e+00 : f32
      %320 = vector.broadcast %cst_174 : f32 to vector<8x128xf32>
      %321 = arith.addf %320, %319 : vector<8x128xf32>
      %322 = arith.divf %320, %321 : vector<8x128xf32>
      %323 = vector.extract_strided_slice %302 {offsets = [0, 256], sizes = [8, 128], strides = [1, 1]} : vector<8x512xf32> to vector<8x128xf32>
      %c0_175 = arith.constant 0 : index
      %c0_176 = arith.constant 0 : index
      %c256_177 = arith.constant 256 : index
      %324 = vector.load %arg4[%c0_175, %c0_176, %c256_177] : memref<1x128x512xf32, #tpu.memory_space<vmem>>, vector<1x128x128xf32>
      %325 = vector.shape_cast %324 : vector<1x128x128xf32> to vector<128x128xf32>
      %cst_178 = arith.constant dense<0.000000e+00> : vector<8x128xf32>
      %326 = tpu.matmul %297, %325, %cst_178 {dimension_numbers = #tpu.dot_dimension_numbers<[1], [0], [0], [1], [0, 0, 1, 1], [], []>} : vector<8x128xf32>, vector<128x128xf32>, vector<8x128xf32> -> vector<8x128xf32>
      %327 = arith.addf %323, %326 : vector<8x128xf32>
      %328 = math.tanh %327 : vector<8x128xf32>
      %329 = vector.extract_strided_slice %302 {offsets = [0, 384], sizes = [8, 128], strides = [1, 1]} : vector<8x512xf32> to vector<8x128xf32>
      %c0_179 = arith.constant 0 : index
      %c0_180 = arith.constant 0 : index
      %c384_181 = arith.constant 384 : index
      %330 = vector.load %arg4[%c0_179, %c0_180, %c384_181] : memref<1x128x512xf32, #tpu.memory_space<vmem>>, vector<1x128x128xf32>
      %331 = vector.shape_cast %330 : vector<1x128x128xf32> to vector<128x128xf32>
      %cst_182 = arith.constant dense<0.000000e+00> : vector<8x128xf32>
      %332 = tpu.matmul %297, %331, %cst_182 {dimension_numbers = #tpu.dot_dimension_numbers<[1], [0], [0], [1], [0, 0, 1, 1], [], []>} : vector<8x128xf32>, vector<128x128xf32>, vector<8x128xf32> -> vector<8x128xf32>
      %333 = arith.addf %329, %332 : vector<8x128xf32>
      %334 = arith.negf %333 : vector<8x128xf32>
      %335 = math.exp %334 : vector<8x128xf32>
      %cst_183 = arith.constant 1.000000e+00 : f32
      %336 = vector.broadcast %cst_183 : f32 to vector<8x128xf32>
      %337 = arith.addf %336, %335 : vector<8x128xf32>
      %338 = arith.divf %336, %337 : vector<8x128xf32>
      %339 = arith.mulf %322, %295 : vector<8x128xf32>
      %340 = arith.mulf %312, %328 : vector<8x128xf32>
      %341 = arith.addf %339, %340 : vector<8x128xf32>
      %342 = math.tanh %341 : vector<8x128xf32>
      %343 = arith.mulf %338, %342 : vector<8x128xf32>
      %c6_184 = arith.constant 6 : index
      %c0_185 = arith.constant 0 : index
      %c0_186 = arith.constant 0 : index
      %344 = vector.load %arg8[%c6_184, %c0_185, %c0_186] : memref<8x8x128xf32, #tpu.memory_space<vmem>>, vector<1x8x128xf32>
      %345 = vector.shape_cast %344 : vector<1x8x128xf32> to vector<8x128xf32>
      %346 = vector.shape_cast %343 : vector<8x128xf32> to vector<1x8x128xf32>
      tpu.vector_store %arg8[%c6_184, %c0_185, %c0_186], %346 {strides = array<i32>} : memref<8x8x128xf32, #tpu.memory_space<vmem>>, vector<1x8x128xf32>,
      %c7 = arith.constant 7 : index
      %c0_187 = arith.constant 0 : index
      %c0_188 = arith.constant 0 : index
      %347 = vector.load %arg11[%c7, %c0_187, %c0_188] : memref<8x8x512xf32, #tpu.memory_space<vmem>>, vector<1x8x512xf32>
      %348 = vector.shape_cast %347 : vector<1x8x512xf32> to vector<8x512xf32>
      %349 = vector.extract_strided_slice %348 {offsets = [0, 0], sizes = [8, 128], strides = [1, 1]} : vector<8x512xf32> to vector<8x128xf32>
      %c0_189 = arith.constant 0 : index
      %c0_190 = arith.constant 0 : index
      %c0_191 = arith.constant 0 : index
      %350 = vector.load %arg4[%c0_189, %c0_190, %c0_191] : memref<1x128x512xf32, #tpu.memory_space<vmem>>, vector<1x128x128xf32>
      %351 = vector.shape_cast %350 : vector<1x128x128xf32> to vector<128x128xf32>
      %cst_192 = arith.constant dense<0.000000e+00> : vector<8x128xf32>
      %352 = tpu.matmul %343, %351, %cst_192 {dimension_numbers = #tpu.dot_dimension_numbers<[1], [0], [0], [1], [0, 0, 1, 1], [], []>} : vector<8x128xf32>, vector<128x128xf32>, vector<8x128xf32> -> vector<8x128xf32>
      %353 = arith.addf %349, %352 : vector<8x128xf32>
      %354 = arith.negf %353 : vector<8x128xf32>
      %355 = math.exp %354 : vector<8x128xf32>
      %cst_193 = arith.constant 1.000000e+00 : f32
      %356 = vector.broadcast %cst_193 : f32 to vector<8x128xf32>
      %357 = arith.addf %356, %355 : vector<8x128xf32>
      %358 = arith.divf %356, %357 : vector<8x128xf32>
      %359 = vector.extract_strided_slice %348 {offsets = [0, 128], sizes = [8, 128], strides = [1, 1]} : vector<8x512xf32> to vector<8x128xf32>
      %c0_194 = arith.constant 0 : index
      %c0_195 = arith.constant 0 : index
      %c128_196 = arith.constant 128 : index
      %360 = vector.load %arg4[%c0_194, %c0_195, %c128_196] : memref<1x128x512xf32, #tpu.memory_space<vmem>>, vector<1x128x128xf32>
      %361 = vector.shape_cast %360 : vector<1x128x128xf32> to vector<128x128xf32>
      %cst_197 = arith.constant dense<0.000000e+00> : vector<8x128xf32>
      %362 = tpu.matmul %343, %361, %cst_197 {dimension_numbers = #tpu.dot_dimension_numbers<[1], [0], [0], [1], [0, 0, 1, 1], [], []>} : vector<8x128xf32>, vector<128x128xf32>, vector<8x128xf32> -> vector<8x128xf32>
      %363 = arith.addf %359, %362 : vector<8x128xf32>
      %364 = arith.negf %363 : vector<8x128xf32>
      %365 = math.exp %364 : vector<8x128xf32>
      %cst_198 = arith.constant 1.000000e+00 : f32
      %366 = vector.broadcast %cst_198 : f32 to vector<8x128xf32>
      %367 = arith.addf %366, %365 : vector<8x128xf32>
      %368 = arith.divf %366, %367 : vector<8x128xf32>
      %369 = vector.extract_strided_slice %348 {offsets = [0, 256], sizes = [8, 128], strides = [1, 1]} : vector<8x512xf32> to vector<8x128xf32>
      %c0_199 = arith.constant 0 : index
      %c0_200 = arith.constant 0 : index
      %c256_201 = arith.constant 256 : index
      %370 = vector.load %arg4[%c0_199, %c0_200, %c256_201] : memref<1x128x512xf32, #tpu.memory_space<vmem>>, vector<1x128x128xf32>
      %371 = vector.shape_cast %370 : vector<1x128x128xf32> to vector<128x128xf32>
      %cst_202 = arith.constant dense<0.000000e+00> : vector<8x128xf32>
      %372 = tpu.matmul %343, %371, %cst_202 {dimension_numbers = #tpu.dot_dimension_numbers<[1], [0], [0], [1], [0, 0, 1, 1], [], []>} : vector<8x128xf32>, vector<128x128xf32>, vector<8x128xf32> -> vector<8x128xf32>
      %373 = arith.addf %369, %372 : vector<8x128xf32>
      %374 = math.tanh %373 : vector<8x128xf32>
      %375 = vector.extract_strided_slice %348 {offsets = [0, 384], sizes = [8, 128], strides = [1, 1]} : vector<8x512xf32> to vector<8x128xf32>
      %c0_203 = arith.constant 0 : index
      %c0_204 = arith.constant 0 : index
      %c384_205 = arith.constant 384 : index
      %376 = vector.load %arg4[%c0_203, %c0_204, %c384_205] : memref<1x128x512xf32, #tpu.memory_space<vmem>>, vector<1x128x128xf32>
      %377 = vector.shape_cast %376 : vector<1x128x128xf32> to vector<128x128xf32>
      %cst_206 = arith.constant dense<0.000000e+00> : vector<8x128xf32>
      %378 = tpu.matmul %343, %377, %cst_206 {dimension_numbers = #tpu.dot_dimension_numbers<[1], [0], [0], [1], [0, 0, 1, 1], [], []>} : vector<8x128xf32>, vector<128x128xf32>, vector<8x128xf32> -> vector<8x128xf32>
      %379 = arith.addf %375, %378 : vector<8x128xf32>
      %380 = arith.negf %379 : vector<8x128xf32>
      %381 = math.exp %380 : vector<8x128xf32>
      %cst_207 = arith.constant 1.000000e+00 : f32
      %382 = vector.broadcast %cst_207 : f32 to vector<8x128xf32>
      %383 = arith.addf %382, %381 : vector<8x128xf32>
      %384 = arith.divf %382, %383 : vector<8x128xf32>
      %385 = arith.mulf %368, %341 : vector<8x128xf32>
      %386 = arith.mulf %358, %374 : vector<8x128xf32>
      %387 = arith.addf %385, %386 : vector<8x128xf32>
      %388 = math.tanh %387 : vector<8x128xf32>
      %389 = arith.mulf %384, %388 : vector<8x128xf32>
      %c7_208 = arith.constant 7 : index
      %c0_209 = arith.constant 0 : index
      %c0_210 = arith.constant 0 : index
      %390 = vector.load %arg8[%c7_208, %c0_209, %c0_210] : memref<8x8x128xf32, #tpu.memory_space<vmem>>, vector<1x8x128xf32>
      %391 = vector.shape_cast %390 : vector<1x8x128xf32> to vector<8x128xf32>
      %392 = vector.shape_cast %389 : vector<8x128xf32> to vector<1x8x128xf32>
      tpu.vector_store %arg8[%c7_208, %c0_209, %c0_210], %392 {strides = array<i32>} : memref<8x8x128xf32, #tpu.memory_space<vmem>>, vector<1x8x128xf32>,
      %c0_211 = arith.constant 0 : index
      %c0_212 = arith.constant 0 : index
      %393 = vector.load %arg12[%c0_211, %c0_212] : memref<8x128xf32, #tpu.memory_space<vmem>>, vector<8x128xf32>
      tpu.vector_store %arg12[%c0_211, %c0_212], %389 {strides = array<i32>} : memref<8x128xf32, #tpu.memory_space<vmem>>, vector<8x128xf32>,
      %c0_213 = arith.constant 0 : index
      %c0_214 = arith.constant 0 : index
      %394 = vector.load %arg13[%c0_213, %c0_214] : memref<8x128xf32, #tpu.memory_space<vmem>>, vector<8x128xf32>
      tpu.vector_store %arg13[%c0_213, %c0_214], %387 {strides = array<i32>} : memref<8x128xf32, #tpu.memory_space<vmem>>, vector<8x128xf32>,
    } else {
    }
    %c1_i32 = arith.constant 1 : i32
    %17 = arith.cmpi eq, %arg0, %c1_i32 : i32
    %18 = arith.extui %17 : i1 to i32
    %c0_i32_14 = arith.constant 0 : i32
    %19 = arith.cmpi ne, %18, %c0_i32_14 : i32
    scf.if %19 {
      %c0_17 = arith.constant 0 : index
      %c0_18 = arith.constant 0 : index
      %23 = vector.load %arg12[%c0_17, %c0_18] : memref<8x128xf32, #tpu.memory_space<vmem>>, vector<8x128xf32>
      %c0_19 = arith.constant 0 : index
      %c0_20 = arith.constant 0 : index
      %24 = vector.load %arg13[%c0_19, %c0_20] : memref<8x128xf32, #tpu.memory_space<vmem>>, vector<8x128xf32>
      %c7 = arith.constant 7 : index
      %c0_21 = arith.constant 0 : index
      %c0_22 = arith.constant 0 : index
      %25 = vector.load %arg11[%c7, %c0_21, %c0_22] : memref<8x8x512xf32, #tpu.memory_space<vmem>>, vector<1x8x512xf32>
      %26 = vector.shape_cast %25 : vector<1x8x512xf32> to vector<8x512xf32>
      %27 = vector.extract_strided_slice %26 {offsets = [0, 0], sizes = [8, 128], strides = [1, 1]} : vector<8x512xf32> to vector<8x128xf32>
      %c0_23 = arith.constant 0 : index
      %c0_24 = arith.constant 0 : index
      %c0_25 = arith.constant 0 : index
      %28 = vector.load %arg4[%c0_23, %c0_24, %c0_25] : memref<1x128x512xf32, #tpu.memory_space<vmem>>, vector<1x128x128xf32>
      %29 = vector.shape_cast %28 : vector<1x128x128xf32> to vector<128x128xf32>
      %cst_26 = arith.constant dense<0.000000e+00> : vector<8x128xf32>
      %30 = tpu.matmul %23, %29, %cst_26 {dimension_numbers = #tpu.dot_dimension_numbers<[1], [0], [0], [1], [0, 0, 1, 1], [], []>} : vector<8x128xf32>, vector<128x128xf32>, vector<8x128xf32> -> vector<8x128xf32>
      %31 = arith.addf %27, %30 : vector<8x128xf32>
      %32 = arith.negf %31 : vector<8x128xf32>
      %33 = math.exp %32 : vector<8x128xf32>
      %cst_27 = arith.constant 1.000000e+00 : f32
      %34 = vector.broadcast %cst_27 : f32 to vector<8x128xf32>
      %35 = arith.addf %34, %33 : vector<8x128xf32>
      %36 = arith.divf %34, %35 : vector<8x128xf32>
      %37 = vector.extract_strided_slice %26 {offsets = [0, 128], sizes = [8, 128], strides = [1, 1]} : vector<8x512xf32> to vector<8x128xf32>
      %c0_28 = arith.constant 0 : index
      %c0_29 = arith.constant 0 : index
      %c128 = arith.constant 128 : index
      %38 = vector.load %arg4[%c0_28, %c0_29, %c128] : memref<1x128x512xf32, #tpu.memory_space<vmem>>, vector<1x128x128xf32>
      %39 = vector.shape_cast %38 : vector<1x128x128xf32> to vector<128x128xf32>
      %cst_30 = arith.constant dense<0.000000e+00> : vector<8x128xf32>
      %40 = tpu.matmul %23, %39, %cst_30 {dimension_numbers = #tpu.dot_dimension_numbers<[1], [0], [0], [1], [0, 0, 1, 1], [], []>} : vector<8x128xf32>, vector<128x128xf32>, vector<8x128xf32> -> vector<8x128xf32>
      %41 = arith.addf %37, %40 : vector<8x128xf32>
      %42 = arith.negf %41 : vector<8x128xf32>
      %43 = math.exp %42 : vector<8x128xf32>
      %cst_31 = arith.constant 1.000000e+00 : f32
      %44 = vector.broadcast %cst_31 : f32 to vector<8x128xf32>
      %45 = arith.addf %44, %43 : vector<8x128xf32>
      %46 = arith.divf %44, %45 : vector<8x128xf32>
      %47 = vector.extract_strided_slice %26 {offsets = [0, 256], sizes = [8, 128], strides = [1, 1]} : vector<8x512xf32> to vector<8x128xf32>
      %c0_32 = arith.constant 0 : index
      %c0_33 = arith.constant 0 : index
      %c256 = arith.constant 256 : index
      %48 = vector.load %arg4[%c0_32, %c0_33, %c256] : memref<1x128x512xf32, #tpu.memory_space<vmem>>, vector<1x128x128xf32>
      %49 = vector.shape_cast %48 : vector<1x128x128xf32> to vector<128x128xf32>
      %cst_34 = arith.constant dense<0.000000e+00> : vector<8x128xf32>
      %50 = tpu.matmul %23, %49, %cst_34 {dimension_numbers = #tpu.dot_dimension_numbers<[1], [0], [0], [1], [0, 0, 1, 1], [], []>} : vector<8x128xf32>, vector<128x128xf32>, vector<8x128xf32> -> vector<8x128xf32>
      %51 = arith.addf %47, %50 : vector<8x128xf32>
      %52 = math.tanh %51 : vector<8x128xf32>
      %53 = vector.extract_strided_slice %26 {offsets = [0, 384], sizes = [8, 128], strides = [1, 1]} : vector<8x512xf32> to vector<8x128xf32>
      %c0_35 = arith.constant 0 : index
      %c0_36 = arith.constant 0 : index
      %c384 = arith.constant 384 : index
      %54 = vector.load %arg4[%c0_35, %c0_36, %c384] : memref<1x128x512xf32, #tpu.memory_space<vmem>>, vector<1x128x128xf32>
      %55 = vector.shape_cast %54 : vector<1x128x128xf32> to vector<128x128xf32>
      %cst_37 = arith.constant dense<0.000000e+00> : vector<8x128xf32>
      %56 = tpu.matmul %23, %55, %cst_37 {dimension_numbers = #tpu.dot_dimension_numbers<[1], [0], [0], [1], [0, 0, 1, 1], [], []>} : vector<8x128xf32>, vector<128x128xf32>, vector<8x128xf32> -> vector<8x128xf32>
      %57 = arith.addf %53, %56 : vector<8x128xf32>
      %58 = arith.negf %57 : vector<8x128xf32>
      %59 = math.exp %58 : vector<8x128xf32>
      %cst_38 = arith.constant 1.000000e+00 : f32
      %60 = vector.broadcast %cst_38 : f32 to vector<8x128xf32>
      %61 = arith.addf %60, %59 : vector<8x128xf32>
      %62 = arith.divf %60, %61 : vector<8x128xf32>
      %63 = arith.mulf %46, %24 : vector<8x128xf32>
      %64 = arith.mulf %36, %52 : vector<8x128xf32>
      %65 = arith.addf %63, %64 : vector<8x128xf32>
      %66 = math.tanh %65 : vector<8x128xf32>
      %67 = arith.mulf %62, %66 : vector<8x128xf32>
      %c7_39 = arith.constant 7 : index
      %c0_40 = arith.constant 0 : index
      %c0_41 = arith.constant 0 : index
      %68 = vector.load %arg8[%c7_39, %c0_40, %c0_41] : memref<8x8x128xf32, #tpu.memory_space<vmem>>, vector<1x8x128xf32>
      %69 = vector.shape_cast %68 : vector<1x8x128xf32> to vector<8x128xf32>
      %70 = vector.shape_cast %67 : vector<8x128xf32> to vector<1x8x128xf32>
      tpu.vector_store %arg8[%c7_39, %c0_40, %c0_41], %70 {strides = array<i32>} : memref<8x8x128xf32, #tpu.memory_space<vmem>>, vector<1x8x128xf32>,
      %c6 = arith.constant 6 : index
      %c0_42 = arith.constant 0 : index
      %c0_43 = arith.constant 0 : index
      %71 = vector.load %arg11[%c6, %c0_42, %c0_43] : memref<8x8x512xf32, #tpu.memory_space<vmem>>, vector<1x8x512xf32>
      %72 = vector.shape_cast %71 : vector<1x8x512xf32> to vector<8x512xf32>
      %73 = vector.extract_strided_slice %72 {offsets = [0, 0], sizes = [8, 128], strides = [1, 1]} : vector<8x512xf32> to vector<8x128xf32>
      %c0_44 = arith.constant 0 : index
      %c0_45 = arith.constant 0 : index
      %c0_46 = arith.constant 0 : index
      %74 = vector.load %arg4[%c0_44, %c0_45, %c0_46] : memref<1x128x512xf32, #tpu.memory_space<vmem>>, vector<1x128x128xf32>
      %75 = vector.shape_cast %74 : vector<1x128x128xf32> to vector<128x128xf32>
      %cst_47 = arith.constant dense<0.000000e+00> : vector<8x128xf32>
      %76 = tpu.matmul %67, %75, %cst_47 {dimension_numbers = #tpu.dot_dimension_numbers<[1], [0], [0], [1], [0, 0, 1, 1], [], []>} : vector<8x128xf32>, vector<128x128xf32>, vector<8x128xf32> -> vector<8x128xf32>
      %77 = arith.addf %73, %76 : vector<8x128xf32>
      %78 = arith.negf %77 : vector<8x128xf32>
      %79 = math.exp %78 : vector<8x128xf32>
      %cst_48 = arith.constant 1.000000e+00 : f32
      %80 = vector.broadcast %cst_48 : f32 to vector<8x128xf32>
      %81 = arith.addf %80, %79 : vector<8x128xf32>
      %82 = arith.divf %80, %81 : vector<8x128xf32>
      %83 = vector.extract_strided_slice %72 {offsets = [0, 128], sizes = [8, 128], strides = [1, 1]} : vector<8x512xf32> to vector<8x128xf32>
      %c0_49 = arith.constant 0 : index
      %c0_50 = arith.constant 0 : index
      %c128_51 = arith.constant 128 : index
      %84 = vector.load %arg4[%c0_49, %c0_50, %c128_51] : memref<1x128x512xf32, #tpu.memory_space<vmem>>, vector<1x128x128xf32>
      %85 = vector.shape_cast %84 : vector<1x128x128xf32> to vector<128x128xf32>
      %cst_52 = arith.constant dense<0.000000e+00> : vector<8x128xf32>
      %86 = tpu.matmul %67, %85, %cst_52 {dimension_numbers = #tpu.dot_dimension_numbers<[1], [0], [0], [1], [0, 0, 1, 1], [], []>} : vector<8x128xf32>, vector<128x128xf32>, vector<8x128xf32> -> vector<8x128xf32>
      %87 = arith.addf %83, %86 : vector<8x128xf32>
      %88 = arith.negf %87 : vector<8x128xf32>
      %89 = math.exp %88 : vector<8x128xf32>
      %cst_53 = arith.constant 1.000000e+00 : f32
      %90 = vector.broadcast %cst_53 : f32 to vector<8x128xf32>
      %91 = arith.addf %90, %89 : vector<8x128xf32>
      %92 = arith.divf %90, %91 : vector<8x128xf32>
      %93 = vector.extract_strided_slice %72 {offsets = [0, 256], sizes = [8, 128], strides = [1, 1]} : vector<8x512xf32> to vector<8x128xf32>
      %c0_54 = arith.constant 0 : index
      %c0_55 = arith.constant 0 : index
      %c256_56 = arith.constant 256 : index
      %94 = vector.load %arg4[%c0_54, %c0_55, %c256_56] : memref<1x128x512xf32, #tpu.memory_space<vmem>>, vector<1x128x128xf32>
      %95 = vector.shape_cast %94 : vector<1x128x128xf32> to vector<128x128xf32>
      %cst_57 = arith.constant dense<0.000000e+00> : vector<8x128xf32>
      %96 = tpu.matmul %67, %95, %cst_57 {dimension_numbers = #tpu.dot_dimension_numbers<[1], [0], [0], [1], [0, 0, 1, 1], [], []>} : vector<8x128xf32>, vector<128x128xf32>, vector<8x128xf32> -> vector<8x128xf32>
      %97 = arith.addf %93, %96 : vector<8x128xf32>
      %98 = math.tanh %97 : vector<8x128xf32>
      %99 = vector.extract_strided_slice %72 {offsets = [0, 384], sizes = [8, 128], strides = [1, 1]} : vector<8x512xf32> to vector<8x128xf32>
      %c0_58 = arith.constant 0 : index
      %c0_59 = arith.constant 0 : index
      %c384_60 = arith.constant 384 : index
      %100 = vector.load %arg4[%c0_58, %c0_59, %c384_60] : memref<1x128x512xf32, #tpu.memory_space<vmem>>, vector<1x128x128xf32>
      %101 = vector.shape_cast %100 : vector<1x128x128xf32> to vector<128x128xf32>
      %cst_61 = arith.constant dense<0.000000e+00> : vector<8x128xf32>
      %102 = tpu.matmul %67, %101, %cst_61 {dimension_numbers = #tpu.dot_dimension_numbers<[1], [0], [0], [1], [0, 0, 1, 1], [], []>} : vector<8x128xf32>, vector<128x128xf32>, vector<8x128xf32> -> vector<8x128xf32>
      %103 = arith.addf %99, %102 : vector<8x128xf32>
      %104 = arith.negf %103 : vector<8x128xf32>
      %105 = math.exp %104 : vector<8x128xf32>
      %cst_62 = arith.constant 1.000000e+00 : f32
      %106 = vector.broadcast %cst_62 : f32 to vector<8x128xf32>
      %107 = arith.addf %106, %105 : vector<8x128xf32>
      %108 = arith.divf %106, %107 : vector<8x128xf32>
      %109 = arith.mulf %92, %65 : vector<8x128xf32>
      %110 = arith.mulf %82, %98 : vector<8x128xf32>
      %111 = arith.addf %109, %110 : vector<8x128xf32>
      %112 = math.tanh %111 : vector<8x128xf32>
      %113 = arith.mulf %108, %112 : vector<8x128xf32>
      %c6_63 = arith.constant 6 : index
      %c0_64 = arith.constant 0 : index
      %c0_65 = arith.constant 0 : index
      %114 = vector.load %arg8[%c6_63, %c0_64, %c0_65] : memref<8x8x128xf32, #tpu.memory_space<vmem>>, vector<1x8x128xf32>
      %115 = vector.shape_cast %114 : vector<1x8x128xf32> to vector<8x128xf32>
      %116 = vector.shape_cast %113 : vector<8x128xf32> to vector<1x8x128xf32>
      tpu.vector_store %arg8[%c6_63, %c0_64, %c0_65], %116 {strides = array<i32>} : memref<8x8x128xf32, #tpu.memory_space<vmem>>, vector<1x8x128xf32>,
      %c5 = arith.constant 5 : index
      %c0_66 = arith.constant 0 : index
      %c0_67 = arith.constant 0 : index
      %117 = vector.load %arg11[%c5, %c0_66, %c0_67] : memref<8x8x512xf32, #tpu.memory_space<vmem>>, vector<1x8x512xf32>
      %118 = vector.shape_cast %117 : vector<1x8x512xf32> to vector<8x512xf32>
      %119 = vector.extract_strided_slice %118 {offsets = [0, 0], sizes = [8, 128], strides = [1, 1]} : vector<8x512xf32> to vector<8x128xf32>
      %c0_68 = arith.constant 0 : index
      %c0_69 = arith.constant 0 : index
      %c0_70 = arith.constant 0 : index
      %120 = vector.load %arg4[%c0_68, %c0_69, %c0_70] : memref<1x128x512xf32, #tpu.memory_space<vmem>>, vector<1x128x128xf32>
      %121 = vector.shape_cast %120 : vector<1x128x128xf32> to vector<128x128xf32>
      %cst_71 = arith.constant dense<0.000000e+00> : vector<8x128xf32>
      %122 = tpu.matmul %113, %121, %cst_71 {dimension_numbers = #tpu.dot_dimension_numbers<[1], [0], [0], [1], [0, 0, 1, 1], [], []>} : vector<8x128xf32>, vector<128x128xf32>, vector<8x128xf32> -> vector<8x128xf32>
      %123 = arith.addf %119, %122 : vector<8x128xf32>
      %124 = arith.negf %123 : vector<8x128xf32>
      %125 = math.exp %124 : vector<8x128xf32>
      %cst_72 = arith.constant 1.000000e+00 : f32
      %126 = vector.broadcast %cst_72 : f32 to vector<8x128xf32>
      %127 = arith.addf %126, %125 : vector<8x128xf32>
      %128 = arith.divf %126, %127 : vector<8x128xf32>
      %129 = vector.extract_strided_slice %118 {offsets = [0, 128], sizes = [8, 128], strides = [1, 1]} : vector<8x512xf32> to vector<8x128xf32>
      %c0_73 = arith.constant 0 : index
      %c0_74 = arith.constant 0 : index
      %c128_75 = arith.constant 128 : index
      %130 = vector.load %arg4[%c0_73, %c0_74, %c128_75] : memref<1x128x512xf32, #tpu.memory_space<vmem>>, vector<1x128x128xf32>
      %131 = vector.shape_cast %130 : vector<1x128x128xf32> to vector<128x128xf32>
      %cst_76 = arith.constant dense<0.000000e+00> : vector<8x128xf32>
      %132 = tpu.matmul %113, %131, %cst_76 {dimension_numbers = #tpu.dot_dimension_numbers<[1], [0], [0], [1], [0, 0, 1, 1], [], []>} : vector<8x128xf32>, vector<128x128xf32>, vector<8x128xf32> -> vector<8x128xf32>
      %133 = arith.addf %129, %132 : vector<8x128xf32>
      %134 = arith.negf %133 : vector<8x128xf32>
      %135 = math.exp %134 : vector<8x128xf32>
      %cst_77 = arith.constant 1.000000e+00 : f32
      %136 = vector.broadcast %cst_77 : f32 to vector<8x128xf32>
      %137 = arith.addf %136, %135 : vector<8x128xf32>
      %138 = arith.divf %136, %137 : vector<8x128xf32>
      %139 = vector.extract_strided_slice %118 {offsets = [0, 256], sizes = [8, 128], strides = [1, 1]} : vector<8x512xf32> to vector<8x128xf32>
      %c0_78 = arith.constant 0 : index
      %c0_79 = arith.constant 0 : index
      %c256_80 = arith.constant 256 : index
      %140 = vector.load %arg4[%c0_78, %c0_79, %c256_80] : memref<1x128x512xf32, #tpu.memory_space<vmem>>, vector<1x128x128xf32>
      %141 = vector.shape_cast %140 : vector<1x128x128xf32> to vector<128x128xf32>
      %cst_81 = arith.constant dense<0.000000e+00> : vector<8x128xf32>
      %142 = tpu.matmul %113, %141, %cst_81 {dimension_numbers = #tpu.dot_dimension_numbers<[1], [0], [0], [1], [0, 0, 1, 1], [], []>} : vector<8x128xf32>, vector<128x128xf32>, vector<8x128xf32> -> vector<8x128xf32>
      %143 = arith.addf %139, %142 : vector<8x128xf32>
      %144 = math.tanh %143 : vector<8x128xf32>
      %145 = vector.extract_strided_slice %118 {offsets = [0, 384], sizes = [8, 128], strides = [1, 1]} : vector<8x512xf32> to vector<8x128xf32>
      %c0_82 = arith.constant 0 : index
      %c0_83 = arith.constant 0 : index
      %c384_84 = arith.constant 384 : index
      %146 = vector.load %arg4[%c0_82, %c0_83, %c384_84] : memref<1x128x512xf32, #tpu.memory_space<vmem>>, vector<1x128x128xf32>
      %147 = vector.shape_cast %146 : vector<1x128x128xf32> to vector<128x128xf32>
      %cst_85 = arith.constant dense<0.000000e+00> : vector<8x128xf32>
      %148 = tpu.matmul %113, %147, %cst_85 {dimension_numbers = #tpu.dot_dimension_numbers<[1], [0], [0], [1], [0, 0, 1, 1], [], []>} : vector<8x128xf32>, vector<128x128xf32>, vector<8x128xf32> -> vector<8x128xf32>
      %149 = arith.addf %145, %148 : vector<8x128xf32>
      %150 = arith.negf %149 : vector<8x128xf32>
      %151 = math.exp %150 : vector<8x128xf32>
      %cst_86 = arith.constant 1.000000e+00 : f32
      %152 = vector.broadcast %cst_86 : f32 to vector<8x128xf32>
      %153 = arith.addf %152, %151 : vector<8x128xf32>
      %154 = arith.divf %152, %153 : vector<8x128xf32>
      %155 = arith.mulf %138, %111 : vector<8x128xf32>
      %156 = arith.mulf %128, %144 : vector<8x128xf32>
      %157 = arith.addf %155, %156 : vector<8x128xf32>
      %158 = math.tanh %157 : vector<8x128xf32>
      %159 = arith.mulf %154, %158 : vector<8x128xf32>
      %c5_87 = arith.constant 5 : index
      %c0_88 = arith.constant 0 : index
      %c0_89 = arith.constant 0 : index
      %160 = vector.load %arg8[%c5_87, %c0_88, %c0_89] : memref<8x8x128xf32, #tpu.memory_space<vmem>>, vector<1x8x128xf32>
      %161 = vector.shape_cast %160 : vector<1x8x128xf32> to vector<8x128xf32>
      %162 = vector.shape_cast %159 : vector<8x128xf32> to vector<1x8x128xf32>
      tpu.vector_store %arg8[%c5_87, %c0_88, %c0_89], %162 {strides = array<i32>} : memref<8x8x128xf32, #tpu.memory_space<vmem>>, vector<1x8x128xf32>,
      %c4 = arith.constant 4 : index
      %c0_90 = arith.constant 0 : index
      %c0_91 = arith.constant 0 : index
      %163 = vector.load %arg11[%c4, %c0_90, %c0_91] : memref<8x8x512xf32, #tpu.memory_space<vmem>>, vector<1x8x512xf32>
      %164 = vector.shape_cast %163 : vector<1x8x512xf32> to vector<8x512xf32>
      %165 = vector.extract_strided_slice %164 {offsets = [0, 0], sizes = [8, 128], strides = [1, 1]} : vector<8x512xf32> to vector<8x128xf32>
      %c0_92 = arith.constant 0 : index
      %c0_93 = arith.constant 0 : index
      %c0_94 = arith.constant 0 : index
      %166 = vector.load %arg4[%c0_92, %c0_93, %c0_94] : memref<1x128x512xf32, #tpu.memory_space<vmem>>, vector<1x128x128xf32>
      %167 = vector.shape_cast %166 : vector<1x128x128xf32> to vector<128x128xf32>
      %cst_95 = arith.constant dense<0.000000e+00> : vector<8x128xf32>
      %168 = tpu.matmul %159, %167, %cst_95 {dimension_numbers = #tpu.dot_dimension_numbers<[1], [0], [0], [1], [0, 0, 1, 1], [], []>} : vector<8x128xf32>, vector<128x128xf32>, vector<8x128xf32> -> vector<8x128xf32>
      %169 = arith.addf %165, %168 : vector<8x128xf32>
      %170 = arith.negf %169 : vector<8x128xf32>
      %171 = math.exp %170 : vector<8x128xf32>
      %cst_96 = arith.constant 1.000000e+00 : f32
      %172 = vector.broadcast %cst_96 : f32 to vector<8x128xf32>
      %173 = arith.addf %172, %171 : vector<8x128xf32>
      %174 = arith.divf %172, %173 : vector<8x128xf32>
      %175 = vector.extract_strided_slice %164 {offsets = [0, 128], sizes = [8, 128], strides = [1, 1]} : vector<8x512xf32> to vector<8x128xf32>
      %c0_97 = arith.constant 0 : index
      %c0_98 = arith.constant 0 : index
      %c128_99 = arith.constant 128 : index
      %176 = vector.load %arg4[%c0_97, %c0_98, %c128_99] : memref<1x128x512xf32, #tpu.memory_space<vmem>>, vector<1x128x128xf32>
      %177 = vector.shape_cast %176 : vector<1x128x128xf32> to vector<128x128xf32>
      %cst_100 = arith.constant dense<0.000000e+00> : vector<8x128xf32>
      %178 = tpu.matmul %159, %177, %cst_100 {dimension_numbers = #tpu.dot_dimension_numbers<[1], [0], [0], [1], [0, 0, 1, 1], [], []>} : vector<8x128xf32>, vector<128x128xf32>, vector<8x128xf32> -> vector<8x128xf32>
      %179 = arith.addf %175, %178 : vector<8x128xf32>
      %180 = arith.negf %179 : vector<8x128xf32>
      %181 = math.exp %180 : vector<8x128xf32>
      %cst_101 = arith.constant 1.000000e+00 : f32
      %182 = vector.broadcast %cst_101 : f32 to vector<8x128xf32>
      %183 = arith.addf %182, %181 : vector<8x128xf32>
      %184 = arith.divf %182, %183 : vector<8x128xf32>
      %185 = vector.extract_strided_slice %164 {offsets = [0, 256], sizes = [8, 128], strides = [1, 1]} : vector<8x512xf32> to vector<8x128xf32>
      %c0_102 = arith.constant 0 : index
      %c0_103 = arith.constant 0 : index
      %c256_104 = arith.constant 256 : index
      %186 = vector.load %arg4[%c0_102, %c0_103, %c256_104] : memref<1x128x512xf32, #tpu.memory_space<vmem>>, vector<1x128x128xf32>
      %187 = vector.shape_cast %186 : vector<1x128x128xf32> to vector<128x128xf32>
      %cst_105 = arith.constant dense<0.000000e+00> : vector<8x128xf32>
      %188 = tpu.matmul %159, %187, %cst_105 {dimension_numbers = #tpu.dot_dimension_numbers<[1], [0], [0], [1], [0, 0, 1, 1], [], []>} : vector<8x128xf32>, vector<128x128xf32>, vector<8x128xf32> -> vector<8x128xf32>
      %189 = arith.addf %185, %188 : vector<8x128xf32>
      %190 = math.tanh %189 : vector<8x128xf32>
      %191 = vector.extract_strided_slice %164 {offsets = [0, 384], sizes = [8, 128], strides = [1, 1]} : vector<8x512xf32> to vector<8x128xf32>
      %c0_106 = arith.constant 0 : index
      %c0_107 = arith.constant 0 : index
      %c384_108 = arith.constant 384 : index
      %192 = vector.load %arg4[%c0_106, %c0_107, %c384_108] : memref<1x128x512xf32, #tpu.memory_space<vmem>>, vector<1x128x128xf32>
      %193 = vector.shape_cast %192 : vector<1x128x128xf32> to vector<128x128xf32>
      %cst_109 = arith.constant dense<0.000000e+00> : vector<8x128xf32>
      %194 = tpu.matmul %159, %193, %cst_109 {dimension_numbers = #tpu.dot_dimension_numbers<[1], [0], [0], [1], [0, 0, 1, 1], [], []>} : vector<8x128xf32>, vector<128x128xf32>, vector<8x128xf32> -> vector<8x128xf32>
      %195 = arith.addf %191, %194 : vector<8x128xf32>
      %196 = arith.negf %195 : vector<8x128xf32>
      %197 = math.exp %196 : vector<8x128xf32>
      %cst_110 = arith.constant 1.000000e+00 : f32
      %198 = vector.broadcast %cst_110 : f32 to vector<8x128xf32>
      %199 = arith.addf %198, %197 : vector<8x128xf32>
      %200 = arith.divf %198, %199 : vector<8x128xf32>
      %201 = arith.mulf %184, %157 : vector<8x128xf32>
      %202 = arith.mulf %174, %190 : vector<8x128xf32>
      %203 = arith.addf %201, %202 : vector<8x128xf32>
      %204 = math.tanh %203 : vector<8x128xf32>
      %205 = arith.mulf %200, %204 : vector<8x128xf32>
      %c4_111 = arith.constant 4 : index
      %c0_112 = arith.constant 0 : index
      %c0_113 = arith.constant 0 : index
      %206 = vector.load %arg8[%c4_111, %c0_112, %c0_113] : memref<8x8x128xf32, #tpu.memory_space<vmem>>, vector<1x8x128xf32>
      %207 = vector.shape_cast %206 : vector<1x8x128xf32> to vector<8x128xf32>
      %208 = vector.shape_cast %205 : vector<8x128xf32> to vector<1x8x128xf32>
      tpu.vector_store %arg8[%c4_111, %c0_112, %c0_113], %208 {strides = array<i32>} : memref<8x8x128xf32, #tpu.memory_space<vmem>>, vector<1x8x128xf32>,
      %c3 = arith.constant 3 : index
      %c0_114 = arith.constant 0 : index
      %c0_115 = arith.constant 0 : index
      %209 = vector.load %arg11[%c3, %c0_114, %c0_115] : memref<8x8x512xf32, #tpu.memory_space<vmem>>, vector<1x8x512xf32>
      %210 = vector.shape_cast %209 : vector<1x8x512xf32> to vector<8x512xf32>
      %211 = vector.extract_strided_slice %210 {offsets = [0, 0], sizes = [8, 128], strides = [1, 1]} : vector<8x512xf32> to vector<8x128xf32>
      %c0_116 = arith.constant 0 : index
      %c0_117 = arith.constant 0 : index
      %c0_118 = arith.constant 0 : index
      %212 = vector.load %arg4[%c0_116, %c0_117, %c0_118] : memref<1x128x512xf32, #tpu.memory_space<vmem>>, vector<1x128x128xf32>
      %213 = vector.shape_cast %212 : vector<1x128x128xf32> to vector<128x128xf32>
      %cst_119 = arith.constant dense<0.000000e+00> : vector<8x128xf32>
      %214 = tpu.matmul %205, %213, %cst_119 {dimension_numbers = #tpu.dot_dimension_numbers<[1], [0], [0], [1], [0, 0, 1, 1], [], []>} : vector<8x128xf32>, vector<128x128xf32>, vector<8x128xf32> -> vector<8x128xf32>
      %215 = arith.addf %211, %214 : vector<8x128xf32>
      %216 = arith.negf %215 : vector<8x128xf32>
      %217 = math.exp %216 : vector<8x128xf32>
      %cst_120 = arith.constant 1.000000e+00 : f32
      %218 = vector.broadcast %cst_120 : f32 to vector<8x128xf32>
      %219 = arith.addf %218, %217 : vector<8x128xf32>
      %220 = arith.divf %218, %219 : vector<8x128xf32>
      %221 = vector.extract_strided_slice %210 {offsets = [0, 128], sizes = [8, 128], strides = [1, 1]} : vector<8x512xf32> to vector<8x128xf32>
      %c0_121 = arith.constant 0 : index
      %c0_122 = arith.constant 0 : index
      %c128_123 = arith.constant 128 : index
      %222 = vector.load %arg4[%c0_121, %c0_122, %c128_123] : memref<1x128x512xf32, #tpu.memory_space<vmem>>, vector<1x128x128xf32>
      %223 = vector.shape_cast %222 : vector<1x128x128xf32> to vector<128x128xf32>
      %cst_124 = arith.constant dense<0.000000e+00> : vector<8x128xf32>
      %224 = tpu.matmul %205, %223, %cst_124 {dimension_numbers = #tpu.dot_dimension_numbers<[1], [0], [0], [1], [0, 0, 1, 1], [], []>} : vector<8x128xf32>, vector<128x128xf32>, vector<8x128xf32> -> vector<8x128xf32>
      %225 = arith.addf %221, %224 : vector<8x128xf32>
      %226 = arith.negf %225 : vector<8x128xf32>
      %227 = math.exp %226 : vector<8x128xf32>
      %cst_125 = arith.constant 1.000000e+00 : f32
      %228 = vector.broadcast %cst_125 : f32 to vector<8x128xf32>
      %229 = arith.addf %228, %227 : vector<8x128xf32>
      %230 = arith.divf %228, %229 : vector<8x128xf32>
      %231 = vector.extract_strided_slice %210 {offsets = [0, 256], sizes = [8, 128], strides = [1, 1]} : vector<8x512xf32> to vector<8x128xf32>
      %c0_126 = arith.constant 0 : index
      %c0_127 = arith.constant 0 : index
      %c256_128 = arith.constant 256 : index
      %232 = vector.load %arg4[%c0_126, %c0_127, %c256_128] : memref<1x128x512xf32, #tpu.memory_space<vmem>>, vector<1x128x128xf32>
      %233 = vector.shape_cast %232 : vector<1x128x128xf32> to vector<128x128xf32>
      %cst_129 = arith.constant dense<0.000000e+00> : vector<8x128xf32>
      %234 = tpu.matmul %205, %233, %cst_129 {dimension_numbers = #tpu.dot_dimension_numbers<[1], [0], [0], [1], [0, 0, 1, 1], [], []>} : vector<8x128xf32>, vector<128x128xf32>, vector<8x128xf32> -> vector<8x128xf32>
      %235 = arith.addf %231, %234 : vector<8x128xf32>
      %236 = math.tanh %235 : vector<8x128xf32>
      %237 = vector.extract_strided_slice %210 {offsets = [0, 384], sizes = [8, 128], strides = [1, 1]} : vector<8x512xf32> to vector<8x128xf32>
      %c0_130 = arith.constant 0 : index
      %c0_131 = arith.constant 0 : index
      %c384_132 = arith.constant 384 : index
      %238 = vector.load %arg4[%c0_130, %c0_131, %c384_132] : memref<1x128x512xf32, #tpu.memory_space<vmem>>, vector<1x128x128xf32>
      %239 = vector.shape_cast %238 : vector<1x128x128xf32> to vector<128x128xf32>
      %cst_133 = arith.constant dense<0.000000e+00> : vector<8x128xf32>
      %240 = tpu.matmul %205, %239, %cst_133 {dimension_numbers = #tpu.dot_dimension_numbers<[1], [0], [0], [1], [0, 0, 1, 1], [], []>} : vector<8x128xf32>, vector<128x128xf32>, vector<8x128xf32> -> vector<8x128xf32>
      %241 = arith.addf %237, %240 : vector<8x128xf32>
      %242 = arith.negf %241 : vector<8x128xf32>
      %243 = math.exp %242 : vector<8x128xf32>
      %cst_134 = arith.constant 1.000000e+00 : f32
      %244 = vector.broadcast %cst_134 : f32 to vector<8x128xf32>
      %245 = arith.addf %244, %243 : vector<8x128xf32>
      %246 = arith.divf %244, %245 : vector<8x128xf32>
      %247 = arith.mulf %230, %203 : vector<8x128xf32>
      %248 = arith.mulf %220, %236 : vector<8x128xf32>
      %249 = arith.addf %247, %248 : vector<8x128xf32>
      %250 = math.tanh %249 : vector<8x128xf32>
      %251 = arith.mulf %246, %250 : vector<8x128xf32>
      %c3_135 = arith.constant 3 : index
      %c0_136 = arith.constant 0 : index
      %c0_137 = arith.constant 0 : index
      %252 = vector.load %arg8[%c3_135, %c0_136, %c0_137] : memref<8x8x128xf32, #tpu.memory_space<vmem>>, vector<1x8x128xf32>
      %253 = vector.shape_cast %252 : vector<1x8x128xf32> to vector<8x128xf32>
      %254 = vector.shape_cast %251 : vector<8x128xf32> to vector<1x8x128xf32>
      tpu.vector_store %arg8[%c3_135, %c0_136, %c0_137], %254 {strides = array<i32>} : memref<8x8x128xf32, #tpu.memory_space<vmem>>, vector<1x8x128xf32>,
      %c2 = arith.constant 2 : index
      %c0_138 = arith.constant 0 : index
      %c0_139 = arith.constant 0 : index
      %255 = vector.load %arg11[%c2, %c0_138, %c0_139] : memref<8x8x512xf32, #tpu.memory_space<vmem>>, vector<1x8x512xf32>
      %256 = vector.shape_cast %255 : vector<1x8x512xf32> to vector<8x512xf32>
      %257 = vector.extract_strided_slice %256 {offsets = [0, 0], sizes = [8, 128], strides = [1, 1]} : vector<8x512xf32> to vector<8x128xf32>
      %c0_140 = arith.constant 0 : index
      %c0_141 = arith.constant 0 : index
      %c0_142 = arith.constant 0 : index
      %258 = vector.load %arg4[%c0_140, %c0_141, %c0_142] : memref<1x128x512xf32, #tpu.memory_space<vmem>>, vector<1x128x128xf32>
      %259 = vector.shape_cast %258 : vector<1x128x128xf32> to vector<128x128xf32>
      %cst_143 = arith.constant dense<0.000000e+00> : vector<8x128xf32>
      %260 = tpu.matmul %251, %259, %cst_143 {dimension_numbers = #tpu.dot_dimension_numbers<[1], [0], [0], [1], [0, 0, 1, 1], [], []>} : vector<8x128xf32>, vector<128x128xf32>, vector<8x128xf32> -> vector<8x128xf32>
      %261 = arith.addf %257, %260 : vector<8x128xf32>
      %262 = arith.negf %261 : vector<8x128xf32>
      %263 = math.exp %262 : vector<8x128xf32>
      %cst_144 = arith.constant 1.000000e+00 : f32
      %264 = vector.broadcast %cst_144 : f32 to vector<8x128xf32>
      %265 = arith.addf %264, %263 : vector<8x128xf32>
      %266 = arith.divf %264, %265 : vector<8x128xf32>
      %267 = vector.extract_strided_slice %256 {offsets = [0, 128], sizes = [8, 128], strides = [1, 1]} : vector<8x512xf32> to vector<8x128xf32>
      %c0_145 = arith.constant 0 : index
      %c0_146 = arith.constant 0 : index
      %c128_147 = arith.constant 128 : index
      %268 = vector.load %arg4[%c0_145, %c0_146, %c128_147] : memref<1x128x512xf32, #tpu.memory_space<vmem>>, vector<1x128x128xf32>
      %269 = vector.shape_cast %268 : vector<1x128x128xf32> to vector<128x128xf32>
      %cst_148 = arith.constant dense<0.000000e+00> : vector<8x128xf32>
      %270 = tpu.matmul %251, %269, %cst_148 {dimension_numbers = #tpu.dot_dimension_numbers<[1], [0], [0], [1], [0, 0, 1, 1], [], []>} : vector<8x128xf32>, vector<128x128xf32>, vector<8x128xf32> -> vector<8x128xf32>
      %271 = arith.addf %267, %270 : vector<8x128xf32>
      %272 = arith.negf %271 : vector<8x128xf32>
      %273 = math.exp %272 : vector<8x128xf32>
      %cst_149 = arith.constant 1.000000e+00 : f32
      %274 = vector.broadcast %cst_149 : f32 to vector<8x128xf32>
      %275 = arith.addf %274, %273 : vector<8x128xf32>
      %276 = arith.divf %274, %275 : vector<8x128xf32>
      %277 = vector.extract_strided_slice %256 {offsets = [0, 256], sizes = [8, 128], strides = [1, 1]} : vector<8x512xf32> to vector<8x128xf32>
      %c0_150 = arith.constant 0 : index
      %c0_151 = arith.constant 0 : index
      %c256_152 = arith.constant 256 : index
      %278 = vector.load %arg4[%c0_150, %c0_151, %c256_152] : memref<1x128x512xf32, #tpu.memory_space<vmem>>, vector<1x128x128xf32>
      %279 = vector.shape_cast %278 : vector<1x128x128xf32> to vector<128x128xf32>
      %cst_153 = arith.constant dense<0.000000e+00> : vector<8x128xf32>
      %280 = tpu.matmul %251, %279, %cst_153 {dimension_numbers = #tpu.dot_dimension_numbers<[1], [0], [0], [1], [0, 0, 1, 1], [], []>} : vector<8x128xf32>, vector<128x128xf32>, vector<8x128xf32> -> vector<8x128xf32>
      %281 = arith.addf %277, %280 : vector<8x128xf32>
      %282 = math.tanh %281 : vector<8x128xf32>
      %283 = vector.extract_strided_slice %256 {offsets = [0, 384], sizes = [8, 128], strides = [1, 1]} : vector<8x512xf32> to vector<8x128xf32>
      %c0_154 = arith.constant 0 : index
      %c0_155 = arith.constant 0 : index
      %c384_156 = arith.constant 384 : index
      %284 = vector.load %arg4[%c0_154, %c0_155, %c384_156] : memref<1x128x512xf32, #tpu.memory_space<vmem>>, vector<1x128x128xf32>
      %285 = vector.shape_cast %284 : vector<1x128x128xf32> to vector<128x128xf32>
      %cst_157 = arith.constant dense<0.000000e+00> : vector<8x128xf32>
      %286 = tpu.matmul %251, %285, %cst_157 {dimension_numbers = #tpu.dot_dimension_numbers<[1], [0], [0], [1], [0, 0, 1, 1], [], []>} : vector<8x128xf32>, vector<128x128xf32>, vector<8x128xf32> -> vector<8x128xf32>
      %287 = arith.addf %283, %286 : vector<8x128xf32>
      %288 = arith.negf %287 : vector<8x128xf32>
      %289 = math.exp %288 : vector<8x128xf32>
      %cst_158 = arith.constant 1.000000e+00 : f32
      %290 = vector.broadcast %cst_158 : f32 to vector<8x128xf32>
      %291 = arith.addf %290, %289 : vector<8x128xf32>
      %292 = arith.divf %290, %291 : vector<8x128xf32>
      %293 = arith.mulf %276, %249 : vector<8x128xf32>
      %294 = arith.mulf %266, %282 : vector<8x128xf32>
      %295 = arith.addf %293, %294 : vector<8x128xf32>
      %296 = math.tanh %295 : vector<8x128xf32>
      %297 = arith.mulf %292, %296 : vector<8x128xf32>
      %c2_159 = arith.constant 2 : index
      %c0_160 = arith.constant 0 : index
      %c0_161 = arith.constant 0 : index
      %298 = vector.load %arg8[%c2_159, %c0_160, %c0_161] : memref<8x8x128xf32, #tpu.memory_space<vmem>>, vector<1x8x128xf32>
      %299 = vector.shape_cast %298 : vector<1x8x128xf32> to vector<8x128xf32>
      %300 = vector.shape_cast %297 : vector<8x128xf32> to vector<1x8x128xf32>
      tpu.vector_store %arg8[%c2_159, %c0_160, %c0_161], %300 {strides = array<i32>} : memref<8x8x128xf32, #tpu.memory_space<vmem>>, vector<1x8x128xf32>,
      %c1 = arith.constant 1 : index
      %c0_162 = arith.constant 0 : index
      %c0_163 = arith.constant 0 : index
      %301 = vector.load %arg11[%c1, %c0_162, %c0_163] : memref<8x8x512xf32, #tpu.memory_space<vmem>>, vector<1x8x512xf32>
      %302 = vector.shape_cast %301 : vector<1x8x512xf32> to vector<8x512xf32>
      %303 = vector.extract_strided_slice %302 {offsets = [0, 0], sizes = [8, 128], strides = [1, 1]} : vector<8x512xf32> to vector<8x128xf32>
      %c0_164 = arith.constant 0 : index
      %c0_165 = arith.constant 0 : index
      %c0_166 = arith.constant 0 : index
      %304 = vector.load %arg4[%c0_164, %c0_165, %c0_166] : memref<1x128x512xf32, #tpu.memory_space<vmem>>, vector<1x128x128xf32>
      %305 = vector.shape_cast %304 : vector<1x128x128xf32> to vector<128x128xf32>
      %cst_167 = arith.constant dense<0.000000e+00> : vector<8x128xf32>
      %306 = tpu.matmul %297, %305, %cst_167 {dimension_numbers = #tpu.dot_dimension_numbers<[1], [0], [0], [1], [0, 0, 1, 1], [], []>} : vector<8x128xf32>, vector<128x128xf32>, vector<8x128xf32> -> vector<8x128xf32>
      %307 = arith.addf %303, %306 : vector<8x128xf32>
      %308 = arith.negf %307 : vector<8x128xf32>
      %309 = math.exp %308 : vector<8x128xf32>
      %cst_168 = arith.constant 1.000000e+00 : f32
      %310 = vector.broadcast %cst_168 : f32 to vector<8x128xf32>
      %311 = arith.addf %310, %309 : vector<8x128xf32>
      %312 = arith.divf %310, %311 : vector<8x128xf32>
      %313 = vector.extract_strided_slice %302 {offsets = [0, 128], sizes = [8, 128], strides = [1, 1]} : vector<8x512xf32> to vector<8x128xf32>
      %c0_169 = arith.constant 0 : index
      %c0_170 = arith.constant 0 : index
      %c128_171 = arith.constant 128 : index
      %314 = vector.load %arg4[%c0_169, %c0_170, %c128_171] : memref<1x128x512xf32, #tpu.memory_space<vmem>>, vector<1x128x128xf32>
      %315 = vector.shape_cast %314 : vector<1x128x128xf32> to vector<128x128xf32>
      %cst_172 = arith.constant dense<0.000000e+00> : vector<8x128xf32>
      %316 = tpu.matmul %297, %315, %cst_172 {dimension_numbers = #tpu.dot_dimension_numbers<[1], [0], [0], [1], [0, 0, 1, 1], [], []>} : vector<8x128xf32>, vector<128x128xf32>, vector<8x128xf32> -> vector<8x128xf32>
      %317 = arith.addf %313, %316 : vector<8x128xf32>
      %318 = arith.negf %317 : vector<8x128xf32>
      %319 = math.exp %318 : vector<8x128xf32>
      %cst_173 = arith.constant 1.000000e+00 : f32
      %320 = vector.broadcast %cst_173 : f32 to vector<8x128xf32>
      %321 = arith.addf %320, %319 : vector<8x128xf32>
      %322 = arith.divf %320, %321 : vector<8x128xf32>
      %323 = vector.extract_strided_slice %302 {offsets = [0, 256], sizes = [8, 128], strides = [1, 1]} : vector<8x512xf32> to vector<8x128xf32>
      %c0_174 = arith.constant 0 : index
      %c0_175 = arith.constant 0 : index
      %c256_176 = arith.constant 256 : index
      %324 = vector.load %arg4[%c0_174, %c0_175, %c256_176] : memref<1x128x512xf32, #tpu.memory_space<vmem>>, vector<1x128x128xf32>
      %325 = vector.shape_cast %324 : vector<1x128x128xf32> to vector<128x128xf32>
      %cst_177 = arith.constant dense<0.000000e+00> : vector<8x128xf32>
      %326 = tpu.matmul %297, %325, %cst_177 {dimension_numbers = #tpu.dot_dimension_numbers<[1], [0], [0], [1], [0, 0, 1, 1], [], []>} : vector<8x128xf32>, vector<128x128xf32>, vector<8x128xf32> -> vector<8x128xf32>
      %327 = arith.addf %323, %326 : vector<8x128xf32>
      %328 = math.tanh %327 : vector<8x128xf32>
      %329 = vector.extract_strided_slice %302 {offsets = [0, 384], sizes = [8, 128], strides = [1, 1]} : vector<8x512xf32> to vector<8x128xf32>
      %c0_178 = arith.constant 0 : index
      %c0_179 = arith.constant 0 : index
      %c384_180 = arith.constant 384 : index
      %330 = vector.load %arg4[%c0_178, %c0_179, %c384_180] : memref<1x128x512xf32, #tpu.memory_space<vmem>>, vector<1x128x128xf32>
      %331 = vector.shape_cast %330 : vector<1x128x128xf32> to vector<128x128xf32>
      %cst_181 = arith.constant dense<0.000000e+00> : vector<8x128xf32>
      %332 = tpu.matmul %297, %331, %cst_181 {dimension_numbers = #tpu.dot_dimension_numbers<[1], [0], [0], [1], [0, 0, 1, 1], [], []>} : vector<8x128xf32>, vector<128x128xf32>, vector<8x128xf32> -> vector<8x128xf32>
      %333 = arith.addf %329, %332 : vector<8x128xf32>
      %334 = arith.negf %333 : vector<8x128xf32>
      %335 = math.exp %334 : vector<8x128xf32>
      %cst_182 = arith.constant 1.000000e+00 : f32
      %336 = vector.broadcast %cst_182 : f32 to vector<8x128xf32>
      %337 = arith.addf %336, %335 : vector<8x128xf32>
      %338 = arith.divf %336, %337 : vector<8x128xf32>
      %339 = arith.mulf %322, %295 : vector<8x128xf32>
      %340 = arith.mulf %312, %328 : vector<8x128xf32>
      %341 = arith.addf %339, %340 : vector<8x128xf32>
      %342 = math.tanh %341 : vector<8x128xf32>
      %343 = arith.mulf %338, %342 : vector<8x128xf32>
      %c1_183 = arith.constant 1 : index
      %c0_184 = arith.constant 0 : index
      %c0_185 = arith.constant 0 : index
      %344 = vector.load %arg8[%c1_183, %c0_184, %c0_185] : memref<8x8x128xf32, #tpu.memory_space<vmem>>, vector<1x8x128xf32>
      %345 = vector.shape_cast %344 : vector<1x8x128xf32> to vector<8x128xf32>
      %346 = vector.shape_cast %343 : vector<8x128xf32> to vector<1x8x128xf32>
      tpu.vector_store %arg8[%c1_183, %c0_184, %c0_185], %346 {strides = array<i32>} : memref<8x8x128xf32, #tpu.memory_space<vmem>>, vector<1x8x128xf32>,
      %c0_186 = arith.constant 0 : index
      %c0_187 = arith.constant 0 : index
      %c0_188 = arith.constant 0 : index
      %347 = vector.load %arg11[%c0_186, %c0_187, %c0_188] : memref<8x8x512xf32, #tpu.memory_space<vmem>>, vector<1x8x512xf32>
      %348 = vector.shape_cast %347 : vector<1x8x512xf32> to vector<8x512xf32>
      %349 = vector.extract_strided_slice %348 {offsets = [0, 0], sizes = [8, 128], strides = [1, 1]} : vector<8x512xf32> to vector<8x128xf32>
      %c0_189 = arith.constant 0 : index
      %c0_190 = arith.constant 0 : index
      %c0_191 = arith.constant 0 : index
      %350 = vector.load %arg4[%c0_189, %c0_190, %c0_191] : memref<1x128x512xf32, #tpu.memory_space<vmem>>, vector<1x128x128xf32>
      %351 = vector.shape_cast %350 : vector<1x128x128xf32> to vector<128x128xf32>
      %cst_192 = arith.constant dense<0.000000e+00> : vector<8x128xf32>
      %352 = tpu.matmul %343, %351, %cst_192 {dimension_numbers = #tpu.dot_dimension_numbers<[1], [0], [0], [1], [0, 0, 1, 1], [], []>} : vector<8x128xf32>, vector<128x128xf32>, vector<8x128xf32> -> vector<8x128xf32>
      %353 = arith.addf %349, %352 : vector<8x128xf32>
      %354 = arith.negf %353 : vector<8x128xf32>
      %355 = math.exp %354 : vector<8x128xf32>
      %cst_193 = arith.constant 1.000000e+00 : f32
      %356 = vector.broadcast %cst_193 : f32 to vector<8x128xf32>
      %357 = arith.addf %356, %355 : vector<8x128xf32>
      %358 = arith.divf %356, %357 : vector<8x128xf32>
      %359 = vector.extract_strided_slice %348 {offsets = [0, 128], sizes = [8, 128], strides = [1, 1]} : vector<8x512xf32> to vector<8x128xf32>
      %c0_194 = arith.constant 0 : index
      %c0_195 = arith.constant 0 : index
      %c128_196 = arith.constant 128 : index
      %360 = vector.load %arg4[%c0_194, %c0_195, %c128_196] : memref<1x128x512xf32, #tpu.memory_space<vmem>>, vector<1x128x128xf32>
      %361 = vector.shape_cast %360 : vector<1x128x128xf32> to vector<128x128xf32>
      %cst_197 = arith.constant dense<0.000000e+00> : vector<8x128xf32>
      %362 = tpu.matmul %343, %361, %cst_197 {dimension_numbers = #tpu.dot_dimension_numbers<[1], [0], [0], [1], [0, 0, 1, 1], [], []>} : vector<8x128xf32>, vector<128x128xf32>, vector<8x128xf32> -> vector<8x128xf32>
      %363 = arith.addf %359, %362 : vector<8x128xf32>
      %364 = arith.negf %363 : vector<8x128xf32>
      %365 = math.exp %364 : vector<8x128xf32>
      %cst_198 = arith.constant 1.000000e+00 : f32
      %366 = vector.broadcast %cst_198 : f32 to vector<8x128xf32>
      %367 = arith.addf %366, %365 : vector<8x128xf32>
      %368 = arith.divf %366, %367 : vector<8x128xf32>
      %369 = vector.extract_strided_slice %348 {offsets = [0, 256], sizes = [8, 128], strides = [1, 1]} : vector<8x512xf32> to vector<8x128xf32>
      %c0_199 = arith.constant 0 : index
      %c0_200 = arith.constant 0 : index
      %c256_201 = arith.constant 256 : index
      %370 = vector.load %arg4[%c0_199, %c0_200, %c256_201] : memref<1x128x512xf32, #tpu.memory_space<vmem>>, vector<1x128x128xf32>
      %371 = vector.shape_cast %370 : vector<1x128x128xf32> to vector<128x128xf32>
      %cst_202 = arith.constant dense<0.000000e+00> : vector<8x128xf32>
      %372 = tpu.matmul %343, %371, %cst_202 {dimension_numbers = #tpu.dot_dimension_numbers<[1], [0], [0], [1], [0, 0, 1, 1], [], []>} : vector<8x128xf32>, vector<128x128xf32>, vector<8x128xf32> -> vector<8x128xf32>
      %373 = arith.addf %369, %372 : vector<8x128xf32>
      %374 = math.tanh %373 : vector<8x128xf32>
      %375 = vector.extract_strided_slice %348 {offsets = [0, 384], sizes = [8, 128], strides = [1, 1]} : vector<8x512xf32> to vector<8x128xf32>
      %c0_203 = arith.constant 0 : index
      %c0_204 = arith.constant 0 : index
      %c384_205 = arith.constant 384 : index
      %376 = vector.load %arg4[%c0_203, %c0_204, %c384_205] : memref<1x128x512xf32, #tpu.memory_space<vmem>>, vector<1x128x128xf32>
      %377 = vector.shape_cast %376 : vector<1x128x128xf32> to vector<128x128xf32>
      %cst_206 = arith.constant dense<0.000000e+00> : vector<8x128xf32>
      %378 = tpu.matmul %343, %377, %cst_206 {dimension_numbers = #tpu.dot_dimension_numbers<[1], [0], [0], [1], [0, 0, 1, 1], [], []>} : vector<8x128xf32>, vector<128x128xf32>, vector<8x128xf32> -> vector<8x128xf32>
      %379 = arith.addf %375, %378 : vector<8x128xf32>
      %380 = arith.negf %379 : vector<8x128xf32>
      %381 = math.exp %380 : vector<8x128xf32>
      %cst_207 = arith.constant 1.000000e+00 : f32
      %382 = vector.broadcast %cst_207 : f32 to vector<8x128xf32>
      %383 = arith.addf %382, %381 : vector<8x128xf32>
      %384 = arith.divf %382, %383 : vector<8x128xf32>
      %385 = arith.mulf %368, %341 : vector<8x128xf32>
      %386 = arith.mulf %358, %374 : vector<8x128xf32>
      %387 = arith.addf %385, %386 : vector<8x128xf32>
      %388 = math.tanh %387 : vector<8x128xf32>
      %389 = arith.mulf %384, %388 : vector<8x128xf32>
      %c0_208 = arith.constant 0 : index
      %c0_209 = arith.constant 0 : index
      %c0_210 = arith.constant 0 : index
      %390 = vector.load %arg8[%c0_208, %c0_209, %c0_210] : memref<8x8x128xf32, #tpu.memory_space<vmem>>, vector<1x8x128xf32>
      %391 = vector.shape_cast %390 : vector<1x8x128xf32> to vector<8x128xf32>
      %392 = vector.shape_cast %389 : vector<8x128xf32> to vector<1x8x128xf32>
      tpu.vector_store %arg8[%c0_208, %c0_209, %c0_210], %392 {strides = array<i32>} : memref<8x8x128xf32, #tpu.memory_space<vmem>>, vector<1x8x128xf32>,
      %c0_211 = arith.constant 0 : index
      %c0_212 = arith.constant 0 : index
      %393 = vector.load %arg12[%c0_211, %c0_212] : memref<8x128xf32, #tpu.memory_space<vmem>>, vector<8x128xf32>
      tpu.vector_store %arg12[%c0_211, %c0_212], %389 {strides = array<i32>} : memref<8x128xf32, #tpu.memory_space<vmem>>, vector<8x128xf32>,
      %c0_213 = arith.constant 0 : index
      %c0_214 = arith.constant 0 : index
      %394 = vector.load %arg13[%c0_213, %c0_214] : memref<8x128xf32, #tpu.memory_space<vmem>>, vector<8x128xf32>
      tpu.vector_store %arg13[%c0_213, %c0_214], %387 {strides = array<i32>} : memref<8x128xf32, #tpu.memory_space<vmem>>, vector<8x128xf32>,
    } else {
    }
    %c1_i32_15 = arith.constant 1 : i32
    %20 = arith.cmpi eq, %arg1, %c1_i32_15 : i32
    %21 = arith.extui %20 : i1 to i32
    %c0_i32_16 = arith.constant 0 : i32
    %22 = arith.cmpi ne, %21, %c0_i32_16 : i32
    scf.if %22 {
      %c0_17 = arith.constant 0 : index
      %c0_18 = arith.constant 0 : index
      %23 = vector.load %arg12[%c0_17, %c0_18] : memref<8x128xf32, #tpu.memory_space<vmem>>, vector<8x128xf32>
      %c0_19 = arith.constant 0 : index
      %c0_20 = arith.constant 0 : index
      %c0_21 = arith.constant 0 : index
      %24 = vector.load %arg9[%c0_19, %c0_20, %c0_21] : memref<1x8x128xf32, #tpu.memory_space<vmem>>, vector<1x8x128xf32>
      %25 = vector.shape_cast %24 : vector<1x8x128xf32> to vector<8x128xf32>
      %26 = vector.shape_cast %23 : vector<8x128xf32> to vector<1x8x128xf32>
      tpu.vector_store %arg9[%c0_19, %c0_20, %c0_21], %26 {strides = array<i32>} : memref<1x8x128xf32, #tpu.memory_space<vmem>>, vector<1x8x128xf32>,
      %c0_22 = arith.constant 0 : index
      %c0_23 = arith.constant 0 : index
      %27 = vector.load %arg13[%c0_22, %c0_23] : memref<8x128xf32, #tpu.memory_space<vmem>>, vector<8x128xf32>
      %c0_24 = arith.constant 0 : index
      %c0_25 = arith.constant 0 : index
      %c0_26 = arith.constant 0 : index
      %28 = vector.load %arg10[%c0_24, %c0_25, %c0_26] : memref<1x8x128xf32, #tpu.memory_space<vmem>>, vector<1x8x128xf32>
      %29 = vector.shape_cast %28 : vector<1x8x128xf32> to vector<8x128xf32>
      %30 = vector.shape_cast %27 : vector<8x128xf32> to vector<1x8x128xf32>
      tpu.vector_store %arg10[%c0_24, %c0_25, %c0_26], %30 {strides = array<i32>} : memref<1x8x128xf32, #tpu.memory_space<vmem>>, vector<1x8x128xf32>,
    } else {
    }
    return
  }
  func.func @transform_0(%arg0: i32, %arg1: i32) -> (i32, i32, i32) {
    %c1_i32 = arith.constant 1 : i32
    %0 = arith.subi %c1_i32, %arg0 : i32
    %1 = arith.muli %0, %arg1 : i32
    %c1_i32_0 = arith.constant 1 : i32
    %2 = arith.subi %c1_i32_0, %arg1 : i32
    %3 = arith.muli %arg0, %2 : i32
    %4 = arith.addi %1, %3 : i32
    %c0_i32 = arith.constant 0 : i32
    %c0_i32_1 = arith.constant 0 : i32
    %c0_i32_2 = arith.constant 0 : i32
    return %4, %c0_i32, %c0_i32_1 : i32, i32, i32
  }
  func.func @transform_1(%arg0: i32, %arg1: i32) -> (i32, i32, i32) {
    %c0_i32 = arith.constant 0 : i32
    %c0_i32_0 = arith.constant 0 : i32
    %c0_i32_1 = arith.constant 0 : i32
    return %arg0, %c0_i32, %c0_i32_0 : i32, i32, i32
  }
  func.func @transform_2(%arg0: i32, %arg1: i32) -> (i32, i32, i32) {
    %c0_i32 = arith.constant 0 : i32
    %c0_i32_0 = arith.constant 0 : i32
    %c0_i32_1 = arith.constant 0 : i32
    return %arg0, %c0_i32, %c0_i32_0 : i32, i32, i32
  }
  func.func @transform_3(%arg0: i32, %arg1: i32) -> (i32, i32, i32) {
    %c0_i32 = arith.constant 0 : i32
    %c0_i32_0 = arith.constant 0 : i32
    %c0_i32_1 = arith.constant 0 : i32
    return %arg0, %c0_i32, %c0_i32_0 : i32, i32, i32
  }
  func.func @transform_4(%arg0: i32, %arg1: i32) -> (i32, i32, i32) {
    %c0_i32 = arith.constant 0 : i32
    %c0_i32_0 = arith.constant 0 : i32
    %c0_i32_1 = arith.constant 0 : i32
    return %arg0, %c0_i32, %c0_i32_0 : i32, i32, i32
  }
  func.func @transform_5(%arg0: i32, %arg1: i32) -> (i32, i32, i32) {
    %c0_i32 = arith.constant 0 : i32
    %c0_i32_0 = arith.constant 0 : i32
    %c0_i32_1 = arith.constant 0 : i32
    return %arg0, %c0_i32, %c0_i32_0 : i32, i32, i32
  }
  func.func @transform_6(%arg0: i32, %arg1: i32) -> (i32, i32, i32) {
    %c1_i32 = arith.constant 1 : i32
    %0 = arith.subi %c1_i32, %arg0 : i32
    %1 = arith.muli %0, %arg1 : i32
    %c1_i32_0 = arith.constant 1 : i32
    %2 = arith.subi %c1_i32_0, %arg1 : i32
    %3 = arith.muli %arg0, %2 : i32
    %4 = arith.addi %1, %3 : i32
    %c0_i32 = arith.constant 0 : i32
    %c0_i32_1 = arith.constant 0 : i32
    return %4, %c0_i32, %arg0 : i32, i32, i32
  }
  func.func @transform_7(%arg0: i32, %arg1: i32) -> (i32, i32, i32) {
    %c0_i32 = arith.constant 0 : i32
    %c0_i32_0 = arith.constant 0 : i32
    %c0_i32_1 = arith.constant 0 : i32
    return %arg0, %c0_i32, %c0_i32_0 : i32, i32, i32
  }
  func.func @transform_8(%arg0: i32, %arg1: i32) -> (i32, i32, i32) {
    %c0_i32 = arith.constant 0 : i32
    %c0_i32_0 = arith.constant 0 : i32
    %c0_i32_1 = arith.constant 0 : i32
    return %arg0, %c0_i32, %c0_i32_0 : i32, i32, i32
  }
}

</mosaic_0001>

<bundles_post_ra>
// kernel: bidirectional_dplstm_layer.1
= control target key start
LH: loop header
LB: loop body
LE: loop exit
PB: predicated region body
PF: predicated region fallthrough
CT: control target
= control target key end

     0   :  { %s14888_s0 = inlined_call_operand.vmem [shape: f32[16,8,32], index: 0, kind: input, shape index: {}]   ;;  %s14889_s1 = inlined_call_operand.vmem [shape: f32[2,32,512], index: 1, kind: input, shape index: {}]   ;;  %s14890_s2 = inlined_call_operand.vmem [shape: f32[2,128,512], index: 2, kind: input, shape index: {}]   ;;  %s14891_s3 = inlined_call_operand.vmem [shape: f32[2,1,512], index: 3, kind: input, shape index: {}]   ;;  %s14892_s4 = inlined_call_operand.vmem [shape: f32[2,8,128], index: 4, kind: input, shape index: {}]   ;;  %s14893_s5 = inlined_call_operand.vmem [shape: f32[2,8,128], index: 5, kind: input, shape index: {}]   ;;  %s14894_s6 = inlined_call_operand.vmem [shape: f32[16,8,256], index: 6, kind: output, shape index: {0}]   ;;  %s14895_s7 = inlined_call_operand.vmem [shape: f32[2,8,128], index: 7, kind: output, shape index: {1}]   ;;  %s14896_s8 = inlined_call_operand.vmem [shape: f32[2,8,128], index: 8, kind: output, shape index: {2}]  }
   0x1   :  { %14902 = sst [smem:[#allocation12_spill]] %s14888_s0 }
   0x2   :  { %14903 = sst [smem:[#allocation13_spill]] %s14889_s1 }
   0x3   :  { %14904 = sst [smem:[#allocation14_spill]] %s14894_s6 }
   0x4   :  { %s12594_s27 = smov 0   ;;  %s12596_s28 = smov 0  }
   0x5   :  { %s12598_s29 = smov 0   ;;  %s12600_s30 = smov 0  }
   0x6   :  { %s12602_s9 = smov 0   ;;  %s12604_s10 = smov 0  }
   0x7   :  { %s12606_s11 = smov 0  }
   0x8 LB: > { %14905 = sst [smem:[#allocation6_spill]] %s12520_s28  ;;  %s28_s12 = sadd.s32 1, %s12532_s9  ;;  %s12540_s11 = sphi %s12606_s11, %s19_s11   ;;  %s12536_s10 = sphi %s12604_s10, %s14920_s10   ;;  %s12532_s9 = sphi %s12602_s9, %s14919_s9   ;;  %s12528_s30 = sphi %s12600_s30, %s14918_s30   ;;  %s12524_s29 = sphi %s12598_s29, %s14917_s29   ;;  %s12520_s28 = sphi %s12596_s28, %s14916_s28   ;;  %s12516_s27 = sphi %s12594_s27, %s14915_s27  }
   0x9   : > { %14906 = sst [smem:[#allocation7_spill]] %s12532_s9  ;;  %p29_p0 = scmp.ge.s32.totalorder %s28_s12, 2 }
   0xa   : > { %14907 = sst [smem:[#allocation8_spill]] %s12536_s10  ;;  %s31_s13 = sadd.s32 1, %s12536_s10 }
   0xb   : > { %s201_s14 = ssub.s32 1, %s12536_s10  ;;  %s203_s15 = ssub.s32 1, %s12532_s9 }
   0xc   : > { %s14922_s12 = smov (%p29_p0, %s28_s12), 0  ;;  %s14924_s13 = smov (!%p29_p0, %s31_s13), %s12536_s10 }
   0xd   : > { %14908 = sst [smem:[#allocation9_spill]] %s14922_s12  ;;  %s7179_s16 = sadd.s32 4294967295, %s12540_s11  }
   0xe   : > { %s202_s17 = smul.u32 %s12532_s9, %s201_s14  ;;  %p33_p1 = scmp.ge.s32.totalorder %s14924_s13, 2 }
   0xf   : > { %s204_s18 = smul.u32 %s12536_s10, %s203_s15  ;;  %s208_s19 = ssub.s32 1, %s14922_s12 }
  0x10   : > { %p226_p2 = scmp.ne.s32.totalorder %s12520_s28, %s12516_s27  ;;  %s14926_s13 = smov (%p33_p1, %s14924_s13), 0 }
  0x11   : > { %14909 = sst [smem:[#allocation10_spill]] %s14926_s13  ;;  %s205_s20 = sadd.s32 %s204_s18, %s202_s17 }
  0x12   : > { %p227_p3 = scmp.eq.s32.totalorder %s7179_s16, 3  ;;  %s206_s21 = ssub.s32 1, %s14926_s13 }
  0x13   : > { %s209_s22 = smul.u32 %s208_s19, %s14926_s13  ;;  %s212_s24 = ssub.s32 %s12536_s10, %s14926_s13 }
  0x14   : > { %s207_s23 = smul.u32 %s206_s21, %s14922_s12  ;;  %p12649_p4 = por %p227_p3, %p226_p2 }
  0x15   : > { %p7183_p5 = scmp.ge.s32.totalorder %s12540_s11, 1  ;;  %p359_p6 = scmp.lt.s32.totalorder %s12540_s11, 5 }
  0x16   : > { %s210_s26 = sadd.s32 %s209_s22, %s207_s23  ;;  %s216_s15 = sadd.s32 1, %s12520_s28 }
  0x17   : > { %s211_s14 = ssub.s32 %s205_s20, %s210_s26  ;;  %p360_p7 = pnand %p7183_p5, %p359_p6 }
  0x18   : > { %s213_s9 = sor.u32 %s212_s24, %s211_s14  ;;  %s412_s16 = sand.u32 (!%p360_p7), 1, %s12516_s27  }
  0x19   : > { %p214_p8 = scmp.eq.s32.totalorder %s213_s9, 0  ;;  %363 = sbr.rel (%p360_p7) target bundleno = 4796 (0x12bc), region = 44 }
  0x1a   : > { %s427_s17 = ssub.s32 (!%p360_p7), 1, %s12528_s30  ;;  %s7184_s18 = sshll.u32 (!%p360_p7), %s412_s16, 6 }
  0x1b   : > { %s12657_s6 = scalar_select %p214_p8, %s12520_s28, %s216_s15  }
  0x1c   : > { %s428_s19 = smul.u32 (!%p360_p7), %s12524_s29, %s427_s17  ;;  %s429_s21 = ssub.s32 (!%p360_p7), 1, %s12524_s29 }
  0x1d   : > { %14911 = sst [smem:[#allocation11_spill]] %s12657_s6  ;;  %s430_s20 = smul.u32 (!%p360_p7), %s12528_s30, %s429_s21 }
  0x1e   : > { %p443_p9 = scmp.lt.s32.totalorder (!%p360_p7), %s12528_s30, 1  ;;  %s14912_s1 = sld [smem:[#allocation13_spill]] (!%p360_p7) }
  0x1f   : > { %s12665_s22 = sadd.s32 (!%p360_p7), %s430_s20, %s428_s19  ;;  %s14913_s0 = sld [smem:[#allocation12_spill]] (!%p360_p7) }
  0x20   : > { %s7185_s9 = sshll.u32 %s12665_s22, 3  ;;  %p7196_p11 = scmp.ne.s32.totalorder %s12524_s29, 0 }
  0x21   : > { %p433_p10 = scmp.lt.s32.totalorder %s7185_s9, 15 }
  0x22   : > { %s444_s23 = scalar_select %p443_p9, %s12528_s30, 1 }
  0x23   : > { %s14928_s9 = smov (!%p433_p10, %s7185_s9), 15 }
  0x24   : > { %s7284_s24 = sshll.u32 %s444_s23, 7  ;;  %s7285_s26 = sshll.u32 %s444_s23, 9 }
  0x25   : > { %s7186_s14 = sshll.u32 %s14928_s9, 3  ;;  %s12672_s27 = scalar_lea.vmem %s14912_s1, %s7284_s24 }
  0x26   : > { %s12677_s21 = scalar_lea.vmem %s14913_s0, %s7186_s14  ;;  %s12682_s12 = scalar_lea.vmem %s14890_s2, %s7285_s26 }
  0x27   : > { %s7191_s10 = sshll.u32 %s444_s23, 2  ;;  %s12684_s6 = sshll.u32 %s444_s23, 3 }
  0x28   : > { %s12689_s13 = scalar_lea.vmem %s14891_s3, %s7191_s10  ;;  %s460_s15 = scalar_lea.vmem %s14892_s4, %s12684_s6 }
  0x29   : > { %s464_s26 = scalar_lea.vmem %s14893_s5, %s12684_s6  ;;  %s474_s20 = scalar_lea.vmem %s14895_s7, %s12684_s6  ;;  %v483_v0 = vld [vmem:[%s460_s15] sm:$0xff] (!%p7196_p11) }
  0x2a   : > { %s478_s9 = scalar_lea.vmem %s14896_s8, %s12684_s6  ;;  %s12707_s1 = scalar_lea.vmem [#allocation5], %s7184_s18  ;;  %v485_v1 = vld [vmem:[%s464_s26] sm:$0xff] (!%p7196_p11)  ;;  %484 = vst [vmem:[#allocation3] sm:$0xff] (!%p7196_p11), %v483_v0 }
  0x2b   : > { %482 = sbr.rel (%p7196_p11) target bundleno = 50 (0x32), region = 48  ;;  %486 = vst [vmem:[#allocation4] sm:$0xff] (!%p7196_p11), %v485_v1 }
  0x32 PF: > { %v496_v2 = vld [vmem:[%s12672_s27 + $0x8] sm:$0xff]  ;;  %v498_v4 = vld [vmem:[%s12672_s27 + $0x18] sm:$0xff]  ;;  %v495_v7 = vld [vmem:[%s12672_s27] sm:$0xff]  ;;  %v12542_v9 = vmov 0.0   ;;  %vm533_vm0 = vcmask 261120   ;;  %v513_v35 = vlaneseq  ;;  %p7213_p12 = scmp.ne.s32.totalorder %s12528_s30, 0 }
  0x33   : > { %v500_v3 = vld [vmem:[%s12672_s27 + $0x28] sm:$0xff]  ;;  %v502_v6 = vld [vmem:[%s12672_s27 + $0x38] sm:$0xff]  ;;  %v499_v8 = vld [vmem:[%s12672_s27 + $0x20] sm:$0xff]  ;;  %622 = vmatprep.mubr.f32.mxu0 %v12542_v9  ;;  %735 = vmatprep.mubr.f32.mxu1 %v12542_v9  ;;  %vm12544_vm1 = vmmov (!%p7213_p12), 0  }
  0x34   : > { %v10615_v5 = vpack.c.bf16 %v500_v3, %v496_v2  ;;  %v10623_v10 = vpack.c.bf16 %v502_v6, %v498_v4  ;;  %v10617_v11 = vpack.c.bf16 %v499_v8, %v495_v7  ;;  %v497_v12 = vld [vmem:[%s12672_s27 + $0x10] sm:$0xff]  ;;  %v504_v14 = vld [vmem:[%s12672_s27 + $0x48] sm:$0xff]  ;;  %v506_v17 = vld [vmem:[%s12672_s27 + $0x58] sm:$0xff]  ;;  %v514_v36 = vshrl.u32 %v513_v35, 7 }
  0x35   : > { %v501_v13 = vld [vmem:[%s12672_s27 + $0x30] sm:$0xff]  ;;  %v508_v16 = vld [vmem:[%s12672_s27 + $0x68] sm:$0xff]  ;;  %v510_v18 = vld [vmem:[%s12672_s27 + $0x78] sm:$0xff] }
  0x36   : > { %10616 = vmatprep.subr.bf16.mxu0 %v10615_v5  ;;  %v10625_v15 = vpack.c.bf16 %v501_v13, %v497_v12  ;;  %10624 = vmatprep.subr.bf16.mxu1 %v10623_v10  ;;  %v10619_v19 = vpack.c.bf16 %v508_v16, %v504_v14  ;;  %v10627_v20 = vpack.c.bf16 %v510_v18, %v506_v17  ;;  %v503_v21 = vld [vmem:[%s12672_s27 + $0x40] sm:$0xff]  ;;  %v505_v23 = vld [vmem:[%s12672_s27 + $0x50] sm:$0xff]  ;;  %v488_v28 = vld [vmem:[%s12677_s21 + $0x8] sm:$0xff]  ;;  %v515_v37 = vsub.s32 0, %v514_v36 }
  0x37   : > { %10618 = vmatpush1.bf16.msra.mxu0 %v10617_v11  ;;  %v507_v22 = vld [vmem:[%s12672_s27 + $0x60] sm:$0xff]  ;;  %v509_v25 = vld [vmem:[%s12672_s27 + $0x70] sm:$0xff]  ;;  %v490_v30 = vld [vmem:[%s12677_s21 + $0x18] sm:$0xff]  ;;  %v523_v39 = vsub.s32 2, %v514_v36  ;;  %v519_v40 = vsub.s32 1, %v514_v36  ;;  %v527_v41 = vsub.s32 3, %v514_v36 }
  0x38   : > { %10626 = vmatpush1.bf16.msra.mxu1 %v10625_v15  ;;  %v10621_v24 = vpack.c.bf16 %v507_v22, %v503_v21  ;;  %10620 = vmatprep.subr.bf16.mxu0 %v10619_v19  ;;  %v10629_v26 = vpack.c.bf16 %v509_v25, %v505_v23  ;;  %v487_v27 = vld [vmem:[%s12677_s21] sm:$0xff]  ;;  %v489_v29 = vld [vmem:[%s12677_s21 + $0x10] sm:$0xff]  ;;  %v492_v32 = vld [vmem:[%s12677_s21 + $0x28] sm:$0xff] }
  0x39   : > { %10628 = vmatprep.subr.bf16.mxu1 %v10627_v20  ;;  %v491_v31 = vld [vmem:[%s12677_s21 + $0x20] sm:$0xff]  ;;  %v493_v33 = vld [vmem:[%s12677_s21 + $0x30] sm:$0xff]  ;;  %v494_v34 = vld [vmem:[%s12677_s21 + $0x38] sm:$0xff] }
  0x3a   : > { %v511_v38 = vld [vmem:[%s12689_s13] sm:$0xf] }
  0x3b   : > { %10622 = vmatpush1.bf16.msra.mxu0 %v10621_v24  ;;  %v12767_v42 = vrot.slane %v511_v38, %v515_v37  ;;  %v12769_v43 = vrot.slane %v511_v38, %v523_v39  ;;  %v12771_v44 = vrot.slane %v511_v38, %v519_v40  ;;  %v12773_v45 = vrot.slane %v511_v38, %v527_v41 }
  0x3c   : > { %10630 = vmatpush1.bf16.msra.mxu1 %v10629_v26 }
  0x3e   : > { %7197 = vmatmul.mubr.msk.f32.vlgmr.msra.gmra.mrb[0].mxu0 %vm533_vm0, %v487_v27 }
  0x3f   : > { %7205 = vmatmul.mubr.msk.f32.vlgmr.msra.gmra.mrb[0].mxu1 %vm533_vm0, %v487_v27  ;;  %628 = vmatprep.mubr.f32.mxu0 %v12542_v9 }
  0x40   : > { %741 = vmatprep.mubr.f32.mxu1 %v12542_v9 }
  0x42   : > { %7198 = vmatmul.mubr.msk.f32.gmra.mrb[2].mxu0 %vm533_vm0, %v488_v28 }
  0x43   : > { %7206 = vmatmul.mubr.msk.f32.gmra.mrb[2].mxu1 %vm533_vm0, %v488_v28  ;;  %634 = vmatprep.mubr.f32.mxu0 %v12542_v9 }
  0x44   : > { %747 = vmatprep.mubr.f32.mxu1 %v12542_v9 }
  0x46   : > { %7199 = vmatmul.mubr.msk.f32.gmra.mrb[4].mxu0 %vm533_vm0, %v489_v29 }
  0x47   : > { %7207 = vmatmul.mubr.msk.f32.gmra.mrb[4].mxu1 %vm533_vm0, %v489_v29  ;;  %640 = vmatprep.mubr.f32.mxu0 %v12542_v9 }
  0x48   : > { %753 = vmatprep.mubr.f32.mxu1 %v12542_v9 }
  0x4a   : > { %7200 = vmatmul.mubr.msk.f32.gmra.mrb[6].mxu0 %vm533_vm0, %v490_v30 }
  0x4b   : > { %7208 = vmatmul.mubr.msk.f32.gmra.mrb[6].mxu1 %vm533_vm0, %v490_v30  ;;  %646 = vmatprep.mubr.f32.mxu0 %v12542_v9 }
  0x4c   : > { %759 = vmatprep.mubr.f32.mxu1 %v12542_v9 }
  0x4e   : > { %7201 = vmatmul.mubr.msk.f32.gmra.mrb[8].mxu0 %vm533_vm0, %v491_v31 }
  0x4f   : > { %7209 = vmatmul.mubr.msk.f32.gmra.mrb[8].mxu1 %vm533_vm0, %v491_v31  ;;  %652 = vmatprep.mubr.f32.mxu0 %v12542_v9 }
  0x50   : > { %765 = vmatprep.mubr.f32.mxu1 %v12542_v9 }
  0x52   : > { %7202 = vmatmul.mubr.msk.f32.gmra.mrb[10].mxu0 %vm533_vm0, %v492_v32 }
  0x53   : > { %7210 = vmatmul.mubr.msk.f32.gmra.mrb[10].mxu1 %vm533_vm0, %v492_v32  ;;  %658 = vmatprep.mubr.f32.mxu0 %v12542_v9 }
  0x54   : > { %771 = vmatprep.mubr.f32.mxu1 %v12542_v9 }
  0x56   : > { %7203 = vmatmul.mubr.msk.f32.gmra.mrb[12].mxu0 %vm533_vm0, %v493_v33 }
  0x57   : > { %7211 = vmatmul.mubr.msk.f32.gmra.mrb[12].mxu1 %vm533_vm0, %v493_v33  ;;  %664 = vmatprep.mubr.f32.mxu0 %v12542_v9 }
  0x58   : > { %777 = vmatprep.mubr.f32.mxu1 %v12542_v9 }
  0x5a   : > { %7204 = vmatmul.mubr.msk.f32.gmra.mrb[14].mxu0 %vm533_vm0, %v494_v34 }
  0x5b   : > { %7212 = vmatmul.mubr.msk.f32.gmra.mrb[14].mxu1 %vm533_vm0, %v494_v34 }
 0x111   : > { %v624_v46 = vpop.f32.mrb[0].mxu0 }
 0x112   : > { %v625_v47 = vadd.f32 %v624_v46, %v12767_v42  ;;  %v737_v48 = vpop.f32.mrb[0].mxu1  ;;  %v626_v49 = vpop.f32.mrb[1].mxu0 }
 0x113   : > { %v738_v50 = vadd.f32 %v737_v48, %v12769_v43  ;;  %v627_v51 = vadd.f32 %v626_v49, %v12771_v44  ;;  %v739_v52 = vpop.f32.mrb[1].mxu1 }
 0x114   : > { %784 = vst [vmem:[#allocation2] sm:$0xff] %v625_v47  ;;  %v740_v53 = vadd.f32 %v739_v52, %v12773_v45  ;;  %v828_v52 = vld [vmem:[%s12682_s12 + $0x40] sm:$0xff] (!%p7213_p12) }
 0x115   : > { %786 = vst [vmem:[#allocation2 + $0x10] sm:$0xff] %v738_v50  ;;  %785 = vst [vmem:[#allocation2 + $0x8] sm:$0xff] %v627_v51  ;;  %v630_v54 = vpop.f32.mrb[2].mxu0  ;;  %v12543_v50 = vmov (!%p7213_p12), 0.0|0.0   ;;  %v920_v51 = vld [vmem:[%s12682_s12 + $0x28] sm:$0xff] (!%p7213_p12) }
 0x116   : > { %787 = vst [vmem:[#allocation2 + $0x18] sm:$0xff] %v740_v53  ;;  %v631_v55 = vadd.f32 %v630_v54, %v12767_v42  ;;  %v743_v56 = vpop.f32.mrb[2].mxu1  ;;  %v632_v57 = vpop.f32.mrb[3].mxu0  ;;  %10631 = vmatprep.subr.bf16.mxu0 (!%p7213_p12), %v12543_v50  ;;  %10655 = vmatprep.subr.bf16.mxu1 (!%p7213_p12), %v12543_v50  ;;  %v829_v53 = vld [vmem:[%s12682_s12 + $0x60] sm:$0xff] (!%p7213_p12) }
 0x117   : > { %v744_v58 = vadd.f32 %v743_v56, %v12769_v43  ;;  %v633_v59 = vadd.f32 %v632_v57, %v12771_v44  ;;  %v745_v60 = vpop.f32.mrb[3].mxu1  ;;  %v922_v56 = vld [vmem:[%s12682_s12 + $0x68] sm:$0xff] (!%p7213_p12)  ;;  %v12545_v57 = vmov (!%p7213_p12), 0.0  }
 0x118   : > { %788 = vst [vmem:[#allocation2 + $0x20] sm:$0xff] %v631_v55  ;;  %v746_v61 = vadd.f32 %v745_v60, %v12773_v45  ;;  %v921_v55 = vld [vmem:[%s12682_s12 + $0x48] sm:$0xff] (!%p7213_p12)  ;;  %8407 = vmatprep.mubr.msk.f32.mxu0 (!%p7213_p12), %vm12544_vm1, %v12545_v57  ;;  %8442 = vmatprep.mubr.msk.f32.mxu1 (!%p7213_p12), %vm12544_vm1, %v12545_v57  ;;  %v830_v60 = vld [vmem:[%s12682_s12 + $0x80] sm:$0xff] (!%p7213_p12) }
 0x119   : > { %790 = vst [vmem:[#allocation2 + $0x30] sm:$0xff] %v744_v58  ;;  %789 = vst [vmem:[#allocation2 + $0x28] sm:$0xff] %v633_v59  ;;  %v636_v62 = vpop.f32.mrb[4].mxu0  ;;  %v12827_v58 = vpack.c.bf16 (!%p7213_p12), %v829_v53, %v828_v52  ;;  %v12831_v59 = vpack.c.bf16 (!%p7213_p12), %v922_v56, %v921_v55  ;;  %v1018_v53 = vld [vmem:[%s12682_s12 + $0xd0] sm:$0xff] (!%p7213_p12)  ;;  %v1106_v56 = vld [vmem:[%s12682_s12 + $0xd8] sm:$0xff] (!%p7213_p12) }
 0x11a   : > { %791 = vst [vmem:[#allocation2 + $0x38] sm:$0xff] %v746_v61  ;;  %v637_v63 = vadd.f32 %v636_v62, %v12767_v42  ;;  %v749_v0 = vpop.f32.mrb[4].mxu1  ;;  %v638_v1 = vpop.f32.mrb[5].mxu0  ;;  %v831_v61 = vld [vmem:[%s12682_s12 + $0xa0] sm:$0xff] (!%p7213_p12)  ;;  %v923_v62 = vld [vmem:[%s12682_s12 + $0x88] sm:$0xff] (!%p7213_p12)  ;;  %v1019_v55 = vld [vmem:[%s12682_s12 + $0xf0] sm:$0xff] (!%p7213_p12) }
 0x11b   : > { %v750_v2 = vadd.f32 %v749_v0, %v12769_v43  ;;  %v639_v3 = vadd.f32 %v638_v1, %v12771_v44  ;;  %v751_v4 = vpop.f32.mrb[5].mxu1  ;;  %v12839_v0 = vpack.c.bf16 (!%p7213_p12), %v831_v61, %v830_v60  ;;  %v1107_v60 = vld [vmem:[%s12682_s12 + $0xf8] sm:$0xff] (!%p7213_p12)  ;;  %v12955_v61 = vpack.c.bf16 (!%p7213_p12), %v1019_v55, %v1018_v53 }
 0x11c   : > { %792 = vst [vmem:[#allocation2 + $0x40] sm:$0xff] %v637_v63  ;;  %v752_v5 = vadd.f32 %v751_v4, %v12773_v45  ;;  %v924_v63 = vld [vmem:[%s12682_s12 + $0xa8] sm:$0xff] (!%p7213_p12) }
 0x11d   : > { %794 = vst [vmem:[#allocation2 + $0x50] sm:$0xff] %v750_v2  ;;  %793 = vst [vmem:[#allocation2 + $0x48] sm:$0xff] %v639_v3  ;;  %v642_v6 = vpop.f32.mrb[6].mxu0  ;;  %v12843_v1 = vpack.c.bf16 (!%p7213_p12), %v924_v63, %v923_v62  ;;  %v832_v2 = vld [vmem:[%s12682_s12 + $0xc0] sm:$0xff] (!%p7213_p12)  ;;  %v925_v4 = vld [vmem:[%s12682_s12 + $0xc8] sm:$0xff] (!%p7213_p12)  ;;  %v12959_v62 = vpack.c.bf16 (!%p7213_p12), %v1107_v60, %v1106_v56 }
 0x11e   : > { %795 = vst [vmem:[#allocation2 + $0x58] sm:$0xff] %v752_v5  ;;  %v643_v7 = vadd.f32 %v642_v6, %v12767_v42  ;;  %v755_v8 = vpop.f32.mrb[6].mxu1  ;;  %v644_v9 = vpop.f32.mrb[7].mxu0  ;;  %v833_v3 = vld [vmem:[%s12682_s12 + $0xe0] sm:$0xff] (!%p7213_p12)  ;;  %v926_v5 = vld [vmem:[%s12682_s12 + $0xe8] sm:$0xff] (!%p7213_p12)  ;;  %v1020_v63 = vld [vmem:[%s12682_s12 + $0x110] sm:$0xff] (!%p7213_p12) }
 0x11f   : > { %v756_v10 = vadd.f32 %v755_v8, %v12769_v43  ;;  %v645_v11 = vadd.f32 %v644_v9, %v12771_v44  ;;  %v757_v12 = vpop.f32.mrb[7].mxu1  ;;  %v12851_v6 = vpack.c.bf16 (!%p7213_p12), %v833_v3, %v832_v2  ;;  %v834_v8 = vld [vmem:[%s12682_s12 + $0x100] sm:$0xff] (!%p7213_p12)  ;;  %v1021_v2 = vld [vmem:[%s12682_s12 + $0x130] sm:$0xff] (!%p7213_p12)  ;;  %v1108_v3 = vld [vmem:[%s12682_s12 + $0x118] sm:$0xff] (!%p7213_p12) }
 0x120   : > { %796 = vst [vmem:[#allocation2 + $0x60] sm:$0xff] %v643_v7  ;;  %v758_v13 = vadd.f32 %v757_v12, %v12773_v45  ;;  %v12855_v7 = vpack.c.bf16 (!%p7213_p12), %v926_v5, %v925_v4  ;;  %v835_v9 = vld [vmem:[%s12682_s12 + $0x120] sm:$0xff] (!%p7213_p12)  ;;  %v1109_v4 = vld [vmem:[%s12682_s12 + $0x138] sm:$0xff] (!%p7213_p12)  ;;  %v12967_v5 = vpack.c.bf16 (!%p7213_p12), %v1021_v2, %v1020_v63  ;;  %v824_v63 = vld [vmem:[#allocation2 + $0x10] sm:$0xff] (!%p7213_p12) }
 0x121   : > { %798 = vst [vmem:[#allocation2 + $0x70] sm:$0xff] %v756_v10  ;;  %797 = vst [vmem:[#allocation2 + $0x68] sm:$0xff] %v645_v11  ;;  %v648_v14 = vpop.f32.mrb[8].mxu0  ;;  %v927_v10 = vld [vmem:[%s12682_s12 + $0x108] sm:$0xff] (!%p7213_p12)  ;;  %v12863_v12 = vpack.c.bf16 (!%p7213_p12), %v835_v9, %v834_v8  ;;  %v12971_v8 = vpack.c.bf16 (!%p7213_p12), %v1109_v4, %v1108_v3  ;;  %v1022_v9 = vld [vmem:[%s12682_s12 + $0x150] sm:$0xff] (!%p7213_p12) }
 0x122   : > { %799 = vst [vmem:[#allocation2 + $0x78] sm:$0xff] %v758_v13  ;;  %v649_v15 = vadd.f32 %v648_v14, %v12767_v42  ;;  %v761_v16 = vpop.f32.mrb[8].mxu1  ;;  %v650_v17 = vpop.f32.mrb[9].mxu0  ;;  %v928_v11 = vld [vmem:[%s12682_s12 + $0x128] sm:$0xff] (!%p7213_p12)  ;;  %v836_v14 = vld [vmem:[%s12682_s12 + $0x140] sm:$0xff] (!%p7213_p12)  ;;  %v825_v2 = vld [vmem:[#allocation2 + $0x18] sm:$0xff] (!%p7213_p12) }
 0x123   : > { %v762_v18 = vadd.f32 %v761_v16, %v12769_v43  ;;  %v651_v19 = vadd.f32 %v650_v17, %v12771_v44  ;;  %v763_v20 = vpop.f32.mrb[9].mxu1  ;;  %v12867_v13 = vpack.c.bf16 (!%p7213_p12), %v928_v11, %v927_v10  ;;  %v929_v16 = vld [vmem:[%s12682_s12 + $0x148] sm:$0xff] (!%p7213_p12)  ;;  %v1023_v10 = vld [vmem:[%s12682_s12 + $0x170] sm:$0xff] (!%p7213_p12)  ;;  %v1110_v11 = vld [vmem:[%s12682_s12 + $0x158] sm:$0xff] (!%p7213_p12) }
 0x124   : > { %800 = vst [vmem:[#allocation2 + $0x80] sm:$0xff] %v649_v15  ;;  %v764_v21 = vadd.f32 %v763_v20, %v12773_v45  ;;  %v837_v15 = vld [vmem:[%s12682_s12 + $0x160] sm:$0xff] (!%p7213_p12)  ;;  %v930_v17 = vld [vmem:[%s12682_s12 + $0x168] sm:$0xff] (!%p7213_p12) }
 0x125   : > { %802 = vst [vmem:[#allocation2 + $0x90] sm:$0xff] %v762_v18  ;;  %801 = vst [vmem:[#allocation2 + $0x88] sm:$0xff] %v651_v19  ;;  %v654_v22 = vpop.f32.mrb[10].mxu0  ;;  %v12875_v18 = vpack.c.bf16 (!%p7213_p12), %v837_v15, %v836_v14  ;;  %v12879_v19 = vpack.c.bf16 (!%p7213_p12), %v930_v17, %v929_v16  ;;  %v838_v20 = vld [vmem:[%s12682_s12 + $0x180] sm:$0xff] (!%p7213_p12)  ;;  %v1111_v14 = vld [vmem:[%s12682_s12 + $0x178] sm:$0xff] (!%p7213_p12)  ;;  %v12979_v15 = vpack.c.bf16 (!%p7213_p12), %v1023_v10, %v1022_v9 }
 0x126   : > { %803 = vst [vmem:[#allocation2 + $0x98] sm:$0xff] %v764_v21  ;;  %v655_v23 = vadd.f32 %v654_v22, %v12767_v42  ;;  %v767_v24 = vpop.f32.mrb[10].mxu1  ;;  %v656_v25 = vpop.f32.mrb[11].mxu0  ;;  %v839_v21 = vld [vmem:[%s12682_s12 + $0x1a0] sm:$0xff] (!%p7213_p12)  ;;  %v931_v22 = vld [vmem:[%s12682_s12 + $0x188] sm:$0xff] (!%p7213_p12)  ;;  %v12983_v16 = vpack.c.bf16 (!%p7213_p12), %v1111_v14, %v1110_v11  ;;  %v1024_v17 = vld [vmem:[%s12682_s12 + $0x190] sm:$0xff] (!%p7213_p12) }
 0x127   : > { %v768_v26 = vadd.f32 %v767_v24, %v12769_v43  ;;  %v657_v27 = vadd.f32 %v656_v25, %v12771_v44  ;;  %v769_v28 = vpop.f32.mrb[11].mxu1  ;;  %v12887_v24 = vpack.c.bf16 (!%p7213_p12), %v839_v21, %v838_v20  ;;  %v1025_v20 = vld [vmem:[%s12682_s12 + $0x1b0] sm:$0xff] (!%p7213_p12)  ;;  %v1112_v21 = vld [vmem:[%s12682_s12 + $0x198] sm:$0xff] (!%p7213_p12) }
 0x128   : > { %804 = vst [vmem:[#allocation2 + $0xa0] sm:$0xff] %v655_v23  ;;  %v770_v29 = vadd.f32 %v769_v28, %v12773_v45  ;;  %v932_v23 = vld [vmem:[%s12682_s12 + $0x1a8] sm:$0xff] (!%p7213_p12) }
 0x129   : > { %806 = vst [vmem:[#allocation2 + $0xb0] sm:$0xff] %v768_v26  ;;  %805 = vst [vmem:[#allocation2 + $0xa8] sm:$0xff] %v657_v27  ;;  %v660_v30 = vpop.f32.mrb[12].mxu0  ;;  %v12891_v25 = vpack.c.bf16 (!%p7213_p12), %v932_v23, %v931_v22  ;;  %v840_v26 = vld [vmem:[%s12682_s12 + $0x1c0] sm:$0xff] (!%p7213_p12)  ;;  %v933_v28 = vld [vmem:[%s12682_s12 + $0x1c8] sm:$0xff] (!%p7213_p12)  ;;  %v12991_v23 = vpack.c.bf16 (!%p7213_p12), %v1025_v20, %v1024_v17 }
 0x12a   : > { %807 = vst [vmem:[#allocation2 + $0xb8] sm:$0xff] %v770_v29  ;;  %v661_v31 = vadd.f32 %v660_v30, %v12767_v42  ;;  %v773_v32 = vpop.f32.mrb[12].mxu1  ;;  %v662_v33 = vpop.f32.mrb[13].mxu0  ;;  %v841_v27 = vld [vmem:[%s12682_s12 + $0x1e0] sm:$0xff] (!%p7213_p12)  ;;  %v934_v29 = vld [vmem:[%s12682_s12 + $0x1e8] sm:$0xff] (!%p7213_p12)  ;;  %v1113_v22 = vld [vmem:[%s12682_s12 + $0x1b8] sm:$0xff] (!%p7213_p12) }
 0x12b   : > { %v774_v34 = vadd.f32 %v773_v32, %v12769_v43  ;;  %v663_v35 = vadd.f32 %v662_v33, %v12771_v44  ;;  %v775_v36 = vpop.f32.mrb[13].mxu1  ;;  %v12899_v30 = vpack.c.bf16 (!%p7213_p12), %v841_v27, %v840_v26  ;;  %v1012_v32 = vld [vmem:[%s12682_s12 + $0x10] sm:$0xff] (!%p7213_p12)  ;;  %v12995_v26 = vpack.c.bf16 (!%p7213_p12), %v1113_v22, %v1112_v21  ;;  %v821_v21 = vld [vmem:[#allocation4] sm:$0xff] (!%p7213_p12) }
 0x12c   : > { %808 = vst [vmem:[#allocation2 + $0xc0] sm:$0xff] %v661_v31  ;;  %v776_v37 = vadd.f32 %v775_v36, %v12773_v45  ;;  %819 = sbr.rel (%p7213_p12) target bundleno = 2538 (0x9ea), region = 52  ;;  %v12903_v31 = vpack.c.bf16 (!%p7213_p12), %v934_v29, %v933_v28  ;;  %v1013_v33 = vld [vmem:[%s12682_s12 + $0x30] sm:$0xff] (!%p7213_p12)  ;;  %v12911_v36 = vld [vmem:[#allocation3] sm:$0xff] (!%p7213_p12)  ;;  %v1114_v29 = vld [vmem:[%s12682_s12 + $0x1d8] sm:$0xff] (!%p7213_p12) }
 0x12d   : > { %810 = vst [vmem:[#allocation2 + $0xd0] sm:$0xff] %v774_v34  ;;  %809 = vst [vmem:[#allocation2 + $0xc8] sm:$0xff] %v663_v35  ;;  %v666_v38 = vpop.f32.mrb[14].mxu0  ;;  %v1100_v34 = vld [vmem:[%s12682_s12 + $0x18] sm:$0xff] (!%p7213_p12)  ;;  %v1026_v27 = vld [vmem:[%s12682_s12 + $0x1d0] sm:$0xff] (!%p7213_p12) }
 0x12e   : > { %811 = vst [vmem:[#allocation2 + $0xd8] sm:$0xff] %v776_v37  ;;  %v667_v39 = vadd.f32 %v666_v38, %v12767_v42  ;;  %v779_v40 = vpop.f32.mrb[14].mxu1  ;;  %v668_v41 = vpop.f32.mrb[15].mxu0  ;;  %v826_v42 = vld [vmem:[%s12682_s12] sm:$0xff] (!%p7213_p12)  ;;  %v1101_v35 = vld [vmem:[%s12682_s12 + $0x38] sm:$0xff] (!%p7213_p12)  ;;  %v12913_v37 = vpack.c.bf16 (!%p7213_p12), %v1013_v33, %v1012_v32  ;;  %v1027_v28 = vld [vmem:[%s12682_s12 + $0x1f0] sm:$0xff] (!%p7213_p12) }
 0x12f   : > { %v780_v46 = vadd.f32 %v779_v40, %v12769_v43  ;;  %v669_v47 = vadd.f32 %v668_v41, %v12771_v44  ;;  %v781_v48 = vpop.f32.mrb[15].mxu1  ;;  %v827_v43 = vld [vmem:[%s12682_s12 + $0x20] sm:$0xff] (!%p7213_p12)  ;;  %v919_v44 = vld [vmem:[%s12682_s12 + $0x8] sm:$0xff] (!%p7213_p12)  ;;  %v12917_v38 = vpack.c.bf16 (!%p7213_p12), %v1101_v35, %v1100_v34  ;;  %v1015_v40 = vld [vmem:[%s12682_s12 + $0x70] sm:$0xff] (!%p7213_p12)  ;;  %v13003_v33 = vpack.c.bf16 (!%p7213_p12), %v1027_v28, %v1026_v27 }
 0x130   : > { %812 = vst [vmem:[#allocation2 + $0xe0] sm:$0xff] %v667_v39  ;;  %v782_v49 = vadd.f32 %v781_v48, %v12773_v45  ;;  %v12813_v45 = vpack.c.bf16 (!%p7213_p12), %v827_v43, %v826_v42  ;;  %v12818_v54 = vpack.c.bf16 (!%p7213_p12), %v920_v51, %v919_v44  ;;  %v1014_v39 = vld [vmem:[%s12682_s12 + $0x50] sm:$0xff] (!%p7213_p12)  ;;  %v1102_v41 = vld [vmem:[%s12682_s12 + $0x58] sm:$0xff] (!%p7213_p12) }
 0x131   : > { %814 = vst [vmem:[#allocation2 + $0xf0] sm:$0xff] %v780_v46  ;;  %813 = vst [vmem:[#allocation2 + $0xe8] sm:$0xff] %v669_v47  ;;  %v1103_v46 = vld [vmem:[%s12682_s12 + $0x78] sm:$0xff] (!%p7213_p12)  ;;  %v12927_v47 = vpack.c.bf16 (!%p7213_p12), %v1015_v40, %v1014_v39  ;;  %v1017_v42 = vld [vmem:[%s12682_s12 + $0xb0] sm:$0xff] (!%p7213_p12) }
 0x132   : > { %815 = vst [vmem:[#allocation2 + $0xf8] sm:$0xff] %v782_v49  ;;  %10633 = vmatpush3.bf16.msra.mxu0 (!%p7213_p12), %v12813_v45  ;;  %10657 = vmatpush3.bf16.msra.mxu1 (!%p7213_p12), %v12818_v54  ;;  %v12931_v48 = vpack.c.bf16 (!%p7213_p12), %v1103_v46, %v1102_v41  ;;  %v1016_v49 = vld [vmem:[%s12682_s12 + $0x90] sm:$0xff] (!%p7213_p12)  ;;  %v1104_v43 = vld [vmem:[%s12682_s12 + $0x98] sm:$0xff] (!%p7213_p12)  ;;  %v823_v41 = vld [vmem:[#allocation2 + $0x8] sm:$0xff] (!%p7213_p12) }
 0x133   : > { %10634 = vmatprep.subr.bf16.mxu0 %v12543_v50  ;;  %10658 = vmatprep.subr.bf16.mxu1 %v12543_v50  ;;  %v1105_v44 = vld [vmem:[%s12682_s12 + $0xb8] sm:$0xff]  ;;  %v12943_v51 = vpack.c.bf16 %v1017_v42, %v1016_v49  ;;  %v822_v46 = vld [vmem:[#allocation2] sm:$0xff] }
 0x134   : > { %v12947_v52 = vpack.c.bf16 %v1105_v44, %v1104_v43  ;;  %v1115_v32 = vld [vmem:[%s12682_s12 + $0x1f8] sm:$0xff] }
 0x135   : > { %v13007_v34 = vpack.c.bf16 %v1115_v32, %v1114_v29 }
 0x136   : > { %10636 = vmatpush3.bf16.msra.mxu0 %v12827_v58  ;;  %10660 = vmatpush3.bf16.msra.mxu1 %v12831_v59 }
 0x137   : > { %10637 = vmatprep.subr.bf16.mxu0 %v12543_v50  ;;  %10661 = vmatprep.subr.bf16.mxu1 %v12543_v50 }
 0x13a   : > { %10639 = vmatpush3.bf16.msra.mxu0 %v12839_v0  ;;  %10663 = vmatpush3.bf16.msra.mxu1 %v12843_v1 }
 0x13b   : > { %10640 = vmatprep.subr.bf16.mxu0 %v12543_v50  ;;  %10664 = vmatprep.subr.bf16.mxu1 %v12543_v50 }
 0x13e   : > { %10642 = vmatpush3.bf16.msra.mxu0 %v12851_v6  ;;  %10666 = vmatpush3.bf16.msra.mxu1 %v12855_v7 }
 0x13f   : > { %10643 = vmatprep.subr.bf16.mxu0 %v12543_v50  ;;  %10667 = vmatprep.subr.bf16.mxu1 %v12543_v50 }
 0x142   : > { %10645 = vmatpush3.bf16.msra.mxu0 %v12863_v12  ;;  %10669 = vmatpush3.bf16.msra.mxu1 %v12867_v13 }
 0x143   : > { %10646 = vmatprep.subr.bf16.mxu0 %v12543_v50  ;;  %10670 = vmatprep.subr.bf16.mxu1 %v12543_v50 }
 0x146   : > { %10648 = vmatpush3.bf16.msra.mxu0 %v12875_v18  ;;  %10672 = vmatpush3.bf16.msra.mxu1 %v12879_v19 }
 0x147   : > { %10649 = vmatprep.subr.bf16.mxu0 %v12543_v50  ;;  %10673 = vmatprep.subr.bf16.mxu1 %v12543_v50 }
 0x14a   : > { %10651 = vmatpush3.bf16.msra.mxu0 %v12887_v24  ;;  %10675 = vmatpush3.bf16.msra.mxu1 %v12891_v25 }
 0x14b   : > { %10652 = vmatprep.subr.bf16.mxu0 %v12543_v50  ;;  %10676 = vmatprep.subr.bf16.mxu1 %v12543_v50 }
 0x14e   : > { %10654 = vmatpush3.bf16.msra.mxu0 %v12899_v30  ;;  %10678 = vmatpush3.bf16.msra.mxu1 %v12903_v31 }
 0x14f   : > { %10679 = vmatprep.subr.bf16.mxu0 %v12543_v50  ;;  %10703 = vmatprep.subr.bf16.mxu1 %v12543_v50 }
 0x151   : > { %8408 = vmatmul.mubr.f32.vlgmr.msra.gmra.mrb[0].mxu0 %v12911_v36  ;;  %8443 = vmatmul.mubr.f32.vlgmr.msra.gmra.mrb[0].mxu1 %v12911_v36 }
 0x152   : > { %10681 = vmatpush3.bf16.msra.mxu0 %v12913_v37  ;;  %10705 = vmatpush3.bf16.msra.mxu1 %v12917_v38 }
 0x153   : > { %10682 = vmatprep.subr.bf16.mxu0 %v12543_v50  ;;  %10706 = vmatprep.subr.bf16.mxu1 %v12543_v50 }
 0x154   : > { %8477 = vmatprep.mubr.msk.f32.mxu0 %vm12544_vm1, %v12545_v57  ;;  %8512 = vmatprep.mubr.msk.f32.mxu1 %vm12544_vm1, %v12545_v57 }
 0x156   : > { %10684 = vmatpush3.bf16.msra.mxu0 %v12927_v47  ;;  %10708 = vmatpush3.bf16.msra.mxu1 %v12931_v48 }
 0x157   : > { %10685 = vmatprep.subr.bf16.mxu0 %v12543_v50  ;;  %10709 = vmatprep.subr.bf16.mxu1 %v12543_v50 }
 0x15a   : > { %10687 = vmatpush3.bf16.msra.mxu0 %v12943_v51  ;;  %10711 = vmatpush3.bf16.msra.mxu1 %v12947_v52 }
 0x15b   : > { %10688 = vmatprep.subr.bf16.mxu0 %v12543_v50  ;;  %10712 = vmatprep.subr.bf16.mxu1 %v12543_v50 }
 0x15e   : > { %10690 = vmatpush3.bf16.msra.mxu0 %v12955_v61  ;;  %10714 = vmatpush3.bf16.msra.mxu1 %v12959_v62 }
 0x15f   : > { %10691 = vmatprep.subr.bf16.mxu0 %v12543_v50  ;;  %10715 = vmatprep.subr.bf16.mxu1 %v12543_v50 }
 0x162   : > { %10693 = vmatpush3.bf16.msra.mxu0 %v12967_v5  ;;  %10717 = vmatpush3.bf16.msra.mxu1 %v12971_v8 }
 0x163   : > { %10694 = vmatprep.subr.bf16.mxu0 %v12543_v50  ;;  %10718 = vmatprep.subr.bf16.mxu1 %v12543_v50 }
 0x166   : > { %10696 = vmatpush3.bf16.msra.mxu0 %v12979_v15  ;;  %10720 = vmatpush3.bf16.msra.mxu1 %v12983_v16 }
 0x167   : > { %10697 = vmatprep.subr.bf16.mxu0 %v12543_v50  ;;  %10721 = vmatprep.subr.bf16.mxu1 %v12543_v50 }
 0x16a   : > { %10699 = vmatpush3.bf16.msra.mxu0 %v12991_v23  ;;  %10723 = vmatpush3.bf16.msra.mxu1 %v12995_v26 }
 0x16b   : > { %10700 = vmatprep.subr.bf16.mxu0 %v12543_v50  ;;  %10724 = vmatprep.subr.bf16.mxu1 %v12543_v50 }
 0x16e   : > { %10702 = vmatpush3.bf16.msra.mxu0 %v13003_v33  ;;  %10726 = vmatpush3.bf16.msra.mxu1 %v13007_v34 }
 0x16f   : > { %10727 = vmatprep.subr.bf16.mxu0 %v12543_v50  ;;  %10751 = vmatprep.subr.bf16.mxu1 %v12543_v50 }
 0x171   : > { %8478 = vmatmul.mubr.f32.vlgmr.msra.gmra.mrb[2].mxu0 %v12911_v36  ;;  %8513 = vmatmul.mubr.f32.vlgmr.msra.gmra.mrb[2].mxu1 %v12911_v36 }
 0x172   : > { %10729 = vmatpush3.bf16.msra.mxu0 %v12813_v45  ;;  %10753 = vmatpush3.bf16.msra.mxu1 %v12818_v54 }
 0x173   : > { %10730 = vmatprep.subr.bf16.mxu0 %v12543_v50  ;;  %10754 = vmatprep.subr.bf16.mxu1 %v12543_v50 }
 0x174   : > { %8547 = vmatprep.mubr.msk.f32.mxu0 %vm12544_vm1, %v12545_v57  ;;  %8582 = vmatprep.mubr.msk.f32.mxu1 %vm12544_vm1, %v12545_v57 }
 0x176   : > { %10732 = vmatpush3.bf16.msra.mxu0 %v12827_v58  ;;  %10756 = vmatpush3.bf16.msra.mxu1 %v12831_v59 }
 0x177   : > { %10733 = vmatprep.subr.bf16.mxu0 %v12543_v50  ;;  %10757 = vmatprep.subr.bf16.mxu1 %v12543_v50 }
 0x17a   : > { %10735 = vmatpush3.bf16.msra.mxu0 %v12839_v0  ;;  %10759 = vmatpush3.bf16.msra.mxu1 %v12843_v1 }
 0x17b   : > { %10736 = vmatprep.subr.bf16.mxu0 %v12543_v50  ;;  %10760 = vmatprep.subr.bf16.mxu1 %v12543_v50 }
 0x17e   : > { %10738 = vmatpush3.bf16.msra.mxu0 %v12851_v6  ;;  %10762 = vmatpush3.bf16.msra.mxu1 %v12855_v7 }
 0x17f   : > { %10739 = vmatprep.subr.bf16.mxu0 %v12543_v50  ;;  %10763 = vmatprep.subr.bf16.mxu1 %v12543_v50 }
 0x182   : > { %10741 = vmatpush3.bf16.msra.mxu0 %v12863_v12  ;;  %10765 = vmatpush3.bf16.msra.mxu1 %v12867_v13 }
 0x183   : > { %10742 = vmatprep.subr.bf16.mxu0 %v12543_v50  ;;  %10766 = vmatprep.subr.bf16.mxu1 %v12543_v50 }
 0x186   : > { %10744 = vmatpush3.bf16.msra.mxu0 %v12875_v18  ;;  %10768 = vmatpush3.bf16.msra.mxu1 %v12879_v19 }
 0x187   : > { %10745 = vmatprep.subr.bf16.mxu0 %v12543_v50  ;;  %10769 = vmatprep.subr.bf16.mxu1 %v12543_v50 }
 0x18a   : > { %10747 = vmatpush3.bf16.msra.mxu0 %v12887_v24  ;;  %10771 = vmatpush3.bf16.msra.mxu1 %v12891_v25 }
 0x18b   : > { %10748 = vmatprep.subr.bf16.mxu0 %v12543_v50  ;;  %10772 = vmatprep.subr.bf16.mxu1 %v12543_v50 }
 0x18e   : > { %10750 = vmatpush3.bf16.msra.mxu0 %v12899_v30  ;;  %10774 = vmatpush3.bf16.msra.mxu1 %v12903_v31 }
 0x18f   : > { %10775 = vmatprep.subr.bf16.mxu0 %v12543_v50  ;;  %10799 = vmatprep.subr.bf16.mxu1 %v12543_v50 }
 0x224   : > { %v908_v35 = vpop.f32.mrb[0].mxu0  ;;  %v1001_v36 = vpop.f32.mrb[0].mxu1 }
 0x225   : > { %v8409_v39 = vpop.f32.mrb[1].mxu0  ;;  %v8444_v40 = vpop.f32.mrb[1].mxu1  ;;  %v1005_v49 = vadd.f32 %v1001_v36, %v823_v41  ;;  %v912_v42 = vadd.f32 %v908_v35, %v822_v46 }
 0x227   : > { %v7215_v43 = vmul.f32 -1.442695, %v1005_v49  ;;  %v7214_v44 = vmul.f32 -1.442695, %v912_v42 }
 0x229   : > { %12230 = vpow2.f32 %v7215_v43 }
 0x22a   : > { %12232 = vpow2.f32 %v7214_v44 }
 0x233   : > { %v12231_v53 = vpop.eup %12230 }
 0x234   : > { %v12233_v55 = vpop.eup %12232  ;;  %v1009_v56 = vadd.f32 1.0, %v12231_v53 }
 0x235   : > { %v916_v60 = vadd.f32 1.0, %v12233_v55 }
 0x236   : > { %12234 = vrcp.f32 %v1009_v56 }
 0x237   : > { %12236 = vrcp.f32 %v916_v60 }
 0x240   : > { %v12235_v20 = vpop.eup %12234 }
 0x241   : > { %v12237_v22 = vpop.eup %12236  ;;  %v1193_v28 = vmul.f32 %v12235_v20, %v821_v21  ;;  %v2060_v20 = vld [vmem:[%s12682_s12 + $0xa8] sm:$0xff] }
 0x244   : > { %v1094_v3 = vpop.f32.mrb[2].mxu0  ;;  %v1182_v9 = vpop.f32.mrb[2].mxu1 }
 0x245   : > { %v1098_v4 = vadd.f32 %v1094_v3, %v824_v63  ;;  %v8479_v10 = vpop.f32.mrb[3].mxu0  ;;  %v1186_v11 = vadd.f32 %v1182_v9, %v825_v2  ;;  %v8514_v14 = vpop.f32.mrb[3].mxu1 }
 0x247   : > { %12238 = vtanh.f32 %v1098_v4  ;;  %v7216_v17 = vmul.f32 -1.442695, %v1186_v11 }
 0x249   : > { %12240 = vpow2.f32 %v7216_v17 }
 0x251   : > { %v12239_v27 = vpop.eup %12238 }
 0x252   : > { %v1194_v29 = vmul.f32 %v12239_v27, %v12237_v22  ;;  %v1968_v22 = vld [vmem:[%s12682_s12 + $0xc0] sm:$0xff] }
 0x253   : > { %v12241_v32 = vpop.eup %12240  ;;  %v1969_v27 = vld [vmem:[%s12682_s12 + $0xe0] sm:$0xff] }
 0x254   : > { %v13052_v35 = vadd.f32 %v1194_v29, %v1193_v28  ;;  %v1190_v36 = vadd.f32 1.0, %v12241_v32  ;;  %v2061_v28 = vld [vmem:[%s12682_s12 + $0xc8] sm:$0xff]  ;;  %v13212_v29 = vpack.c.bf16 %v1969_v27, %v1968_v22 }
 0x255   : > { %v2062_v32 = vld [vmem:[%s12682_s12 + $0xe8] sm:$0xff] }
 0x256   : > { %12242 = vtanh.f32 %v13052_v35 }
 0x257   : > { %12244 = vrcp.f32 %v1190_v36  ;;  %v1970_v36 = vld [vmem:[%s12682_s12 + $0x100] sm:$0xff] }
 0x260   : > { %v12243_v39 = vpop.eup %12242 }
 0x261   : > { %v12245_v40 = vpop.eup %12244 }
 0x262   : > { %v1197_v41 = vmul.f32 %v12245_v40, %v12243_v39  ;;  %v1971_v39 = vld [vmem:[%s12682_s12 + $0x120] sm:$0xff]  ;;  %v2063_v40 = vld [vmem:[%s12682_s12 + $0x108] sm:$0xff] }
 0x264   : > { %1198 = vst [vmem:[%s12707_s1] sm:$0xff] %v1197_v41  ;;  %8548 = vmatmul.mubr.f32.vlgmr.msra.gmra.mrb[4].mxu0 %v1197_v41  ;;  %8583 = vmatmul.mubr.f32.vlgmr.msra.gmra.mrb[4].mxu1 %v1197_v41 }
 0x265   : > { %10777 = vmatpush3.bf16.msra.mxu0 %v12913_v37  ;;  %10801 = vmatpush3.bf16.msra.mxu1 %v12917_v38 }
 0x266   : > { %10778 = vmatprep.subr.bf16.mxu0 %v12543_v50  ;;  %10802 = vmatprep.subr.bf16.mxu1 %v12543_v50 }
 0x267   : > { %8617 = vmatprep.mubr.msk.f32.mxu0 %vm12544_vm1, %v12545_v57  ;;  %8652 = vmatprep.mubr.msk.f32.mxu1 %vm12544_vm1, %v12545_v57 }
 0x269   : > { %10780 = vmatpush3.bf16.msra.mxu0 %v12927_v47  ;;  %10804 = vmatpush3.bf16.msra.mxu1 %v12931_v48 }
 0x26a   : > { %10781 = vmatprep.subr.bf16.mxu0 %v12543_v50  ;;  %10805 = vmatprep.subr.bf16.mxu1 %v12543_v50 }
 0x26d   : > { %10783 = vmatpush3.bf16.msra.mxu0 %v12943_v51  ;;  %10807 = vmatpush3.bf16.msra.mxu1 %v12947_v52 }
 0x26e   : > { %10784 = vmatprep.subr.bf16.mxu0 %v12543_v50  ;;  %10808 = vmatprep.subr.bf16.mxu1 %v12543_v50 }
 0x271   : > { %10786 = vmatpush3.bf16.msra.mxu0 %v12955_v61  ;;  %10810 = vmatpush3.bf16.msra.mxu1 %v12959_v62 }
 0x272   : > { %10787 = vmatprep.subr.bf16.mxu0 %v12543_v50  ;;  %10811 = vmatprep.subr.bf16.mxu1 %v12543_v50 }
 0x275   : > { %10789 = vmatpush3.bf16.msra.mxu0 %v12967_v5  ;;  %10813 = vmatpush3.bf16.msra.mxu1 %v12971_v8 }
 0x276   : > { %10790 = vmatprep.subr.bf16.mxu0 %v12543_v50  ;;  %10814 = vmatprep.subr.bf16.mxu1 %v12543_v50 }
 0x279   : > { %10792 = vmatpush3.bf16.msra.mxu0 %v12979_v15  ;;  %10816 = vmatpush3.bf16.msra.mxu1 %v12983_v16 }
 0x27a   : > { %10793 = vmatprep.subr.bf16.mxu0 %v12543_v50  ;;  %10817 = vmatprep.subr.bf16.mxu1 %v12543_v50 }
 0x27d   : > { %10795 = vmatpush3.bf16.msra.mxu0 %v12991_v23  ;;  %10819 = vmatpush3.bf16.msra.mxu1 %v12995_v26 }
 0x27e   : > { %10796 = vmatprep.subr.bf16.mxu0 %v12543_v50  ;;  %10820 = vmatprep.subr.bf16.mxu1 %v12543_v50 }
 0x281   : > { %10798 = vmatpush3.bf16.msra.mxu0 %v13003_v33  ;;  %10822 = vmatpush3.bf16.msra.mxu1 %v13007_v34 }
 0x282   : > { %10823 = vmatprep.subr.bf16.mxu0 %v12543_v50  ;;  %10847 = vmatprep.subr.bf16.mxu1 %v12543_v50 }
 0x284   : > { %8618 = vmatmul.mubr.f32.vlgmr.msra.gmra.mrb[6].mxu0 %v1197_v41  ;;  %8653 = vmatmul.mubr.f32.vlgmr.msra.gmra.mrb[6].mxu1 %v1197_v41  ;;  %v13224_v41 = vpack.c.bf16 %v1971_v39, %v1970_v36 }
 0x285   : > { %10825 = vmatpush3.bf16.msra.mxu0 %v12813_v45  ;;  %10849 = vmatpush3.bf16.msra.mxu1 %v12818_v54 }
 0x286   : > { %10826 = vmatprep.subr.bf16.mxu0 %v12543_v50  ;;  %10850 = vmatprep.subr.bf16.mxu1 %v12543_v50 }
 0x287   : > { %8687 = vmatprep.mubr.msk.f32.mxu0 %vm12544_vm1, %v12545_v57  ;;  %8722 = vmatprep.mubr.msk.f32.mxu1 %vm12544_vm1, %v12545_v57 }
 0x289   : > { %10828 = vmatpush3.bf16.msra.mxu0 %v12827_v58  ;;  %10852 = vmatpush3.bf16.msra.mxu1 %v12831_v59 }
 0x28a   : > { %10829 = vmatprep.subr.bf16.mxu0 %v12543_v50  ;;  %10853 = vmatprep.subr.bf16.mxu1 %v12543_v50 }
 0x28d   : > { %10831 = vmatpush3.bf16.msra.mxu0 %v12839_v0  ;;  %10855 = vmatpush3.bf16.msra.mxu1 %v12843_v1  ;;  %v1201_v0 = vld [vmem:[#allocation2 + $0x28] sm:$0xff]  ;;  %v1200_v1 = vld [vmem:[#allocation2 + $0x20] sm:$0xff] }
 0x28e   : > { %10832 = vmatprep.subr.bf16.mxu0 %v12543_v50  ;;  %10856 = vmatprep.subr.bf16.mxu1 %v12543_v50 }
 0x291   : > { %10834 = vmatpush3.bf16.msra.mxu0 %v12851_v6  ;;  %10858 = vmatpush3.bf16.msra.mxu1 %v12855_v7 }
 0x292   : > { %10835 = vmatprep.subr.bf16.mxu0 %v12543_v50  ;;  %10859 = vmatprep.subr.bf16.mxu1 %v12543_v50 }
 0x295   : > { %10837 = vmatpush3.bf16.msra.mxu0 %v12863_v12  ;;  %10861 = vmatpush3.bf16.msra.mxu1 %v12867_v13 }
 0x296   : > { %10838 = vmatprep.subr.bf16.mxu0 %v12543_v50  ;;  %10862 = vmatprep.subr.bf16.mxu1 %v12543_v50 }
 0x299   : > { %10840 = vmatpush3.bf16.msra.mxu0 %v12875_v18  ;;  %10864 = vmatpush3.bf16.msra.mxu1 %v12879_v19 }
 0x29a   : > { %10841 = vmatprep.subr.bf16.mxu0 %v12543_v50  ;;  %10865 = vmatprep.subr.bf16.mxu1 %v12543_v50 }
 0x29d   : > { %10843 = vmatpush3.bf16.msra.mxu0 %v12887_v24  ;;  %10867 = vmatpush3.bf16.msra.mxu1 %v12891_v25 }
 0x29e   : > { %10844 = vmatprep.subr.bf16.mxu0 %v12543_v50  ;;  %10868 = vmatprep.subr.bf16.mxu1 %v12543_v50 }
 0x2a1   : > { %10846 = vmatpush3.bf16.msra.mxu0 %v12899_v30  ;;  %10870 = vmatpush3.bf16.msra.mxu1 %v12903_v31  ;;  %v1202_v30 = vld [vmem:[#allocation2 + $0x30] sm:$0xff]  ;;  %v1203_v31 = vld [vmem:[#allocation2 + $0x38] sm:$0xff] }
 0x2a2   : > { %10871 = vmatprep.subr.bf16.mxu0 %v12543_v50  ;;  %10895 = vmatprep.subr.bf16.mxu1 %v12543_v50 }
 0x337   : > { %v1286_v45 = vpop.f32.mrb[4].mxu0  ;;  %v1379_v54 = vpop.f32.mrb[4].mxu1 }
 0x338   : > { %v8549_v58 = vpop.f32.mrb[5].mxu0  ;;  %v8584_v59 = vpop.f32.mrb[5].mxu1  ;;  %v1383_v6 = vadd.f32 %v1379_v54, %v1201_v0  ;;  %v1290_v7 = vadd.f32 %v1286_v45, %v1200_v1  ;;  %v2064_v45 = vld [vmem:[%s12682_s12 + $0x128] sm:$0xff] }
 0x339   : > { %v13227_v54 = vpack.c.bf16 %v2064_v45, %v2063_v40  ;;  %v1972_v58 = vld [vmem:[%s12682_s12 + $0x140] sm:$0xff]  ;;  %v2065_v0 = vld [vmem:[%s12682_s12 + $0x148] sm:$0xff]  ;;  %v2148_v40 = vld [vmem:[%s12682_s12 + $0x10] sm:$0xff] }
 0x33a   : > { %v7218_v12 = vmul.f32 -1.442695, %v1383_v6  ;;  %v7217_v13 = vmul.f32 -1.442695, %v1290_v7  ;;  %v1973_v59 = vld [vmem:[%s12682_s12 + $0x160] sm:$0xff]  ;;  %v2066_v6 = vld [vmem:[%s12682_s12 + $0x168] sm:$0xff] }
 0x33b   : > { %v13236_v1 = vpack.c.bf16 %v1973_v59, %v1972_v58  ;;  %v13239_v7 = vpack.c.bf16 %v2066_v6, %v2065_v0  ;;  %v2149_v45 = vld [vmem:[%s12682_s12 + $0x30] sm:$0xff]  ;;  %v2236_v58 = vld [vmem:[%s12682_s12 + $0x18] sm:$0xff] }
 0x33c   : > { %12246 = vpow2.f32 %v7218_v12  ;;  %v1974_v12 = vld [vmem:[%s12682_s12 + $0x180] sm:$0xff]  ;;  %v2237_v59 = vld [vmem:[%s12682_s12 + $0x38] sm:$0xff] }
 0x33d   : > { %12248 = vpow2.f32 %v7217_v13  ;;  %v1975_v13 = vld [vmem:[%s12682_s12 + $0x1a0] sm:$0xff] }
 0x346   : > { %v12247_v18 = vpop.eup %12246 }
 0x347   : > { %v12249_v19 = vpop.eup %12248  ;;  %v1387_v24 = vadd.f32 1.0, %v12247_v18  ;;  %v2067_v18 = vld [vmem:[%s12682_s12 + $0x188] sm:$0xff] }
 0x348   : > { %v1294_v25 = vadd.f32 1.0, %v12249_v19  ;;  %v13245_v19 = vpack.c.bf16 %v1975_v13, %v1974_v12  ;;  %v13279_v12 = vpack.c.bf16 %v2237_v59, %v2236_v58  ;;  %v2150_v13 = vld [vmem:[%s12682_s12 + $0x50] sm:$0xff]  ;;  %v2250_v58 = vld [vmem:[%s12682_s12 + $0x1d8] sm:$0xff] }
 0x349   : > { %12250 = vrcp.f32 %v1387_v24  ;;  %v2068_v24 = vld [vmem:[%s12682_s12 + $0x1a8] sm:$0xff]  ;;  %v2251_v59 = vld [vmem:[%s12682_s12 + $0x1f8] sm:$0xff] }
 0x34a   : > { %12252 = vrcp.f32 %v1294_v25  ;;  %v13250_v25 = vpack.c.bf16 %v2068_v24, %v2067_v18  ;;  %v2151_v24 = vld [vmem:[%s12682_s12 + $0x70] sm:$0xff] }
 0x353   : > { %v12251_v56 = vpop.eup %12250 }
 0x354   : > { %v12253_v60 = vpop.eup %12252  ;;  %v1571_v2 = vmul.f32 %v12251_v56, %v13052_v35  ;;  %v13215_v35 = vpack.c.bf16 %v2062_v32, %v2061_v28 }
 0x357   : > { %v1472_v46 = vpop.f32.mrb[6].mxu0  ;;  %v1560_v49 = vpop.f32.mrb[6].mxu1 }
 0x358   : > { %v1476_v42 = vadd.f32 %v1472_v46, %v1202_v30  ;;  %v1564_v43 = vadd.f32 %v1560_v49, %v1203_v31  ;;  %v8619_v44 = vpop.f32.mrb[7].mxu0  ;;  %v8654_v53 = vpop.f32.mrb[7].mxu1  ;;  %v1976_v30 = vld [vmem:[%s12682_s12 + $0x1c0] sm:$0xff]  ;;  %v2069_v46 = vld [vmem:[%s12682_s12 + $0x1c8] sm:$0xff] }
 0x359   : > { %v1977_v31 = vld [vmem:[%s12682_s12 + $0x1e0] sm:$0xff]  ;;  %v2070_v49 = vld [vmem:[%s12682_s12 + $0x1e8] sm:$0xff] }
 0x35a   : > { %12254 = vtanh.f32 %v1476_v42  ;;  %v7219_v55 = vmul.f32 -1.442695, %v1564_v43  ;;  %v13258_v42 = vpack.c.bf16 %v1977_v31, %v1976_v30  ;;  %v13262_v43 = vpack.c.bf16 %v2070_v49, %v2069_v46  ;;  %v2238_v30 = vld [vmem:[%s12682_s12 + $0x58] sm:$0xff] }
 0x35b   : > { %v2239_v31 = vld [vmem:[%s12682_s12 + $0x78] sm:$0xff]  ;;  %v13293_v46 = vpack.c.bf16 %v2151_v24, %v2150_v13 }
 0x35c   : > { %12256 = vpow2.f32 %v7219_v55  ;;  %v13295_v49 = vpack.c.bf16 %v2239_v31, %v2238_v30  ;;  %v1959_v31 = vld [vmem:[#allocation2 + $0x68] sm:$0xff] }
 0x364   : > { %v12255_v63 = vpop.eup %12254 }
 0x365   : > { %v1572_v3 = vmul.f32 %v12255_v63, %v12253_v60  ;;  %v1580_v60 = vld [vmem:[#allocation2 + $0x48] sm:$0xff]  ;;  %v1579_v63 = vld [vmem:[#allocation2 + $0x40] sm:$0xff] }
 0x366   : > { %v12257_v4 = vpop.eup %12256 }
 0x367   : > { %v13129_v9 = vadd.f32 %v1572_v3, %v1571_v2  ;;  %v1568_v10 = vadd.f32 1.0, %v12257_v4 }
 0x369   : > { %12258 = vtanh.f32 %v13129_v9 }
 0x36a   : > { %12260 = vrcp.f32 %v1568_v10 }
 0x373   : > { %v12259_v11 = vpop.eup %12258 }
 0x374   : > { %v12261_v14 = vpop.eup %12260 }
 0x375   : > { %v1575_v17 = vmul.f32 %v12261_v14, %v12259_v11 }
 0x377   : > { %7220 = vst [vmem:[%s12707_s1 + $0x8] sm:$0xff] %v1575_v17  ;;  %8688 = vmatmul.mubr.f32.vlgmr.msra.gmra.mrb[8].mxu0 %v1575_v17  ;;  %8723 = vmatmul.mubr.f32.vlgmr.msra.gmra.mrb[8].mxu1 %v1575_v17 }
 0x378   : > { %10873 = vmatpush3.bf16.msra.mxu0 %v12913_v37  ;;  %10897 = vmatpush3.bf16.msra.mxu1 %v12917_v38  ;;  %v1962_v37 = vld [vmem:[%s12682_s12] sm:$0xff] }
 0x379   : > { %10874 = vmatprep.subr.bf16.mxu0 %v12543_v50  ;;  %10898 = vmatprep.subr.bf16.mxu1 %v12543_v50  ;;  %v1963_v38 = vld [vmem:[%s12682_s12 + $0x20] sm:$0xff] }
 0x37a   : > { %8757 = vmatprep.mubr.msk.f32.mxu0 %vm12544_vm1, %v12545_v57  ;;  %8792 = vmatprep.mubr.msk.f32.mxu1 %vm12544_vm1, %v12545_v57 }
 0x37c   : > { %10876 = vmatpush3.bf16.msra.mxu0 %v12927_v47  ;;  %10900 = vmatpush3.bf16.msra.mxu1 %v12931_v48  ;;  %v2055_v47 = vld [vmem:[%s12682_s12 + $0x8] sm:$0xff]  ;;  %v13176_v48 = vpack.c.bf16 %v1963_v38, %v1962_v37  ;;  %v1581_v38 = vld [vmem:[#allocation2 + $0x50] sm:$0xff] }
 0x37d   : > { %10877 = vmatprep.subr.bf16.mxu0 %v12543_v50  ;;  %10901 = vmatprep.subr.bf16.mxu1 %v12543_v50 }
 0x380   : > { %10879 = vmatpush3.bf16.msra.mxu0 %v12943_v51  ;;  %10903 = vmatpush3.bf16.msra.mxu1 %v12947_v52  ;;  %v2056_v51 = vld [vmem:[%s12682_s12 + $0x28] sm:$0xff] }
 0x381   : > { %10880 = vmatprep.subr.bf16.mxu0 %v12543_v50  ;;  %10904 = vmatprep.subr.bf16.mxu1 %v12543_v50  ;;  %v13179_v52 = vpack.c.bf16 %v2056_v51, %v2055_v47  ;;  %v1582_v47 = vld [vmem:[#allocation2 + $0x58] sm:$0xff] }
 0x384   : > { %10882 = vmatpush3.bf16.msra.mxu0 %v12955_v61  ;;  %10906 = vmatpush3.bf16.msra.mxu1 %v12959_v62  ;;  %v1964_v61 = vld [vmem:[%s12682_s12 + $0x40] sm:$0xff] }
 0x385   : > { %10883 = vmatprep.subr.bf16.mxu0 %v12543_v50  ;;  %10907 = vmatprep.subr.bf16.mxu1 %v12543_v50  ;;  %v1965_v62 = vld [vmem:[%s12682_s12 + $0x60] sm:$0xff] }
 0x388   : > { %10885 = vmatpush3.bf16.msra.mxu0 %v12967_v5  ;;  %10909 = vmatpush3.bf16.msra.mxu1 %v12971_v8  ;;  %v2057_v5 = vld [vmem:[%s12682_s12 + $0x48] sm:$0xff]  ;;  %v13188_v8 = vpack.c.bf16 %v1965_v62, %v1964_v61 }
 0x389   : > { %10886 = vmatprep.subr.bf16.mxu0 %v12543_v50  ;;  %10910 = vmatprep.subr.bf16.mxu1 %v12543_v50 }
 0x38c   : > { %10888 = vmatpush3.bf16.msra.mxu0 %v12979_v15  ;;  %10912 = vmatpush3.bf16.msra.mxu1 %v12983_v16  ;;  %v2058_v15 = vld [vmem:[%s12682_s12 + $0x68] sm:$0xff] }
 0x38d   : > { %10889 = vmatprep.subr.bf16.mxu0 %v12543_v50  ;;  %10913 = vmatprep.subr.bf16.mxu1 %v12543_v50  ;;  %v13191_v16 = vpack.c.bf16 %v2058_v15, %v2057_v5 }
 0x390   : > { %10891 = vmatpush3.bf16.msra.mxu0 %v12991_v23  ;;  %10915 = vmatpush3.bf16.msra.mxu1 %v12995_v26  ;;  %v1966_v23 = vld [vmem:[%s12682_s12 + $0x80] sm:$0xff] }
 0x391   : > { %10892 = vmatprep.subr.bf16.mxu0 %v12543_v50  ;;  %10916 = vmatprep.subr.bf16.mxu1 %v12543_v50  ;;  %v1967_v26 = vld [vmem:[%s12682_s12 + $0xa0] sm:$0xff] }
 0x394   : > { %10894 = vmatpush3.bf16.msra.mxu0 %v13003_v33  ;;  %10918 = vmatpush3.bf16.msra.mxu1 %v13007_v34  ;;  %v2059_v33 = vld [vmem:[%s12682_s12 + $0x88] sm:$0xff]  ;;  %v13200_v34 = vpack.c.bf16 %v1967_v26, %v1966_v23 }
 0x395   : > { %10919 = vmatprep.subr.bf16.mxu0 %v12543_v50  ;;  %10943 = vmatprep.subr.bf16.mxu1 %v12543_v50  ;;  %v13203_v21 = vpack.c.bf16 %v2060_v20, %v2059_v33 }
 0x397   : > { %8758 = vmatmul.mubr.f32.vlgmr.msra.gmra.mrb[10].mxu0 %v1575_v17  ;;  %8793 = vmatmul.mubr.f32.vlgmr.msra.gmra.mrb[10].mxu1 %v1575_v17 }
 0x398   : > { %8827 = vmatprep.mubr.msk.f32.mxu0 %vm12544_vm1, %v12545_v57  ;;  %8862 = vmatprep.mubr.msk.f32.mxu1 %vm12544_vm1, %v12545_v57 }
 0x399   : > { %10921 = vmatpush3.bf16.msra.mxu0 %v13176_v48  ;;  %10945 = vmatpush3.bf16.msra.mxu1 %v13179_v52 }
 0x39a   : > { %10922 = vmatprep.subr.bf16.mxu0 %v12543_v50  ;;  %10946 = vmatprep.subr.bf16.mxu1 %v12543_v50 }
 0x39d   : > { %10924 = vmatpush3.bf16.msra.mxu0 %v13188_v8  ;;  %10948 = vmatpush3.bf16.msra.mxu1 %v13191_v16 }
 0x39e   : > { %10925 = vmatprep.subr.bf16.mxu0 %v12543_v50  ;;  %10949 = vmatprep.subr.bf16.mxu1 %v12543_v50 }
 0x3a1   : > { %10927 = vmatpush3.bf16.msra.mxu0 %v13200_v34  ;;  %10951 = vmatpush3.bf16.msra.mxu1 %v13203_v21 }
 0x3a2   : > { %10928 = vmatprep.subr.bf16.mxu0 %v12543_v50  ;;  %10952 = vmatprep.subr.bf16.mxu1 %v12543_v50 }
 0x3a5   : > { %10930 = vmatpush3.bf16.msra.mxu0 %v13212_v29  ;;  %10954 = vmatpush3.bf16.msra.mxu1 %v13215_v35 }
 0x3a6   : > { %10931 = vmatprep.subr.bf16.mxu0 %v12543_v50  ;;  %10955 = vmatprep.subr.bf16.mxu1 %v12543_v50 }
 0x3a9   : > { %10933 = vmatpush3.bf16.msra.mxu0 %v13224_v41  ;;  %10957 = vmatpush3.bf16.msra.mxu1 %v13227_v54 }
 0x3aa   : > { %10934 = vmatprep.subr.bf16.mxu0 %v12543_v50  ;;  %10958 = vmatprep.subr.bf16.mxu1 %v12543_v50 }
 0x3ad   : > { %10936 = vmatpush3.bf16.msra.mxu0 %v13236_v1  ;;  %10960 = vmatpush3.bf16.msra.mxu1 %v13239_v7 }
 0x3ae   : > { %10937 = vmatprep.subr.bf16.mxu0 %v12543_v50  ;;  %10961 = vmatprep.subr.bf16.mxu1 %v12543_v50 }
 0x3b1   : > { %10939 = vmatpush3.bf16.msra.mxu0 %v13245_v19  ;;  %10963 = vmatpush3.bf16.msra.mxu1 %v13250_v25 }
 0x3b2   : > { %10940 = vmatprep.subr.bf16.mxu0 %v12543_v50  ;;  %10964 = vmatprep.subr.bf16.mxu1 %v12543_v50 }
 0x3b5   : > { %10942 = vmatpush3.bf16.msra.mxu0 %v13258_v42  ;;  %10966 = vmatpush3.bf16.msra.mxu1 %v13262_v43 }
 0x3b6   : > { %10967 = vmatprep.subr.bf16.mxu0 %v12543_v50  ;;  %10991 = vmatprep.subr.bf16.mxu1 %v12543_v50 }
 0x44a   : > { %v1665_v44 = vpop.f32.mrb[8].mxu0  ;;  %v1758_v53 = vpop.f32.mrb[8].mxu1 }
 0x44b   : > { %v8689_v55 = vpop.f32.mrb[9].mxu0  ;;  %v8724_v56 = vpop.f32.mrb[9].mxu1  ;;  %v1762_v2 = vadd.f32 %v1758_v53, %v1580_v60  ;;  %v1669_v3 = vadd.f32 %v1665_v44, %v1579_v63  ;;  %v2152_v44 = vld [vmem:[%s12682_s12 + $0x90] sm:$0xff] }
 0x44c   : > { %v2153_v53 = vld [vmem:[%s12682_s12 + $0xb0] sm:$0xff]  ;;  %v2240_v55 = vld [vmem:[%s12682_s12 + $0x98] sm:$0xff] }
 0x44d   : > { %v7222_v4 = vmul.f32 -1.442695, %v1762_v2  ;;  %v7221_v10 = vmul.f32 -1.442695, %v1669_v3  ;;  %v2241_v56 = vld [vmem:[%s12682_s12 + $0xb8] sm:$0xff]  ;;  %v13309_v60 = vpack.c.bf16 %v2153_v53, %v2152_v44  ;;  %v2154_v2 = vld [vmem:[%s12682_s12 + $0xd0] sm:$0xff] }
 0x44e   : > { %v13311_v63 = vpack.c.bf16 %v2241_v56, %v2240_v55  ;;  %v2155_v3 = vld [vmem:[%s12682_s12 + $0xf0] sm:$0xff]  ;;  %v1958_v44 = vld [vmem:[#allocation2 + $0x60] sm:$0xff] }
 0x44f   : > { %12262 = vpow2.f32 %v7222_v4  ;;  %v2242_v4 = vld [vmem:[%s12682_s12 + $0xd8] sm:$0xff] }
 0x450   : > { %12264 = vpow2.f32 %v7221_v10  ;;  %v2243_v10 = vld [vmem:[%s12682_s12 + $0xf8] sm:$0xff] }
 0x459   : > { %v12263_v11 = vpop.eup %12262 }
 0x45a   : > { %v12265_v14 = vpop.eup %12264  ;;  %v1766_v17 = vadd.f32 1.0, %v12263_v11  ;;  %v13321_v11 = vpack.c.bf16 %v2155_v3, %v2154_v2 }
 0x45b   : > { %v1673_v37 = vadd.f32 1.0, %v12265_v14  ;;  %v13323_v14 = vpack.c.bf16 %v2243_v10, %v2242_v4 }
 0x45c   : > { %12266 = vrcp.f32 %v1766_v17  ;;  %v2156_v17 = vld [vmem:[%s12682_s12 + $0x110] sm:$0xff] }
 0x45d   : > { %12268 = vrcp.f32 %v1673_v37  ;;  %v2157_v37 = vld [vmem:[%s12682_s12 + $0x130] sm:$0xff] }
 0x466   : > { %v12267_v33 = vpop.eup %12266 }
 0x467   : > { %v12269_v20 = vpop.eup %12268  ;;  %v1950_v27 = vmul.f32 %v12267_v33, %v13129_v9  ;;  %v13277_v9 = vpack.c.bf16 %v2149_v45, %v2148_v40  ;;  %v2162_v40 = vld [vmem:[%s12682_s12 + $0x1d0] sm:$0xff] }
 0x468   : > { %v2163_v45 = vld [vmem:[%s12682_s12 + $0x1f0] sm:$0xff] }
 0x46a   : > { %v1851_v51 = vpop.f32.mrb[10].mxu0  ;;  %v1939_v61 = vpop.f32.mrb[10].mxu1 }
 0x46b   : > { %v1855_v62 = vadd.f32 %v1851_v51, %v1581_v38  ;;  %v1943_v5 = vadd.f32 %v1939_v61, %v1582_v47  ;;  %v8759_v15 = vpop.f32.mrb[11].mxu0  ;;  %v8794_v23 = vpop.f32.mrb[11].mxu1  ;;  %v2244_v38 = vld [vmem:[%s12682_s12 + $0x118] sm:$0xff]  ;;  %v13333_v51 = vpack.c.bf16 %v2157_v37, %v2156_v17  ;;  %v1960_v37 = vld [vmem:[#allocation2 + $0x70] sm:$0xff] }
 0x46c   : > { %v2245_v47 = vld [vmem:[%s12682_s12 + $0x138] sm:$0xff] }
 0x46d   : > { %12270 = vtanh.f32 %v1855_v62  ;;  %v7223_v26 = vmul.f32 -1.442695, %v1943_v5  ;;  %v13335_v61 = vpack.c.bf16 %v2245_v47, %v2244_v38  ;;  %v2158_v62 = vld [vmem:[%s12682_s12 + $0x150] sm:$0xff]  ;;  %v2246_v15 = vld [vmem:[%s12682_s12 + $0x158] sm:$0xff] }
 0x46e   : > { %v2159_v5 = vld [vmem:[%s12682_s12 + $0x170] sm:$0xff]  ;;  %v2247_v23 = vld [vmem:[%s12682_s12 + $0x178] sm:$0xff] }
 0x46f   : > { %12272 = vpow2.f32 %v7223_v26  ;;  %v13345_v26 = vpack.c.bf16 %v2159_v5, %v2158_v62  ;;  %v13347_v33 = vpack.c.bf16 %v2247_v23, %v2246_v15  ;;  %v1961_v38 = vld [vmem:[#allocation2 + $0x78] sm:$0xff] }
 0x477   : > { %v12271_v22 = vpop.eup %12270 }
 0x478   : > { %v1951_v28 = vmul.f32 %v12271_v22, %v12269_v20  ;;  %v2160_v20 = vld [vmem:[%s12682_s12 + $0x190] sm:$0xff] }
 0x479   : > { %v12273_v32 = vpop.eup %12272  ;;  %v2161_v22 = vld [vmem:[%s12682_s12 + $0x1b0] sm:$0xff] }
 0x47a   : > { %v13270_v36 = vadd.f32 %v1951_v28, %v1950_v27  ;;  %v1947_v39 = vadd.f32 1.0, %v12273_v32  ;;  %v2248_v27 = vld [vmem:[%s12682_s12 + $0x198] sm:$0xff]  ;;  %v13357_v32 = vpack.c.bf16 %v2161_v22, %v2160_v20 }
 0x47b   : > { %v2249_v28 = vld [vmem:[%s12682_s12 + $0x1b8] sm:$0xff] }
 0x47c   : > { %12274 = vtanh.f32 %v13270_v36 }
 0x47d   : > { %12276 = vrcp.f32 %v1947_v39  ;;  %v13359_v39 = vpack.c.bf16 %v2249_v28, %v2248_v27 }
 0x486   : > { %v12275_v0 = vpop.eup %12274 }
 0x487   : > { %v12277_v6 = vpop.eup %12276 }
 0x488   : > { %v13282_v18 = vmul.f32 %v12277_v6, %v12275_v0  ;;  %v13369_v0 = vpack.c.bf16 %v2163_v45, %v2162_v40  ;;  %v13371_v6 = vpack.c.bf16 %v2251_v59, %v2250_v58 }
 0x48a   : > { %7224 = vst [vmem:[%s12707_s1 + $0x10] sm:$0xff] %v13282_v18  ;;  %8828 = vmatmul.mubr.f32.vlgmr.msra.gmra.mrb[12].mxu0 %v13282_v18  ;;  %8863 = vmatmul.mubr.f32.vlgmr.msra.gmra.mrb[12].mxu1 %v13282_v18 }
 0x48b   : > { %10969 = vmatpush3.bf16.msra.mxu0 %v13277_v9  ;;  %10993 = vmatpush3.bf16.msra.mxu1 %v13279_v12 }
 0x48c   : > { %10970 = vmatprep.subr.bf16.mxu0 %v12543_v50  ;;  %10994 = vmatprep.subr.bf16.mxu1 %v12543_v50 }
 0x48d   : > { %8897 = vmatprep.mubr.msk.f32.mxu0 %vm12544_vm1, %v12545_v57  ;;  %8932 = vmatprep.mubr.msk.f32.mxu1 %vm12544_vm1, %v12545_v57 }
 0x48f   : > { %10972 = vmatpush3.bf16.msra.mxu0 %v13293_v46  ;;  %10996 = vmatpush3.bf16.msra.mxu1 %v13295_v49 }
 0x490   : > { %10973 = vmatprep.subr.bf16.mxu0 %v12543_v50  ;;  %10997 = vmatprep.subr.bf16.mxu1 %v12543_v50 }
 0x493   : > { %10975 = vmatpush3.bf16.msra.mxu0 %v13309_v60  ;;  %10999 = vmatpush3.bf16.msra.mxu1 %v13311_v63 }
 0x494   : > { %10976 = vmatprep.subr.bf16.mxu0 %v12543_v50  ;;  %11000 = vmatprep.subr.bf16.mxu1 %v12543_v50 }
 0x497   : > { %10978 = vmatpush3.bf16.msra.mxu0 %v13321_v11  ;;  %11002 = vmatpush3.bf16.msra.mxu1 %v13323_v14 }
 0x498   : > { %10979 = vmatprep.subr.bf16.mxu0 %v12543_v50  ;;  %11003 = vmatprep.subr.bf16.mxu1 %v12543_v50 }
 0x49b   : > { %10981 = vmatpush3.bf16.msra.mxu0 %v13333_v51  ;;  %11005 = vmatpush3.bf16.msra.mxu1 %v13335_v61 }
 0x49c   : > { %10982 = vmatprep.subr.bf16.mxu0 %v12543_v50  ;;  %11006 = vmatprep.subr.bf16.mxu1 %v12543_v50 }
 0x49f   : > { %10984 = vmatpush3.bf16.msra.mxu0 %v13345_v26  ;;  %11008 = vmatpush3.bf16.msra.mxu1 %v13347_v33 }
 0x4a0   : > { %10985 = vmatprep.subr.bf16.mxu0 %v12543_v50  ;;  %11009 = vmatprep.subr.bf16.mxu1 %v12543_v50 }
 0x4a3   : > { %10987 = vmatpush3.bf16.msra.mxu0 %v13357_v32  ;;  %11011 = vmatpush3.bf16.msra.mxu1 %v13359_v39 }
 0x4a4   : > { %10988 = vmatprep.subr.bf16.mxu0 %v12543_v50  ;;  %11012 = vmatprep.subr.bf16.mxu1 %v12543_v50 }
 0x4a7   : > { %10990 = vmatpush3.bf16.msra.mxu0 %v13369_v0  ;;  %11014 = vmatpush3.bf16.msra.mxu1 %v13371_v6 }
 0x4a8   : > { %11015 = vmatprep.subr.bf16.mxu0 %v12543_v50  ;;  %11039 = vmatprep.subr.bf16.mxu1 %v12543_v50 }
 0x4aa   : > { %8898 = vmatmul.mubr.f32.vlgmr.msra.gmra.mrb[14].mxu0 %v13282_v18  ;;  %8933 = vmatmul.mubr.f32.vlgmr.msra.gmra.mrb[14].mxu1 %v13282_v18 }
 0x4ab   : > { %11017 = vmatpush3.bf16.msra.mxu0 %v13176_v48  ;;  %11041 = vmatpush3.bf16.msra.mxu1 %v13179_v52 }
 0x4ac   : > { %11018 = vmatprep.subr.bf16.mxu0 %v12543_v50  ;;  %11042 = vmatprep.subr.bf16.mxu1 %v12543_v50 }
 0x4ad   : > { %8967 = vmatprep.mubr.msk.f32.mxu0 %vm12544_vm1, %v12545_v57  ;;  %9002 = vmatprep.mubr.msk.f32.mxu1 %vm12544_vm1, %v12545_v57 }
 0x4af   : > { %11020 = vmatpush3.bf16.msra.mxu0 %v13188_v8  ;;  %11044 = vmatpush3.bf16.msra.mxu1 %v13191_v16 }
 0x4b0   : > { %11021 = vmatprep.subr.bf16.mxu0 %v12543_v50  ;;  %11045 = vmatprep.subr.bf16.mxu1 %v12543_v50 }
 0x4b3   : > { %11023 = vmatpush3.bf16.msra.mxu0 %v13200_v34  ;;  %11047 = vmatpush3.bf16.msra.mxu1 %v13203_v21 }
 0x4b4   : > { %11024 = vmatprep.subr.bf16.mxu0 %v12543_v50  ;;  %11048 = vmatprep.subr.bf16.mxu1 %v12543_v50 }
 0x4b7   : > { %11026 = vmatpush3.bf16.msra.mxu0 %v13212_v29  ;;  %11050 = vmatpush3.bf16.msra.mxu1 %v13215_v35 }
 0x4b8   : > { %11027 = vmatprep.subr.bf16.mxu0 %v12543_v50  ;;  %11051 = vmatprep.subr.bf16.mxu1 %v12543_v50 }
 0x4bb   : > { %11029 = vmatpush3.bf16.msra.mxu0 %v13224_v41  ;;  %11053 = vmatpush3.bf16.msra.mxu1 %v13227_v54 }
 0x4bc   : > { %11030 = vmatprep.subr.bf16.mxu0 %v12543_v50  ;;  %11054 = vmatprep.subr.bf16.mxu1 %v12543_v50 }
 0x4bf   : > { %11032 = vmatpush3.bf16.msra.mxu0 %v13236_v1  ;;  %11056 = vmatpush3.bf16.msra.mxu1 %v13239_v7 }
 0x4c0   : > { %11033 = vmatprep.subr.bf16.mxu0 %v12543_v50  ;;  %11057 = vmatprep.subr.bf16.mxu1 %v12543_v50 }
 0x4c3   : > { %11035 = vmatpush3.bf16.msra.mxu0 %v13245_v19  ;;  %11059 = vmatpush3.bf16.msra.mxu1 %v13250_v25 }
 0x4c4   : > { %11036 = vmatprep.subr.bf16.mxu0 %v12543_v50  ;;  %11060 = vmatprep.subr.bf16.mxu1 %v12543_v50 }
 0x4c7   : > { %11038 = vmatpush3.bf16.msra.mxu0 %v13258_v42  ;;  %11062 = vmatpush3.bf16.msra.mxu1 %v13262_v43 }
 0x4c8   : > { %11063 = vmatprep.subr.bf16.mxu0 %v12543_v50  ;;  %11087 = vmatprep.subr.bf16.mxu1 %v12543_v50 }
 0x55d   : > { %v2044_v13 = vpop.f32.mrb[12].mxu0  ;;  %v2137_v18 = vpop.f32.mrb[12].mxu1 }
 0x55e   : > { %v8829_v24 = vpop.f32.mrb[13].mxu0  ;;  %v8864_v30 = vpop.f32.mrb[13].mxu1  ;;  %v2141_v53 = vadd.f32 %v2137_v18, %v1959_v31  ;;  %v2048_v55 = vadd.f32 %v2044_v13, %v1958_v44 }
 0x560   : > { %v7226_v56 = vmul.f32 -1.442695, %v2141_v53  ;;  %v7225_v2 = vmul.f32 -1.442695, %v2048_v55 }
 0x562   : > { %12278 = vpow2.f32 %v7226_v56 }
 0x563   : > { %12280 = vpow2.f32 %v7225_v2 }
 0x56c   : > { %v12279_v3 = vpop.eup %12278 }
 0x56d   : > { %v12281_v4 = vpop.eup %12280  ;;  %v2145_v10 = vadd.f32 1.0, %v12279_v3 }
 0x56e   : > { %v2052_v17 = vadd.f32 1.0, %v12281_v4 }
 0x56f   : > { %12282 = vrcp.f32 %v2145_v10 }
 0x570   : > { %12284 = vrcp.f32 %v2052_v17 }
 0x579   : > { %v12283_v27 = vpop.eup %12282 }
 0x57a   : > { %v12285_v28 = vpop.eup %12284  ;;  %v2329_v45 = vmul.f32 %v12283_v27, %v13270_v36 }
 0x57d   : > { %v2230_v47 = vpop.f32.mrb[14].mxu0  ;;  %v2318_v62 = vpop.f32.mrb[14].mxu1 }
 0x57e   : > { %v2234_v5 = vadd.f32 %v2230_v47, %v1960_v37  ;;  %v2322_v15 = vadd.f32 %v2318_v62, %v1961_v38  ;;  %v8899_v23 = vpop.f32.mrb[15].mxu0  ;;  %v8934_v20 = vpop.f32.mrb[15].mxu1 }
 0x580   : > { %12286 = vtanh.f32 %v2234_v5  ;;  %v7227_v22 = vmul.f32 -1.442695, %v2322_v15 }
 0x582   : > { %12288 = vpow2.f32 %v7227_v22  ;;  %v3197_v22 = vld [vmem:[%s12682_s12 + $0xa8] sm:$0xff] }
 0x58a   : > { %v12287_v40 = vpop.eup %12286 }
 0x58b   : > { %v2330_v58 = vmul.f32 %v12287_v40, %v12285_v28  ;;  %v3105_v28 = vld [vmem:[%s12682_s12 + $0xc0] sm:$0xff] }
 0x58c   : > { %v12289_v59 = vpop.eup %12288  ;;  %v3106_v40 = vld [vmem:[%s12682_s12 + $0xe0] sm:$0xff] }
 0x58d   : > { %v13418_v13 = vadd.f32 %v2330_v58, %v2329_v45  ;;  %v2326_v18 = vadd.f32 1.0, %v12289_v59  ;;  %v3198_v45 = vld [vmem:[%s12682_s12 + $0xc8] sm:$0xff]  ;;  %v13578_v58 = vpack.c.bf16 %v3106_v40, %v3105_v28 }
 0x58e   : > { %v3199_v59 = vld [vmem:[%s12682_s12 + $0xe8] sm:$0xff] }
 0x58f   : > { %12290 = vtanh.f32 %v13418_v13 }
 0x590   : > { %12292 = vrcp.f32 %v2326_v18  ;;  %v3107_v18 = vld [vmem:[%s12682_s12 + $0x100] sm:$0xff] }
 0x599   : > { %v12291_v24 = vpop.eup %12290 }
 0x59a   : > { %v12293_v30 = vpop.eup %12292 }
 0x59b   : > { %v2333_v31 = vmul.f32 %v12293_v30, %v12291_v24  ;;  %v3108_v24 = vld [vmem:[%s12682_s12 + $0x120] sm:$0xff]  ;;  %v3200_v30 = vld [vmem:[%s12682_s12 + $0x108] sm:$0xff] }
 0x59d   : > { %7228 = vst [vmem:[%s12707_s1 + $0x18] sm:$0xff] %v2333_v31  ;;  %8968 = vmatmul.mubr.f32.vlgmr.msra.gmra.mrb[16].mxu0 %v2333_v31  ;;  %9003 = vmatmul.mubr.f32.vlgmr.msra.gmra.mrb[16].mxu1 %v2333_v31 }
 0x59e   : > { %11065 = vmatpush3.bf16.msra.mxu0 %v13277_v9  ;;  %11089 = vmatpush3.bf16.msra.mxu1 %v13279_v12 }
 0x59f   : > { %11066 = vmatprep.subr.bf16.mxu0 %v12543_v50  ;;  %11090 = vmatprep.subr.bf16.mxu1 %v12543_v50 }
 0x5a0   : > { %9037 = vmatprep.mubr.msk.f32.mxu0 %vm12544_vm1, %v12545_v57  ;;  %9072 = vmatprep.mubr.msk.f32.mxu1 %vm12544_vm1, %v12545_v57 }
 0x5a2   : > { %11068 = vmatpush3.bf16.msra.mxu0 %v13293_v46  ;;  %11092 = vmatpush3.bf16.msra.mxu1 %v13295_v49 }
 0x5a3   : > { %11069 = vmatprep.subr.bf16.mxu0 %v12543_v50  ;;  %11093 = vmatprep.subr.bf16.mxu1 %v12543_v50 }
 0x5a6   : > { %11071 = vmatpush3.bf16.msra.mxu0 %v13309_v60  ;;  %11095 = vmatpush3.bf16.msra.mxu1 %v13311_v63 }
 0x5a7   : > { %11072 = vmatprep.subr.bf16.mxu0 %v12543_v50  ;;  %11096 = vmatprep.subr.bf16.mxu1 %v12543_v50 }
 0x5aa   : > { %11074 = vmatpush3.bf16.msra.mxu0 %v13321_v11  ;;  %11098 = vmatpush3.bf16.msra.mxu1 %v13323_v14 }
 0x5ab   : > { %11075 = vmatprep.subr.bf16.mxu0 %v12543_v50  ;;  %11099 = vmatprep.subr.bf16.mxu1 %v12543_v50 }
 0x5ae   : > { %11077 = vmatpush3.bf16.msra.mxu0 %v13333_v51  ;;  %11101 = vmatpush3.bf16.msra.mxu1 %v13335_v61 }
 0x5af   : > { %11078 = vmatprep.subr.bf16.mxu0 %v12543_v50  ;;  %11102 = vmatprep.subr.bf16.mxu1 %v12543_v50 }
 0x5b2   : > { %11080 = vmatpush3.bf16.msra.mxu0 %v13345_v26  ;;  %11104 = vmatpush3.bf16.msra.mxu1 %v13347_v33 }
 0x5b3   : > { %11081 = vmatprep.subr.bf16.mxu0 %v12543_v50  ;;  %11105 = vmatprep.subr.bf16.mxu1 %v12543_v50 }
 0x5b6   : > { %11083 = vmatpush3.bf16.msra.mxu0 %v13357_v32  ;;  %11107 = vmatpush3.bf16.msra.mxu1 %v13359_v39 }
 0x5b7   : > { %11084 = vmatprep.subr.bf16.mxu0 %v12543_v50  ;;  %11108 = vmatprep.subr.bf16.mxu1 %v12543_v50 }
 0x5ba   : > { %11086 = vmatpush3.bf16.msra.mxu0 %v13369_v0  ;;  %11110 = vmatpush3.bf16.msra.mxu1 %v13371_v6 }
 0x5bb   : > { %11111 = vmatprep.subr.bf16.mxu0 %v12543_v50  ;;  %11135 = vmatprep.subr.bf16.mxu1 %v12543_v50 }
 0x5bd   : > { %9038 = vmatmul.mubr.f32.vlgmr.msra.gmra.mrb[18].mxu0 %v2333_v31  ;;  %9073 = vmatmul.mubr.f32.vlgmr.msra.gmra.mrb[18].mxu1 %v2333_v31  ;;  %v13590_v31 = vpack.c.bf16 %v3108_v24, %v3107_v18 }
 0x5be   : > { %11113 = vmatpush3.bf16.msra.mxu0 %v13176_v48  ;;  %11137 = vmatpush3.bf16.msra.mxu1 %v13179_v52 }
 0x5bf   : > { %11114 = vmatprep.subr.bf16.mxu0 %v12543_v50  ;;  %11138 = vmatprep.subr.bf16.mxu1 %v12543_v50 }
 0x5c0   : > { %9107 = vmatprep.mubr.msk.f32.mxu0 %vm12544_vm1, %v12545_v57  ;;  %9142 = vmatprep.mubr.msk.f32.mxu1 %vm12544_vm1, %v12545_v57 }
 0x5c2   : > { %11116 = vmatpush3.bf16.msra.mxu0 %v13188_v8  ;;  %11140 = vmatpush3.bf16.msra.mxu1 %v13191_v16 }
 0x5c3   : > { %11117 = vmatprep.subr.bf16.mxu0 %v12543_v50  ;;  %11141 = vmatprep.subr.bf16.mxu1 %v12543_v50 }
 0x5c6   : > { %11119 = vmatpush3.bf16.msra.mxu0 %v13200_v34  ;;  %11143 = vmatpush3.bf16.msra.mxu1 %v13203_v21  ;;  %v2338_v34 = vld [vmem:[#allocation2 + $0x88] sm:$0xff]  ;;  %v2337_v21 = vld [vmem:[#allocation2 + $0x80] sm:$0xff] }
 0x5c7   : > { %11120 = vmatprep.subr.bf16.mxu0 %v12543_v50  ;;  %11144 = vmatprep.subr.bf16.mxu1 %v12543_v50 }
 0x5ca   : > { %11122 = vmatpush3.bf16.msra.mxu0 %v13212_v29  ;;  %11146 = vmatpush3.bf16.msra.mxu1 %v13215_v35 }
 0x5cb   : > { %11123 = vmatprep.subr.bf16.mxu0 %v12543_v50  ;;  %11147 = vmatprep.subr.bf16.mxu1 %v12543_v50 }
 0x5ce   : > { %11125 = vmatpush3.bf16.msra.mxu0 %v13224_v41  ;;  %11149 = vmatpush3.bf16.msra.mxu1 %v13227_v54 }
 0x5cf   : > { %11126 = vmatprep.subr.bf16.mxu0 %v12543_v50  ;;  %11150 = vmatprep.subr.bf16.mxu1 %v12543_v50 }
 0x5d2   : > { %11128 = vmatpush3.bf16.msra.mxu0 %v13236_v1  ;;  %11152 = vmatpush3.bf16.msra.mxu1 %v13239_v7 }
 0x5d3   : > { %11129 = vmatprep.subr.bf16.mxu0 %v12543_v50  ;;  %11153 = vmatprep.subr.bf16.mxu1 %v12543_v50 }
 0x5d6   : > { %11131 = vmatpush3.bf16.msra.mxu0 %v13245_v19  ;;  %11155 = vmatpush3.bf16.msra.mxu1 %v13250_v25 }
 0x5d7   : > { %11132 = vmatprep.subr.bf16.mxu0 %v12543_v50  ;;  %11156 = vmatprep.subr.bf16.mxu1 %v12543_v50 }
 0x5da   : > { %11134 = vmatpush3.bf16.msra.mxu0 %v13258_v42  ;;  %11158 = vmatpush3.bf16.msra.mxu1 %v13262_v43  ;;  %v2339_v42 = vld [vmem:[#allocation2 + $0x90] sm:$0xff]  ;;  %v2340_v43 = vld [vmem:[#allocation2 + $0x98] sm:$0xff] }
 0x5db   : > { %11159 = vmatprep.subr.bf16.mxu0 %v12543_v50  ;;  %11183 = vmatprep.subr.bf16.mxu1 %v12543_v50 }
 0x670   : > { %v2423_v48 = vpop.f32.mrb[16].mxu0  ;;  %v2516_v52 = vpop.f32.mrb[16].mxu1 }
 0x671   : > { %v8969_v8 = vpop.f32.mrb[17].mxu0  ;;  %v9004_v16 = vpop.f32.mrb[17].mxu1  ;;  %v2520_v29 = vadd.f32 %v2516_v52, %v2338_v34  ;;  %v2427_v35 = vadd.f32 %v2423_v48, %v2337_v21  ;;  %v3201_v48 = vld [vmem:[%s12682_s12 + $0x128] sm:$0xff] }
 0x672   : > { %v13593_v52 = vpack.c.bf16 %v3201_v48, %v3200_v30  ;;  %v3109_v8 = vld [vmem:[%s12682_s12 + $0x140] sm:$0xff]  ;;  %v3202_v34 = vld [vmem:[%s12682_s12 + $0x148] sm:$0xff]  ;;  %v3285_v30 = vld [vmem:[%s12682_s12 + $0x10] sm:$0xff] }
 0x673   : > { %v7230_v41 = vmul.f32 -1.442695, %v2520_v29  ;;  %v7229_v54 = vmul.f32 -1.442695, %v2427_v35  ;;  %v3110_v16 = vld [vmem:[%s12682_s12 + $0x160] sm:$0xff]  ;;  %v3203_v29 = vld [vmem:[%s12682_s12 + $0x168] sm:$0xff] }
 0x674   : > { %v13602_v21 = vpack.c.bf16 %v3110_v16, %v3109_v8  ;;  %v13605_v35 = vpack.c.bf16 %v3203_v29, %v3202_v34  ;;  %v3286_v48 = vld [vmem:[%s12682_s12 + $0x30] sm:$0xff]  ;;  %v3373_v8 = vld [vmem:[%s12682_s12 + $0x18] sm:$0xff] }
 0x675   : > { %12294 = vpow2.f32 %v7230_v41  ;;  %v3111_v41 = vld [vmem:[%s12682_s12 + $0x180] sm:$0xff]  ;;  %v3374_v16 = vld [vmem:[%s12682_s12 + $0x38] sm:$0xff] }
 0x676   : > { %12296 = vpow2.f32 %v7229_v54  ;;  %v3112_v54 = vld [vmem:[%s12682_s12 + $0x1a0] sm:$0xff] }
 0x67f   : > { %v12295_v1 = vpop.eup %12294 }
 0x680   : > { %v12297_v7 = vpop.eup %12296  ;;  %v2524_v19 = vadd.f32 1.0, %v12295_v1  ;;  %v3204_v1 = vld [vmem:[%s12682_s12 + $0x188] sm:$0xff] }
 0x681   : > { %v2431_v25 = vadd.f32 1.0, %v12297_v7  ;;  %v13611_v7 = vpack.c.bf16 %v3112_v54, %v3111_v41  ;;  %v13645_v41 = vpack.c.bf16 %v3374_v16, %v3373_v8  ;;  %v3287_v54 = vld [vmem:[%s12682_s12 + $0x50] sm:$0xff]  ;;  %v3387_v8 = vld [vmem:[%s12682_s12 + $0x1d8] sm:$0xff] }
 0x682   : > { %12298 = vrcp.f32 %v2524_v19  ;;  %v3205_v19 = vld [vmem:[%s12682_s12 + $0x1a8] sm:$0xff]  ;;  %v3388_v16 = vld [vmem:[%s12682_s12 + $0x1f8] sm:$0xff] }
 0x683   : > { %12300 = vrcp.f32 %v2431_v25  ;;  %v13616_v25 = vpack.c.bf16 %v3205_v19, %v3204_v1  ;;  %v3288_v19 = vld [vmem:[%s12682_s12 + $0x70] sm:$0xff] }
 0x68c   : > { %v12299_v4 = vpop.eup %12298 }
 0x68d   : > { %v12301_v10 = vpop.eup %12300  ;;  %v2708_v37 = vmul.f32 %v12299_v4, %v13418_v13  ;;  %v13581_v13 = vpack.c.bf16 %v3199_v59, %v3198_v45 }
 0x690   : > { %v2609_v36 = vpop.f32.mrb[18].mxu0  ;;  %v2697_v44 = vpop.f32.mrb[18].mxu1 }
 0x691   : > { %v2613_v53 = vadd.f32 %v2609_v36, %v2339_v42  ;;  %v2701_v55 = vadd.f32 %v2697_v44, %v2340_v43  ;;  %v9039_v56 = vpop.f32.mrb[19].mxu0  ;;  %v9074_v2 = vpop.f32.mrb[19].mxu1  ;;  %v3113_v42 = vld [vmem:[%s12682_s12 + $0x1c0] sm:$0xff]  ;;  %v3206_v36 = vld [vmem:[%s12682_s12 + $0x1c8] sm:$0xff] }
 0x692   : > { %v3114_v43 = vld [vmem:[%s12682_s12 + $0x1e0] sm:$0xff]  ;;  %v3207_v44 = vld [vmem:[%s12682_s12 + $0x1e8] sm:$0xff] }
 0x693   : > { %12302 = vtanh.f32 %v2613_v53  ;;  %v7231_v3 = vmul.f32 -1.442695, %v2701_v55  ;;  %v13624_v53 = vpack.c.bf16 %v3114_v43, %v3113_v42  ;;  %v13628_v55 = vpack.c.bf16 %v3207_v44, %v3206_v36  ;;  %v3375_v42 = vld [vmem:[%s12682_s12 + $0x58] sm:$0xff] }
 0x694   : > { %v3376_v43 = vld [vmem:[%s12682_s12 + $0x78] sm:$0xff]  ;;  %v13659_v36 = vpack.c.bf16 %v3288_v19, %v3287_v54 }
 0x695   : > { %12304 = vpow2.f32 %v7231_v3  ;;  %v13661_v44 = vpack.c.bf16 %v3376_v43, %v3375_v42 }
 0x69d   : > { %v12303_v17 = vpop.eup %12302 }
 0x69e   : > { %v2709_v38 = vmul.f32 %v12303_v17, %v12301_v10  ;;  %v2717_v10 = vld [vmem:[#allocation2 + $0xa8] sm:$0xff]  ;;  %v2716_v17 = vld [vmem:[#allocation2 + $0xa0] sm:$0xff] }
 0x69f   : > { %v12305_v47 = vpop.eup %12304 }
 0x6a0   : > { %v13495_v62 = vadd.f32 %v2709_v38, %v2708_v37  ;;  %v2705_v5 = vadd.f32 1.0, %v12305_v47 }
 0x6a2   : > { %12306 = vtanh.f32 %v13495_v62 }
 0x6a3   : > { %12308 = vrcp.f32 %v2705_v5 }
 0x6ac   : > { %v12307_v15 = vpop.eup %12306 }
 0x6ad   : > { %v12309_v23 = vpop.eup %12308 }
 0x6ae   : > { %v2712_v20 = vmul.f32 %v12309_v23, %v12307_v15 }
 0x6b0   : > { %7232 = vst [vmem:[%s12707_s1 + $0x20] sm:$0xff] %v2712_v20  ;;  %9108 = vmatmul.mubr.f32.vlgmr.msra.gmra.mrb[20].mxu0 %v2712_v20  ;;  %9143 = vmatmul.mubr.f32.vlgmr.msra.gmra.mrb[20].mxu1 %v2712_v20 }
 0x6b1   : > { %11161 = vmatpush3.bf16.msra.mxu0 %v13277_v9  ;;  %11185 = vmatpush3.bf16.msra.mxu1 %v13279_v12  ;;  %v3099_v9 = vld [vmem:[%s12682_s12] sm:$0xff] }
 0x6b2   : > { %11162 = vmatprep.subr.bf16.mxu0 %v12543_v50  ;;  %11186 = vmatprep.subr.bf16.mxu1 %v12543_v50  ;;  %v3100_v12 = vld [vmem:[%s12682_s12 + $0x20] sm:$0xff] }
 0x6b3   : > { %9177 = vmatprep.mubr.msk.f32.mxu0 %vm12544_vm1, %v12545_v57  ;;  %9212 = vmatprep.mubr.msk.f32.mxu1 %vm12544_vm1, %v12545_v57 }
 0x6b5   : > { %11164 = vmatpush3.bf16.msra.mxu0 %v13293_v46  ;;  %11188 = vmatpush3.bf16.msra.mxu1 %v13295_v49  ;;  %v3192_v46 = vld [vmem:[%s12682_s12 + $0x8] sm:$0xff]  ;;  %v13542_v49 = vpack.c.bf16 %v3100_v12, %v3099_v9  ;;  %v2718_v12 = vld [vmem:[#allocation2 + $0xb0] sm:$0xff] }
 0x6b6   : > { %11165 = vmatprep.subr.bf16.mxu0 %v12543_v50  ;;  %11189 = vmatprep.subr.bf16.mxu1 %v12543_v50 }
 0x6b9   : > { %11167 = vmatpush3.bf16.msra.mxu0 %v13309_v60  ;;  %11191 = vmatpush3.bf16.msra.mxu1 %v13311_v63  ;;  %v3193_v60 = vld [vmem:[%s12682_s12 + $0x28] sm:$0xff] }
 0x6ba   : > { %11168 = vmatprep.subr.bf16.mxu0 %v12543_v50  ;;  %11192 = vmatprep.subr.bf16.mxu1 %v12543_v50  ;;  %v13545_v63 = vpack.c.bf16 %v3193_v60, %v3192_v46  ;;  %v2719_v46 = vld [vmem:[#allocation2 + $0xb8] sm:$0xff] }
 0x6bd   : > { %11170 = vmatpush3.bf16.msra.mxu0 %v13321_v11  ;;  %11194 = vmatpush3.bf16.msra.mxu1 %v13323_v14  ;;  %v3101_v11 = vld [vmem:[%s12682_s12 + $0x40] sm:$0xff] }
 0x6be   : > { %11171 = vmatprep.subr.bf16.mxu0 %v12543_v50  ;;  %11195 = vmatprep.subr.bf16.mxu1 %v12543_v50  ;;  %v3102_v14 = vld [vmem:[%s12682_s12 + $0x60] sm:$0xff] }
 0x6c1   : > { %11173 = vmatpush3.bf16.msra.mxu0 %v13333_v51  ;;  %11197 = vmatpush3.bf16.msra.mxu1 %v13335_v61  ;;  %v3194_v51 = vld [vmem:[%s12682_s12 + $0x48] sm:$0xff]  ;;  %v13554_v61 = vpack.c.bf16 %v3102_v14, %v3101_v11 }
 0x6c2   : > { %11174 = vmatprep.subr.bf16.mxu0 %v12543_v50  ;;  %11198 = vmatprep.subr.bf16.mxu1 %v12543_v50 }
 0x6c5   : > { %11176 = vmatpush3.bf16.msra.mxu0 %v13345_v26  ;;  %11200 = vmatpush3.bf16.msra.mxu1 %v13347_v33  ;;  %v3195_v26 = vld [vmem:[%s12682_s12 + $0x68] sm:$0xff] }
 0x6c6   : > { %11177 = vmatprep.subr.bf16.mxu0 %v12543_v50  ;;  %11201 = vmatprep.subr.bf16.mxu1 %v12543_v50  ;;  %v13557_v33 = vpack.c.bf16 %v3195_v26, %v3194_v51 }
 0x6c9   : > { %11179 = vmatpush3.bf16.msra.mxu0 %v13357_v32  ;;  %11203 = vmatpush3.bf16.msra.mxu1 %v13359_v39  ;;  %v3103_v32 = vld [vmem:[%s12682_s12 + $0x80] sm:$0xff] }
 0x6ca   : > { %11180 = vmatprep.subr.bf16.mxu0 %v12543_v50  ;;  %11204 = vmatprep.subr.bf16.mxu1 %v12543_v50  ;;  %v3104_v39 = vld [vmem:[%s12682_s12 + $0xa0] sm:$0xff] }
 0x6cd   : > { %11182 = vmatpush3.bf16.msra.mxu0 %v13369_v0  ;;  %11206 = vmatpush3.bf16.msra.mxu1 %v13371_v6  ;;  %v3196_v0 = vld [vmem:[%s12682_s12 + $0x88] sm:$0xff]  ;;  %v13566_v6 = vpack.c.bf16 %v3104_v39, %v3103_v32 }
 0x6ce   : > { %11207 = vmatprep.subr.bf16.mxu0 %v12543_v50  ;;  %11231 = vmatprep.subr.bf16.mxu1 %v12543_v50  ;;  %v13569_v27 = vpack.c.bf16 %v3197_v22, %v3196_v0 }
 0x6d0   : > { %9178 = vmatmul.mubr.f32.vlgmr.msra.gmra.mrb[22].mxu0 %v2712_v20  ;;  %9213 = vmatmul.mubr.f32.vlgmr.msra.gmra.mrb[22].mxu1 %v2712_v20 }
 0x6d1   : > { %9247 = vmatprep.mubr.msk.f32.mxu0 %vm12544_vm1, %v12545_v57  ;;  %9282 = vmatprep.mubr.msk.f32.mxu1 %vm12544_vm1, %v12545_v57 }
 0x6d2   : > { %11209 = vmatpush3.bf16.msra.mxu0 %v13542_v49  ;;  %11233 = vmatpush3.bf16.msra.mxu1 %v13545_v63 }
 0x6d3   : > { %11210 = vmatprep.subr.bf16.mxu0 %v12543_v50  ;;  %11234 = vmatprep.subr.bf16.mxu1 %v12543_v50 }
 0x6d6   : > { %11212 = vmatpush3.bf16.msra.mxu0 %v13554_v61  ;;  %11236 = vmatpush3.bf16.msra.mxu1 %v13557_v33 }
 0x6d7   : > { %11213 = vmatprep.subr.bf16.mxu0 %v12543_v50  ;;  %11237 = vmatprep.subr.bf16.mxu1 %v12543_v50 }
 0x6da   : > { %11215 = vmatpush3.bf16.msra.mxu0 %v13566_v6  ;;  %11239 = vmatpush3.bf16.msra.mxu1 %v13569_v27 }
 0x6db   : > { %11216 = vmatprep.subr.bf16.mxu0 %v12543_v50  ;;  %11240 = vmatprep.subr.bf16.mxu1 %v12543_v50 }
 0x6de   : > { %11218 = vmatpush3.bf16.msra.mxu0 %v13578_v58  ;;  %11242 = vmatpush3.bf16.msra.mxu1 %v13581_v13 }
 0x6df   : > { %11219 = vmatprep.subr.bf16.mxu0 %v12543_v50  ;;  %11243 = vmatprep.subr.bf16.mxu1 %v12543_v50 }
 0x6e2   : > { %11221 = vmatpush3.bf16.msra.mxu0 %v13590_v31  ;;  %11245 = vmatpush3.bf16.msra.mxu1 %v13593_v52 }
 0x6e3   : > { %11222 = vmatprep.subr.bf16.mxu0 %v12543_v50  ;;  %11246 = vmatprep.subr.bf16.mxu1 %v12543_v50 }
 0x6e6   : > { %11224 = vmatpush3.bf16.msra.mxu0 %v13602_v21  ;;  %11248 = vmatpush3.bf16.msra.mxu1 %v13605_v35 }
 0x6e7   : > { %11225 = vmatprep.subr.bf16.mxu0 %v12543_v50  ;;  %11249 = vmatprep.subr.bf16.mxu1 %v12543_v50 }
 0x6ea   : > { %11227 = vmatpush3.bf16.msra.mxu0 %v13611_v7  ;;  %11251 = vmatpush3.bf16.msra.mxu1 %v13616_v25 }
 0x6eb   : > { %11228 = vmatprep.subr.bf16.mxu0 %v12543_v50  ;;  %11252 = vmatprep.subr.bf16.mxu1 %v12543_v50 }
 0x6ee   : > { %11230 = vmatpush3.bf16.msra.mxu0 %v13624_v53  ;;  %11254 = vmatpush3.bf16.msra.mxu1 %v13628_v55 }
 0x6ef   : > { %11255 = vmatprep.subr.bf16.mxu0 %v12543_v50  ;;  %11279 = vmatprep.subr.bf16.mxu1 %v12543_v50 }
 0x783   : > { %v2802_v56 = vpop.f32.mrb[20].mxu0  ;;  %v2895_v2 = vpop.f32.mrb[20].mxu1 }
 0x784   : > { %v9109_v3 = vpop.f32.mrb[21].mxu0  ;;  %v9144_v4 = vpop.f32.mrb[21].mxu1  ;;  %v2899_v37 = vadd.f32 %v2895_v2, %v2717_v10  ;;  %v2806_v38 = vadd.f32 %v2802_v56, %v2716_v17  ;;  %v3289_v56 = vld [vmem:[%s12682_s12 + $0x90] sm:$0xff] }
 0x785   : > { %v3290_v2 = vld [vmem:[%s12682_s12 + $0xb0] sm:$0xff]  ;;  %v3377_v3 = vld [vmem:[%s12682_s12 + $0x98] sm:$0xff] }
 0x786   : > { %v7234_v47 = vmul.f32 -1.442695, %v2899_v37  ;;  %v7233_v5 = vmul.f32 -1.442695, %v2806_v38  ;;  %v3378_v4 = vld [vmem:[%s12682_s12 + $0xb8] sm:$0xff]  ;;  %v13675_v10 = vpack.c.bf16 %v3290_v2, %v3289_v56  ;;  %v3291_v37 = vld [vmem:[%s12682_s12 + $0xd0] sm:$0xff] }
 0x787   : > { %v13677_v17 = vpack.c.bf16 %v3378_v4, %v3377_v3  ;;  %v3292_v38 = vld [vmem:[%s12682_s12 + $0xf0] sm:$0xff] }
 0x788   : > { %12310 = vpow2.f32 %v7234_v47  ;;  %v3379_v47 = vld [vmem:[%s12682_s12 + $0xd8] sm:$0xff] }
 0x789   : > { %12312 = vpow2.f32 %v7233_v5  ;;  %v3380_v5 = vld [vmem:[%s12682_s12 + $0xf8] sm:$0xff] }
 0x792   : > { %v12311_v15 = vpop.eup %12310 }
 0x793   : > { %v12313_v23 = vpop.eup %12312  ;;  %v2903_v20 = vadd.f32 1.0, %v12311_v15  ;;  %v13687_v15 = vpack.c.bf16 %v3292_v38, %v3291_v37 }
 0x794   : > { %v2810_v9 = vadd.f32 1.0, %v12313_v23  ;;  %v13689_v23 = vpack.c.bf16 %v3380_v5, %v3379_v47 }
 0x795   : > { %12314 = vrcp.f32 %v2903_v20  ;;  %v3293_v20 = vld [vmem:[%s12682_s12 + $0x110] sm:$0xff] }
 0x796   : > { %12316 = vrcp.f32 %v2810_v9  ;;  %v3294_v9 = vld [vmem:[%s12682_s12 + $0x130] sm:$0xff] }
 0x79f   : > { %v12315_v0 = vpop.eup %12314 }
 0x7a0   : > { %v12317_v22 = vpop.eup %12316  ;;  %v3087_v40 = vmul.f32 %v12315_v0, %v13495_v62  ;;  %v13643_v62 = vpack.c.bf16 %v3286_v48, %v3285_v30  ;;  %v3299_v30 = vld [vmem:[%s12682_s12 + $0x1d0] sm:$0xff] }
 0x7a1   : > { %v3300_v48 = vld [vmem:[%s12682_s12 + $0x1f0] sm:$0xff] }
 0x7a3   : > { %v2988_v60 = vpop.f32.mrb[22].mxu0  ;;  %v3076_v11 = vpop.f32.mrb[22].mxu1 }
 0x7a4   : > { %v2992_v14 = vadd.f32 %v2988_v60, %v2718_v12  ;;  %v3080_v51 = vadd.f32 %v3076_v11, %v2719_v46  ;;  %v9179_v26 = vpop.f32.mrb[23].mxu0  ;;  %v9214_v32 = vpop.f32.mrb[23].mxu1  ;;  %v3381_v12 = vld [vmem:[%s12682_s12 + $0x118] sm:$0xff]  ;;  %v13699_v60 = vpack.c.bf16 %v3294_v9, %v3293_v20 }
 0x7a5   : > { %v3382_v46 = vld [vmem:[%s12682_s12 + $0x138] sm:$0xff] }
 0x7a6   : > { %12318 = vtanh.f32 %v2992_v14  ;;  %v7235_v39 = vmul.f32 -1.442695, %v3080_v51  ;;  %v13701_v11 = vpack.c.bf16 %v3382_v46, %v3381_v12  ;;  %v3295_v14 = vld [vmem:[%s12682_s12 + $0x150] sm:$0xff]  ;;  %v3383_v26 = vld [vmem:[%s12682_s12 + $0x158] sm:$0xff] }
 0x7a7   : > { %v3296_v51 = vld [vmem:[%s12682_s12 + $0x170] sm:$0xff]  ;;  %v3384_v32 = vld [vmem:[%s12682_s12 + $0x178] sm:$0xff] }
 0x7a8   : > { %12320 = vpow2.f32 %v7235_v39  ;;  %v13711_v39 = vpack.c.bf16 %v3296_v51, %v3295_v14  ;;  %v13713_v0 = vpack.c.bf16 %v3384_v32, %v3383_v26  ;;  %v3476_v26 = vld [vmem:[#allocation2 + $0xf0] sm:$0xff]  ;;  %v3477_v32 = vld [vmem:[#allocation2 + $0xf8] sm:$0xff] }
 0x7b0   : > { %v12319_v28 = vpop.eup %12318 }
 0x7b1   : > { %v3088_v45 = vmul.f32 %v12319_v28, %v12317_v22  ;;  %v3297_v22 = vld [vmem:[%s12682_s12 + $0x190] sm:$0xff] }
 0x7b2   : > { %v12321_v59 = vpop.eup %12320  ;;  %v3298_v28 = vld [vmem:[%s12682_s12 + $0x1b0] sm:$0xff] }
 0x7b3   : > { %v13636_v18 = vadd.f32 %v3088_v45, %v3087_v40  ;;  %v3084_v24 = vadd.f32 1.0, %v12321_v59  ;;  %v3385_v40 = vld [vmem:[%s12682_s12 + $0x198] sm:$0xff]  ;;  %v13723_v59 = vpack.c.bf16 %v3298_v28, %v3297_v22 }
 0x7b4   : > { %v3386_v45 = vld [vmem:[%s12682_s12 + $0x1b8] sm:$0xff] }
 0x7b5   : > { %12322 = vtanh.f32 %v13636_v18 }
 0x7b6   : > { %12324 = vrcp.f32 %v3084_v24  ;;  %v13725_v24 = vpack.c.bf16 %v3386_v45, %v3385_v40 }
 0x7bf   : > { %v12323_v34 = vpop.eup %12322 }
 0x7c0   : > { %v12325_v29 = vpop.eup %12324 }
 0x7c1   : > { %v13648_v1 = vmul.f32 %v12325_v29, %v12323_v34  ;;  %v13735_v34 = vpack.c.bf16 %v3300_v48, %v3299_v30  ;;  %v13737_v29 = vpack.c.bf16 %v3388_v16, %v3387_v8 }
 0x7c3   : > { %7236 = vst [vmem:[%s12707_s1 + $0x28] sm:$0xff] %v13648_v1  ;;  %9248 = vmatmul.mubr.f32.vlgmr.msra.gmra.mrb[24].mxu0 %v13648_v1  ;;  %9283 = vmatmul.mubr.f32.vlgmr.msra.gmra.mrb[24].mxu1 %v13648_v1 }
 0x7c4   : > { %11257 = vmatpush3.bf16.msra.mxu0 %v13643_v62  ;;  %11281 = vmatpush3.bf16.msra.mxu1 %v13645_v41 }
 0x7c5   : > { %11258 = vmatprep.subr.bf16.mxu0 %v12543_v50  ;;  %11282 = vmatprep.subr.bf16.mxu1 %v12543_v50 }
 0x7c6   : > { %9317 = vmatprep.mubr.msk.f32.mxu0 %vm12544_vm1, %v12545_v57  ;;  %9352 = vmatprep.mubr.msk.f32.mxu1 %vm12544_vm1, %v12545_v57 }
 0x7c8   : > { %11260 = vmatpush3.bf16.msra.mxu0 %v13659_v36  ;;  %11284 = vmatpush3.bf16.msra.mxu1 %v13661_v44 }
 0x7c9   : > { %11261 = vmatprep.subr.bf16.mxu0 %v12543_v50  ;;  %11285 = vmatprep.subr.bf16.mxu1 %v12543_v50 }
 0x7cc   : > { %11263 = vmatpush3.bf16.msra.mxu0 %v13675_v10  ;;  %11287 = vmatpush3.bf16.msra.mxu1 %v13677_v17 }
 0x7cd   : > { %11264 = vmatprep.subr.bf16.mxu0 %v12543_v50  ;;  %11288 = vmatprep.subr.bf16.mxu1 %v12543_v50 }
 0x7d0   : > { %11266 = vmatpush3.bf16.msra.mxu0 %v13687_v15  ;;  %11290 = vmatpush3.bf16.msra.mxu1 %v13689_v23 }
 0x7d1   : > { %11267 = vmatprep.subr.bf16.mxu0 %v12543_v50  ;;  %11291 = vmatprep.subr.bf16.mxu1 %v12543_v50 }
 0x7d4   : > { %11269 = vmatpush3.bf16.msra.mxu0 %v13699_v60  ;;  %11293 = vmatpush3.bf16.msra.mxu1 %v13701_v11 }
 0x7d5   : > { %11270 = vmatprep.subr.bf16.mxu0 %v12543_v50  ;;  %11294 = vmatprep.subr.bf16.mxu1 %v12543_v50 }
 0x7d8   : > { %11272 = vmatpush3.bf16.msra.mxu0 %v13711_v39  ;;  %11296 = vmatpush3.bf16.msra.mxu1 %v13713_v0 }
 0x7d9   : > { %11273 = vmatprep.subr.bf16.mxu0 %v12543_v50  ;;  %11297 = vmatprep.subr.bf16.mxu1 %v12543_v50 }
 0x7dc   : > { %11275 = vmatpush3.bf16.msra.mxu0 %v13723_v59  ;;  %11299 = vmatpush3.bf16.msra.mxu1 %v13725_v24 }
 0x7dd   : > { %11276 = vmatprep.subr.bf16.mxu0 %v12543_v50  ;;  %11300 = vmatprep.subr.bf16.mxu1 %v12543_v50 }
 0x7e0   : > { %11278 = vmatpush3.bf16.msra.mxu0 %v13735_v34  ;;  %11302 = vmatpush3.bf16.msra.mxu1 %v13737_v29 }
 0x7e1   : > { %11303 = vmatprep.subr.bf16.mxu0 %v12543_v50  ;;  %11327 = vmatprep.subr.bf16.mxu1 %v12543_v50 }
 0x7e3   : > { %9318 = vmatmul.mubr.f32.vlgmr.msra.gmra.mrb[26].mxu0 %v13648_v1  ;;  %9353 = vmatmul.mubr.f32.vlgmr.msra.gmra.mrb[26].mxu1 %v13648_v1 }
 0x7e4   : > { %11305 = vmatpush3.bf16.msra.mxu0 %v13542_v49  ;;  %11329 = vmatpush3.bf16.msra.mxu1 %v13545_v63 }
 0x7e5   : > { %11306 = vmatprep.subr.bf16.mxu0 %v12543_v50  ;;  %11330 = vmatprep.subr.bf16.mxu1 %v12543_v50 }
 0x7e6   : > { %9387 = vmatprep.mubr.msk.f32.mxu0 %vm12544_vm1, %v12545_v57  ;;  %9422 = vmatprep.mubr.msk.f32.mxu1 %vm12544_vm1, %v12545_v57 }
 0x7e8   : > { %11308 = vmatpush3.bf16.msra.mxu0 %v13554_v61  ;;  %11332 = vmatpush3.bf16.msra.mxu1 %v13557_v33 }
 0x7e9   : > { %11309 = vmatprep.subr.bf16.mxu0 %v12543_v50  ;;  %11333 = vmatprep.subr.bf16.mxu1 %v12543_v50 }
 0x7ec   : > { %11311 = vmatpush3.bf16.msra.mxu0 %v13566_v6  ;;  %11335 = vmatpush3.bf16.msra.mxu1 %v13569_v27  ;;  %v3096_v6 = vld [vmem:[#allocation2 + $0xc8] sm:$0xff]  ;;  %v3095_v27 = vld [vmem:[#allocation2 + $0xc0] sm:$0xff] }
 0x7ed   : > { %11312 = vmatprep.subr.bf16.mxu0 %v12543_v50  ;;  %11336 = vmatprep.subr.bf16.mxu1 %v12543_v50 }
 0x7f0   : > { %11314 = vmatpush3.bf16.msra.mxu0 %v13578_v58  ;;  %11338 = vmatpush3.bf16.msra.mxu1 %v13581_v13 }
 0x7f1   : > { %11315 = vmatprep.subr.bf16.mxu0 %v12543_v50  ;;  %11339 = vmatprep.subr.bf16.mxu1 %v12543_v50 }
 0x7f4   : > { %11317 = vmatpush3.bf16.msra.mxu0 %v13590_v31  ;;  %11341 = vmatpush3.bf16.msra.mxu1 %v13593_v52 }
 0x7f5   : > { %11318 = vmatprep.subr.bf16.mxu0 %v12543_v50  ;;  %11342 = vmatprep.subr.bf16.mxu1 %v12543_v50 }
 0x7f8   : > { %11320 = vmatpush3.bf16.msra.mxu0 %v13602_v21  ;;  %11344 = vmatpush3.bf16.msra.mxu1 %v13605_v35 }
 0x7f9   : > { %11321 = vmatprep.subr.bf16.mxu0 %v12543_v50  ;;  %11345 = vmatprep.subr.bf16.mxu1 %v12543_v50 }
 0x7fc   : > { %11323 = vmatpush3.bf16.msra.mxu0 %v13611_v7  ;;  %11347 = vmatpush3.bf16.msra.mxu1 %v13616_v25 }
 0x7fd   : > { %11324 = vmatprep.subr.bf16.mxu0 %v12543_v50  ;;  %11348 = vmatprep.subr.bf16.mxu1 %v12543_v50 }
 0x800   : > { %11326 = vmatpush3.bf16.msra.mxu0 %v13624_v53  ;;  %11350 = vmatpush3.bf16.msra.mxu1 %v13628_v55  ;;  %v3097_v53 = vld [vmem:[#allocation2 + $0xd0] sm:$0xff]  ;;  %v3098_v55 = vld [vmem:[#allocation2 + $0xd8] sm:$0xff] }
 0x801   : > { %11351 = vmatprep.subr.bf16.mxu0 %v12543_v50  ;;  %11375 = vmatprep.subr.bf16.mxu1 %v12543_v50 }
 0x896   : > { %v3181_v49 = vpop.f32.mrb[24].mxu0  ;;  %v3274_v63 = vpop.f32.mrb[24].mxu1 }
 0x897   : > { %v9249_v61 = vpop.f32.mrb[25].mxu0  ;;  %v9284_v33 = vpop.f32.mrb[25].mxu1  ;;  %v3278_v58 = vadd.f32 %v3274_v63, %v3096_v6  ;;  %v3185_v13 = vadd.f32 %v3181_v49, %v3095_v27 }
 0x899   : > { %v7238_v31 = vmul.f32 -1.442695, %v3278_v58  ;;  %v7237_v52 = vmul.f32 -1.442695, %v3185_v13 }
 0x89b   : > { %12326 = vpow2.f32 %v7238_v31 }
 0x89c   : > { %12328 = vpow2.f32 %v7237_v52 }
 0x8a5   : > { %v12327_v21 = vpop.eup %12326 }
 0x8a6   : > { %v12329_v35 = vpop.eup %12328  ;;  %v3282_v7 = vadd.f32 1.0, %v12327_v21 }
 0x8a7   : > { %v3189_v25 = vadd.f32 1.0, %v12329_v35 }
 0x8a8   : > { %12330 = vrcp.f32 %v3282_v7 }
 0x8a9   : > { %12332 = vrcp.f32 %v3189_v25 }
 0x8b2   : > { %v12331_v3 = vpop.eup %12330 }
 0x8b3   : > { %v12333_v4 = vpop.eup %12332  ;;  %v3466_v38 = vmul.f32 %v12331_v3, %v13636_v18 }
 0x8b6   : > { %v3367_v54 = vpop.f32.mrb[26].mxu0  ;;  %v3455_v1 = vpop.f32.mrb[26].mxu1 }
 0x8b7   : > { %v3371_v19 = vadd.f32 %v3367_v54, %v3097_v53  ;;  %v3459_v42 = vadd.f32 %v3455_v1, %v3098_v55  ;;  %v9319_v43 = vpop.f32.mrb[27].mxu0  ;;  %v9354_v56 = vpop.f32.mrb[27].mxu1 }
 0x8b9   : > { %12334 = vtanh.f32 %v3371_v19  ;;  %v7239_v2 = vmul.f32 -1.442695, %v3459_v42 }
 0x8bb   : > { %12336 = vpow2.f32 %v7239_v2 }
 0x8c3   : > { %v12335_v37 = vpop.eup %12334 }
 0x8c4   : > { %v3467_v47 = vmul.f32 %v12335_v37, %v12333_v4 }
 0x8c5   : > { %v12337_v5 = vpop.eup %12336 }
 0x8c6   : > { %v13784_v20 = vadd.f32 %v3467_v47, %v3466_v38  ;;  %v3463_v9 = vadd.f32 1.0, %v12337_v5 }
 0x8c8   : > { %12338 = vtanh.f32 %v13784_v20 }
 0x8c9   : > { %12340 = vrcp.f32 %v3463_v9 }
 0x8d2   : > { %v12339_v12 = vpop.eup %12338 }
 0x8d3   : > { %v12341_v46 = vpop.eup %12340 }
 0x8d4   : > { %v3470_v14 = vmul.f32 %v12341_v46, %v12339_v12 }
 0x8d6   : > { %7240 = vst [vmem:[%s12707_s1 + $0x30] sm:$0xff] %v3470_v14  ;;  %9388 = vmatmul.mubr.f32.vlgmr.msra.gmra.mrb[28].mxu0 %v3470_v14  ;;  %9423 = vmatmul.mubr.f32.vlgmr.msra.gmra.mrb[28].mxu1 %v3470_v14 }
 0x8d7   : > { %11353 = vmatpush3.bf16.msra.mxu0 %v13643_v62  ;;  %11377 = vmatpush3.bf16.msra.mxu1 %v13645_v41 }
 0x8d8   : > { %11354 = vmatprep.subr.bf16.mxu0 %v12543_v50  ;;  %11378 = vmatprep.subr.bf16.mxu1 %v12543_v50 }
 0x8d9   : > { %9457 = vmatprep.mubr.msk.f32.mxu0 %vm12544_vm1, %v12545_v57  ;;  %9492 = vmatprep.mubr.msk.f32.mxu1 %vm12544_vm1, %v12545_v57 }
 0x8db   : > { %11356 = vmatpush3.bf16.msra.mxu0 %v13659_v36  ;;  %11380 = vmatpush3.bf16.msra.mxu1 %v13661_v44  ;;  %v3475_v36 = vld [vmem:[#allocation2 + $0xe8] sm:$0xff]  ;;  %v3474_v44 = vld [vmem:[#allocation2 + $0xe0] sm:$0xff] }
 0x8dc   : > { %11357 = vmatprep.subr.bf16.mxu0 %v12543_v50  ;;  %11381 = vmatprep.subr.bf16.mxu1 %v12543_v50 }
 0x8df   : > { %11359 = vmatpush3.bf16.msra.mxu0 %v13675_v10  ;;  %11383 = vmatpush3.bf16.msra.mxu1 %v13677_v17 }
 0x8e0   : > { %11360 = vmatprep.subr.bf16.mxu0 %v12543_v50  ;;  %11384 = vmatprep.subr.bf16.mxu1 %v12543_v50 }
 0x8e3   : > { %11362 = vmatpush3.bf16.msra.mxu0 %v13687_v15  ;;  %11386 = vmatpush3.bf16.msra.mxu1 %v13689_v23 }
 0x8e4   : > { %11363 = vmatprep.subr.bf16.mxu0 %v12543_v50  ;;  %11387 = vmatprep.subr.bf16.mxu1 %v12543_v50 }
 0x8e7   : > { %11365 = vmatpush3.bf16.msra.mxu0 %v13699_v60  ;;  %11389 = vmatpush3.bf16.msra.mxu1 %v13701_v11 }
 0x8e8   : > { %11366 = vmatprep.subr.bf16.mxu0 %v12543_v50  ;;  %11390 = vmatprep.subr.bf16.mxu1 %v12543_v50 }
 0x8eb   : > { %11368 = vmatpush3.bf16.msra.mxu0 %v13711_v39  ;;  %11392 = vmatpush3.bf16.msra.mxu1 %v13713_v0 }
 0x8ec   : > { %11369 = vmatprep.subr.bf16.mxu0 %v12543_v50  ;;  %11393 = vmatprep.subr.bf16.mxu1 %v12543_v50 }
 0x8ef   : > { %11371 = vmatpush3.bf16.msra.mxu0 %v13723_v59  ;;  %11395 = vmatpush3.bf16.msra.mxu1 %v13725_v24 }
 0x8f0   : > { %11372 = vmatprep.subr.bf16.mxu0 %v12543_v50  ;;  %11396 = vmatprep.subr.bf16.mxu1 %v12543_v50 }
 0x8f3   : > { %11374 = vmatpush3.bf16.msra.mxu0 %v13735_v34  ;;  %11398 = vmatpush3.bf16.msra.mxu1 %v13737_v29 }
 0x8f6   : > { %9458 = vmatmul.mubr.f32.vlgmr.msra.gmra.mrb[30].mxu0 %v3470_v14  ;;  %9493 = vmatmul.mubr.f32.vlgmr.msra.gmra.mrb[30].mxu1 %v3470_v14 }
 0x9a9   : > { %v3560_v57 = vpop.f32.mrb[28].mxu0  ;;  %v3653_v18 = vpop.f32.mrb[28].mxu1 }
 0x9aa   : > { %v9389_v62 = vpop.f32.mrb[29].mxu0  ;;  %v9424_v41 = vpop.f32.mrb[29].mxu1  ;;  %v3657_v10 = vadd.f32 %v3653_v18, %v3475_v36  ;;  %v3564_v17 = vadd.f32 %v3560_v57, %v3474_v44 }
 0x9ac   : > { %v7242_v15 = vmul.f32 -1.442695, %v3657_v10  ;;  %v7241_v23 = vmul.f32 -1.442695, %v3564_v17 }
 0x9ae   : > { %12342 = vpow2.f32 %v7242_v15 }
 0x9af   : > { %12344 = vpow2.f32 %v7241_v23 }
 0x9b8   : > { %v12343_v60 = vpop.eup %12342 }
 0x9b9   : > { %v12345_v50 = vpop.eup %12344  ;;  %v3661_v11 = vadd.f32 1.0, %v12343_v60 }
 0x9ba   : > { %v3568_v51 = vadd.f32 1.0, %v12345_v50 }
 0x9bb   : > { %12346 = vrcp.f32 %v3661_v11 }
 0x9bc   : > { %12348 = vrcp.f32 %v3568_v51 }
 0x9c5   : > { %v12347_v24 = vpop.eup %12346 }
 0x9c6   : > { %v12349_v30 = vpop.eup %12348  ;;  %v3845_v8 = vmul.f32 %v12347_v24, %v13784_v20 }
 0x9c9   : > { %v3746_v39 = vpop.f32.mrb[30].mxu0  ;;  %v3834_v0 = vpop.f32.mrb[30].mxu1 }
 0x9ca   : > { %v3750_v22 = vadd.f32 %v3746_v39, %v3476_v26  ;;  %v3838_v28 = vadd.f32 %v3834_v0, %v3477_v32  ;;  %v9459_v40 = vpop.f32.mrb[31].mxu0  ;;  %v9494_v45 = vpop.f32.mrb[31].mxu1 }
 0x9cc   : > { %12350 = vtanh.f32 %v3750_v22  ;;  %v7243_v59 = vmul.f32 -1.442695, %v3838_v28 }
 0x9ce   : > { %12352 = vpow2.f32 %v7243_v59 }
 0x9d6   : > { %v12351_v48 = vpop.eup %12350 }
 0x9d7   : > { %v3846_v16 = vmul.f32 %v12351_v48, %v12349_v30 }
 0x9d8   : > { %v12353_v34 = vpop.eup %12352 }
 0x9d9   : > { %v3847_v29 = vadd.f32 %v3846_v16, %v3845_v8  ;;  %v3842_v49 = vadd.f32 1.0, %v12353_v34 }
 0x9db   : > { %12354 = vtanh.f32 %v3847_v29  ;;  %3853 = vst [vmem:[#allocation4] sm:$0xff] %v3847_v29 }
 0x9dc   : > { %12356 = vrcp.f32 %v3842_v49 }
 0x9e5   : > { %v12355_v63 = vpop.eup %12354 }
 0x9e6   : > { %v12357_v61 = vpop.eup %12356 }
 0x9e7   : > { %v3849_v33 = vmul.f32 %v12357_v61, %v12355_v63 }
 0x9e9   : > { %7244 = vst [vmem:[%s12707_s1 + $0x38] sm:$0xff] %v3849_v33  ;;  %3852 = vst [vmem:[#allocation3] sm:$0xff] %v3849_v33 }
 0x9ea PF: > { %p7245_p13 = scmp.ne.s32.totalorder %s12528_s30, 1 }
 0x9eb   : > { %v3865_v6 = vld [vmem:[%s12682_s12] sm:$0xff] (!%p7245_p13)  ;;  %v3958_v58 = vld [vmem:[%s12682_s12 + $0x8] sm:$0xff] (!%p7245_p13)  ;;  %v12546_v13 = vmov (!%p7245_p13), 0.0|0.0   ;;  %vm12547_vm2 = vmmov (!%p7245_p13), 0   ;;  %v12548_v55 = vmov (!%p7245_p13), 0.0   ;;  %v4051_v40 = vld [vmem:[%s12682_s12 + $0x10] sm:$0xff] (!%p7245_p13) }
 0x9ec   : > { %3857 = sbr.rel (%p7245_p13) target bundleno = 4775 (0x12a7), region = 56  ;;  %v3866_v27 = vld [vmem:[%s12682_s12 + $0x20] sm:$0xff] (!%p7245_p13)  ;;  %11399 = vmatprep.subr.bf16.mxu0 (!%p7245_p13), %v12546_v13  ;;  %11423 = vmatprep.subr.bf16.mxu1 (!%p7245_p13), %v12546_v13  ;;  %v3959_v52 = vld [vmem:[%s12682_s12 + $0x28] sm:$0xff] (!%p7245_p13)  ;;  %v4052_v45 = vld [vmem:[%s12682_s12 + $0x30] sm:$0xff] (!%p7245_p13) }
 0x9ed   : > { %v13830_v31 = vpack.c.bf16 (!%p7245_p13), %v3866_v27, %v3865_v6  ;;  %v3867_v21 = vld [vmem:[%s12682_s12 + $0x40] sm:$0xff] (!%p7245_p13)  ;;  %v13835_v7 = vpack.c.bf16 (!%p7245_p13), %v3959_v52, %v3958_v58  ;;  %v3960_v25 = vld [vmem:[%s12682_s12 + $0x48] sm:$0xff] (!%p7245_p13)  ;;  %9527 = vmatprep.mubr.msk.f32.mxu0 (!%p7245_p13), %vm12547_vm2, %v12548_v55  ;;  %9562 = vmatprep.mubr.msk.f32.mxu1 (!%p7245_p13), %vm12547_vm2, %v12548_v55  ;;  %v4139_v59 = vld [vmem:[%s12682_s12 + $0x18] sm:$0xff] (!%p7245_p13)  ;;  %v13930_v48 = vpack.c.bf16 (!%p7245_p13), %v4052_v45, %v4051_v40 }
 0x9ee   : > { %v3868_v35 = vld [vmem:[%s12682_s12 + $0x60] sm:$0xff] (!%p7245_p13)  ;;  %v3961_v53 = vld [vmem:[%s12682_s12 + $0x68] sm:$0xff] (!%p7245_p13)  ;;  %v4140_v24 = vld [vmem:[%s12682_s12 + $0x38] sm:$0xff] (!%p7245_p13) }
 0x9ef   : > { %11401 = vmatpush3.bf16.msra.mxu0 (!%p7245_p13), %v13830_v31  ;;  %v13844_v54 = vpack.c.bf16 (!%p7245_p13), %v3868_v35, %v3867_v21  ;;  %11425 = vmatpush3.bf16.msra.mxu1 (!%p7245_p13), %v13835_v7  ;;  %v13848_v1 = vpack.c.bf16 (!%p7245_p13), %v3961_v53, %v3960_v25  ;;  %v3869_v19 = vld [vmem:[%s12682_s12 + $0x80] sm:$0xff] (!%p7245_p13)  ;;  %v3962_v43 = vld [vmem:[%s12682_s12 + $0x88] sm:$0xff] (!%p7245_p13)  ;;  %v13934_v8 = vpack.c.bf16 (!%p7245_p13), %v4140_v24, %v4139_v59  ;;  %v4053_v16 = vld [vmem:[%s12682_s12 + $0x50] sm:$0xff] (!%p7245_p13) }
 0x9f0   : > { %11402 = vmatprep.subr.bf16.mxu0 (!%p7245_p13), %v12546_v13  ;;  %v3870_v42 = vld [vmem:[%s12682_s12 + $0xa0] sm:$0xff] (!%p7245_p13)  ;;  %11426 = vmatprep.subr.bf16.mxu1 (!%p7245_p13), %v12546_v13  ;;  %v3963_v56 = vld [vmem:[%s12682_s12 + $0xa8] sm:$0xff] (!%p7245_p13)  ;;  %v4054_v34 = vld [vmem:[%s12682_s12 + $0x70] sm:$0xff] (!%p7245_p13) }
 0x9f1   : > { %v13856_v2 = vpack.c.bf16 (!%p7245_p13), %v3870_v42, %v3869_v19  ;;  %v13860_v3 = vpack.c.bf16 (!%p7245_p13), %v3963_v56, %v3962_v43  ;;  %v3871_v4 = vld [vmem:[%s12682_s12 + $0xc0] sm:$0xff] (!%p7245_p13)  ;;  %v3964_v38 = vld [vmem:[%s12682_s12 + $0xc8] sm:$0xff] (!%p7245_p13)  ;;  %v4141_v29 = vld [vmem:[%s12682_s12 + $0x58] sm:$0xff] (!%p7245_p13)  ;;  %v13944_v63 = vpack.c.bf16 (!%p7245_p13), %v4054_v34, %v4053_v16 }
 0x9f2   : > { %v3872_v37 = vld [vmem:[%s12682_s12 + $0xe0] sm:$0xff] (!%p7245_p13)  ;;  %v3965_v47 = vld [vmem:[%s12682_s12 + $0xe8] sm:$0xff] (!%p7245_p13)  ;;  %v4142_v49 = vld [vmem:[%s12682_s12 + $0x78] sm:$0xff] (!%p7245_p13) }
 0x9f3   : > { %11404 = vmatpush3.bf16.msra.mxu0 %v13844_v54  ;;  %11428 = vmatpush3.bf16.msra.mxu1 %v13848_v1  ;;  %v13868_v5 = vpack.c.bf16 %v3872_v37, %v3871_v4  ;;  %v13872_v20 = vpack.c.bf16 %v3965_v47, %v3964_v38  ;;  %v3873_v9 = vld [vmem:[%s12682_s12 + $0x100] sm:$0xff]  ;;  %v3966_v46 = vld [vmem:[%s12682_s12 + $0x108] sm:$0xff]  ;;  %v13948_v61 = vpack.c.bf16 %v4142_v49, %v4141_v29  ;;  %v4055_v33 = vld [vmem:[%s12682_s12 + $0x90] sm:$0xff] }
 0x9f4   : > { %11405 = vmatprep.subr.bf16.mxu0 %v12546_v13  ;;  %11429 = vmatprep.subr.bf16.mxu1 %v12546_v13  ;;  %v3874_v12 = vld [vmem:[%s12682_s12 + $0x120] sm:$0xff]  ;;  %v3967_v14 = vld [vmem:[%s12682_s12 + $0x128] sm:$0xff]  ;;  %v4056_v6 = vld [vmem:[%s12682_s12 + $0xb0] sm:$0xff] }
 0x9f5   : > { %v13880_v57 = vpack.c.bf16 %v3874_v12, %v3873_v9  ;;  %v13884_v18 = vpack.c.bf16 %v3967_v14, %v3966_v46  ;;  %v3875_v62 = vld [vmem:[%s12682_s12 + $0x140] sm:$0xff]  ;;  %v3968_v36 = vld [vmem:[%s12682_s12 + $0x148] sm:$0xff]  ;;  %v4143_v27 = vld [vmem:[%s12682_s12 + $0x98] sm:$0xff]  ;;  %v13960_v52 = vpack.c.bf16 %v4056_v6, %v4055_v33 }
 0x9f6   : > { %v3876_v41 = vld [vmem:[%s12682_s12 + $0x160] sm:$0xff]  ;;  %v3969_v44 = vld [vmem:[%s12682_s12 + $0x168] sm:$0xff]  ;;  %v4144_v58 = vld [vmem:[%s12682_s12 + $0xb8] sm:$0xff] }
 0x9f7   : > { %11407 = vmatpush3.bf16.msra.mxu0 %v13856_v2  ;;  %11431 = vmatpush3.bf16.msra.mxu1 %v13860_v3  ;;  %v13892_v10 = vpack.c.bf16 %v3876_v41, %v3875_v62  ;;  %v13896_v17 = vpack.c.bf16 %v3969_v44, %v3968_v36  ;;  %v3877_v15 = vld [vmem:[%s12682_s12 + $0x180] sm:$0xff]  ;;  %v3970_v60 = vld [vmem:[%s12682_s12 + $0x188] sm:$0xff]  ;;  %v13964_v21 = vpack.c.bf16 %v4144_v58, %v4143_v27  ;;  %v4057_v35 = vld [vmem:[%s12682_s12 + $0xd0] sm:$0xff] }
 0x9f8   : > { %11408 = vmatprep.subr.bf16.mxu0 %v12546_v13  ;;  %11432 = vmatprep.subr.bf16.mxu1 %v12546_v13  ;;  %v3878_v23 = vld [vmem:[%s12682_s12 + $0x1a0] sm:$0xff]  ;;  %v3971_v50 = vld [vmem:[%s12682_s12 + $0x1a8] sm:$0xff]  ;;  %v4058_v25 = vld [vmem:[%s12682_s12 + $0xf0] sm:$0xff] }
 0x9f9   : > { %v13904_v11 = vpack.c.bf16 %v3878_v23, %v3877_v15  ;;  %v13908_v51 = vpack.c.bf16 %v3971_v50, %v3970_v60  ;;  %v3879_v26 = vld [vmem:[%s12682_s12 + $0x1c0] sm:$0xff]  ;;  %v3972_v39 = vld [vmem:[%s12682_s12 + $0x1c8] sm:$0xff]  ;;  %v4145_v53 = vld [vmem:[%s12682_s12 + $0xd8] sm:$0xff]  ;;  %v13972_v42 = vpack.c.bf16 %v4058_v25, %v4057_v35 }
 0x9fa   : > { %v3880_v32 = vld [vmem:[%s12682_s12 + $0x1e0] sm:$0xff]  ;;  %v3973_v0 = vld [vmem:[%s12682_s12 + $0x1e8] sm:$0xff]  ;;  %v4146_v19 = vld [vmem:[%s12682_s12 + $0xf8] sm:$0xff] }
 0x9fb   : > { %11410 = vmatpush3.bf16.msra.mxu0 %v13868_v5  ;;  %11434 = vmatpush3.bf16.msra.mxu1 %v13872_v20  ;;  %v13916_v22 = vpack.c.bf16 %v3880_v32, %v3879_v26  ;;  %v13920_v28 = vpack.c.bf16 %v3973_v0, %v3972_v39  ;;  %v13928_v30 = vld [vmem:[#allocation3] sm:$0xff]  ;;  %v13976_v43 = vpack.c.bf16 %v4146_v19, %v4145_v53  ;;  %v4059_v56 = vld [vmem:[%s12682_s12 + $0x110] sm:$0xff]  ;;  %v4147_v37 = vld [vmem:[%s12682_s12 + $0x118] sm:$0xff] }
 0x9fc   : > { %11411 = vmatprep.subr.bf16.mxu0 %v12546_v13  ;;  %11435 = vmatprep.subr.bf16.mxu1 %v12546_v13  ;;  %v4060_v4 = vld [vmem:[%s12682_s12 + $0x130] sm:$0xff]  ;;  %v4148_v38 = vld [vmem:[%s12682_s12 + $0x138] sm:$0xff]  ;;  %v3862_v29 = vld [vmem:[#allocation2 + $0xe8] sm:$0xff] }
 0x9fd   : > { %v13984_v47 = vpack.c.bf16 %v4060_v4, %v4059_v56  ;;  %v13988_v9 = vpack.c.bf16 %v4148_v38, %v4147_v37  ;;  %v4061_v12 = vld [vmem:[%s12682_s12 + $0x150] sm:$0xff]  ;;  %v4149_v14 = vld [vmem:[%s12682_s12 + $0x158] sm:$0xff]  ;;  %v3861_v49 = vld [vmem:[#allocation2 + $0xe0] sm:$0xff] }
 0x9fe   : > { %v4062_v46 = vld [vmem:[%s12682_s12 + $0x170] sm:$0xff]  ;;  %v4150_v62 = vld [vmem:[%s12682_s12 + $0x178] sm:$0xff] }
 0x9ff   : > { %11413 = vmatpush3.bf16.msra.mxu0 %v13880_v57  ;;  %11437 = vmatpush3.bf16.msra.mxu1 %v13884_v18  ;;  %v13996_v41 = vpack.c.bf16 %v4062_v46, %v4061_v12  ;;  %v14000_v36 = vpack.c.bf16 %v4150_v62, %v4149_v14  ;;  %v4063_v44 = vld [vmem:[%s12682_s12 + $0x190] sm:$0xff]  ;;  %v4151_v23 = vld [vmem:[%s12682_s12 + $0x198] sm:$0xff] }
 0xa00   : > { %11414 = vmatprep.subr.bf16.mxu0 %v12546_v13  ;;  %11438 = vmatprep.subr.bf16.mxu1 %v12546_v13  ;;  %v4064_v15 = vld [vmem:[%s12682_s12 + $0x1b0] sm:$0xff]  ;;  %v4152_v60 = vld [vmem:[%s12682_s12 + $0x1b8] sm:$0xff] }
 0xa01   : > { %v14008_v50 = vpack.c.bf16 %v4064_v15, %v4063_v44  ;;  %v14012_v26 = vpack.c.bf16 %v4152_v60, %v4151_v23  ;;  %v4065_v32 = vld [vmem:[%s12682_s12 + $0x1d0] sm:$0xff]  ;;  %v4153_v0 = vld [vmem:[%s12682_s12 + $0x1d8] sm:$0xff]  ;;  %v3859_v23 = vld [vmem:[#allocation4] sm:$0xff] }
 0xa02   : > { %v4066_v39 = vld [vmem:[%s12682_s12 + $0x1f0] sm:$0xff]  ;;  %v4154_v40 = vld [vmem:[%s12682_s12 + $0x1f8] sm:$0xff] }
 0xa03   : > { %11416 = vmatpush3.bf16.msra.mxu0 %v13892_v10  ;;  %11440 = vmatpush3.bf16.msra.mxu1 %v13896_v17  ;;  %v14020_v45 = vpack.c.bf16 %v4066_v39, %v4065_v32  ;;  %v14024_v59 = vpack.c.bf16 %v4154_v40, %v4153_v0  ;;  %v3863_v56 = vld [vmem:[#allocation2 + $0xf0] sm:$0xff]  ;;  %v3864_v4 = vld [vmem:[#allocation2 + $0xf8] sm:$0xff] }
 0xa04   : > { %11417 = vmatprep.subr.bf16.mxu0 %v12546_v13  ;;  %11441 = vmatprep.subr.bf16.mxu1 %v12546_v13 }
 0xa07   : > { %11419 = vmatpush3.bf16.msra.mxu0 %v13904_v11  ;;  %11443 = vmatpush3.bf16.msra.mxu1 %v13908_v51 }
 0xa08   : > { %11420 = vmatprep.subr.bf16.mxu0 %v12546_v13  ;;  %11444 = vmatprep.subr.bf16.mxu1 %v12546_v13 }
 0xa0b   : > { %11422 = vmatpush3.bf16.msra.mxu0 %v13916_v22  ;;  %11446 = vmatpush3.bf16.msra.mxu1 %v13920_v28 }
 0xa0c   : > { %11447 = vmatprep.subr.bf16.mxu0 %v12546_v13  ;;  %11471 = vmatprep.subr.bf16.mxu1 %v12546_v13 }
 0xa0e   : > { %9528 = vmatmul.mubr.f32.vlgmr.msra.gmra.mrb[0].mxu0 %v13928_v30  ;;  %9563 = vmatmul.mubr.f32.vlgmr.msra.gmra.mrb[0].mxu1 %v13928_v30 }
 0xa0f   : > { %11449 = vmatpush3.bf16.msra.mxu0 %v13930_v48  ;;  %11473 = vmatpush3.bf16.msra.mxu1 %v13934_v8 }
 0xa10   : > { %11450 = vmatprep.subr.bf16.mxu0 %v12546_v13  ;;  %11474 = vmatprep.subr.bf16.mxu1 %v12546_v13 }
 0xa11   : > { %9597 = vmatprep.mubr.msk.f32.mxu0 %vm12547_vm2, %v12548_v55  ;;  %9632 = vmatprep.mubr.msk.f32.mxu1 %vm12547_vm2, %v12548_v55 }
 0xa13   : > { %11452 = vmatpush3.bf16.msra.mxu0 %v13944_v63  ;;  %11476 = vmatpush3.bf16.msra.mxu1 %v13948_v61 }
 0xa14   : > { %11453 = vmatprep.subr.bf16.mxu0 %v12546_v13  ;;  %11477 = vmatprep.subr.bf16.mxu1 %v12546_v13 }
 0xa17   : > { %11455 = vmatpush3.bf16.msra.mxu0 %v13960_v52  ;;  %11479 = vmatpush3.bf16.msra.mxu1 %v13964_v21 }
 0xa18   : > { %11456 = vmatprep.subr.bf16.mxu0 %v12546_v13  ;;  %11480 = vmatprep.subr.bf16.mxu1 %v12546_v13 }
 0xa1b   : > { %11458 = vmatpush3.bf16.msra.mxu0 %v13972_v42  ;;  %11482 = vmatpush3.bf16.msra.mxu1 %v13976_v43 }
 0xa1c   : > { %11459 = vmatprep.subr.bf16.mxu0 %v12546_v13  ;;  %11483 = vmatprep.subr.bf16.mxu1 %v12546_v13 }
 0xa1f   : > { %11461 = vmatpush3.bf16.msra.mxu0 %v13984_v47  ;;  %11485 = vmatpush3.bf16.msra.mxu1 %v13988_v9 }
 0xa20   : > { %11462 = vmatprep.subr.bf16.mxu0 %v12546_v13  ;;  %11486 = vmatprep.subr.bf16.mxu1 %v12546_v13 }
 0xa23   : > { %11464 = vmatpush3.bf16.msra.mxu0 %v13996_v41  ;;  %11488 = vmatpush3.bf16.msra.mxu1 %v14000_v36 }
 0xa24   : > { %11465 = vmatprep.subr.bf16.mxu0 %v12546_v13  ;;  %11489 = vmatprep.subr.bf16.mxu1 %v12546_v13 }
 0xa27   : > { %11467 = vmatpush3.bf16.msra.mxu0 %v14008_v50  ;;  %11491 = vmatpush3.bf16.msra.mxu1 %v14012_v26 }
 0xa28   : > { %11468 = vmatprep.subr.bf16.mxu0 %v12546_v13  ;;  %11492 = vmatprep.subr.bf16.mxu1 %v12546_v13 }
 0xa2b   : > { %11470 = vmatpush3.bf16.msra.mxu0 %v14020_v45  ;;  %11494 = vmatpush3.bf16.msra.mxu1 %v14024_v59 }
 0xa2c   : > { %11495 = vmatprep.subr.bf16.mxu0 %v12546_v13  ;;  %11519 = vmatprep.subr.bf16.mxu1 %v12546_v13 }
 0xa2e   : > { %9598 = vmatmul.mubr.f32.vlgmr.msra.gmra.mrb[2].mxu0 %v13928_v30  ;;  %9633 = vmatmul.mubr.f32.vlgmr.msra.gmra.mrb[2].mxu1 %v13928_v30 }
 0xa2f   : > { %11497 = vmatpush3.bf16.msra.mxu0 %v13830_v31  ;;  %11521 = vmatpush3.bf16.msra.mxu1 %v13835_v7 }
 0xa30   : > { %11498 = vmatprep.subr.bf16.mxu0 %v12546_v13  ;;  %11522 = vmatprep.subr.bf16.mxu1 %v12546_v13 }
 0xa31   : > { %9667 = vmatprep.mubr.msk.f32.mxu0 %vm12547_vm2, %v12548_v55  ;;  %9702 = vmatprep.mubr.msk.f32.mxu1 %vm12547_vm2, %v12548_v55 }
 0xa33   : > { %11500 = vmatpush3.bf16.msra.mxu0 %v13844_v54  ;;  %11524 = vmatpush3.bf16.msra.mxu1 %v13848_v1 }
 0xa34   : > { %11501 = vmatprep.subr.bf16.mxu0 %v12546_v13  ;;  %11525 = vmatprep.subr.bf16.mxu1 %v12546_v13 }
 0xa37   : > { %11503 = vmatpush3.bf16.msra.mxu0 %v13856_v2  ;;  %11527 = vmatpush3.bf16.msra.mxu1 %v13860_v3 }
 0xa38   : > { %11504 = vmatprep.subr.bf16.mxu0 %v12546_v13  ;;  %11528 = vmatprep.subr.bf16.mxu1 %v12546_v13 }
 0xa3b   : > { %11506 = vmatpush3.bf16.msra.mxu0 %v13868_v5  ;;  %11530 = vmatpush3.bf16.msra.mxu1 %v13872_v20 }
 0xa3c   : > { %11507 = vmatprep.subr.bf16.mxu0 %v12546_v13  ;;  %11531 = vmatprep.subr.bf16.mxu1 %v12546_v13 }
 0xa3f   : > { %11509 = vmatpush3.bf16.msra.mxu0 %v13880_v57  ;;  %11533 = vmatpush3.bf16.msra.mxu1 %v13884_v18 }
 0xa40   : > { %11510 = vmatprep.subr.bf16.mxu0 %v12546_v13  ;;  %11534 = vmatprep.subr.bf16.mxu1 %v12546_v13 }
 0xa43   : > { %11512 = vmatpush3.bf16.msra.mxu0 %v13892_v10  ;;  %11536 = vmatpush3.bf16.msra.mxu1 %v13896_v17 }
 0xa44   : > { %11513 = vmatprep.subr.bf16.mxu0 %v12546_v13  ;;  %11537 = vmatprep.subr.bf16.mxu1 %v12546_v13 }
 0xa47   : > { %11515 = vmatpush3.bf16.msra.mxu0 %v13904_v11  ;;  %11539 = vmatpush3.bf16.msra.mxu1 %v13908_v51 }
 0xa48   : > { %11516 = vmatprep.subr.bf16.mxu0 %v12546_v13  ;;  %11540 = vmatprep.subr.bf16.mxu1 %v12546_v13 }
 0xa4b   : > { %11518 = vmatpush3.bf16.msra.mxu0 %v13916_v22  ;;  %11542 = vmatpush3.bf16.msra.mxu1 %v13920_v28 }
 0xa4c   : > { %11543 = vmatprep.subr.bf16.mxu0 %v12546_v13  ;;  %11567 = vmatprep.subr.bf16.mxu1 %v12546_v13 }
 0xae1   : > { %v3947_v24 = vpop.f32.mrb[0].mxu0  ;;  %v4040_v30 = vpop.f32.mrb[0].mxu1 }
 0xae2   : > { %v9529_v16 = vpop.f32.mrb[1].mxu0  ;;  %v9564_v34 = vpop.f32.mrb[1].mxu1  ;;  %v4044_v33 = vadd.f32 %v4040_v30, %v3862_v29  ;;  %v3951_v6 = vadd.f32 %v3947_v24, %v3861_v49 }
 0xae4   : > { %v7247_v27 = vmul.f32 -1.442695, %v4044_v33  ;;  %v7246_v58 = vmul.f32 -1.442695, %v3951_v6 }
 0xae6   : > { %12358 = vpow2.f32 %v7247_v27 }
 0xae7   : > { %12360 = vpow2.f32 %v7246_v58 }
 0xaf0   : > { %v12359_v35 = vpop.eup %12358 }
 0xaf1   : > { %v12361_v25 = vpop.eup %12360  ;;  %v4048_v53 = vadd.f32 1.0, %v12359_v35 }
 0xaf2   : > { %v3955_v19 = vadd.f32 1.0, %v12361_v25 }
 0xaf3   : > { %12362 = vrcp.f32 %v4048_v53 }
 0xaf4   : > { %12364 = vrcp.f32 %v3955_v19 }
 0xafd   : > { %v12363_v15 = vpop.eup %12362 }
 0xafe   : > { %v12365_v60 = vpop.eup %12364  ;;  %v4232_v39 = vmul.f32 %v12363_v15, %v3859_v23  ;;  %v5100_v15 = vld [vmem:[%s12682_s12 + $0xa8] sm:$0xff] }
 0xb01   : > { %v4133_v37 = vpop.f32.mrb[2].mxu0  ;;  %v4221_v12 = vpop.f32.mrb[2].mxu1 }
 0xb02   : > { %v4137_v38 = vadd.f32 %v4133_v37, %v3863_v56  ;;  %v9599_v46 = vpop.f32.mrb[3].mxu0  ;;  %v4225_v14 = vadd.f32 %v4221_v12, %v3864_v4  ;;  %v9634_v62 = vpop.f32.mrb[3].mxu1 }
 0xb04   : > { %12366 = vtanh.f32 %v4137_v38  ;;  %v7248_v44 = vmul.f32 -1.442695, %v4225_v14 }
 0xb06   : > { %12368 = vpow2.f32 %v7248_v44 }
 0xb0e   : > { %v12367_v32 = vpop.eup %12366 }
 0xb0f   : > { %v4233_v0 = vmul.f32 %v12367_v32, %v12365_v60  ;;  %v5008_v60 = vld [vmem:[%s12682_s12 + $0xc0] sm:$0xff] }
 0xb10   : > { %v12369_v40 = vpop.eup %12368  ;;  %v5009_v32 = vld [vmem:[%s12682_s12 + $0xe0] sm:$0xff] }
 0xb11   : > { %v14069_v24 = vadd.f32 %v4233_v0, %v4232_v39  ;;  %v4229_v30 = vadd.f32 1.0, %v12369_v40  ;;  %v5101_v39 = vld [vmem:[%s12682_s12 + $0xc8] sm:$0xff]  ;;  %v14229_v0 = vpack.c.bf16 %v5009_v32, %v5008_v60 }
 0xb12   : > { %v5102_v40 = vld [vmem:[%s12682_s12 + $0xe8] sm:$0xff] }
 0xb13   : > { %12370 = vtanh.f32 %v14069_v24 }
 0xb14   : > { %12372 = vrcp.f32 %v4229_v30  ;;  %v5010_v30 = vld [vmem:[%s12682_s12 + $0x100] sm:$0xff] }
 0xb1d   : > { %v12371_v16 = vpop.eup %12370 }
 0xb1e   : > { %v12373_v34 = vpop.eup %12372 }
 0xb1f   : > { %v4236_v29 = vmul.f32 %v12373_v34, %v12371_v16  ;;  %v5011_v16 = vld [vmem:[%s12682_s12 + $0x120] sm:$0xff]  ;;  %v5103_v34 = vld [vmem:[%s12682_s12 + $0x108] sm:$0xff] }
 0xb21   : > { %7249 = vst [vmem:[%s12707_s1 + $0x38] sm:$0xff] %v4236_v29  ;;  %9668 = vmatmul.mubr.f32.vlgmr.msra.gmra.mrb[4].mxu0 %v4236_v29  ;;  %9703 = vmatmul.mubr.f32.vlgmr.msra.gmra.mrb[4].mxu1 %v4236_v29 }
 0xb22   : > { %11545 = vmatpush3.bf16.msra.mxu0 %v13930_v48  ;;  %11569 = vmatpush3.bf16.msra.mxu1 %v13934_v8 }
 0xb23   : > { %11546 = vmatprep.subr.bf16.mxu0 %v12546_v13  ;;  %11570 = vmatprep.subr.bf16.mxu1 %v12546_v13 }
 0xb24   : > { %9737 = vmatprep.mubr.msk.f32.mxu0 %vm12547_vm2, %v12548_v55  ;;  %9772 = vmatprep.mubr.msk.f32.mxu1 %vm12547_vm2, %v12548_v55 }
 0xb26   : > { %11548 = vmatpush3.bf16.msra.mxu0 %v13944_v63  ;;  %11572 = vmatpush3.bf16.msra.mxu1 %v13948_v61 }
 0xb27   : > { %11549 = vmatprep.subr.bf16.mxu0 %v12546_v13  ;;  %11573 = vmatprep.subr.bf16.mxu1 %v12546_v13 }
 0xb2a   : > { %11551 = vmatpush3.bf16.msra.mxu0 %v13960_v52  ;;  %11575 = vmatpush3.bf16.msra.mxu1 %v13964_v21 }
 0xb2b   : > { %11552 = vmatprep.subr.bf16.mxu0 %v12546_v13  ;;  %11576 = vmatprep.subr.bf16.mxu1 %v12546_v13 }
 0xb2e   : > { %11554 = vmatpush3.bf16.msra.mxu0 %v13972_v42  ;;  %11578 = vmatpush3.bf16.msra.mxu1 %v13976_v43 }
 0xb2f   : > { %11555 = vmatprep.subr.bf16.mxu0 %v12546_v13  ;;  %11579 = vmatprep.subr.bf16.mxu1 %v12546_v13 }
 0xb32   : > { %11557 = vmatpush3.bf16.msra.mxu0 %v13984_v47  ;;  %11581 = vmatpush3.bf16.msra.mxu1 %v13988_v9 }
 0xb33   : > { %11558 = vmatprep.subr.bf16.mxu0 %v12546_v13  ;;  %11582 = vmatprep.subr.bf16.mxu1 %v12546_v13 }
 0xb36   : > { %11560 = vmatpush3.bf16.msra.mxu0 %v13996_v41  ;;  %11584 = vmatpush3.bf16.msra.mxu1 %v14000_v36 }
 0xb37   : > { %11561 = vmatprep.subr.bf16.mxu0 %v12546_v13  ;;  %11585 = vmatprep.subr.bf16.mxu1 %v12546_v13 }
 0xb3a   : > { %11563 = vmatpush3.bf16.msra.mxu0 %v14008_v50  ;;  %11587 = vmatpush3.bf16.msra.mxu1 %v14012_v26 }
 0xb3b   : > { %11564 = vmatprep.subr.bf16.mxu0 %v12546_v13  ;;  %11588 = vmatprep.subr.bf16.mxu1 %v12546_v13 }
 0xb3e   : > { %11566 = vmatpush3.bf16.msra.mxu0 %v14020_v45  ;;  %11590 = vmatpush3.bf16.msra.mxu1 %v14024_v59 }
 0xb3f   : > { %11591 = vmatprep.subr.bf16.mxu0 %v12546_v13  ;;  %11615 = vmatprep.subr.bf16.mxu1 %v12546_v13 }
 0xb41   : > { %9738 = vmatmul.mubr.f32.vlgmr.msra.gmra.mrb[6].mxu0 %v4236_v29  ;;  %9773 = vmatmul.mubr.f32.vlgmr.msra.gmra.mrb[6].mxu1 %v4236_v29  ;;  %v14241_v29 = vpack.c.bf16 %v5011_v16, %v5010_v30 }
 0xb42   : > { %11593 = vmatpush3.bf16.msra.mxu0 %v13830_v31  ;;  %11617 = vmatpush3.bf16.msra.mxu1 %v13835_v7 }
 0xb43   : > { %11594 = vmatprep.subr.bf16.mxu0 %v12546_v13  ;;  %11618 = vmatprep.subr.bf16.mxu1 %v12546_v13 }
 0xb44   : > { %9807 = vmatprep.mubr.msk.f32.mxu0 %vm12547_vm2, %v12548_v55  ;;  %9842 = vmatprep.mubr.msk.f32.mxu1 %vm12547_vm2, %v12548_v55 }
 0xb46   : > { %11596 = vmatpush3.bf16.msra.mxu0 %v13844_v54  ;;  %11620 = vmatpush3.bf16.msra.mxu1 %v13848_v1 }
 0xb47   : > { %11597 = vmatprep.subr.bf16.mxu0 %v12546_v13  ;;  %11621 = vmatprep.subr.bf16.mxu1 %v12546_v13 }
 0xb4a   : > { %11599 = vmatpush3.bf16.msra.mxu0 %v13856_v2  ;;  %11623 = vmatpush3.bf16.msra.mxu1 %v13860_v3  ;;  %v4241_v2 = vld [vmem:[#allocation2 + $0xc8] sm:$0xff]  ;;  %v4240_v3 = vld [vmem:[#allocation2 + $0xc0] sm:$0xff] }
 0xb4b   : > { %11600 = vmatprep.subr.bf16.mxu0 %v12546_v13  ;;  %11624 = vmatprep.subr.bf16.mxu1 %v12546_v13 }
 0xb4e   : > { %11602 = vmatpush3.bf16.msra.mxu0 %v13868_v5  ;;  %11626 = vmatpush3.bf16.msra.mxu1 %v13872_v20 }
 0xb4f   : > { %11603 = vmatprep.subr.bf16.mxu0 %v12546_v13  ;;  %11627 = vmatprep.subr.bf16.mxu1 %v12546_v13 }
 0xb52   : > { %11605 = vmatpush3.bf16.msra.mxu0 %v13880_v57  ;;  %11629 = vmatpush3.bf16.msra.mxu1 %v13884_v18 }
 0xb53   : > { %11606 = vmatprep.subr.bf16.mxu0 %v12546_v13  ;;  %11630 = vmatprep.subr.bf16.mxu1 %v12546_v13 }
 0xb56   : > { %11608 = vmatpush3.bf16.msra.mxu0 %v13892_v10  ;;  %11632 = vmatpush3.bf16.msra.mxu1 %v13896_v17 }
 0xb57   : > { %11609 = vmatprep.subr.bf16.mxu0 %v12546_v13  ;;  %11633 = vmatprep.subr.bf16.mxu1 %v12546_v13 }
 0xb5a   : > { %11611 = vmatpush3.bf16.msra.mxu0 %v13904_v11  ;;  %11635 = vmatpush3.bf16.msra.mxu1 %v13908_v51 }
 0xb5b   : > { %11612 = vmatprep.subr.bf16.mxu0 %v12546_v13  ;;  %11636 = vmatprep.subr.bf16.mxu1 %v12546_v13 }
 0xb5e   : > { %11614 = vmatpush3.bf16.msra.mxu0 %v13916_v22  ;;  %11638 = vmatpush3.bf16.msra.mxu1 %v13920_v28  ;;  %v4242_v22 = vld [vmem:[#allocation2 + $0xd0] sm:$0xff]  ;;  %v4243_v28 = vld [vmem:[#allocation2 + $0xd8] sm:$0xff] }
 0xb5f   : > { %11639 = vmatprep.subr.bf16.mxu0 %v12546_v13  ;;  %11663 = vmatprep.subr.bf16.mxu1 %v12546_v13 }
 0xbf4   : > { %v4326_v31 = vpop.f32.mrb[4].mxu0  ;;  %v4419_v7 = vpop.f32.mrb[4].mxu1 }
 0xbf5   : > { %v9669_v54 = vpop.f32.mrb[5].mxu0  ;;  %v9704_v1 = vpop.f32.mrb[5].mxu1  ;;  %v4423_v5 = vadd.f32 %v4419_v7, %v4241_v2  ;;  %v4330_v20 = vadd.f32 %v4326_v31, %v4240_v3  ;;  %v5104_v31 = vld [vmem:[%s12682_s12 + $0x128] sm:$0xff] }
 0xbf6   : > { %v14244_v7 = vpack.c.bf16 %v5104_v31, %v5103_v34  ;;  %v5012_v54 = vld [vmem:[%s12682_s12 + $0x140] sm:$0xff]  ;;  %v5105_v2 = vld [vmem:[%s12682_s12 + $0x148] sm:$0xff]  ;;  %v5188_v34 = vld [vmem:[%s12682_s12 + $0x10] sm:$0xff] }
 0xbf7   : > { %v7251_v57 = vmul.f32 -1.442695, %v4423_v5  ;;  %v7250_v18 = vmul.f32 -1.442695, %v4330_v20  ;;  %v5013_v1 = vld [vmem:[%s12682_s12 + $0x160] sm:$0xff]  ;;  %v5106_v5 = vld [vmem:[%s12682_s12 + $0x168] sm:$0xff] }
 0xbf8   : > { %v14253_v3 = vpack.c.bf16 %v5013_v1, %v5012_v54  ;;  %v14256_v20 = vpack.c.bf16 %v5106_v5, %v5105_v2  ;;  %v5189_v31 = vld [vmem:[%s12682_s12 + $0x30] sm:$0xff]  ;;  %v5276_v54 = vld [vmem:[%s12682_s12 + $0x18] sm:$0xff] }
 0xbf9   : > { %12374 = vpow2.f32 %v7251_v57  ;;  %v5014_v57 = vld [vmem:[%s12682_s12 + $0x180] sm:$0xff]  ;;  %v5277_v1 = vld [vmem:[%s12682_s12 + $0x38] sm:$0xff] }
 0xbfa   : > { %12376 = vpow2.f32 %v7250_v18  ;;  %v5015_v18 = vld [vmem:[%s12682_s12 + $0x1a0] sm:$0xff] }
 0xc03   : > { %v12375_v10 = vpop.eup %12374 }
 0xc04   : > { %v12377_v17 = vpop.eup %12376  ;;  %v4427_v11 = vadd.f32 1.0, %v12375_v10  ;;  %v5107_v10 = vld [vmem:[%s12682_s12 + $0x188] sm:$0xff] }
 0xc05   : > { %v4334_v51 = vadd.f32 1.0, %v12377_v17  ;;  %v14262_v17 = vpack.c.bf16 %v5015_v18, %v5014_v57  ;;  %v14296_v57 = vpack.c.bf16 %v5277_v1, %v5276_v54  ;;  %v5190_v18 = vld [vmem:[%s12682_s12 + $0x50] sm:$0xff]  ;;  %v5290_v54 = vld [vmem:[%s12682_s12 + $0x1d8] sm:$0xff] }
 0xc06   : > { %12378 = vrcp.f32 %v4427_v11  ;;  %v5108_v11 = vld [vmem:[%s12682_s12 + $0x1a8] sm:$0xff]  ;;  %v5291_v1 = vld [vmem:[%s12682_s12 + $0x1f8] sm:$0xff] }
 0xc07   : > { %12380 = vrcp.f32 %v4334_v51  ;;  %v14267_v51 = vpack.c.bf16 %v5108_v11, %v5107_v10  ;;  %v5191_v11 = vld [vmem:[%s12682_s12 + $0x70] sm:$0xff] }
 0xc10   : > { %v12379_v53 = vpop.eup %12378 }
 0xc11   : > { %v12381_v19 = vpop.eup %12380  ;;  %v4611_v4 = vmul.f32 %v12379_v53, %v14069_v24  ;;  %v14232_v24 = vpack.c.bf16 %v5102_v40, %v5101_v39 }
 0xc14   : > { %v4512_v49 = vpop.f32.mrb[6].mxu0  ;;  %v4600_v33 = vpop.f32.mrb[6].mxu1 }
 0xc15   : > { %v4516_v6 = vadd.f32 %v4512_v49, %v4242_v22  ;;  %v4604_v27 = vadd.f32 %v4600_v33, %v4243_v28  ;;  %v9739_v58 = vpop.f32.mrb[7].mxu0  ;;  %v9774_v35 = vpop.f32.mrb[7].mxu1  ;;  %v5016_v22 = vld [vmem:[%s12682_s12 + $0x1c0] sm:$0xff]  ;;  %v5109_v49 = vld [vmem:[%s12682_s12 + $0x1c8] sm:$0xff] }
 0xc16   : > { %v5017_v28 = vld [vmem:[%s12682_s12 + $0x1e0] sm:$0xff]  ;;  %v5110_v33 = vld [vmem:[%s12682_s12 + $0x1e8] sm:$0xff] }
 0xc17   : > { %12382 = vtanh.f32 %v4516_v6  ;;  %v7252_v25 = vmul.f32 -1.442695, %v4604_v27  ;;  %v14275_v6 = vpack.c.bf16 %v5017_v28, %v5016_v22  ;;  %v14279_v27 = vpack.c.bf16 %v5110_v33, %v5109_v49  ;;  %v5278_v22 = vld [vmem:[%s12682_s12 + $0x58] sm:$0xff] }
 0xc18   : > { %v5279_v28 = vld [vmem:[%s12682_s12 + $0x78] sm:$0xff]  ;;  %v14310_v49 = vpack.c.bf16 %v5191_v11, %v5190_v18 }
 0xc19   : > { %12384 = vpow2.f32 %v7252_v25  ;;  %v14312_v33 = vpack.c.bf16 %v5279_v28, %v5278_v22  ;;  %v4999_v28 = vld [vmem:[#allocation2 + $0x88] sm:$0xff] }
 0xc21   : > { %v12383_v56 = vpop.eup %12382 }
 0xc22   : > { %v4612_v37 = vmul.f32 %v12383_v56, %v12381_v19  ;;  %v4620_v19 = vld [vmem:[#allocation2 + $0xa8] sm:$0xff]  ;;  %v4619_v56 = vld [vmem:[#allocation2 + $0xa0] sm:$0xff] }
 0xc23   : > { %v12385_v38 = vpop.eup %12384 }
 0xc24   : > { %v14146_v12 = vadd.f32 %v4612_v37, %v4611_v4  ;;  %v4608_v46 = vadd.f32 1.0, %v12385_v38 }
 0xc26   : > { %12386 = vtanh.f32 %v14146_v12 }
 0xc27   : > { %12388 = vrcp.f32 %v4608_v46 }
 0xc30   : > { %v12387_v14 = vpop.eup %12386 }
 0xc31   : > { %v12389_v62 = vpop.eup %12388 }
 0xc32   : > { %v4615_v44 = vmul.f32 %v12389_v62, %v12387_v14 }
 0xc34   : > { %7253 = vst [vmem:[%s12707_s1 + $0x30] sm:$0xff] %v4615_v44  ;;  %9808 = vmatmul.mubr.f32.vlgmr.msra.gmra.mrb[8].mxu0 %v4615_v44  ;;  %9843 = vmatmul.mubr.f32.vlgmr.msra.gmra.mrb[8].mxu1 %v4615_v44 }
 0xc35   : > { %11641 = vmatpush3.bf16.msra.mxu0 %v13930_v48  ;;  %11665 = vmatpush3.bf16.msra.mxu1 %v13934_v8  ;;  %v5002_v48 = vld [vmem:[%s12682_s12] sm:$0xff] }
 0xc36   : > { %11642 = vmatprep.subr.bf16.mxu0 %v12546_v13  ;;  %11666 = vmatprep.subr.bf16.mxu1 %v12546_v13  ;;  %v5003_v8 = vld [vmem:[%s12682_s12 + $0x20] sm:$0xff] }
 0xc37   : > { %9877 = vmatprep.mubr.msk.f32.mxu0 %vm12547_vm2, %v12548_v55  ;;  %9912 = vmatprep.mubr.msk.f32.mxu1 %vm12547_vm2, %v12548_v55 }
 0xc39   : > { %11644 = vmatpush3.bf16.msra.mxu0 %v13944_v63  ;;  %11668 = vmatpush3.bf16.msra.mxu1 %v13948_v61  ;;  %v5095_v63 = vld [vmem:[%s12682_s12 + $0x8] sm:$0xff]  ;;  %v14193_v61 = vpack.c.bf16 %v5003_v8, %v5002_v48  ;;  %v4621_v8 = vld [vmem:[#allocation2 + $0xb0] sm:$0xff] }
 0xc3a   : > { %11645 = vmatprep.subr.bf16.mxu0 %v12546_v13  ;;  %11669 = vmatprep.subr.bf16.mxu1 %v12546_v13 }
 0xc3d   : > { %11647 = vmatpush3.bf16.msra.mxu0 %v13960_v52  ;;  %11671 = vmatpush3.bf16.msra.mxu1 %v13964_v21  ;;  %v5096_v52 = vld [vmem:[%s12682_s12 + $0x28] sm:$0xff] }
 0xc3e   : > { %11648 = vmatprep.subr.bf16.mxu0 %v12546_v13  ;;  %11672 = vmatprep.subr.bf16.mxu1 %v12546_v13  ;;  %v14196_v21 = vpack.c.bf16 %v5096_v52, %v5095_v63  ;;  %v4622_v63 = vld [vmem:[#allocation2 + $0xb8] sm:$0xff] }
 0xc41   : > { %11650 = vmatpush3.bf16.msra.mxu0 %v13972_v42  ;;  %11674 = vmatpush3.bf16.msra.mxu1 %v13976_v43  ;;  %v5004_v42 = vld [vmem:[%s12682_s12 + $0x40] sm:$0xff] }
 0xc42   : > { %11651 = vmatprep.subr.bf16.mxu0 %v12546_v13  ;;  %11675 = vmatprep.subr.bf16.mxu1 %v12546_v13  ;;  %v5005_v43 = vld [vmem:[%s12682_s12 + $0x60] sm:$0xff] }
 0xc45   : > { %11653 = vmatpush3.bf16.msra.mxu0 %v13984_v47  ;;  %11677 = vmatpush3.bf16.msra.mxu1 %v13988_v9  ;;  %v5097_v47 = vld [vmem:[%s12682_s12 + $0x48] sm:$0xff]  ;;  %v14205_v9 = vpack.c.bf16 %v5005_v43, %v5004_v42 }
 0xc46   : > { %11654 = vmatprep.subr.bf16.mxu0 %v12546_v13  ;;  %11678 = vmatprep.subr.bf16.mxu1 %v12546_v13 }
 0xc49   : > { %11656 = vmatpush3.bf16.msra.mxu0 %v13996_v41  ;;  %11680 = vmatpush3.bf16.msra.mxu1 %v14000_v36  ;;  %v5098_v41 = vld [vmem:[%s12682_s12 + $0x68] sm:$0xff] }
 0xc4a   : > { %11657 = vmatprep.subr.bf16.mxu0 %v12546_v13  ;;  %11681 = vmatprep.subr.bf16.mxu1 %v12546_v13  ;;  %v14208_v36 = vpack.c.bf16 %v5098_v41, %v5097_v47 }
 0xc4d   : > { %11659 = vmatpush3.bf16.msra.mxu0 %v14008_v50  ;;  %11683 = vmatpush3.bf16.msra.mxu1 %v14012_v26  ;;  %v5006_v50 = vld [vmem:[%s12682_s12 + $0x80] sm:$0xff] }
 0xc4e   : > { %11660 = vmatprep.subr.bf16.mxu0 %v12546_v13  ;;  %11684 = vmatprep.subr.bf16.mxu1 %v12546_v13  ;;  %v5007_v26 = vld [vmem:[%s12682_s12 + $0xa0] sm:$0xff] }
 0xc51   : > { %11662 = vmatpush3.bf16.msra.mxu0 %v14020_v45  ;;  %11686 = vmatpush3.bf16.msra.mxu1 %v14024_v59  ;;  %v5099_v45 = vld [vmem:[%s12682_s12 + $0x88] sm:$0xff]  ;;  %v14217_v59 = vpack.c.bf16 %v5007_v26, %v5006_v50 }
 0xc52   : > { %11687 = vmatprep.subr.bf16.mxu0 %v12546_v13  ;;  %11711 = vmatprep.subr.bf16.mxu1 %v12546_v13  ;;  %v14220_v23 = vpack.c.bf16 %v5100_v15, %v5099_v45 }
 0xc54   : > { %9878 = vmatmul.mubr.f32.vlgmr.msra.gmra.mrb[10].mxu0 %v4615_v44  ;;  %9913 = vmatmul.mubr.f32.vlgmr.msra.gmra.mrb[10].mxu1 %v4615_v44 }
 0xc55   : > { %9947 = vmatprep.mubr.msk.f32.mxu0 %vm12547_vm2, %v12548_v55  ;;  %9982 = vmatprep.mubr.msk.f32.mxu1 %vm12547_vm2, %v12548_v55 }
 0xc56   : > { %11689 = vmatpush3.bf16.msra.mxu0 %v14193_v61  ;;  %11713 = vmatpush3.bf16.msra.mxu1 %v14196_v21 }
 0xc57   : > { %11690 = vmatprep.subr.bf16.mxu0 %v12546_v13  ;;  %11714 = vmatprep.subr.bf16.mxu1 %v12546_v13 }
 0xc5a   : > { %11692 = vmatpush3.bf16.msra.mxu0 %v14205_v9  ;;  %11716 = vmatpush3.bf16.msra.mxu1 %v14208_v36 }
 0xc5b   : > { %11693 = vmatprep.subr.bf16.mxu0 %v12546_v13  ;;  %11717 = vmatprep.subr.bf16.mxu1 %v12546_v13 }
 0xc5e   : > { %11695 = vmatpush3.bf16.msra.mxu0 %v14217_v59  ;;  %11719 = vmatpush3.bf16.msra.mxu1 %v14220_v23 }
 0xc5f   : > { %11696 = vmatprep.subr.bf16.mxu0 %v12546_v13  ;;  %11720 = vmatprep.subr.bf16.mxu1 %v12546_v13 }
 0xc62   : > { %11698 = vmatpush3.bf16.msra.mxu0 %v14229_v0  ;;  %11722 = vmatpush3.bf16.msra.mxu1 %v14232_v24 }
 0xc63   : > { %11699 = vmatprep.subr.bf16.mxu0 %v12546_v13  ;;  %11723 = vmatprep.subr.bf16.mxu1 %v12546_v13 }
 0xc66   : > { %11701 = vmatpush3.bf16.msra.mxu0 %v14241_v29  ;;  %11725 = vmatpush3.bf16.msra.mxu1 %v14244_v7 }
 0xc67   : > { %11702 = vmatprep.subr.bf16.mxu0 %v12546_v13  ;;  %11726 = vmatprep.subr.bf16.mxu1 %v12546_v13 }
 0xc6a   : > { %11704 = vmatpush3.bf16.msra.mxu0 %v14253_v3  ;;  %11728 = vmatpush3.bf16.msra.mxu1 %v14256_v20 }
 0xc6b   : > { %11705 = vmatprep.subr.bf16.mxu0 %v12546_v13  ;;  %11729 = vmatprep.subr.bf16.mxu1 %v12546_v13 }
 0xc6e   : > { %11707 = vmatpush3.bf16.msra.mxu0 %v14262_v17  ;;  %11731 = vmatpush3.bf16.msra.mxu1 %v14267_v51 }
 0xc6f   : > { %11708 = vmatprep.subr.bf16.mxu0 %v12546_v13  ;;  %11732 = vmatprep.subr.bf16.mxu1 %v12546_v13 }
 0xc72   : > { %11710 = vmatpush3.bf16.msra.mxu0 %v14275_v6  ;;  %11734 = vmatpush3.bf16.msra.mxu1 %v14279_v27 }
 0xc73   : > { %11735 = vmatprep.subr.bf16.mxu0 %v12546_v13  ;;  %11759 = vmatprep.subr.bf16.mxu1 %v12546_v13 }
 0xd07   : > { %v4705_v58 = vpop.f32.mrb[8].mxu0  ;;  %v4798_v35 = vpop.f32.mrb[8].mxu1 }
 0xd08   : > { %v9809_v25 = vpop.f32.mrb[9].mxu0  ;;  %v9844_v53 = vpop.f32.mrb[9].mxu1  ;;  %v4802_v4 = vadd.f32 %v4798_v35, %v4620_v19  ;;  %v4709_v37 = vadd.f32 %v4705_v58, %v4619_v56  ;;  %v5192_v58 = vld [vmem:[%s12682_s12 + $0x90] sm:$0xff] }
 0xd09   : > { %v5193_v35 = vld [vmem:[%s12682_s12 + $0xb0] sm:$0xff]  ;;  %v5280_v25 = vld [vmem:[%s12682_s12 + $0x98] sm:$0xff] }
 0xd0a   : > { %v7255_v38 = vmul.f32 -1.442695, %v4802_v4  ;;  %v7254_v46 = vmul.f32 -1.442695, %v4709_v37  ;;  %v5281_v53 = vld [vmem:[%s12682_s12 + $0xb8] sm:$0xff]  ;;  %v14326_v19 = vpack.c.bf16 %v5193_v35, %v5192_v58  ;;  %v5194_v4 = vld [vmem:[%s12682_s12 + $0xd0] sm:$0xff] }
 0xd0b   : > { %v14328_v56 = vpack.c.bf16 %v5281_v53, %v5280_v25  ;;  %v5195_v37 = vld [vmem:[%s12682_s12 + $0xf0] sm:$0xff]  ;;  %v4998_v58 = vld [vmem:[#allocation2 + $0x80] sm:$0xff] }
 0xd0c   : > { %12390 = vpow2.f32 %v7255_v38  ;;  %v5282_v38 = vld [vmem:[%s12682_s12 + $0xd8] sm:$0xff] }
 0xd0d   : > { %12392 = vpow2.f32 %v7254_v46  ;;  %v5283_v46 = vld [vmem:[%s12682_s12 + $0xf8] sm:$0xff] }
 0xd16   : > { %v12391_v14 = vpop.eup %12390 }
 0xd17   : > { %v12393_v62 = vpop.eup %12392  ;;  %v4806_v44 = vadd.f32 1.0, %v12391_v14  ;;  %v14338_v14 = vpack.c.bf16 %v5195_v37, %v5194_v4 }
 0xd18   : > { %v4713_v48 = vadd.f32 1.0, %v12393_v62  ;;  %v14340_v62 = vpack.c.bf16 %v5283_v46, %v5282_v38 }
 0xd19   : > { %12394 = vrcp.f32 %v4806_v44  ;;  %v5196_v44 = vld [vmem:[%s12682_s12 + $0x110] sm:$0xff] }
 0xd1a   : > { %12396 = vrcp.f32 %v4713_v48  ;;  %v5197_v48 = vld [vmem:[%s12682_s12 + $0x130] sm:$0xff] }
 0xd23   : > { %v12395_v45 = vpop.eup %12394 }
 0xd24   : > { %v12397_v15 = vpop.eup %12396  ;;  %v4990_v32 = vmul.f32 %v12395_v45, %v14146_v12  ;;  %v14294_v12 = vpack.c.bf16 %v5189_v31, %v5188_v34  ;;  %v5202_v34 = vld [vmem:[%s12682_s12 + $0x1d0] sm:$0xff] }
 0xd25   : > { %v5203_v31 = vld [vmem:[%s12682_s12 + $0x1f0] sm:$0xff] }
 0xd27   : > { %v4891_v52 = vpop.f32.mrb[10].mxu0  ;;  %v4979_v42 = vpop.f32.mrb[10].mxu1 }
 0xd28   : > { %v4895_v43 = vadd.f32 %v4891_v52, %v4621_v8  ;;  %v4983_v47 = vadd.f32 %v4979_v42, %v4622_v63  ;;  %v9879_v41 = vpop.f32.mrb[11].mxu0  ;;  %v9914_v50 = vpop.f32.mrb[11].mxu1  ;;  %v5284_v8 = vld [vmem:[%s12682_s12 + $0x118] sm:$0xff]  ;;  %v14350_v52 = vpack.c.bf16 %v5197_v48, %v5196_v44  ;;  %v5000_v48 = vld [vmem:[#allocation2 + $0x90] sm:$0xff] }
 0xd29   : > { %v5285_v63 = vld [vmem:[%s12682_s12 + $0x138] sm:$0xff] }
 0xd2a   : > { %12398 = vtanh.f32 %v4895_v43  ;;  %v7256_v26 = vmul.f32 -1.442695, %v4983_v47  ;;  %v14352_v42 = vpack.c.bf16 %v5285_v63, %v5284_v8  ;;  %v5198_v43 = vld [vmem:[%s12682_s12 + $0x150] sm:$0xff]  ;;  %v5286_v41 = vld [vmem:[%s12682_s12 + $0x158] sm:$0xff] }
 0xd2b   : > { %v5199_v47 = vld [vmem:[%s12682_s12 + $0x170] sm:$0xff]  ;;  %v5287_v50 = vld [vmem:[%s12682_s12 + $0x178] sm:$0xff] }
 0xd2c   : > { %12400 = vpow2.f32 %v7256_v26  ;;  %v14362_v26 = vpack.c.bf16 %v5199_v47, %v5198_v43  ;;  %v14364_v45 = vpack.c.bf16 %v5287_v50, %v5286_v41  ;;  %v5001_v8 = vld [vmem:[#allocation2 + $0x98] sm:$0xff] }
 0xd34   : > { %v12399_v60 = vpop.eup %12398 }
 0xd35   : > { %v4991_v39 = vmul.f32 %v12399_v60, %v12397_v15  ;;  %v5200_v15 = vld [vmem:[%s12682_s12 + $0x190] sm:$0xff] }
 0xd36   : > { %v12401_v40 = vpop.eup %12400  ;;  %v5201_v60 = vld [vmem:[%s12682_s12 + $0x1b0] sm:$0xff] }
 0xd37   : > { %v14287_v30 = vadd.f32 %v4991_v39, %v4990_v32  ;;  %v4987_v16 = vadd.f32 1.0, %v12401_v40  ;;  %v5288_v32 = vld [vmem:[%s12682_s12 + $0x198] sm:$0xff]  ;;  %v14374_v40 = vpack.c.bf16 %v5201_v60, %v5200_v15 }
 0xd38   : > { %v5289_v39 = vld [vmem:[%s12682_s12 + $0x1b8] sm:$0xff] }
 0xd39   : > { %12402 = vtanh.f32 %v14287_v30 }
 0xd3a   : > { %12404 = vrcp.f32 %v4987_v16  ;;  %v14376_v16 = vpack.c.bf16 %v5289_v39, %v5288_v32 }
 0xd43   : > { %v12403_v2 = vpop.eup %12402 }
 0xd44   : > { %v12405_v5 = vpop.eup %12404 }
 0xd45   : > { %v14299_v10 = vmul.f32 %v12405_v5, %v12403_v2  ;;  %v14386_v2 = vpack.c.bf16 %v5203_v31, %v5202_v34  ;;  %v14388_v5 = vpack.c.bf16 %v5291_v1, %v5290_v54 }
 0xd47   : > { %7257 = vst [vmem:[%s12707_s1 + $0x28] sm:$0xff] %v14299_v10  ;;  %9948 = vmatmul.mubr.f32.vlgmr.msra.gmra.mrb[12].mxu0 %v14299_v10  ;;  %9983 = vmatmul.mubr.f32.vlgmr.msra.gmra.mrb[12].mxu1 %v14299_v10 }
 0xd48   : > { %11737 = vmatpush3.bf16.msra.mxu0 %v14294_v12  ;;  %11761 = vmatpush3.bf16.msra.mxu1 %v14296_v57 }
 0xd49   : > { %11738 = vmatprep.subr.bf16.mxu0 %v12546_v13  ;;  %11762 = vmatprep.subr.bf16.mxu1 %v12546_v13 }
 0xd4a   : > { %10017 = vmatprep.mubr.msk.f32.mxu0 %vm12547_vm2, %v12548_v55  ;;  %10052 = vmatprep.mubr.msk.f32.mxu1 %vm12547_vm2, %v12548_v55 }
 0xd4c   : > { %11740 = vmatpush3.bf16.msra.mxu0 %v14310_v49  ;;  %11764 = vmatpush3.bf16.msra.mxu1 %v14312_v33 }
 0xd4d   : > { %11741 = vmatprep.subr.bf16.mxu0 %v12546_v13  ;;  %11765 = vmatprep.subr.bf16.mxu1 %v12546_v13 }
 0xd50   : > { %11743 = vmatpush3.bf16.msra.mxu0 %v14326_v19  ;;  %11767 = vmatpush3.bf16.msra.mxu1 %v14328_v56 }
 0xd51   : > { %11744 = vmatprep.subr.bf16.mxu0 %v12546_v13  ;;  %11768 = vmatprep.subr.bf16.mxu1 %v12546_v13 }
 0xd54   : > { %11746 = vmatpush3.bf16.msra.mxu0 %v14338_v14  ;;  %11770 = vmatpush3.bf16.msra.mxu1 %v14340_v62 }
 0xd55   : > { %11747 = vmatprep.subr.bf16.mxu0 %v12546_v13  ;;  %11771 = vmatprep.subr.bf16.mxu1 %v12546_v13 }
 0xd58   : > { %11749 = vmatpush3.bf16.msra.mxu0 %v14350_v52  ;;  %11773 = vmatpush3.bf16.msra.mxu1 %v14352_v42 }
 0xd59   : > { %11750 = vmatprep.subr.bf16.mxu0 %v12546_v13  ;;  %11774 = vmatprep.subr.bf16.mxu1 %v12546_v13 }
 0xd5c   : > { %11752 = vmatpush3.bf16.msra.mxu0 %v14362_v26  ;;  %11776 = vmatpush3.bf16.msra.mxu1 %v14364_v45 }
 0xd5d   : > { %11753 = vmatprep.subr.bf16.mxu0 %v12546_v13  ;;  %11777 = vmatprep.subr.bf16.mxu1 %v12546_v13 }
 0xd60   : > { %11755 = vmatpush3.bf16.msra.mxu0 %v14374_v40  ;;  %11779 = vmatpush3.bf16.msra.mxu1 %v14376_v16 }
 0xd61   : > { %11756 = vmatprep.subr.bf16.mxu0 %v12546_v13  ;;  %11780 = vmatprep.subr.bf16.mxu1 %v12546_v13 }
 0xd64   : > { %11758 = vmatpush3.bf16.msra.mxu0 %v14386_v2  ;;  %11782 = vmatpush3.bf16.msra.mxu1 %v14388_v5 }
 0xd65   : > { %11783 = vmatprep.subr.bf16.mxu0 %v12546_v13  ;;  %11807 = vmatprep.subr.bf16.mxu1 %v12546_v13 }
 0xd67   : > { %10018 = vmatmul.mubr.f32.vlgmr.msra.gmra.mrb[14].mxu0 %v14299_v10  ;;  %10053 = vmatmul.mubr.f32.vlgmr.msra.gmra.mrb[14].mxu1 %v14299_v10 }
 0xd68   : > { %11785 = vmatpush3.bf16.msra.mxu0 %v14193_v61  ;;  %11809 = vmatpush3.bf16.msra.mxu1 %v14196_v21 }
 0xd69   : > { %11786 = vmatprep.subr.bf16.mxu0 %v12546_v13  ;;  %11810 = vmatprep.subr.bf16.mxu1 %v12546_v13 }
 0xd6a   : > { %10087 = vmatprep.mubr.msk.f32.mxu0 %vm12547_vm2, %v12548_v55  ;;  %10122 = vmatprep.mubr.msk.f32.mxu1 %vm12547_vm2, %v12548_v55 }
 0xd6c   : > { %11788 = vmatpush3.bf16.msra.mxu0 %v14205_v9  ;;  %11812 = vmatpush3.bf16.msra.mxu1 %v14208_v36 }
 0xd6d   : > { %11789 = vmatprep.subr.bf16.mxu0 %v12546_v13  ;;  %11813 = vmatprep.subr.bf16.mxu1 %v12546_v13 }
 0xd70   : > { %11791 = vmatpush3.bf16.msra.mxu0 %v14217_v59  ;;  %11815 = vmatpush3.bf16.msra.mxu1 %v14220_v23 }
 0xd71   : > { %11792 = vmatprep.subr.bf16.mxu0 %v12546_v13  ;;  %11816 = vmatprep.subr.bf16.mxu1 %v12546_v13 }
 0xd74   : > { %11794 = vmatpush3.bf16.msra.mxu0 %v14229_v0  ;;  %11818 = vmatpush3.bf16.msra.mxu1 %v14232_v24 }
 0xd75   : > { %11795 = vmatprep.subr.bf16.mxu0 %v12546_v13  ;;  %11819 = vmatprep.subr.bf16.mxu1 %v12546_v13 }
 0xd78   : > { %11797 = vmatpush3.bf16.msra.mxu0 %v14241_v29  ;;  %11821 = vmatpush3.bf16.msra.mxu1 %v14244_v7 }
 0xd79   : > { %11798 = vmatprep.subr.bf16.mxu0 %v12546_v13  ;;  %11822 = vmatprep.subr.bf16.mxu1 %v12546_v13 }
 0xd7c   : > { %11800 = vmatpush3.bf16.msra.mxu0 %v14253_v3  ;;  %11824 = vmatpush3.bf16.msra.mxu1 %v14256_v20 }
 0xd7d   : > { %11801 = vmatprep.subr.bf16.mxu0 %v12546_v13  ;;  %11825 = vmatprep.subr.bf16.mxu1 %v12546_v13 }
 0xd80   : > { %11803 = vmatpush3.bf16.msra.mxu0 %v14262_v17  ;;  %11827 = vmatpush3.bf16.msra.mxu1 %v14267_v51 }
 0xd81   : > { %11804 = vmatprep.subr.bf16.mxu0 %v12546_v13  ;;  %11828 = vmatprep.subr.bf16.mxu1 %v12546_v13 }
 0xd84   : > { %11806 = vmatpush3.bf16.msra.mxu0 %v14275_v6  ;;  %11830 = vmatpush3.bf16.msra.mxu1 %v14279_v27 }
 0xd85   : > { %11831 = vmatprep.subr.bf16.mxu0 %v12546_v13  ;;  %11855 = vmatprep.subr.bf16.mxu1 %v12546_v13 }
 0xe1a   : > { %v5084_v18 = vpop.f32.mrb[12].mxu0  ;;  %v5177_v10 = vpop.f32.mrb[12].mxu1 }
 0xe1b   : > { %v9949_v11 = vpop.f32.mrb[13].mxu0  ;;  %v9984_v22 = vpop.f32.mrb[13].mxu1  ;;  %v5181_v35 = vadd.f32 %v5177_v10, %v4999_v28  ;;  %v5088_v25 = vadd.f32 %v5084_v18, %v4998_v58 }
 0xe1d   : > { %v7259_v53 = vmul.f32 -1.442695, %v5181_v35  ;;  %v7258_v4 = vmul.f32 -1.442695, %v5088_v25 }
 0xe1f   : > { %12406 = vpow2.f32 %v7259_v53 }
 0xe20   : > { %12408 = vpow2.f32 %v7258_v4 }
 0xe29   : > { %v12407_v37 = vpop.eup %12406 }
 0xe2a   : > { %v12409_v38 = vpop.eup %12408  ;;  %v5185_v46 = vadd.f32 1.0, %v12407_v37 }
 0xe2b   : > { %v5092_v44 = vadd.f32 1.0, %v12409_v38 }
 0xe2c   : > { %12410 = vrcp.f32 %v5185_v46 }
 0xe2d   : > { %12412 = vrcp.f32 %v5092_v44 }
 0xe36   : > { %v12411_v32 = vpop.eup %12410 }
 0xe37   : > { %v12413_v39 = vpop.eup %12412  ;;  %v5369_v31 = vmul.f32 %v12411_v32, %v14287_v30 }
 0xe3a   : > { %v5270_v63 = vpop.f32.mrb[14].mxu0  ;;  %v5358_v43 = vpop.f32.mrb[14].mxu1 }
 0xe3b   : > { %v5274_v47 = vadd.f32 %v5270_v63, %v5000_v48  ;;  %v5362_v41 = vadd.f32 %v5358_v43, %v5001_v8  ;;  %v10019_v50 = vpop.f32.mrb[15].mxu0  ;;  %v10054_v15 = vpop.f32.mrb[15].mxu1 }
 0xe3d   : > { %12414 = vtanh.f32 %v5274_v47  ;;  %v7260_v60 = vmul.f32 -1.442695, %v5362_v41 }
 0xe3f   : > { %12416 = vpow2.f32 %v7260_v60  ;;  %v6237_v60 = vld [vmem:[%s12682_s12 + $0xa8] sm:$0xff] }
 0xe47   : > { %v12415_v34 = vpop.eup %12414 }
 0xe48   : > { %v5370_v54 = vmul.f32 %v12415_v34, %v12413_v39  ;;  %v6145_v39 = vld [vmem:[%s12682_s12 + $0xc0] sm:$0xff] }
 0xe49   : > { %v12417_v1 = vpop.eup %12416  ;;  %v6146_v34 = vld [vmem:[%s12682_s12 + $0xe0] sm:$0xff] }
 0xe4a   : > { %v14435_v18 = vadd.f32 %v5370_v54, %v5369_v31  ;;  %v5366_v10 = vadd.f32 1.0, %v12417_v1  ;;  %v6238_v31 = vld [vmem:[%s12682_s12 + $0xc8] sm:$0xff]  ;;  %v14595_v54 = vpack.c.bf16 %v6146_v34, %v6145_v39 }
 0xe4b   : > { %v6239_v1 = vld [vmem:[%s12682_s12 + $0xe8] sm:$0xff] }
 0xe4c   : > { %12418 = vtanh.f32 %v14435_v18 }
 0xe4d   : > { %12420 = vrcp.f32 %v5366_v10  ;;  %v6147_v10 = vld [vmem:[%s12682_s12 + $0x100] sm:$0xff] }
 0xe56   : > { %v12419_v11 = vpop.eup %12418 }
 0xe57   : > { %v12421_v22 = vpop.eup %12420 }
 0xe58   : > { %v5373_v28 = vmul.f32 %v12421_v22, %v12419_v11  ;;  %v6148_v11 = vld [vmem:[%s12682_s12 + $0x120] sm:$0xff]  ;;  %v6240_v22 = vld [vmem:[%s12682_s12 + $0x108] sm:$0xff] }
 0xe5a   : > { %7261 = vst [vmem:[%s12707_s1 + $0x20] sm:$0xff] %v5373_v28  ;;  %10088 = vmatmul.mubr.f32.vlgmr.msra.gmra.mrb[16].mxu0 %v5373_v28  ;;  %10123 = vmatmul.mubr.f32.vlgmr.msra.gmra.mrb[16].mxu1 %v5373_v28 }
 0xe5b   : > { %11833 = vmatpush3.bf16.msra.mxu0 %v14294_v12  ;;  %11857 = vmatpush3.bf16.msra.mxu1 %v14296_v57 }
 0xe5c   : > { %11834 = vmatprep.subr.bf16.mxu0 %v12546_v13  ;;  %11858 = vmatprep.subr.bf16.mxu1 %v12546_v13 }
 0xe5d   : > { %10157 = vmatprep.mubr.msk.f32.mxu0 %vm12547_vm2, %v12548_v55  ;;  %10192 = vmatprep.mubr.msk.f32.mxu1 %vm12547_vm2, %v12548_v55 }
 0xe5f   : > { %11836 = vmatpush3.bf16.msra.mxu0 %v14310_v49  ;;  %11860 = vmatpush3.bf16.msra.mxu1 %v14312_v33 }
 0xe60   : > { %11837 = vmatprep.subr.bf16.mxu0 %v12546_v13  ;;  %11861 = vmatprep.subr.bf16.mxu1 %v12546_v13 }
 0xe63   : > { %11839 = vmatpush3.bf16.msra.mxu0 %v14326_v19  ;;  %11863 = vmatpush3.bf16.msra.mxu1 %v14328_v56 }
 0xe64   : > { %11840 = vmatprep.subr.bf16.mxu0 %v12546_v13  ;;  %11864 = vmatprep.subr.bf16.mxu1 %v12546_v13 }
 0xe67   : > { %11842 = vmatpush3.bf16.msra.mxu0 %v14338_v14  ;;  %11866 = vmatpush3.bf16.msra.mxu1 %v14340_v62 }
 0xe68   : > { %11843 = vmatprep.subr.bf16.mxu0 %v12546_v13  ;;  %11867 = vmatprep.subr.bf16.mxu1 %v12546_v13 }
 0xe6b   : > { %11845 = vmatpush3.bf16.msra.mxu0 %v14350_v52  ;;  %11869 = vmatpush3.bf16.msra.mxu1 %v14352_v42 }
 0xe6c   : > { %11846 = vmatprep.subr.bf16.mxu0 %v12546_v13  ;;  %11870 = vmatprep.subr.bf16.mxu1 %v12546_v13 }
 0xe6f   : > { %11848 = vmatpush3.bf16.msra.mxu0 %v14362_v26  ;;  %11872 = vmatpush3.bf16.msra.mxu1 %v14364_v45 }
 0xe70   : > { %11849 = vmatprep.subr.bf16.mxu0 %v12546_v13  ;;  %11873 = vmatprep.subr.bf16.mxu1 %v12546_v13 }
 0xe73   : > { %11851 = vmatpush3.bf16.msra.mxu0 %v14374_v40  ;;  %11875 = vmatpush3.bf16.msra.mxu1 %v14376_v16 }
 0xe74   : > { %11852 = vmatprep.subr.bf16.mxu0 %v12546_v13  ;;  %11876 = vmatprep.subr.bf16.mxu1 %v12546_v13 }
 0xe77   : > { %11854 = vmatpush3.bf16.msra.mxu0 %v14386_v2  ;;  %11878 = vmatpush3.bf16.msra.mxu1 %v14388_v5 }
 0xe78   : > { %11879 = vmatprep.subr.bf16.mxu0 %v12546_v13  ;;  %11903 = vmatprep.subr.bf16.mxu1 %v12546_v13 }
 0xe7a   : > { %10158 = vmatmul.mubr.f32.vlgmr.msra.gmra.mrb[18].mxu0 %v5373_v28  ;;  %10193 = vmatmul.mubr.f32.vlgmr.msra.gmra.mrb[18].mxu1 %v5373_v28  ;;  %v14607_v28 = vpack.c.bf16 %v6148_v11, %v6147_v10 }
 0xe7b   : > { %11881 = vmatpush3.bf16.msra.mxu0 %v14193_v61  ;;  %11905 = vmatpush3.bf16.msra.mxu1 %v14196_v21 }
 0xe7c   : > { %11882 = vmatprep.subr.bf16.mxu0 %v12546_v13  ;;  %11906 = vmatprep.subr.bf16.mxu1 %v12546_v13 }
 0xe7d   : > { %10227 = vmatprep.mubr.msk.f32.mxu0 %vm12547_vm2, %v12548_v55  ;;  %10262 = vmatprep.mubr.msk.f32.mxu1 %vm12547_vm2, %v12548_v55 }
 0xe7f   : > { %11884 = vmatpush3.bf16.msra.mxu0 %v14205_v9  ;;  %11908 = vmatpush3.bf16.msra.mxu1 %v14208_v36 }
 0xe80   : > { %11885 = vmatprep.subr.bf16.mxu0 %v12546_v13  ;;  %11909 = vmatprep.subr.bf16.mxu1 %v12546_v13 }
 0xe83   : > { %11887 = vmatpush3.bf16.msra.mxu0 %v14217_v59  ;;  %11911 = vmatpush3.bf16.msra.mxu1 %v14220_v23  ;;  %v5378_v59 = vld [vmem:[#allocation2 + $0x68] sm:$0xff]  ;;  %v5377_v23 = vld [vmem:[#allocation2 + $0x60] sm:$0xff] }
 0xe84   : > { %11888 = vmatprep.subr.bf16.mxu0 %v12546_v13  ;;  %11912 = vmatprep.subr.bf16.mxu1 %v12546_v13 }
 0xe87   : > { %11890 = vmatpush3.bf16.msra.mxu0 %v14229_v0  ;;  %11914 = vmatpush3.bf16.msra.mxu1 %v14232_v24 }
 0xe88   : > { %11891 = vmatprep.subr.bf16.mxu0 %v12546_v13  ;;  %11915 = vmatprep.subr.bf16.mxu1 %v12546_v13 }
 0xe8b   : > { %11893 = vmatpush3.bf16.msra.mxu0 %v14241_v29  ;;  %11917 = vmatpush3.bf16.msra.mxu1 %v14244_v7 }
 0xe8c   : > { %11894 = vmatprep.subr.bf16.mxu0 %v12546_v13  ;;  %11918 = vmatprep.subr.bf16.mxu1 %v12546_v13 }
 0xe8f   : > { %11896 = vmatpush3.bf16.msra.mxu0 %v14253_v3  ;;  %11920 = vmatpush3.bf16.msra.mxu1 %v14256_v20 }
 0xe90   : > { %11897 = vmatprep.subr.bf16.mxu0 %v12546_v13  ;;  %11921 = vmatprep.subr.bf16.mxu1 %v12546_v13 }
 0xe93   : > { %11899 = vmatpush3.bf16.msra.mxu0 %v14262_v17  ;;  %11923 = vmatpush3.bf16.msra.mxu1 %v14267_v51 }
 0xe94   : > { %11900 = vmatprep.subr.bf16.mxu0 %v12546_v13  ;;  %11924 = vmatprep.subr.bf16.mxu1 %v12546_v13 }
 0xe97   : > { %11902 = vmatpush3.bf16.msra.mxu0 %v14275_v6  ;;  %11926 = vmatpush3.bf16.msra.mxu1 %v14279_v27  ;;  %v5379_v6 = vld [vmem:[#allocation2 + $0x70] sm:$0xff]  ;;  %v5380_v27 = vld [vmem:[#allocation2 + $0x78] sm:$0xff] }
 0xe98   : > { %11927 = vmatprep.subr.bf16.mxu0 %v12546_v13  ;;  %11951 = vmatprep.subr.bf16.mxu1 %v12546_v13 }
 0xf2d   : > { %v5463_v61 = vpop.f32.mrb[16].mxu0  ;;  %v5556_v21 = vpop.f32.mrb[16].mxu1 }
 0xf2e   : > { %v10089_v9 = vpop.f32.mrb[17].mxu0  ;;  %v10124_v36 = vpop.f32.mrb[17].mxu1  ;;  %v5560_v0 = vadd.f32 %v5556_v21, %v5378_v59  ;;  %v5467_v24 = vadd.f32 %v5463_v61, %v5377_v23  ;;  %v6241_v61 = vld [vmem:[%s12682_s12 + $0x128] sm:$0xff] }
 0xf2f   : > { %v14610_v21 = vpack.c.bf16 %v6241_v61, %v6240_v22  ;;  %v6149_v9 = vld [vmem:[%s12682_s12 + $0x140] sm:$0xff]  ;;  %v6242_v59 = vld [vmem:[%s12682_s12 + $0x148] sm:$0xff]  ;;  %v6325_v22 = vld [vmem:[%s12682_s12 + $0x10] sm:$0xff] }
 0xf30   : > { %v7263_v29 = vmul.f32 -1.442695, %v5560_v0  ;;  %v7262_v7 = vmul.f32 -1.442695, %v5467_v24  ;;  %v6150_v36 = vld [vmem:[%s12682_s12 + $0x160] sm:$0xff]  ;;  %v6243_v0 = vld [vmem:[%s12682_s12 + $0x168] sm:$0xff] }
 0xf31   : > { %v14619_v23 = vpack.c.bf16 %v6150_v36, %v6149_v9  ;;  %v14622_v24 = vpack.c.bf16 %v6243_v0, %v6242_v59  ;;  %v6326_v61 = vld [vmem:[%s12682_s12 + $0x30] sm:$0xff]  ;;  %v6413_v9 = vld [vmem:[%s12682_s12 + $0x18] sm:$0xff] }
 0xf32   : > { %12422 = vpow2.f32 %v7263_v29  ;;  %v6151_v29 = vld [vmem:[%s12682_s12 + $0x180] sm:$0xff]  ;;  %v6414_v36 = vld [vmem:[%s12682_s12 + $0x38] sm:$0xff] }
 0xf33   : > { %12424 = vpow2.f32 %v7262_v7  ;;  %v6152_v7 = vld [vmem:[%s12682_s12 + $0x1a0] sm:$0xff] }
 0xf3c   : > { %v12423_v3 = vpop.eup %12422 }
 0xf3d   : > { %v12425_v20 = vpop.eup %12424  ;;  %v5564_v17 = vadd.f32 1.0, %v12423_v3  ;;  %v6244_v3 = vld [vmem:[%s12682_s12 + $0x188] sm:$0xff] }
 0xf3e   : > { %v5471_v51 = vadd.f32 1.0, %v12425_v20  ;;  %v14628_v20 = vpack.c.bf16 %v6152_v7, %v6151_v29  ;;  %v14662_v29 = vpack.c.bf16 %v6414_v36, %v6413_v9  ;;  %v6327_v7 = vld [vmem:[%s12682_s12 + $0x50] sm:$0xff]  ;;  %v6427_v9 = vld [vmem:[%s12682_s12 + $0x1d8] sm:$0xff] }
 0xf3f   : > { %12426 = vrcp.f32 %v5564_v17  ;;  %v6245_v17 = vld [vmem:[%s12682_s12 + $0x1a8] sm:$0xff]  ;;  %v6428_v36 = vld [vmem:[%s12682_s12 + $0x1f8] sm:$0xff] }
 0xf40   : > { %12428 = vrcp.f32 %v5471_v51  ;;  %v14633_v51 = vpack.c.bf16 %v6245_v17, %v6244_v3  ;;  %v6328_v17 = vld [vmem:[%s12682_s12 + $0x70] sm:$0xff] }
 0xf49   : > { %v12427_v38 = vpop.eup %12426 }
 0xf4a   : > { %v12429_v46 = vpop.eup %12428  ;;  %v5748_v48 = vmul.f32 %v12427_v38, %v14435_v18  ;;  %v14598_v18 = vpack.c.bf16 %v6239_v1, %v6238_v31 }
 0xf4d   : > { %v5649_v30 = vpop.f32.mrb[18].mxu0  ;;  %v5737_v58 = vpop.f32.mrb[18].mxu1 }
 0xf4e   : > { %v5653_v35 = vadd.f32 %v5649_v30, %v5379_v6  ;;  %v5741_v25 = vadd.f32 %v5737_v58, %v5380_v27  ;;  %v10159_v53 = vpop.f32.mrb[19].mxu0  ;;  %v10194_v4 = vpop.f32.mrb[19].mxu1  ;;  %v6153_v6 = vld [vmem:[%s12682_s12 + $0x1c0] sm:$0xff]  ;;  %v6246_v30 = vld [vmem:[%s12682_s12 + $0x1c8] sm:$0xff] }
 0xf4f   : > { %v6154_v27 = vld [vmem:[%s12682_s12 + $0x1e0] sm:$0xff]  ;;  %v6247_v58 = vld [vmem:[%s12682_s12 + $0x1e8] sm:$0xff] }
 0xf50   : > { %12430 = vtanh.f32 %v5653_v35  ;;  %v7264_v37 = vmul.f32 -1.442695, %v5741_v25  ;;  %v14641_v35 = vpack.c.bf16 %v6154_v27, %v6153_v6  ;;  %v14645_v25 = vpack.c.bf16 %v6247_v58, %v6246_v30  ;;  %v6415_v6 = vld [vmem:[%s12682_s12 + $0x58] sm:$0xff] }
 0xf51   : > { %v6416_v27 = vld [vmem:[%s12682_s12 + $0x78] sm:$0xff]  ;;  %v14676_v30 = vpack.c.bf16 %v6328_v17, %v6327_v7 }
 0xf52   : > { %12432 = vpow2.f32 %v7264_v37  ;;  %v14678_v58 = vpack.c.bf16 %v6416_v27, %v6415_v6 }
 0xf5a   : > { %v12431_v44 = vpop.eup %12430 }
 0xf5b   : > { %v5749_v8 = vmul.f32 %v12431_v44, %v12429_v46  ;;  %v5757_v46 = vld [vmem:[#allocation2 + $0x48] sm:$0xff]  ;;  %v5756_v44 = vld [vmem:[#allocation2 + $0x40] sm:$0xff] }
 0xf5c   : > { %v12433_v63 = vpop.eup %12432 }
 0xf5d   : > { %v14512_v43 = vadd.f32 %v5749_v8, %v5748_v48  ;;  %v5745_v47 = vadd.f32 1.0, %v12433_v63 }
 0xf5f   : > { %12434 = vtanh.f32 %v14512_v43 }
 0xf60   : > { %12436 = vrcp.f32 %v5745_v47 }
 0xf69   : > { %v12435_v41 = vpop.eup %12434 }
 0xf6a   : > { %v12437_v50 = vpop.eup %12436 }
 0xf6b   : > { %v5752_v15 = vmul.f32 %v12437_v50, %v12435_v41 }
 0xf6d   : > { %7265 = vst [vmem:[%s12707_s1 + $0x18] sm:$0xff] %v5752_v15  ;;  %10228 = vmatmul.mubr.f32.vlgmr.msra.gmra.mrb[20].mxu0 %v5752_v15  ;;  %10263 = vmatmul.mubr.f32.vlgmr.msra.gmra.mrb[20].mxu1 %v5752_v15 }
 0xf6e   : > { %11929 = vmatpush3.bf16.msra.mxu0 %v14294_v12  ;;  %11953 = vmatpush3.bf16.msra.mxu1 %v14296_v57  ;;  %v6139_v12 = vld [vmem:[%s12682_s12] sm:$0xff] }
 0xf6f   : > { %11930 = vmatprep.subr.bf16.mxu0 %v12546_v13  ;;  %11954 = vmatprep.subr.bf16.mxu1 %v12546_v13  ;;  %v6140_v57 = vld [vmem:[%s12682_s12 + $0x20] sm:$0xff] }
 0xf70   : > { %10297 = vmatprep.mubr.msk.f32.mxu0 %vm12547_vm2, %v12548_v55  ;;  %10332 = vmatprep.mubr.msk.f32.mxu1 %vm12547_vm2, %v12548_v55 }
 0xf72   : > { %11932 = vmatpush3.bf16.msra.mxu0 %v14310_v49  ;;  %11956 = vmatpush3.bf16.msra.mxu1 %v14312_v33  ;;  %v6232_v49 = vld [vmem:[%s12682_s12 + $0x8] sm:$0xff]  ;;  %v14559_v33 = vpack.c.bf16 %v6140_v57, %v6139_v12  ;;  %v5758_v57 = vld [vmem:[#allocation2 + $0x50] sm:$0xff] }
 0xf73   : > { %11933 = vmatprep.subr.bf16.mxu0 %v12546_v13  ;;  %11957 = vmatprep.subr.bf16.mxu1 %v12546_v13 }
 0xf76   : > { %11935 = vmatpush3.bf16.msra.mxu0 %v14326_v19  ;;  %11959 = vmatpush3.bf16.msra.mxu1 %v14328_v56  ;;  %v6233_v19 = vld [vmem:[%s12682_s12 + $0x28] sm:$0xff] }
 0xf77   : > { %11936 = vmatprep.subr.bf16.mxu0 %v12546_v13  ;;  %11960 = vmatprep.subr.bf16.mxu1 %v12546_v13  ;;  %v14562_v56 = vpack.c.bf16 %v6233_v19, %v6232_v49  ;;  %v5759_v49 = vld [vmem:[#allocation2 + $0x58] sm:$0xff] }
 0xf7a   : > { %11938 = vmatpush3.bf16.msra.mxu0 %v14338_v14  ;;  %11962 = vmatpush3.bf16.msra.mxu1 %v14340_v62  ;;  %v6141_v14 = vld [vmem:[%s12682_s12 + $0x40] sm:$0xff] }
 0xf7b   : > { %11939 = vmatprep.subr.bf16.mxu0 %v12546_v13  ;;  %11963 = vmatprep.subr.bf16.mxu1 %v12546_v13  ;;  %v6142_v62 = vld [vmem:[%s12682_s12 + $0x60] sm:$0xff] }
 0xf7e   : > { %11941 = vmatpush3.bf16.msra.mxu0 %v14350_v52  ;;  %11965 = vmatpush3.bf16.msra.mxu1 %v14352_v42  ;;  %v6234_v52 = vld [vmem:[%s12682_s12 + $0x48] sm:$0xff]  ;;  %v14571_v42 = vpack.c.bf16 %v6142_v62, %v6141_v14 }
 0xf7f   : > { %11942 = vmatprep.subr.bf16.mxu0 %v12546_v13  ;;  %11966 = vmatprep.subr.bf16.mxu1 %v12546_v13 }
 0xf82   : > { %11944 = vmatpush3.bf16.msra.mxu0 %v14362_v26  ;;  %11968 = vmatpush3.bf16.msra.mxu1 %v14364_v45  ;;  %v6235_v26 = vld [vmem:[%s12682_s12 + $0x68] sm:$0xff] }
 0xf83   : > { %11945 = vmatprep.subr.bf16.mxu0 %v12546_v13  ;;  %11969 = vmatprep.subr.bf16.mxu1 %v12546_v13  ;;  %v14574_v45 = vpack.c.bf16 %v6235_v26, %v6234_v52 }
 0xf86   : > { %11947 = vmatpush3.bf16.msra.mxu0 %v14374_v40  ;;  %11971 = vmatpush3.bf16.msra.mxu1 %v14376_v16  ;;  %v6143_v40 = vld [vmem:[%s12682_s12 + $0x80] sm:$0xff] }
 0xf87   : > { %11948 = vmatprep.subr.bf16.mxu0 %v12546_v13  ;;  %11972 = vmatprep.subr.bf16.mxu1 %v12546_v13  ;;  %v6144_v16 = vld [vmem:[%s12682_s12 + $0xa0] sm:$0xff] }
 0xf8a   : > { %11950 = vmatpush3.bf16.msra.mxu0 %v14386_v2  ;;  %11974 = vmatpush3.bf16.msra.mxu1 %v14388_v5  ;;  %v6236_v2 = vld [vmem:[%s12682_s12 + $0x88] sm:$0xff]  ;;  %v14583_v5 = vpack.c.bf16 %v6144_v16, %v6143_v40 }
 0xf8b   : > { %11975 = vmatprep.subr.bf16.mxu0 %v12546_v13  ;;  %11999 = vmatprep.subr.bf16.mxu1 %v12546_v13  ;;  %v14586_v32 = vpack.c.bf16 %v6237_v60, %v6236_v2 }
 0xf8d   : > { %10298 = vmatmul.mubr.f32.vlgmr.msra.gmra.mrb[22].mxu0 %v5752_v15  ;;  %10333 = vmatmul.mubr.f32.vlgmr.msra.gmra.mrb[22].mxu1 %v5752_v15 }
 0xf8e   : > { %10367 = vmatprep.mubr.msk.f32.mxu0 %vm12547_vm2, %v12548_v55  ;;  %10402 = vmatprep.mubr.msk.f32.mxu1 %vm12547_vm2, %v12548_v55 }
 0xf8f   : > { %11977 = vmatpush3.bf16.msra.mxu0 %v14559_v33  ;;  %12001 = vmatpush3.bf16.msra.mxu1 %v14562_v56 }
 0xf90   : > { %11978 = vmatprep.subr.bf16.mxu0 %v12546_v13  ;;  %12002 = vmatprep.subr.bf16.mxu1 %v12546_v13 }
 0xf93   : > { %11980 = vmatpush3.bf16.msra.mxu0 %v14571_v42  ;;  %12004 = vmatpush3.bf16.msra.mxu1 %v14574_v45 }
 0xf94   : > { %11981 = vmatprep.subr.bf16.mxu0 %v12546_v13  ;;  %12005 = vmatprep.subr.bf16.mxu1 %v12546_v13 }
 0xf97   : > { %11983 = vmatpush3.bf16.msra.mxu0 %v14583_v5  ;;  %12007 = vmatpush3.bf16.msra.mxu1 %v14586_v32 }
 0xf98   : > { %11984 = vmatprep.subr.bf16.mxu0 %v12546_v13  ;;  %12008 = vmatprep.subr.bf16.mxu1 %v12546_v13 }
 0xf9b   : > { %11986 = vmatpush3.bf16.msra.mxu0 %v14595_v54  ;;  %12010 = vmatpush3.bf16.msra.mxu1 %v14598_v18 }
 0xf9c   : > { %11987 = vmatprep.subr.bf16.mxu0 %v12546_v13  ;;  %12011 = vmatprep.subr.bf16.mxu1 %v12546_v13 }
 0xf9f   : > { %11989 = vmatpush3.bf16.msra.mxu0 %v14607_v28  ;;  %12013 = vmatpush3.bf16.msra.mxu1 %v14610_v21 }
 0xfa0   : > { %11990 = vmatprep.subr.bf16.mxu0 %v12546_v13  ;;  %12014 = vmatprep.subr.bf16.mxu1 %v12546_v13 }
 0xfa3   : > { %11992 = vmatpush3.bf16.msra.mxu0 %v14619_v23  ;;  %12016 = vmatpush3.bf16.msra.mxu1 %v14622_v24 }
 0xfa4   : > { %11993 = vmatprep.subr.bf16.mxu0 %v12546_v13  ;;  %12017 = vmatprep.subr.bf16.mxu1 %v12546_v13 }
 0xfa7   : > { %11995 = vmatpush3.bf16.msra.mxu0 %v14628_v20  ;;  %12019 = vmatpush3.bf16.msra.mxu1 %v14633_v51 }
 0xfa8   : > { %11996 = vmatprep.subr.bf16.mxu0 %v12546_v13  ;;  %12020 = vmatprep.subr.bf16.mxu1 %v12546_v13 }
 0xfab   : > { %11998 = vmatpush3.bf16.msra.mxu0 %v14641_v35  ;;  %12022 = vmatpush3.bf16.msra.mxu1 %v14645_v25 }
 0xfac   : > { %12023 = vmatprep.subr.bf16.mxu0 %v12546_v13  ;;  %12047 = vmatprep.subr.bf16.mxu1 %v12546_v13 }
0x1040   : > { %v5842_v53 = vpop.f32.mrb[20].mxu0  ;;  %v5935_v4 = vpop.f32.mrb[20].mxu1 }
0x1041   : > { %v10229_v37 = vpop.f32.mrb[21].mxu0  ;;  %v10264_v38 = vpop.f32.mrb[21].mxu1  ;;  %v5939_v48 = vadd.f32 %v5935_v4, %v5757_v46  ;;  %v5846_v8 = vadd.f32 %v5842_v53, %v5756_v44  ;;  %v6329_v53 = vld [vmem:[%s12682_s12 + $0x90] sm:$0xff] }
0x1042   : > { %v6330_v4 = vld [vmem:[%s12682_s12 + $0xb0] sm:$0xff]  ;;  %v6417_v37 = vld [vmem:[%s12682_s12 + $0x98] sm:$0xff] }
0x1043   : > { %v7267_v63 = vmul.f32 -1.442695, %v5939_v48  ;;  %v7266_v47 = vmul.f32 -1.442695, %v5846_v8  ;;  %v6418_v38 = vld [vmem:[%s12682_s12 + $0xb8] sm:$0xff]  ;;  %v14692_v46 = vpack.c.bf16 %v6330_v4, %v6329_v53  ;;  %v6331_v48 = vld [vmem:[%s12682_s12 + $0xd0] sm:$0xff] }
0x1044   : > { %v14694_v44 = vpack.c.bf16 %v6418_v38, %v6417_v37  ;;  %v6332_v8 = vld [vmem:[%s12682_s12 + $0xf0] sm:$0xff] }
0x1045   : > { %12438 = vpow2.f32 %v7267_v63  ;;  %v6419_v63 = vld [vmem:[%s12682_s12 + $0xd8] sm:$0xff] }
0x1046   : > { %12440 = vpow2.f32 %v7266_v47  ;;  %v6420_v47 = vld [vmem:[%s12682_s12 + $0xf8] sm:$0xff] }
0x104f   : > { %v12439_v41 = vpop.eup %12438 }
0x1050   : > { %v12441_v50 = vpop.eup %12440  ;;  %v5943_v15 = vadd.f32 1.0, %v12439_v41  ;;  %v14704_v41 = vpack.c.bf16 %v6332_v8, %v6331_v48 }
0x1051   : > { %v5850_v12 = vadd.f32 1.0, %v12441_v50  ;;  %v14706_v50 = vpack.c.bf16 %v6420_v47, %v6419_v63 }
0x1052   : > { %12442 = vrcp.f32 %v5943_v15  ;;  %v6333_v15 = vld [vmem:[%s12682_s12 + $0x110] sm:$0xff] }
0x1053   : > { %12444 = vrcp.f32 %v5850_v12  ;;  %v6334_v12 = vld [vmem:[%s12682_s12 + $0x130] sm:$0xff] }
0x105c   : > { %v12443_v2 = vpop.eup %12442 }
0x105d   : > { %v12445_v60 = vpop.eup %12444  ;;  %v6127_v34 = vmul.f32 %v12443_v2, %v14512_v43  ;;  %v14660_v43 = vpack.c.bf16 %v6326_v61, %v6325_v22  ;;  %v6339_v22 = vld [vmem:[%s12682_s12 + $0x1d0] sm:$0xff] }
0x105e   : > { %v6340_v61 = vld [vmem:[%s12682_s12 + $0x1f0] sm:$0xff] }
0x1060   : > { %v6028_v19 = vpop.f32.mrb[22].mxu0  ;;  %v6116_v14 = vpop.f32.mrb[22].mxu1 }
0x1061   : > { %v6032_v62 = vadd.f32 %v6028_v19, %v5758_v57  ;;  %v6120_v52 = vadd.f32 %v6116_v14, %v5759_v49  ;;  %v10299_v26 = vpop.f32.mrb[23].mxu0  ;;  %v10334_v40 = vpop.f32.mrb[23].mxu1  ;;  %v6421_v57 = vld [vmem:[%s12682_s12 + $0x118] sm:$0xff]  ;;  %v14716_v19 = vpack.c.bf16 %v6334_v12, %v6333_v15 }
0x1062   : > { %v6422_v49 = vld [vmem:[%s12682_s12 + $0x138] sm:$0xff] }
0x1063   : > { %12446 = vtanh.f32 %v6032_v62  ;;  %v7268_v16 = vmul.f32 -1.442695, %v6120_v52  ;;  %v14718_v14 = vpack.c.bf16 %v6422_v49, %v6421_v57  ;;  %v6335_v62 = vld [vmem:[%s12682_s12 + $0x150] sm:$0xff]  ;;  %v6423_v26 = vld [vmem:[%s12682_s12 + $0x158] sm:$0xff] }
0x1064   : > { %v6336_v52 = vld [vmem:[%s12682_s12 + $0x170] sm:$0xff]  ;;  %v6424_v40 = vld [vmem:[%s12682_s12 + $0x178] sm:$0xff] }
0x1065   : > { %12448 = vpow2.f32 %v7268_v16  ;;  %v14728_v16 = vpack.c.bf16 %v6336_v52, %v6335_v62  ;;  %v14730_v2 = vpack.c.bf16 %v6424_v40, %v6423_v26  ;;  %v6515_v26 = vld [vmem:[#allocation2 + $0x10] sm:$0xff]  ;;  %v6516_v40 = vld [vmem:[#allocation2 + $0x18] sm:$0xff] }
0x106d   : > { %v12447_v39 = vpop.eup %12446 }
0x106e   : > { %v6128_v31 = vmul.f32 %v12447_v39, %v12445_v60  ;;  %v6337_v60 = vld [vmem:[%s12682_s12 + $0x190] sm:$0xff] }
0x106f   : > { %v12449_v1 = vpop.eup %12448  ;;  %v6338_v39 = vld [vmem:[%s12682_s12 + $0x1b0] sm:$0xff] }
0x1070   : > { %v14653_v10 = vadd.f32 %v6128_v31, %v6127_v34  ;;  %v6124_v11 = vadd.f32 1.0, %v12449_v1  ;;  %v6425_v34 = vld [vmem:[%s12682_s12 + $0x198] sm:$0xff]  ;;  %v14740_v1 = vpack.c.bf16 %v6338_v39, %v6337_v60 }
0x1071   : > { %v6426_v31 = vld [vmem:[%s12682_s12 + $0x1b8] sm:$0xff] }
0x1072   : > { %12450 = vtanh.f32 %v14653_v10 }
0x1073   : > { %12452 = vrcp.f32 %v6124_v11  ;;  %v14742_v11 = vpack.c.bf16 %v6426_v31, %v6425_v34 }
0x107c   : > { %v12451_v59 = vpop.eup %12450 }
0x107d   : > { %v12453_v0 = vpop.eup %12452 }
0x107e   : > { %v14665_v3 = vmul.f32 %v12453_v0, %v12451_v59  ;;  %v14752_v59 = vpack.c.bf16 %v6340_v61, %v6339_v22  ;;  %v14754_v0 = vpack.c.bf16 %v6428_v36, %v6427_v9 }
0x1080   : > { %7269 = vst [vmem:[%s12707_s1 + $0x10] sm:$0xff] %v14665_v3  ;;  %10368 = vmatmul.mubr.f32.vlgmr.msra.gmra.mrb[24].mxu0 %v14665_v3  ;;  %10403 = vmatmul.mubr.f32.vlgmr.msra.gmra.mrb[24].mxu1 %v14665_v3 }
0x1081   : > { %12025 = vmatpush3.bf16.msra.mxu0 %v14660_v43  ;;  %12049 = vmatpush3.bf16.msra.mxu1 %v14662_v29 }
0x1082   : > { %12026 = vmatprep.subr.bf16.mxu0 %v12546_v13  ;;  %12050 = vmatprep.subr.bf16.mxu1 %v12546_v13 }
0x1083   : > { %10437 = vmatprep.mubr.msk.f32.mxu0 %vm12547_vm2, %v12548_v55  ;;  %10472 = vmatprep.mubr.msk.f32.mxu1 %vm12547_vm2, %v12548_v55 }
0x1085   : > { %12028 = vmatpush3.bf16.msra.mxu0 %v14676_v30  ;;  %12052 = vmatpush3.bf16.msra.mxu1 %v14678_v58 }
0x1086   : > { %12029 = vmatprep.subr.bf16.mxu0 %v12546_v13  ;;  %12053 = vmatprep.subr.bf16.mxu1 %v12546_v13 }
0x1089   : > { %12031 = vmatpush3.bf16.msra.mxu0 %v14692_v46  ;;  %12055 = vmatpush3.bf16.msra.mxu1 %v14694_v44 }
0x108a   : > { %12032 = vmatprep.subr.bf16.mxu0 %v12546_v13  ;;  %12056 = vmatprep.subr.bf16.mxu1 %v12546_v13 }
0x108d   : > { %12034 = vmatpush3.bf16.msra.mxu0 %v14704_v41  ;;  %12058 = vmatpush3.bf16.msra.mxu1 %v14706_v50 }
0x108e   : > { %12035 = vmatprep.subr.bf16.mxu0 %v12546_v13  ;;  %12059 = vmatprep.subr.bf16.mxu1 %v12546_v13 }
0x1091   : > { %12037 = vmatpush3.bf16.msra.mxu0 %v14716_v19  ;;  %12061 = vmatpush3.bf16.msra.mxu1 %v14718_v14 }
0x1092   : > { %12038 = vmatprep.subr.bf16.mxu0 %v12546_v13  ;;  %12062 = vmatprep.subr.bf16.mxu1 %v12546_v13 }
0x1095   : > { %12040 = vmatpush3.bf16.msra.mxu0 %v14728_v16  ;;  %12064 = vmatpush3.bf16.msra.mxu1 %v14730_v2 }
0x1096   : > { %12041 = vmatprep.subr.bf16.mxu0 %v12546_v13  ;;  %12065 = vmatprep.subr.bf16.mxu1 %v12546_v13 }
0x1099   : > { %12043 = vmatpush3.bf16.msra.mxu0 %v14740_v1  ;;  %12067 = vmatpush3.bf16.msra.mxu1 %v14742_v11 }
0x109a   : > { %12044 = vmatprep.subr.bf16.mxu0 %v12546_v13  ;;  %12068 = vmatprep.subr.bf16.mxu1 %v12546_v13 }
0x109d   : > { %12046 = vmatpush3.bf16.msra.mxu0 %v14752_v59  ;;  %12070 = vmatpush3.bf16.msra.mxu1 %v14754_v0 }
0x109e   : > { %12071 = vmatprep.subr.bf16.mxu0 %v12546_v13  ;;  %12095 = vmatprep.subr.bf16.mxu1 %v12546_v13 }
0x10a0   : > { %10438 = vmatmul.mubr.f32.vlgmr.msra.gmra.mrb[26].mxu0 %v14665_v3  ;;  %10473 = vmatmul.mubr.f32.vlgmr.msra.gmra.mrb[26].mxu1 %v14665_v3 }
0x10a1   : > { %12073 = vmatpush3.bf16.msra.mxu0 %v14559_v33  ;;  %12097 = vmatpush3.bf16.msra.mxu1 %v14562_v56 }
0x10a2   : > { %12074 = vmatprep.subr.bf16.mxu0 %v12546_v13  ;;  %12098 = vmatprep.subr.bf16.mxu1 %v12546_v13 }
0x10a3   : > { %10507 = vmatprep.mubr.msk.f32.mxu0 %vm12547_vm2, %v12548_v55  ;;  %10542 = vmatprep.mubr.msk.f32.mxu1 %vm12547_vm2, %v12548_v55 }
0x10a5   : > { %12076 = vmatpush3.bf16.msra.mxu0 %v14571_v42  ;;  %12100 = vmatpush3.bf16.msra.mxu1 %v14574_v45 }
0x10a6   : > { %12077 = vmatprep.subr.bf16.mxu0 %v12546_v13  ;;  %12101 = vmatprep.subr.bf16.mxu1 %v12546_v13 }
0x10a9   : > { %12079 = vmatpush3.bf16.msra.mxu0 %v14583_v5  ;;  %12103 = vmatpush3.bf16.msra.mxu1 %v14586_v32  ;;  %v6136_v5 = vld [vmem:[#allocation2 + $0x28] sm:$0xff]  ;;  %v6135_v32 = vld [vmem:[#allocation2 + $0x20] sm:$0xff] }
0x10aa   : > { %12080 = vmatprep.subr.bf16.mxu0 %v12546_v13  ;;  %12104 = vmatprep.subr.bf16.mxu1 %v12546_v13 }
0x10ad   : > { %12082 = vmatpush3.bf16.msra.mxu0 %v14595_v54  ;;  %12106 = vmatpush3.bf16.msra.mxu1 %v14598_v18 }
0x10ae   : > { %12083 = vmatprep.subr.bf16.mxu0 %v12546_v13  ;;  %12107 = vmatprep.subr.bf16.mxu1 %v12546_v13 }
0x10b1   : > { %12085 = vmatpush3.bf16.msra.mxu0 %v14607_v28  ;;  %12109 = vmatpush3.bf16.msra.mxu1 %v14610_v21 }
0x10b2   : > { %12086 = vmatprep.subr.bf16.mxu0 %v12546_v13  ;;  %12110 = vmatprep.subr.bf16.mxu1 %v12546_v13 }
0x10b5   : > { %12088 = vmatpush3.bf16.msra.mxu0 %v14619_v23  ;;  %12112 = vmatpush3.bf16.msra.mxu1 %v14622_v24 }
0x10b6   : > { %12089 = vmatprep.subr.bf16.mxu0 %v12546_v13  ;;  %12113 = vmatprep.subr.bf16.mxu1 %v12546_v13 }
0x10b9   : > { %12091 = vmatpush3.bf16.msra.mxu0 %v14628_v20  ;;  %12115 = vmatpush3.bf16.msra.mxu1 %v14633_v51 }
0x10ba   : > { %12092 = vmatprep.subr.bf16.mxu0 %v12546_v13  ;;  %12116 = vmatprep.subr.bf16.mxu1 %v12546_v13 }
0x10bd   : > { %12094 = vmatpush3.bf16.msra.mxu0 %v14641_v35  ;;  %12118 = vmatpush3.bf16.msra.mxu1 %v14645_v25  ;;  %v6137_v35 = vld [vmem:[#allocation2 + $0x30] sm:$0xff]  ;;  %v6138_v25 = vld [vmem:[#allocation2 + $0x38] sm:$0xff] }
0x10be   : > { %12119 = vmatprep.subr.bf16.mxu0 %v12546_v13  ;;  %12143 = vmatprep.subr.bf16.mxu1 %v12546_v13 }
0x1153   : > { %v6221_v33 = vpop.f32.mrb[24].mxu0  ;;  %v6314_v56 = vpop.f32.mrb[24].mxu1 }
0x1154   : > { %v10369_v42 = vpop.f32.mrb[25].mxu0  ;;  %v10404_v45 = vpop.f32.mrb[25].mxu1  ;;  %v6318_v54 = vadd.f32 %v6314_v56, %v6136_v5  ;;  %v6225_v18 = vadd.f32 %v6221_v33, %v6135_v32 }
0x1156   : > { %v7271_v28 = vmul.f32 -1.442695, %v6318_v54  ;;  %v7270_v21 = vmul.f32 -1.442695, %v6225_v18 }
0x1158   : > { %12454 = vpow2.f32 %v7271_v28 }
0x1159   : > { %12456 = vpow2.f32 %v7270_v21 }
0x1162   : > { %v12455_v23 = vpop.eup %12454 }
0x1163   : > { %v12457_v24 = vpop.eup %12456  ;;  %v6322_v20 = vadd.f32 1.0, %v12455_v23 }
0x1164   : > { %v6229_v51 = vadd.f32 1.0, %v12457_v24 }
0x1165   : > { %12458 = vrcp.f32 %v6322_v20 }
0x1166   : > { %12460 = vrcp.f32 %v6229_v51 }
0x116f   : > { %v12459_v37 = vpop.eup %12458 }
0x1170   : > { %v12461_v38 = vpop.eup %12460  ;;  %v6506_v8 = vmul.f32 %v12459_v37, %v14653_v10 }
0x1173   : > { %v6407_v7 = vpop.f32.mrb[26].mxu0  ;;  %v6495_v3 = vpop.f32.mrb[26].mxu1 }
0x1174   : > { %v6411_v17 = vadd.f32 %v6407_v7, %v6137_v35  ;;  %v6499_v6 = vadd.f32 %v6495_v3, %v6138_v25  ;;  %v10439_v27 = vpop.f32.mrb[27].mxu0  ;;  %v10474_v53 = vpop.f32.mrb[27].mxu1 }
0x1176   : > { %12462 = vtanh.f32 %v6411_v17  ;;  %v7272_v4 = vmul.f32 -1.442695, %v6499_v6 }
0x1178   : > { %12464 = vpow2.f32 %v7272_v4 }
0x1180   : > { %v12463_v48 = vpop.eup %12462 }
0x1181   : > { %v6507_v63 = vmul.f32 %v12463_v48, %v12461_v38 }
0x1182   : > { %v12465_v47 = vpop.eup %12464 }
0x1183   : > { %v14801_v15 = vadd.f32 %v6507_v63, %v6506_v8  ;;  %v6503_v12 = vadd.f32 1.0, %v12465_v47 }
0x1185   : > { %12466 = vtanh.f32 %v14801_v15 }
0x1186   : > { %12468 = vrcp.f32 %v6503_v12 }
0x118f   : > { %v12467_v57 = vpop.eup %12466 }
0x1190   : > { %v12469_v49 = vpop.eup %12468 }
0x1191   : > { %v6510_v62 = vmul.f32 %v12469_v49, %v12467_v57 }
0x1193   : > { %7273 = vst [vmem:[%s12707_s1 + $0x8] sm:$0xff] %v6510_v62  ;;  %10508 = vmatmul.mubr.f32.vlgmr.msra.gmra.mrb[28].mxu0 %v6510_v62  ;;  %10543 = vmatmul.mubr.f32.vlgmr.msra.gmra.mrb[28].mxu1 %v6510_v62 }
0x1194   : > { %12121 = vmatpush3.bf16.msra.mxu0 %v14660_v43  ;;  %12145 = vmatpush3.bf16.msra.mxu1 %v14662_v29 }
0x1195   : > { %12122 = vmatprep.subr.bf16.mxu0 %v12546_v13  ;;  %12146 = vmatprep.subr.bf16.mxu1 %v12546_v13 }
0x1196   : > { %10577 = vmatprep.mubr.msk.f32.mxu0 %vm12547_vm2, %v12548_v55  ;;  %10612 = vmatprep.mubr.msk.f32.mxu1 %vm12547_vm2, %v12548_v55 }
0x1198   : > { %12124 = vmatpush3.bf16.msra.mxu0 %v14676_v30  ;;  %12148 = vmatpush3.bf16.msra.mxu1 %v14678_v58  ;;  %v6514_v30 = vld [vmem:[#allocation2 + $0x8] sm:$0xff]  ;;  %v6513_v58 = vld [vmem:[#allocation2] sm:$0xff] }
0x1199   : > { %12125 = vmatprep.subr.bf16.mxu0 %v12546_v13  ;;  %12149 = vmatprep.subr.bf16.mxu1 %v12546_v13 }
0x119c   : > { %12127 = vmatpush3.bf16.msra.mxu0 %v14692_v46  ;;  %12151 = vmatpush3.bf16.msra.mxu1 %v14694_v44 }
0x119d   : > { %12128 = vmatprep.subr.bf16.mxu0 %v12546_v13  ;;  %12152 = vmatprep.subr.bf16.mxu1 %v12546_v13 }
0x11a0   : > { %12130 = vmatpush3.bf16.msra.mxu0 %v14704_v41  ;;  %12154 = vmatpush3.bf16.msra.mxu1 %v14706_v50 }
0x11a1   : > { %12131 = vmatprep.subr.bf16.mxu0 %v12546_v13  ;;  %12155 = vmatprep.subr.bf16.mxu1 %v12546_v13 }
0x11a4   : > { %12133 = vmatpush3.bf16.msra.mxu0 %v14716_v19  ;;  %12157 = vmatpush3.bf16.msra.mxu1 %v14718_v14 }
0x11a5   : > { %12134 = vmatprep.subr.bf16.mxu0 %v12546_v13  ;;  %12158 = vmatprep.subr.bf16.mxu1 %v12546_v13 }
0x11a8   : > { %12136 = vmatpush3.bf16.msra.mxu0 %v14728_v16  ;;  %12160 = vmatpush3.bf16.msra.mxu1 %v14730_v2 }
0x11a9   : > { %12137 = vmatprep.subr.bf16.mxu0 %v12546_v13  ;;  %12161 = vmatprep.subr.bf16.mxu1 %v12546_v13 }
0x11ac   : > { %12139 = vmatpush3.bf16.msra.mxu0 %v14740_v1  ;;  %12163 = vmatpush3.bf16.msra.mxu1 %v14742_v11 }
0x11ad   : > { %12140 = vmatprep.subr.bf16.mxu0 %v12546_v13  ;;  %12164 = vmatprep.subr.bf16.mxu1 %v12546_v13 }
0x11b0   : > { %12142 = vmatpush3.bf16.msra.mxu0 %v14752_v59  ;;  %12166 = vmatpush3.bf16.msra.mxu1 %v14754_v0 }
0x11b3   : > { %10578 = vmatmul.mubr.f32.vlgmr.msra.gmra.mrb[30].mxu0 %v6510_v62  ;;  %10613 = vmatmul.mubr.f32.vlgmr.msra.gmra.mrb[30].mxu1 %v6510_v62 }
0x1266   : > { %v6599_v55 = vpop.f32.mrb[28].mxu0  ;;  %v6692_v10 = vpop.f32.mrb[28].mxu1 }
0x1267   : > { %v10509_v43 = vpop.f32.mrb[29].mxu0  ;;  %v10544_v29 = vpop.f32.mrb[29].mxu1  ;;  %v6696_v46 = vadd.f32 %v6692_v10, %v6514_v30  ;;  %v6603_v44 = vadd.f32 %v6599_v55, %v6513_v58 }
0x1269   : > { %v7275_v41 = vmul.f32 -1.442695, %v6696_v46  ;;  %v7274_v50 = vmul.f32 -1.442695, %v6603_v44 }
0x126b   : > { %12470 = vpow2.f32 %v7275_v41 }
0x126c   : > { %12472 = vpow2.f32 %v7274_v50 }
0x1275   : > { %v12471_v19 = vpop.eup %12470 }
0x1276   : > { %v12473_v13 = vpop.eup %12472  ;;  %v6700_v14 = vadd.f32 1.0, %v12471_v19 }
0x1277   : > { %v6607_v52 = vadd.f32 1.0, %v12473_v13 }
0x1278   : > { %12474 = vrcp.f32 %v6700_v14 }
0x1279   : > { %12476 = vrcp.f32 %v6607_v52 }
0x1282   : > { %v12475_v11 = vpop.eup %12474 }
0x1283   : > { %v12477_v22 = vpop.eup %12476  ;;  %v6884_v9 = vmul.f32 %v12475_v11, %v14801_v15 }
0x1286   : > { %v6785_v16 = vpop.f32.mrb[30].mxu0  ;;  %v6873_v2 = vpop.f32.mrb[30].mxu1 }
0x1287   : > { %v6789_v60 = vadd.f32 %v6785_v16, %v6515_v26  ;;  %v6877_v39 = vadd.f32 %v6873_v2, %v6516_v40  ;;  %v10579_v34 = vpop.f32.mrb[31].mxu0  ;;  %v10614_v31 = vpop.f32.mrb[31].mxu1 }
0x1289   : > { %12478 = vtanh.f32 %v6789_v60  ;;  %v7276_v1 = vmul.f32 -1.442695, %v6877_v39 }
0x128b   : > { %12480 = vpow2.f32 %v7276_v1 }
0x1293   : > { %v12479_v61 = vpop.eup %12478 }
0x1294   : > { %v6885_v36 = vmul.f32 %v12479_v61, %v12477_v22 }
0x1295   : > { %v12481_v59 = vpop.eup %12480 }
0x1296   : > { %v6886_v0 = vadd.f32 %v6885_v36, %v6884_v9  ;;  %v6881_v33 = vadd.f32 1.0, %v12481_v59 }
0x1298   : > { %12482 = vtanh.f32 %v6886_v0  ;;  %6891 = vst [vmem:[#allocation4] sm:$0xff] %v6886_v0 }
0x1299   : > { %12484 = vrcp.f32 %v6881_v33 }
0x12a2   : > { %v12483_v56 = vpop.eup %12482 }
0x12a3   : > { %v12485_v42 = vpop.eup %12484 }
0x12a4   : > { %v6888_v45 = vmul.f32 %v12485_v42, %v12483_v56 }
0x12a6   : > { %6889 = vst [vmem:[%s12707_s1] sm:$0xff] %v6888_v45  ;;  %6890 = vst [vmem:[#allocation3] sm:$0xff] %v6888_v45 }
0x12a7 PF: > { %p7277_p0 = scmp.ne.s32.totalorder %s12524_s29, 1 }
0x12a8   : > { %v6898_v32 = vld [vmem:[#allocation4] sm:$0xff] (!%p7277_p0) }
0x12a9   : > { %6895 = sbr.rel (%p7277_p0) target bundleno = 4784 (0x12b0), region = 60  ;;  %6899 = vst [vmem:[%s478_s9] sm:$0xff] (!%p7277_p0), %v6898_v32 }
0x12ad   : > { %v6896_v5 = vld [vmem:[#allocation3] sm:$0xff] (!%p7277_p0) }
0x12ae   : > { %6897 = vst [vmem:[%s474_s20] sm:$0xff] (!%p7277_p0), %v6896_v5 }
0x12b0 PF: > { %6914 = sbr.rel (!%p12649_p4) target bundleno = 4796 (0x12bc), region = 64  ;;  %s7286_s29 = sshll.u32 (%p12649_p4), %s12665_s22, 4  ;;  %v6966_v54 = vld [vmem:[%s12707_s1] sm:$0xff] (%p12649_p4)  ;;  %v6968_v18 = vld [vmem:[%s12707_s1 + $0x8] sm:$0xff] (%p12649_p4)  ;;  %v6970_v28 = vld [vmem:[%s12707_s1 + $0x10] sm:$0xff] (%p12649_p4) }
0x12b1   : > { %s6922_s6 = sadd.s32 (%p12649_p4), %s12528_s30, %s7286_s29  ;;  %v6972_v21 = vld [vmem:[%s12707_s1 + $0x18] sm:$0xff] (%p12649_p4)  ;;  %v6974_v23 = vld [vmem:[%s12707_s1 + $0x20] sm:$0xff] (%p12649_p4)  ;;  %v6976_v24 = vld [vmem:[%s12707_s1 + $0x28] sm:$0xff] (%p12649_p4)  ;;  %s14914_s13 = sld [smem:[#allocation14_spill]] (%p12649_p4) }
0x12b2   : > { %s7281_s25 = sshll.u32 (%p12649_p4), %s6922_s6, 3  ;;  %v6978_v20 = vld [vmem:[%s12707_s1 + $0x30] sm:$0xff] (%p12649_p4)  ;;  %v6980_v51 = vld [vmem:[%s12707_s1 + $0x38] sm:$0xff] (%p12649_p4) }
0x12b7   : > { %s6924_s24 = scalar_lea.vmem %s14914_s13, %s7281_s25 }
0x12b8   : > { %6967 = vst [vmem:[%s6924_s24] sm:$0xff] %v6966_v54  ;;  %6969 = vst [vmem:[%s6924_s24 + $0x10] sm:$0xff] %v6968_v18 }
0x12b9   : > { %6971 = vst [vmem:[%s6924_s24 + $0x20] sm:$0xff] %v6970_v28  ;;  %6973 = vst [vmem:[%s6924_s24 + $0x30] sm:$0xff] %v6972_v21 }
0x12ba   : > { %6975 = vst [vmem:[%s6924_s24 + $0x40] sm:$0xff] %v6974_v23  ;;  %6977 = vst [vmem:[%s6924_s24 + $0x50] sm:$0xff] %v6976_v24 }
0x12bb   : > { %6979 = vst [vmem:[%s6924_s24 + $0x60] sm:$0xff] %v6978_v20  ;;  %6981 = vst [vmem:[%s6924_s24 + $0x70] sm:$0xff] %v6980_v51 }
0x12bc PF: > { %s19_s11 = sadd.s32 1, %s12540_s11   ;;  %s14915_s27 = sld [smem:[#allocation6_spill]] }
0x12bd   : > { %p16_p1 = scmp.ge.s32.totalorder %s19_s11, 6   ;;  %s14916_s28 = sld [smem:[#allocation11_spill]] }
0x12be   : > { %s14917_s29 = sld [smem:[#allocation7_spill]]  ;;  %s14918_s30 = sld [smem:[#allocation8_spill]] }
0x12bf   : > { %s14919_s9 = sld [smem:[#allocation9_spill]]  ;;  %s14920_s10 = sld [smem:[#allocation10_spill]] }
0x12c0   :  { %18 = sbr.rel (!%p16_p1) target bundleno = 8 (0x8), region = 195 }

</bundles_post_ra>
